<compile_context>
chip_gen: v7x
topology: tpu7x:2x2x1
jax: 0.10.0
libtpu: 0.0.40
codegen_flags: <defaults>
</compile_context>

<pallas_src>
import functools

import jax
import jax.numpy as jnp
from jax.experimental import pallas as pl
from jax.experimental.pallas import tpu as pltpu


def fused_experts_kernel(x_ref, w1_ref, b1_ref, w2_ref, b2_ref, w3_ref,
                         b3_ref, wg_ref, bg_ref, v2_ref, out_ref, h1_ref):
    """Fused Q1Network MLP + gating softmax + expert mix.

    Grid = (H2 // tn,): column tiles of W2 / row tiles of W3 (the HBM-dominant
    stream).  The output block index is constant along it, so out_ref is the
    resident f32 accumulator for the layer-3 partial sums; init happens under
    pl.when(j == 0) and the full epilogue is fused under pl.when(j == last).
    """
    j = pl.program_id(0)

    @pl.when(j == 0)
    def _():
        # Hoisted layer 1 (computed once, reused for every W2 tile), stored bf16.
        h1 = jnp.dot(x_ref[...].astype(jnp.bfloat16), w1_ref[...],
                     preferred_element_type=jnp.float32) + b1_ref[...]
        h1_ref[...] = jnp.maximum(h1, 0.0).astype(jnp.bfloat16)
        out_ref[...] = jnp.zeros_like(out_ref)

    # Layer 2 on a bf16 column tile of W2 (the HBM-bandwidth-dominant stream).
    h2 = jnp.dot(h1_ref[...], w2_ref[...],
                 preferred_element_type=jnp.float32) + b2_ref[...]
    h2 = jnp.maximum(h2, 0.0)

    # Layer 3 partial product, accumulated directly in the f32 output block.
    out_ref[...] += jnp.dot(h2.astype(jnp.bfloat16), w3_ref[...],
                            preferred_element_type=jnp.float32)

    @pl.when(j == pl.num_programs(0) - 1)
    def _():
        B, OUT = out_ref.shape
        value1 = out_ref[...] + b3_ref[...]                       # (B, OUT)

        # GatingNetwork: Linear(IN, 2) + softmax (f32).  For two logits,
        # softmax(.)[:, 0] == sigmoid(logit0 - logit1).
        logits = jnp.dot(x_ref[...], wg_ref[...],
                         preferred_element_type=jnp.float32) + bg_ref[...]
        diff = logits[:, 0:1] - logits[:, 1:2]                    # (B, 1)
        g_col = 1.0 / (1.0 + jnp.exp(-diff))                      # (B, 1)

        # torch broadcasting in `value1 * weights[:, 0]` aligns the (B,) gate
        # vector with value1's LAST axis (well defined because OUT == B).
        # Build the gate as a (1, OUT) lane vector WITHOUT a cross-lane
        # transpose: scatter the column onto a diagonal via 2-D iota masks,
        # then reduce over the sublane axis.
        rows = jax.lax.broadcasted_iota(jnp.int32, (OUT, OUT), 0)
        cols = jax.lax.broadcasted_iota(jnp.int32, (OUT, OUT), 1)
        g_diag = jnp.where(rows == cols, g_col, 0.0)              # diag(g)
        g_row = jnp.sum(g_diag, axis=0, keepdims=True)            # (1, OUT)

        v2 = v2_ref[0]                                            # SMEM scalar
        # value1 * g + value2 * (1 - g)  ==  (value1 - value2) * g + value2
        out_ref[...] = (value1 - v2) * g_row + v2


@functools.partial(jax.jit, static_argnames=("tn",))
def memory_dqn_experts(x, params, value2, *, tn=2048):
    B, IN = x.shape
    w1, b1 = params["w1"], params["b1"]
    w2, b2 = params["w2"], params["b2"]
    w3, b3 = params["w3"], params["b3"]
    wg, bg = params["wg"], params["bg"]
    H1 = w1.shape[1]
    H2 = w2.shape[1]
    OUT = w3.shape[1]
    assert H2 % tn == 0, "H2 must tile evenly by tn"
    # torch trailing-dim broadcast of weights[:, 0] against value1 needs OUT==B.
    assert OUT == B, "module's final broadcast requires output_size == batch"
    jsteps = H2 // tn

    value2 = jnp.asarray(value2, jnp.float32).reshape(1)          # SMEM scalar

    flops = 2 * B * (IN * H1 + H1 * H2 + H2 * OUT + 2 * IN) + 8 * B * OUT
    bytes_accessed = (x.size * 4 + w1.size * 2 + b1.size * 4 + w2.size * 2 +
                      b2.size * 4 + w3.size * 2 + b3.size * 4 + wg.size * 4 +
                      bg.size * 4 + 4 + B * OUT * 4)

    return pl.pallas_call(
        fused_experts_kernel,
        out_shape=jax.ShapeDtypeStruct((B, OUT), jnp.float32),
        grid_spec=pltpu.PrefetchScalarGridSpec(
            num_scalar_prefetch=0,
            grid=(jsteps,),
            in_specs=[
                pl.BlockSpec((B, IN), lambda j: (0, 0)),            # x   (f32)
                pl.BlockSpec((IN, H1), lambda j: (0, 0)),           # W1  (bf16)
                pl.BlockSpec((1, H1), lambda j: (0, 0)),            # b1  (f32)
                pl.BlockSpec((H1, tn), lambda j: (0, j)),           # W2 tile (bf16)
                pl.BlockSpec((1, tn), lambda j: (0, j)),            # b2 tile (f32)
                pl.BlockSpec((tn, OUT), lambda j: (j, 0)),          # W3 tile (bf16)
                pl.BlockSpec((1, OUT), lambda j: (0, 0)),           # b3  (f32)
                pl.BlockSpec((IN, 2), lambda j: (0, 0)),            # Wg  (f32)
                pl.BlockSpec((1, 2), lambda j: (0, 0)),             # bg  (f32)
                pl.BlockSpec(memory_space=pltpu.MemorySpace.SMEM),  # value2 scalar
            ],
            out_specs=pl.BlockSpec((B, OUT), lambda j: (0, 0)),     # final result
            scratch_shapes=[pltpu.VMEM((B, H1), jnp.bfloat16)],     # hoisted h1
        ),
        compiler_params=pltpu.CompilerParams(
            dimension_semantics=("arbitrary",),
            vmem_limit_bytes=32 * 1024 * 1024),
        cost_estimate=pl.CostEstimate(flops=flops, transcendentals=B,
                                      bytes_accessed=bytes_accessed),
    )(x, w1, b1, w2, b2, w3, b3, wg, bg, value2)


def reference_forward(x, params, value2):
    w1 = params["w1"].astype(jnp.float32)
    w2 = params["w2"].astype(jnp.float32)
    w3 = params["w3"].astype(jnp.float32)
    h1 = jnp.maximum(x @ w1 + params["b1"], 0.0)
    h2 = jnp.maximum(h1 @ w2 + params["b2"], 0.0)
    value1 = h2 @ w3 + params["b3"]
    logits = x @ params["wg"] + params["bg"]
    gates = jax.nn.softmax(logits, axis=-1)
    return value1 * gates[:, 0] + value2 * gates[:, 1]


def init_params(key, input_size, output_size, hidden=(2048, 2048)):
    h1, h2 = hidden
    ks = jax.random.split(key, 4)
    scale = 0.02
    # Weight matrices in bf16 (halves the dominant HBM traffic); biases/gating f32.
    return {
        "w1": (scale * jax.random.normal(ks[0], (input_size, h1), jnp.float32)
               ).astype(jnp.bfloat16),
        "b1": jnp.zeros((1, h1), jnp.float32),
        "w2": (scale * jax.random.normal(ks[1], (h1, h2), jnp.float32)
               ).astype(jnp.bfloat16),
        "b2": jnp.zeros((1, h2), jnp.float32),
        "w3": (scale * jax.random.normal(ks[2], (h2, output_size), jnp.float32)
               ).astype(jnp.bfloat16),
        "b3": jnp.zeros((1, output_size), jnp.float32),
        "wg": scale * jax.random.normal(ks[3], (input_size, 2), jnp.float32),
        "bg": jnp.zeros((1, 2), jnp.float32),
    }


if __name__ == "__main__":
    # Small shapes: batch == output_size == 8 so the torch-style broadcast of
    # weights[:, 0] against value1's last dim is well defined (OUT == B).
    B, IN, OUT = 8, 32, 8

    key = jax.random.PRNGKey(0)
    k_param, k_x = jax.random.split(key)
    params = init_params(k_param, IN, OUT)
    x = jax.random.normal(k_x, (B, IN), jnp.float32)

    # TODO(synk): EpisodicMemory.get_value walks a host-side python deque of past
    # (key, value) pairs; the deque is empty at construction, so the forward
    # receives the scalar 0.0.  A populated memory would be host-side state.
    value2 = jnp.zeros((1,), jnp.float32)

    out = memory_dqn_experts(x, params, value2)
    out = jax.block_until_ready(out)

    ref = reference_forward(x, params, value2)
    assert out.shape == (B, OUT)
    assert jnp.allclose(out, ref, rtol=2e-2, atol=2e-2), "mismatch vs reference"

    print("KERNEL_OK")
</pallas_src>

<mosaic_0001>
module attributes {stable_mosaic.version = 11 : i64} {
  func.func @fused_experts_kernel(%arg0: i32, %arg1: memref<8x32xf32, #tpu.memory_space<vmem>>, %arg2: memref<32x2048xbf16, #tpu.memory_space<vmem>>, %arg3: memref<1x2048xf32, #tpu.memory_space<vmem>>, %arg4: memref<2048x2048xbf16, #tpu.memory_space<vmem>>, %arg5: memref<1x2048xf32, #tpu.memory_space<vmem>>, %arg6: memref<2048x8xbf16, #tpu.memory_space<vmem>>, %arg7: memref<1x8xf32, #tpu.memory_space<vmem>>, %arg8: memref<32x2xf32, #tpu.memory_space<vmem>>, %arg9: memref<1x2xf32, #tpu.memory_space<vmem>>, %arg10: memref<1xf32, #tpu.memory_space<smem>>, %arg11: memref<8x8xf32, #tpu.memory_space<vmem>>, %arg12: memref<8x2048xbf16, #tpu.memory_space<vmem>>) attributes {dimension_semantics = [#tpu.dimension_semantics<arbitrary>], iteration_bounds = array<i64: 1>, scalar_prefetch = 0 : i64, scratch_operands = 1 : i64, tpu.core_type = #tpu.core_type<tc>, window_params = [{pipeline_mode = #tpu.pipeline_mode<synchronous>, transform_indices = @transform_0, window_bounds = array<i64: 8, 32>}, {pipeline_mode = #tpu.pipeline_mode<synchronous>, transform_indices = @transform_1, window_bounds = array<i64: 32, 2048>}, {pipeline_mode = #tpu.pipeline_mode<synchronous>, transform_indices = @transform_2, window_bounds = array<i64: 1, 2048>}, {transform_indices = @transform_3, window_bounds = array<i64: 2048, 2048>}, {transform_indices = @transform_4, window_bounds = array<i64: 1, 2048>}, {transform_indices = @transform_5, window_bounds = array<i64: 2048, 8>}, {pipeline_mode = #tpu.pipeline_mode<synchronous>, transform_indices = @transform_6, window_bounds = array<i64: 1, 8>}, {pipeline_mode = #tpu.pipeline_mode<synchronous>, transform_indices = @transform_7, window_bounds = array<i64: 32, 2>}, {pipeline_mode = #tpu.pipeline_mode<synchronous>, transform_indices = @transform_8, window_bounds = array<i64: 1, 2>}, {transform_indices = @transform_9, window_bounds = array<i64: 1>}, {pipeline_mode = #tpu.pipeline_mode<synchronous>, transform_indices = @transform_10, window_bounds = array<i64: 8, 8>}]} {
    %c0_i32 = arith.constant 0 : i32
    %0 = arith.cmpi eq, %arg0, %c0_i32 : i32
    %1 = arith.extui %0 : i1 to i32
    %c0_i32_0 = arith.constant 0 : i32
    %2 = arith.cmpi ne, %1, %c0_i32_0 : i32
    scf.if %2 {
      %c0_16 = arith.constant 0 : index
      %c0_17 = arith.constant 0 : index
      %20 = vector.load %arg1[%c0_16, %c0_17] : memref<8x32xf32, #tpu.memory_space<vmem>>, vector<8x32xf32>
      %21 = arith.truncf %20 : vector<8x32xf32> to vector<8x32xbf16>
      %c0_18 = arith.constant 0 : index
      %c0_19 = arith.constant 0 : index
      %22 = vector.load %arg2[%c0_18, %c0_19] : memref<32x2048xbf16, #tpu.memory_space<vmem>>, vector<32x2048xbf16>
      %cst_20 = arith.constant dense<0.000000e+00> : vector<8x2048xf32>
      %23 = tpu.matmul %21, %22, %cst_20 {dimension_numbers = #tpu.dot_dimension_numbers<[1], [0], [0], [1], [0, 0, 1, 1], [], []>} : vector<8x32xbf16>, vector<32x2048xbf16>, vector<8x2048xf32> -> vector<8x2048xf32>
      %c0_21 = arith.constant 0 : index
      %c0_22 = arith.constant 0 : index
      %24 = vector.load %arg3[%c0_21, %c0_22] : memref<1x2048xf32, #tpu.memory_space<vmem>>, vector<1x2048xf32>
      %25 = vector.broadcast %24 : vector<1x2048xf32> to vector<8x2048xf32>
      %26 = arith.addf %23, %25 : vector<8x2048xf32>
      %cst_23 = arith.constant 0.000000e+00 : f32
      %27 = vector.broadcast %cst_23 : f32 to vector<8x2048xf32>
      %28 = arith.maximumf %26, %27 : vector<8x2048xf32>
      %29 = arith.truncf %28 : vector<8x2048xf32> to vector<8x2048xbf16>
      %c0_24 = arith.constant 0 : index
      %c0_25 = arith.constant 0 : index
      %30 = vector.load %arg12[%c0_24, %c0_25] : memref<8x2048xbf16, #tpu.memory_space<vmem>>, vector<8x2048xbf16>
      tpu.vector_store %arg12[%c0_24, %c0_25], %29 {strides = array<i32>} : memref<8x2048xbf16, #tpu.memory_space<vmem>>, vector<8x2048xbf16>,
      %cst_26 = arith.constant 0.000000e+00 : f32
      %31 = vector.broadcast %cst_26 : f32 to vector<8x8xf32>
      %c0_27 = arith.constant 0 : index
      %c0_28 = arith.constant 0 : index
      %32 = vector.load %arg11[%c0_27, %c0_28] : memref<8x8xf32, #tpu.memory_space<vmem>>, vector<8x8xf32>
      tpu.vector_store %arg11[%c0_27, %c0_28], %31 {strides = array<i32>} : memref<8x8xf32, #tpu.memory_space<vmem>>, vector<8x8xf32>,
    } else {
    }
    %c0 = arith.constant 0 : index
    %c0_1 = arith.constant 0 : index
    %3 = vector.load %arg12[%c0, %c0_1] : memref<8x2048xbf16, #tpu.memory_space<vmem>>, vector<8x2048xbf16>
    %c0_2 = arith.constant 0 : index
    %c0_3 = arith.constant 0 : index
    %4 = vector.load %arg4[%c0_2, %c0_3] : memref<2048x2048xbf16, #tpu.memory_space<vmem>>, vector<2048x2048xbf16>
    %cst = arith.constant dense<0.000000e+00> : vector<8x2048xf32>
    %5 = tpu.matmul %3, %4, %cst {dimension_numbers = #tpu.dot_dimension_numbers<[1], [0], [0], [1], [0, 0, 1, 1], [], []>} : vector<8x2048xbf16>, vector<2048x2048xbf16>, vector<8x2048xf32> -> vector<8x2048xf32>
    %c0_4 = arith.constant 0 : index
    %c0_5 = arith.constant 0 : index
    %6 = vector.load %arg5[%c0_4, %c0_5] : memref<1x2048xf32, #tpu.memory_space<vmem>>, vector<1x2048xf32>
    %7 = vector.broadcast %6 : vector<1x2048xf32> to vector<8x2048xf32>
    %8 = arith.addf %5, %7 : vector<8x2048xf32>
    %cst_6 = arith.constant 0.000000e+00 : f32
    %9 = vector.broadcast %cst_6 : f32 to vector<8x2048xf32>
    %10 = arith.maximumf %8, %9 : vector<8x2048xf32>
    %c0_7 = arith.constant 0 : index
    %c0_8 = arith.constant 0 : index
    %11 = vector.load %arg11[%c0_7, %c0_8] : memref<8x8xf32, #tpu.memory_space<vmem>>, vector<8x8xf32>
    %12 = arith.truncf %10 : vector<8x2048xf32> to vector<8x2048xbf16>
    %c0_9 = arith.constant 0 : index
    %c0_10 = arith.constant 0 : index
    %13 = vector.load %arg6[%c0_9, %c0_10] : memref<2048x8xbf16, #tpu.memory_space<vmem>>, vector<2048x8xbf16>
    %cst_11 = arith.constant dense<0.000000e+00> : vector<8x8xf32>
    %14 = tpu.matmul %12, %13, %cst_11 {dimension_numbers = #tpu.dot_dimension_numbers<[1], [0], [0], [1], [0, 0, 1, 1], [], []>} : vector<8x2048xbf16>, vector<2048x8xbf16>, vector<8x8xf32> -> vector<8x8xf32>
    %15 = arith.addf %11, %14 : vector<8x8xf32>
    %c0_12 = arith.constant 0 : index
    %c0_13 = arith.constant 0 : index
    %16 = vector.load %arg11[%c0_12, %c0_13] : memref<8x8xf32, #tpu.memory_space<vmem>>, vector<8x8xf32>
    tpu.vector_store %arg11[%c0_12, %c0_13], %15 {strides = array<i32>} : memref<8x8xf32, #tpu.memory_space<vmem>>, vector<8x8xf32>,
    %c0_i32_14 = arith.constant 0 : i32
    %17 = arith.cmpi eq, %arg0, %c0_i32_14 : i32
    %18 = arith.extui %17 : i1 to i32
    %c0_i32_15 = arith.constant 0 : i32
    %19 = arith.cmpi ne, %18, %c0_i32_15 : i32
    scf.if %19 {
      %c0_16 = arith.constant 0 : index
      %c0_17 = arith.constant 0 : index
      %20 = vector.load %arg11[%c0_16, %c0_17] : memref<8x8xf32, #tpu.memory_space<vmem>>, vector<8x8xf32>
      %c0_18 = arith.constant 0 : index
      %c0_19 = arith.constant 0 : index
      %21 = vector.load %arg7[%c0_18, %c0_19] : memref<1x8xf32, #tpu.memory_space<vmem>>, vector<1x8xf32>
      %22 = vector.broadcast %21 : vector<1x8xf32> to vector<8x8xf32>
      %23 = arith.addf %20, %22 : vector<8x8xf32>
      %c0_20 = arith.constant 0 : index
      %c0_21 = arith.constant 0 : index
      %24 = vector.load %arg1[%c0_20, %c0_21] : memref<8x32xf32, #tpu.memory_space<vmem>>, vector<8x32xf32>
      %c0_22 = arith.constant 0 : index
      %c0_23 = arith.constant 0 : index
      %25 = vector.load %arg8[%c0_22, %c0_23] : memref<32x2xf32, #tpu.memory_space<vmem>>, vector<32x2xf32>
      %cst_24 = arith.constant dense<0.000000e+00> : vector<8x2xf32>
      %26 = tpu.matmul %24, %25, %cst_24 {dimension_numbers = #tpu.dot_dimension_numbers<[1], [0], [0], [1], [0, 0, 1, 1], [], []>} : vector<8x32xf32>, vector<32x2xf32>, vector<8x2xf32> -> vector<8x2xf32>
      %c0_25 = arith.constant 0 : index
      %c0_26 = arith.constant 0 : index
      %27 = vector.load %arg9[%c0_25, %c0_26] : memref<1x2xf32, #tpu.memory_space<vmem>>, vector<1x2xf32>
      %28 = vector.broadcast %27 : vector<1x2xf32> to vector<8x2xf32>
      %29 = arith.addf %26, %28 : vector<8x2xf32>
      %30 = vector.extract_strided_slice %29 {offsets = [0, 0], sizes = [8, 1], strides = [1, 1]} : vector<8x2xf32> to vector<8x1xf32>
      %31 = vector.extract_strided_slice %29 {offsets = [0, 1], sizes = [8, 1], strides = [1, 1]} : vector<8x2xf32> to vector<8x1xf32>
      %32 = arith.subf %30, %31 : vector<8x1xf32>
      %cst_27 = arith.constant 0.000000e+00 : f32
      %33 = vector.broadcast %cst_27 : f32 to vector<8x1xf32>
      %34 = arith.subf %33, %32 : vector<8x1xf32>
      %35 = math.exp %34 : vector<8x1xf32>
      %cst_28 = arith.constant 1.000000e+00 : f32
      %36 = vector.broadcast %cst_28 : f32 to vector<8x1xf32>
      %37 = arith.addf %36, %35 : vector<8x1xf32>
      %cst_29 = arith.constant 1.000000e+00 : f32
      %38 = vector.broadcast %cst_29 : f32 to vector<8x1xf32>
      %39 = arith.divf %38, %37 : vector<8x1xf32>
      %40 = tpu.iota {dimensions = array<i32: 0>} : vector<8x8xi32>
      %41 = tpu.iota {dimensions = array<i32: 1>} : vector<8x8xi32>
      %42 = arith.cmpi eq, %40, %41 : vector<8x8xi32>
      %cst_30 = arith.constant 0.000000e+00 : f32
      %43 = vector.shape_cast %39 : vector<8x1xf32> to vector<8x1xf32>
      %44 = vector.broadcast %43 : vector<8x1xf32> to vector<8x8xf32>
      %45 = vector.broadcast %cst_30 : f32 to vector<8x8xf32>
      %46 = arith.select %42, %44, %45 : vector<8x8xi1>, vector<8x8xf32>
      %cst_31 = arith.constant dense<0.000000e+00> : vector<8xf32>
      %47 = vector.multi_reduction <add>, %46, %cst_31 [0] : vector<8x8xf32> to vector<8xf32>
      %48 = vector.shape_cast %47 : vector<8xf32> to vector<1x8xf32>
      %c0_32 = arith.constant 0 : index
      %49 = memref.load %arg10[%c0_32] : memref<1xf32, #tpu.memory_space<smem>>
      %50 = vector.broadcast %49 : f32 to vector<8x8xf32>
      %51 = arith.subf %23, %50 : vector<8x8xf32>
      %52 = vector.broadcast %48 : vector<1x8xf32> to vector<8x8xf32>
      %53 = arith.mulf %51, %52 : vector<8x8xf32>
      %54 = vector.broadcast %49 : f32 to vector<8x8xf32>
      %55 = arith.addf %53, %54 : vector<8x8xf32>
      %c0_33 = arith.constant 0 : index
      %c0_34 = arith.constant 0 : index
      %56 = vector.load %arg11[%c0_33, %c0_34] : memref<8x8xf32, #tpu.memory_space<vmem>>, vector<8x8xf32>
      tpu.vector_store %arg11[%c0_33, %c0_34], %55 {strides = array<i32>} : memref<8x8xf32, #tpu.memory_space<vmem>>, vector<8x8xf32>,
    } else {
    }
    return
  }
  func.func @transform_0(%arg0: i32) -> (i32, i32) {
    %c0_i32 = arith.constant 0 : i32
    %c0_i32_0 = arith.constant 0 : i32
    %c0_i32_1 = arith.constant 0 : i32
    return %c0_i32, %c0_i32_0 : i32, i32
  }
  func.func @transform_1(%arg0: i32) -> (i32, i32) {
    %c0_i32 = arith.constant 0 : i32
    %c0_i32_0 = arith.constant 0 : i32
    %c0_i32_1 = arith.constant 0 : i32
    return %c0_i32, %c0_i32_0 : i32, i32
  }
  func.func @transform_2(%arg0: i32) -> (i32, i32) {
    %c0_i32 = arith.constant 0 : i32
    %c0_i32_0 = arith.constant 0 : i32
    %c0_i32_1 = arith.constant 0 : i32
    return %c0_i32, %c0_i32_0 : i32, i32
  }
  func.func @transform_3(%arg0: i32) -> (i32, i32) {
    %c0_i32 = arith.constant 0 : i32
    %c0_i32_0 = arith.constant 0 : i32
    return %c0_i32, %arg0 : i32, i32
  }
  func.func @transform_4(%arg0: i32) -> (i32, i32) {
    %c0_i32 = arith.constant 0 : i32
    %c0_i32_0 = arith.constant 0 : i32
    return %c0_i32, %arg0 : i32, i32
  }
  func.func @transform_5(%arg0: i32) -> (i32, i32) {
    %c0_i32 = arith.constant 0 : i32
    %c0_i32_0 = arith.constant 0 : i32
    return %arg0, %c0_i32 : i32, i32
  }
  func.func @transform_6(%arg0: i32) -> (i32, i32) {
    %c0_i32 = arith.constant 0 : i32
    %c0_i32_0 = arith.constant 0 : i32
    %c0_i32_1 = arith.constant 0 : i32
    return %c0_i32, %c0_i32_0 : i32, i32
  }
  func.func @transform_7(%arg0: i32) -> (i32, i32) {
    %c0_i32 = arith.constant 0 : i32
    %c0_i32_0 = arith.constant 0 : i32
    %c0_i32_1 = arith.constant 0 : i32
    return %c0_i32, %c0_i32_0 : i32, i32
  }
  func.func @transform_8(%arg0: i32) -> (i32, i32) {
    %c0_i32 = arith.constant 0 : i32
    %c0_i32_0 = arith.constant 0 : i32
    %c0_i32_1 = arith.constant 0 : i32
    return %c0_i32, %c0_i32_0 : i32, i32
  }
  func.func @transform_9(%arg0: i32) -> i32 {
    %c0_i32 = arith.constant 0 : i32
    %c0_i32_0 = arith.constant 0 : i32
    return %c0_i32 : i32
  }
  func.func @transform_10(%arg0: i32) -> (i32, i32) {
    %c0_i32 = arith.constant 0 : i32
    %c0_i32_0 = arith.constant 0 : i32
    %c0_i32_1 = arith.constant 0 : i32
    return %c0_i32, %c0_i32_0 : i32, i32
  }
}

</mosaic_0001>

<bundles_post_ra>
// kernel: memory_dqn_experts.1
= control target key start
LH: loop header
LB: loop body
LE: loop exit
PB: predicated region body
PF: predicated region fallthrough
CT: control target
= control target key end

     0   :  { %16 = vsyncpa [#allocation5], 0  ;;  %s21393_s0 = inlined_call_operand.hbm [shape: f32[8,32], index: 0, kind: input, shape index: {}]   ;;  %s21394_s1 = inlined_call_operand.hbm [shape: bf16[32,2048], index: 1, kind: input, shape index: {}]   ;;  %s21395_s2 = inlined_call_operand.hbm [shape: f32[1,2048], index: 2, kind: input, shape index: {}]   ;;  %s21396_s3 = inlined_call_operand.hbm [shape: bf16[2048,2048], index: 3, kind: input, shape index: {}]   ;;  %s21397_s4 = inlined_call_operand.hbm [shape: f32[1,2048], index: 4, kind: input, shape index: {}]   ;;  %s21398_s5 = inlined_call_operand.vmem [shape: bf16[2048,8], index: 5, kind: input, shape index: {}]   ;;  %s21399_s6 = inlined_call_operand.hbm [shape: f32[1,8], index: 6, kind: input, shape index: {}]   ;;  %s21400_s7 = inlined_call_operand.vmem [shape: f32[32,2], index: 7, kind: input, shape index: {}]   ;;  %s21401_s8 = inlined_call_operand.hbm [shape: f32[1,2], index: 8, kind: input, shape index: {}]   ;;  %s21402_s9 = inlined_call_operand.<no memory space> [shape: f32[1], index: 9, kind: input, shape index: {}]   ;;  %s21403_s10 = inlined_call_operand.hbm [shape: f32[8,8], index: 10, kind: output, shape index: {}]  }
   0x1   :  { %17 = vsyncpa [#allocation8], 0 }
   0x2   :  { %18 = vsyncpa [#allocation11], 0 }
   0x3   :  { %19 = vsyncpa [#allocation14], 0 }
   0x4   :  { %20 = vsyncpa [#allocation6], 0  ;;  %s20459_s13 = smov [#allocation7]   ;;  %s20273_s17 = scalar_lea.hbm %s21394_s1, 4096 }
   0x5   :  { %s36_s14 = sshll.u32 %s20459_s13, 4  ;;  %p20274_p0 = scmp.ne.s32.totalorder %s21394_s1, %s20273_s17  ;;  %s37_s14 = int_to_ptr.vmem [resolvable:$true] %s36_s14 }
   0x6   :  { %p20277_p1 = scmp.lt.u32.totalorder %s20273_s17, %s21394_s1 }
   0x8   :  { %p20279_p2 = pnand %p20277_p1, %p20274_p0 }
   0xa   :  { %20282 = shalt.err (!%p20279_p2)
}
   0xb   :  { %s20283_s22 = scalar_lea.vmem %s37_s14, 4096  ;;  %p20288_p4 = scmp.lt.s32.totalorder %s37_s14, %s37_s14 }
   0xc   :  { %p20284_p3 = scmp.ne.s32.totalorder %s37_s14, %s20283_s22  ;;  %p20289_p5 = scmp.lt.s32.totalorder %s20283_s22, %s20283_s22 }
   0xe   :  { %p20290_p6 = por %p20289_p5, %p20288_p4 }
  0x10   :  { %p20291_p7 = pnand %p20290_p6, %p20284_p3 }
  0x12   :  { %20294 = shalt.err (!%p20291_p7)
}
  0x13   :  { %s20460_s23 = smov 1024   ;;  %s20461_s24 = smov 64  }
  0x14   :  { %42 = dma.hbm_to_vmem [thread:$0]  %s21394_s1, 4096, %s37_s14, [#allocation8], %s20460_s23, %s20460_s23, %s20461_s24  }
  0x15   :  { %s20462_s27 = smov [#allocation10]   ;;  %s20463_s29 = smov [#allocation13]  }
  0x16   :  { %s58_s28 = sshll.u32 %s20462_s27, 4  ;;  %s83_s30 = sshll.u32 %s20463_s29, 4  ;;  %s59_s28 = int_to_ptr.vmem [resolvable:$true] %s58_s28  ;;  %s84_s30 = int_to_ptr.vmem [resolvable:$true] %s83_s30 }
  0x17   :  { %s20295_s13 = scalar_lea.hbm %s21396_s3, 262144 }
  0x18   :  { %p20296_p8 = scmp.ne.s32.totalorder %s21396_s3, %s20295_s13  ;;  %p20299_p9 = scmp.lt.u32.totalorder %s20295_s13, %s21396_s3 }
  0x1a   :  { %p20301_p10 = pnand %p20299_p9, %p20296_p8 }
  0x1c   :  { %20304 = shalt.err (!%p20301_p10)
}
  0x1d   :  { %s20305_s1 = scalar_lea.vmem %s59_s28, 262144  ;;  %p20310_p12 = scmp.lt.s32.totalorder %s59_s28, %s59_s28 }
  0x1e   :  { %p20306_p11 = scmp.ne.s32.totalorder %s59_s28, %s20305_s1  ;;  %p20311_p13 = scmp.lt.s32.totalorder %s20305_s1, %s20305_s1 }
  0x20   :  { %p20312_p0 = por %p20311_p13, %p20310_p12 }
  0x22   :  { %p20313_p1 = pnand %p20312_p0, %p20306_p11 }
  0x24   :  { %20316 = shalt.err (!%p20313_p1)
}
  0x25   :  { %64 = dma.hbm_to_vmem [thread:$0]  %s21396_s3, 262144, %s59_s28, [#allocation11], %s20460_s23, %s20460_s23, %s20461_s24  }
  0x26   :  { %s20317_s22 = scalar_lea.hbm %s21399_s6, 16 }
  0x27   :  { %p20318_p2 = scmp.ne.s32.totalorder %s21399_s6, %s20317_s22  ;;  %p20321_p3 = scmp.lt.u32.totalorder %s20317_s22, %s21399_s6 }
  0x29   :  { %p20323_p4 = pnand %p20321_p3, %p20318_p2 }
  0x2b   :  { %20326 = shalt.err (!%p20323_p4)
}
  0x2c   :  { %s20327_s11 = scalar_lea.vmem %s84_s30, 16  ;;  %s20331_s12 = scalar_lea.vmem %s84_s30, 32 }
  0x2d   :  { %p20328_p5 = scmp.ne.s32.totalorder %s84_s30, %s20327_s11  ;;  %p20332_p6 = scmp.lt.s32.totalorder %s84_s30, %s84_s30 }
  0x2e   :  { %p20333_p7 = scmp.lt.s32.totalorder %s20331_s12, %s20327_s11 }
  0x30   :  { %p20334_p8 = por %p20333_p7, %p20332_p6 }
  0x32   :  { %p20335_p9 = pnand %p20334_p8, %p20328_p5 }
  0x34   :  { %20338 = shalt.err (!%p20335_p9)
}
  0x35   :  { %86 = dma.hbm_to_vmem [thread:$0]  %s21399_s6, 16, %s84_s30, [#allocation14]  }
  0x36   :  { %s20464_s24 = smov [#allocation4]   ;;  %s20465_s13 = smov [#allocation9]  }
  0x37   :  { %s27_s28 = sshll.u32 %s20464_s24, 4  ;;  %s49_s15 = sshll.u32 %s20465_s13, 4  ;;  %s28_s28 = int_to_ptr.vmem [resolvable:$true] %s27_s28  ;;  %s50_s15 = int_to_ptr.vmem [resolvable:$true] %s49_s15 }
  0x38   :  { %s20339_s18 = scalar_lea.hbm %s21393_s0, 128 }
  0x39   :  { %p20340_p10 = scmp.ne.s32.totalorder %s21393_s0, %s20339_s18  ;;  %p20343_p11 = scmp.lt.u32.totalorder %s20339_s18, %s21393_s0 }
  0x3b   :  { %p20345_p12 = pnand %p20343_p11, %p20340_p10 }
  0x3d   :  { %20348 = shalt.err (!%p20345_p12)
}
  0x3e   :  { %s20349_s6 = scalar_lea.vmem %s28_s28, 128  ;;  %p20354_p0 = scmp.lt.s32.totalorder %s28_s28, %s28_s28 }
  0x3f   :  { %p20350_p13 = scmp.ne.s32.totalorder %s28_s28, %s20349_s6  ;;  %p20355_p1 = scmp.lt.s32.totalorder %s20349_s6, %s20349_s6 }
  0x41   :  { %p20356_p2 = por %p20355_p1, %p20354_p0 }
  0x43   :  { %p20357_p3 = pnand %p20356_p2, %p20350_p13 }
  0x45   :  { %20360 = shalt.err (!%p20357_p3)
}
  0x46   :  { %30 = dma.hbm_to_vmem [thread:$0]  %s21393_s0, 128, %s28_s28, [#allocation5]  }
  0x47   :  { %s20361_s26 = scalar_lea.hbm %s21395_s2, 256 }
  0x48   :  { %p20362_p4 = scmp.ne.s32.totalorder %s21395_s2, %s20361_s26  ;;  %p20365_p5 = scmp.lt.u32.totalorder %s20361_s26, %s21395_s2 }
  0x4a   :  { %p20367_p6 = pnand %p20365_p5, %p20362_p4 }
  0x4c   :  { %20370 = shalt.err (!%p20367_p6)
}
  0x4d   :  { %s20371_s3 = scalar_lea.vmem %s50_s15, 256  ;;  %p20376_p8 = scmp.lt.s32.totalorder %s50_s15, %s50_s15 }
  0x4e   :  { %p20372_p7 = scmp.ne.s32.totalorder %s50_s15, %s20371_s3  ;;  %p20377_p9 = scmp.lt.s32.totalorder %s20371_s3, %s20371_s3 }
  0x50   :  { %p20378_p10 = por %p20377_p9, %p20376_p8 }
  0x52   :  { %p20379_p11 = pnand %p20378_p10, %p20372_p7 }
  0x54   :  { %20382 = shalt.err (!%p20379_p11)
}
  0x55   :  { %52 = dma.hbm_to_vmem [thread:$0]  %s21395_s2, 256, %s50_s15, [#allocation8]  }
  0x56   :  { %s20466_s24 = smov [#allocation12]   ;;  %s20467_s13 = smov [#allocation15]  }
  0x57   :  { %s71_s28 = sshll.u32 %s20466_s24, 4  ;;  %s95_s16 = sshll.u32 %s20467_s13, 4  ;;  %s72_s28 = int_to_ptr.vmem [resolvable:$true] %s71_s28  ;;  %s96_s16 = int_to_ptr.vmem [resolvable:$true] %s95_s16 }
  0x58   :  { %s20383_s1 = scalar_lea.hbm %s21397_s4, 256 }
  0x59   :  { %p20384_p12 = scmp.ne.s32.totalorder %s21397_s4, %s20383_s1  ;;  %p20387_p13 = scmp.lt.u32.totalorder %s20383_s1, %s21397_s4 }
  0x5b   :  { %p20389_p0 = pnand %p20387_p13, %p20384_p12 }
  0x5d   :  { %20392 = shalt.err (!%p20389_p0)
}
  0x5e   :  { %s20393_s2 = scalar_lea.vmem %s72_s28, 256  ;;  %p20398_p2 = scmp.lt.s32.totalorder %s72_s28, %s72_s28 }
  0x5f   :  { %p20394_p1 = scmp.ne.s32.totalorder %s72_s28, %s20393_s2  ;;  %p20399_p3 = scmp.lt.s32.totalorder %s20393_s2, %s20393_s2 }
  0x61   :  { %p20400_p4 = por %p20399_p3, %p20398_p2 }
  0x63   :  { %p20401_p5 = pnand %p20400_p4, %p20394_p1 }
  0x65   :  { %20404 = shalt.err (!%p20401_p5)
}
  0x66   :  { %74 = dma.hbm_to_vmem [thread:$0]  %s21397_s4, 256, %s72_s28, [#allocation11]  }
  0x67   :  { %s20405_s25 = scalar_lea.hbm %s21401_s8, 16 }
  0x68   :  { %p20406_p6 = scmp.ne.s32.totalorder %s21401_s8, %s20405_s25  ;;  %p20409_p7 = scmp.lt.u32.totalorder %s20405_s25, %s21401_s8 }
  0x6a   :  { %p20411_p8 = pnand %p20409_p7, %p20406_p6 }
  0x6c   :  { %20414 = shalt.err (!%p20411_p8)
}
  0x6d   :  { %s20415_s12 = scalar_lea.vmem %s96_s16, 16  ;;  %s20419_s3 = scalar_lea.vmem %s96_s16, 32 }
  0x6e   :  { %p20416_p9 = scmp.ne.s32.totalorder %s96_s16, %s20415_s12  ;;  %p20420_p10 = scmp.lt.s32.totalorder %s96_s16, %s96_s16 }
  0x6f   :  { %p20421_p11 = scmp.lt.s32.totalorder %s20419_s3, %s20415_s12 }
  0x71   :  { %p20422_p12 = por %p20421_p11, %p20420_p10 }
  0x73   :  { %p20423_p13 = pnand %p20422_p12, %p20416_p9 }
  0x75   :  { %20426 = shalt.err (!%p20423_p13)
}
  0x76   :  { %98 = dma.hbm_to_vmem [thread:$0]  %s21401_s8, 16, %s96_s16, [#allocation14]  }
  0x77   :  { %20449 = dma.done.wait [#allocation5], 128  }
  0x78   :  { %20450 = vsyncadd [#allocation5], 4294967168 }
  0x79   :  { %20451 = dma.done.wait [#allocation8], 4352  }
  0x7a   :  { %20452 = vsyncadd [#allocation8], 4294962944 }
  0x7b   :  { %20453 = dma.done.wait [#allocation11], 262400  }
  0x7c   :  { %20454 = vsyncadd [#allocation11], 4294704896 }
  0x7d   :  { %20455 = dma.done.wait [#allocation14], 32  }
  0x7e   :  { %20456 = vsyncadd [#allocation14], 4294967264  ;;  %v20468_v0 = vmov 0   ;;  %v129_v1 = vld [vmem:[#allocation7] sm:$0xff]  ;;  %v130_v7 = vld [vmem:[#allocation7 + $0x8] sm:$0xff]  ;;  %vm405_vm0 = vcmask 261120  }
  0x7f   :  { %441 = vmatprep.mubr.bf16.mxu0 %v20468_v0  ;;  %482 = vmatprep.mubr.bf16.mxu1 %v20468_v0  ;;  %v137_v2 = vld [vmem:[#allocation7 + $0x40] sm:$0xff]  ;;  %v138_v9 = vld [vmem:[#allocation7 + $0x48] sm:$0xff]  ;;  %v131_v15 = vld [vmem:[#allocation7 + $0x10] sm:$0xff]  ;;  %vm20470_vm1 = vmmov 0   ;;  %vm825_vm2 = vcmask 64512   ;;  %s20473_s11 = smov [#allocation16]  }
  0x80   :  { %20138 = vset.pattern.permute.xlu0 %v20468_v0  ;;  %v145_v3 = vld [vmem:[#allocation7 + $0x80] sm:$0xff]  ;;  %v17419_v4 = vcombine.high %v129_v1, %v137_v2  ;;  %v17418_v5 = vcombine.low %v129_v1, %v137_v2  ;;  %v146_v10 = vld [vmem:[#allocation7 + $0x88] sm:$0xff]  ;;  %v17421_v12 = vcombine.high %v130_v7, %v138_v9  ;;  %v17420_v13 = vcombine.low %v130_v7, %v138_v9  ;;  %v139_v16 = vld [vmem:[#allocation7 + $0x50] sm:$0xff]  ;;  %s17406_s12 = sshll.u32 %s20473_s11, 4  ;;  %s17407_s12 = int_to_ptr.vmem [resolvable:$true] %s17406_s12 }
  0x81   :  { %v153_v6 = vld [vmem:[#allocation7 + $0xc0] sm:$0xff]  ;;  %v154_v11 = vld [vmem:[#allocation7 + $0xc8] sm:$0xff]  ;;  %v127_v18 = vld [vmem:[#allocation4] sm:$0xff]  ;;  %v17423_v21 = vcombine.high %v131_v15, %v139_v16  ;;  %v17422_v27 = vcombine.low %v131_v15, %v139_v16  ;;  %s20427_s3 = scalar_lea.vmem %s17407_s12, 128  ;;  %p20432_p1 = scmp.lt.s32.totalorder %s17407_s12, %s17407_s12 }
  0x82   :  { %v17435_v8 = vcombine.high %v145_v3, %v153_v6  ;;  %409 = vmatprep.subr.bf16.mxu0 %v17419_v4  ;;  %v17437_v14 = vcombine.high %v146_v10, %v154_v11  ;;  %v17434_v17 = vcombine.low %v145_v3, %v153_v6  ;;  %v132_v19 = vld [vmem:[#allocation7 + $0x18] sm:$0xff]  ;;  %450 = vmatprep.subr.bf16.mxu1 %v17421_v12  ;;  %v147_v23 = vld [vmem:[#allocation7 + $0x90] sm:$0xff]  ;;  %v133_v32 = vld [vmem:[#allocation7 + $0x20] sm:$0xff]  ;;  %p20428_p0 = scmp.ne.s32.totalorder %s17407_s12, %s20427_s3  ;;  %p20433_p2 = scmp.lt.s32.totalorder %s20427_s3, %s20427_s3 }
  0x83   :  { %410 = vmatpush1.bf16.msra.mxu0 %v17418_v5  ;;  %v140_v20 = vld [vmem:[#allocation7 + $0x58] sm:$0xff]  ;;  %451 = vmatpush1.bf16.msra.mxu1 %v17420_v13  ;;  %v17436_v22 = vcombine.low %v146_v10, %v154_v11  ;;  %v155_v24 = vld [vmem:[#allocation7 + $0xd0] sm:$0xff]  ;;  %v20616_v25 = vpack.c.bf16 %v127_v18, %v127_v18  ;;  %v141_v33 = vld [vmem:[#allocation7 + $0x60] sm:$0xff] }
  0x84   :  { %411 = vmatprep.subr.bf16.mxu0 %v17435_v8  ;;  %452 = vmatprep.subr.bf16.mxu1 %v17437_v14  ;;  %v17425_v26 = vcombine.high %v132_v19, %v140_v20  ;;  %v148_v28 = vld [vmem:[#allocation7 + $0x98] sm:$0xff]  ;;  %v17439_v30 = vcombine.high %v147_v23, %v155_v24  ;;  %v17424_v31 = vcombine.low %v132_v19, %v140_v20  ;;  %v134_v36 = vld [vmem:[#allocation7 + $0x28] sm:$0xff]  ;;  %v149_v40 = vld [vmem:[#allocation7 + $0xa0] sm:$0xff]  ;;  %p20434_p3 = por %p20433_p2, %p20432_p1 }
  0x85   :  { %v156_v29 = vld [vmem:[#allocation7 + $0xd8] sm:$0xff]  ;;  %v17438_v35 = vcombine.low %v147_v23, %v155_v24  ;;  %v142_v37 = vld [vmem:[#allocation7 + $0x68] sm:$0xff]  ;;  %v17427_v38 = vcombine.high %v133_v32, %v141_v33  ;;  %v157_v41 = vld [vmem:[#allocation7 + $0xe0] sm:$0xff]  ;;  %v17426_v43 = vcombine.low %v133_v32, %v141_v33 }
  0x86   :  { %v17441_v34 = vcombine.high %v148_v28, %v156_v29  ;;  %v17440_v39 = vcombine.low %v148_v28, %v156_v29  ;;  %v17429_v42 = vcombine.high %v134_v36, %v142_v37  ;;  %v150_v44 = vld [vmem:[#allocation7 + $0xa8] sm:$0xff]  ;;  %v17443_v46 = vcombine.high %v149_v40, %v157_v41  ;;  %v135_v48 = vld [vmem:[#allocation7 + $0x30] sm:$0xff]  ;;  %v136_v52 = vld [vmem:[#allocation7 + $0x38] sm:$0xff]  ;;  %p20435_p4 = pnand %p20434_p3, %p20428_p0 }
  0x87   :  { %412 = vmatpush1.bf16.msra.mxu0 %v17434_v17  ;;  %453 = vmatpush1.bf16.msra.mxu1 %v17436_v22  ;;  %v158_v45 = vld [vmem:[#allocation7 + $0xe8] sm:$0xff]  ;;  %v17428_v47 = vcombine.low %v134_v36, %v142_v37  ;;  %v143_v49 = vld [vmem:[#allocation7 + $0x70] sm:$0xff]  ;;  %v17442_v51 = vcombine.low %v149_v40, %v157_v41  ;;  %v144_v53 = vld [vmem:[#allocation7 + $0x78] sm:$0xff] }
  0x88   :  { %491 = vmatprep.subr.bf16.mxu0 %v17423_v21  ;;  %532 = vmatprep.subr.bf16.mxu1 %v17425_v26  ;;  %v17445_v50 = vcombine.high %v150_v44, %v158_v45  ;;  %v17431_v54 = vcombine.high %v135_v48, %v143_v49  ;;  %v17444_v55 = vcombine.low %v150_v44, %v158_v45  ;;  %v151_v56 = vld [vmem:[#allocation7 + $0xb0] sm:$0xff]  ;;  %v152_v60 = vld [vmem:[#allocation7 + $0xb8] sm:$0xff] }
  0x89   :  { %v159_v57 = vld [vmem:[#allocation7 + $0xf0] sm:$0xff]  ;;  %v17433_v58 = vcombine.high %v136_v52, %v144_v53  ;;  %v17430_v59 = vcombine.low %v135_v48, %v143_v49  ;;  %v160_v61 = vld [vmem:[#allocation7 + $0xf8] sm:$0xff]  ;;  %v17432_v63 = vcombine.low %v136_v52, %v144_v53 }
  0x8a   :  { %17450 = vmatmul.mubr.msk.bf16.vlgmr.msra.gmra.mrb[0].mxu0 %vm405_vm0, %v20616_v25  ;;  %17451 = vmatmul.mubr.msk.bf16.vlgmr.msra.gmra.mrb[0].mxu1 %vm405_vm0, %v20616_v25  ;;  %v17447_v62 = vcombine.high %v151_v56, %v159_v57  ;;  %v835_v1 = vld [vmem:[#allocation10] sm:$0xff]  ;;  %v17449_v3 = vcombine.high %v152_v60, %v160_v61  ;;  %v17446_v4 = vcombine.low %v151_v56, %v159_v57  ;;  %v836_v5 = vld [vmem:[#allocation10 + $0x8] sm:$0xff] }
  0x8b   :  { %492 = vmatpush1.bf16.msra.mxu0 %v17422_v27  ;;  %523 = vmatprep.mubr.bf16.mxu0 %v20468_v0  ;;  %v843_v2 = vld [vmem:[#allocation10 + $0x40] sm:$0xff]  ;;  %v844_v6 = vld [vmem:[#allocation10 + $0x48] sm:$0xff]  ;;  %v17448_v10 = vcombine.low %v152_v60, %v160_v61 }
  0x8c   :  { %493 = vmatprep.subr.bf16.mxu0 %v17439_v30  ;;  %533 = vmatpush1.bf16.msra.mxu1 %v17424_v31  ;;  %v17483_v7 = vcombine.high %v835_v1, %v843_v2  ;;  %v851_v8 = vld [vmem:[#allocation10 + $0x80] sm:$0xff]  ;;  %v852_v11 = vld [vmem:[#allocation10 + $0x88] sm:$0xff]  ;;  %v17485_v13 = vcombine.high %v836_v5, %v844_v6  ;;  %v17482_v14 = vcombine.low %v835_v1, %v843_v2 }
  0x8d   :  { %564 = vmatprep.mubr.bf16.mxu1 %v20468_v0  ;;  %534 = vmatprep.subr.bf16.mxu1 %v17441_v34  ;;  %v859_v9 = vld [vmem:[#allocation10 + $0xc0] sm:$0xff]  ;;  %v860_v12 = vld [vmem:[#allocation10 + $0xc8] sm:$0xff]  ;;  %v17484_v18 = vcombine.low %v836_v5, %v844_v6 }
  0x8e   :  { %v867_v15 = vld [vmem:[#allocation10 + $0x100] sm:$0xff]  ;;  %v17499_v17 = vcombine.high %v851_v8, %v859_v9  ;;  %v868_v19 = vld [vmem:[#allocation10 + $0x108] sm:$0xff]  ;;  %v17501_v21 = vcombine.high %v852_v11, %v860_v12  ;;  %v17500_v26 = vcombine.low %v852_v11, %v860_v12 }
  0x8f   :  { %494 = vmatpush1.bf16.msra.mxu0 %v17438_v35  ;;  %v875_v16 = vld [vmem:[#allocation10 + $0x140] sm:$0xff]  ;;  %v876_v20 = vld [vmem:[#allocation10 + $0x148] sm:$0xff] }
  0x90   :  { %573 = vmatprep.subr.bf16.mxu0 %v17427_v38  ;;  %535 = vmatpush1.bf16.msra.mxu1 %v17440_v39  ;;  %v883_v22 = vld [vmem:[#allocation10 + $0x180] sm:$0xff]  ;;  %v17515_v24 = vcombine.high %v867_v15, %v875_v16  ;;  %v884_v27 = vld [vmem:[#allocation10 + $0x188] sm:$0xff]  ;;  %v17517_v29 = vcombine.high %v868_v19, %v876_v20  ;;  %v17514_v30 = vcombine.low %v867_v15, %v875_v16 }
  0x91   :  { %614 = vmatprep.subr.bf16.mxu1 %v17429_v42  ;;  %v891_v23 = vld [vmem:[#allocation10 + $0x1c0] sm:$0xff]  ;;  %v892_v28 = vld [vmem:[#allocation10 + $0x1c8] sm:$0xff]  ;;  %v17516_v34 = vcombine.low %v868_v19, %v876_v20 }
  0x92   :  { %17452 = vmatmul.mubr.msk.bf16.vlgmr.msra.gmra.mrb[4].mxu0 %vm405_vm0, %v20616_v25  ;;  %v899_v31 = vld [vmem:[#allocation10 + $0x200] sm:$0xff]  ;;  %v17531_v33 = vcombine.high %v883_v22, %v891_v23  ;;  %v900_v35 = vld [vmem:[#allocation10 + $0x208] sm:$0xff]  ;;  %v17530_v37 = vcombine.low %v883_v22, %v891_v23  ;;  %v17532_v41 = vcombine.low %v884_v27, %v892_v28 }
  0x93   :  { %574 = vmatpush1.bf16.msra.mxu0 %v17426_v43  ;;  %605 = vmatprep.mubr.bf16.mxu0 %v20468_v0  ;;  %v907_v32 = vld [vmem:[#allocation10 + $0x240] sm:$0xff]  ;;  %v908_v36 = vld [vmem:[#allocation10 + $0x248] sm:$0xff] }
  0x94   :  { %17453 = vmatmul.mubr.msk.bf16.vlgmr.msra.gmra.mrb[4].mxu1 %vm405_vm0, %v20616_v25  ;;  %575 = vmatprep.subr.bf16.mxu0 %v17443_v46  ;;  %v915_v38 = vld [vmem:[#allocation10 + $0x280] sm:$0xff]  ;;  %v17547_v40 = vcombine.high %v899_v31, %v907_v32  ;;  %v916_v42 = vld [vmem:[#allocation10 + $0x288] sm:$0xff]  ;;  %v17549_v44 = vcombine.high %v900_v35, %v908_v36  ;;  %v17546_v45 = vcombine.low %v899_v31, %v907_v32 }
  0x95   :  { %615 = vmatpush1.bf16.msra.mxu1 %v17428_v47  ;;  %646 = vmatprep.mubr.bf16.mxu1 %v20468_v0  ;;  %v923_v39 = vld [vmem:[#allocation10 + $0x2c0] sm:$0xff]  ;;  %v924_v43 = vld [vmem:[#allocation10 + $0x2c8] sm:$0xff]  ;;  %v17548_v49 = vcombine.low %v900_v35, %v908_v36 }
  0x96   :  { %616 = vmatprep.subr.bf16.mxu1 %v17445_v50  ;;  %v931_v46 = vld [vmem:[#allocation10 + $0x300] sm:$0xff]  ;;  %v17563_v48 = vcombine.high %v915_v38, %v923_v39  ;;  %v932_v50 = vld [vmem:[#allocation10 + $0x308] sm:$0xff]  ;;  %v17565_v52 = vcombine.high %v916_v42, %v924_v43  ;;  %v17562_v53 = vcombine.low %v915_v38, %v923_v39  ;;  %v17564_v57 = vcombine.low %v916_v42, %v924_v43 }
  0x97   :  { %576 = vmatpush1.bf16.msra.mxu0 %v17442_v51  ;;  %v939_v47 = vld [vmem:[#allocation10 + $0x340] sm:$0xff]  ;;  %v940_v51 = vld [vmem:[#allocation10 + $0x348] sm:$0xff] }
  0x98   :  { %655 = vmatprep.subr.bf16.mxu0 %v17431_v54  ;;  %v947_v54 = vld [vmem:[#allocation10 + $0x380] sm:$0xff]  ;;  %v17579_v56 = vcombine.high %v931_v46, %v939_v47  ;;  %v17581_v60 = vcombine.high %v932_v50, %v940_v51  ;;  %v17578_v61 = vcombine.low %v931_v46, %v939_v47  ;;  %v17580_v2 = vcombine.low %v932_v50, %v940_v51  ;;  %v980_v11 = vld [vmem:[#allocation10 + $0x488] sm:$0xff] }
  0x99   :  { %617 = vmatpush1.bf16.msra.mxu1 %v17444_v55  ;;  %v955_v55 = vld [vmem:[#allocation10 + $0x3c0] sm:$0xff]  ;;  %v988_v12 = vld [vmem:[#allocation10 + $0x4c8] sm:$0xff] }
  0x9a   :  { %17454 = vmatmul.mubr.msk.bf16.vlgmr.msra.gmra.mrb[8].mxu0 %vm405_vm0, %v20616_v25  ;;  %696 = vmatprep.subr.bf16.mxu1 %v17433_v58  ;;  %v948_v58 = vld [vmem:[#allocation10 + $0x388] sm:$0xff]  ;;  %v17595_v1 = vcombine.high %v947_v54, %v955_v55  ;;  %v17594_v6 = vcombine.low %v947_v54, %v955_v55  ;;  %v995_v15 = vld [vmem:[#allocation10 + $0x500] sm:$0xff] }
  0x9b   :  { %656 = vmatpush1.bf16.msra.mxu0 %v17430_v59  ;;  %687 = vmatprep.mubr.bf16.mxu0 %v20468_v0  ;;  %v956_v59 = vld [vmem:[#allocation10 + $0x3c8] sm:$0xff]  ;;  %v1003_v16 = vld [vmem:[#allocation10 + $0x540] sm:$0xff] }
  0x9c   :  { %17455 = vmatmul.mubr.msk.bf16.vlgmr.msra.gmra.mrb[8].mxu1 %vm405_vm0, %v20616_v25  ;;  %657 = vmatprep.subr.bf16.mxu0 %v17447_v62  ;;  %v963_v62 = vld [vmem:[#allocation10 + $0x400] sm:$0xff]  ;;  %v17597_v5 = vcombine.high %v948_v58, %v956_v59  ;;  %v996_v19 = vld [vmem:[#allocation10 + $0x508] sm:$0xff] }
  0x9d   :  { %697 = vmatpush1.bf16.msra.mxu1 %v17432_v63  ;;  %728 = vmatprep.mubr.bf16.mxu1 %v20468_v0  ;;  %v17498_v0 = vcombine.low %v851_v8, %v859_v9  ;;  %v971_v63 = vld [vmem:[#allocation10 + $0x440] sm:$0xff]  ;;  %v1004_v20 = vld [vmem:[#allocation10 + $0x548] sm:$0xff] }
  0x9e   :  { %698 = vmatprep.subr.bf16.mxu1 %v17449_v3  ;;  %v964_v3 = vld [vmem:[#allocation10 + $0x408] sm:$0xff]  ;;  %v987_v8 = vld [vmem:[#allocation10 + $0x4c0] sm:$0xff]  ;;  %v17611_v9 = vcombine.high %v963_v62, %v971_v63 }
  0x9f   :  { %658 = vmatpush1.bf16.msra.mxu0 %v17446_v4  ;;  %v972_v4 = vld [vmem:[#allocation10 + $0x448] sm:$0xff]  ;;  %v1011_v22 = vld [vmem:[#allocation10 + $0x580] sm:$0xff] }
  0xa0   :  { %13263 = vmatprep.subr.bf16.mxu0 %v17483_v7  ;;  %v979_v7 = vld [vmem:[#allocation10 + $0x480] sm:$0xff]  ;;  %v1028_v35 = vld [vmem:[#allocation10 + $0x608] sm:$0xff] }
  0xa1   :  { %699 = vmatpush1.bf16.msra.mxu1 %v17448_v10  ;;  %v17596_v10 = vcombine.low %v948_v58, %v956_v59  ;;  %v1019_v23 = vld [vmem:[#allocation10 + $0x5c0] sm:$0xff]  ;;  %v1036_v36 = vld [vmem:[#allocation10 + $0x648] sm:$0xff] }
  0xa2   :  { %17456 = vmatmul.mubr.msk.bf16.vlgmr.msra.gmra.mrb[12].mxu0 %vm405_vm0, %v20616_v25  ;;  %13591 = vmatprep.subr.bf16.mxu1 %v17485_v13  ;;  %v17613_v13 = vcombine.high %v964_v3, %v972_v4  ;;  %v1027_v31 = vld [vmem:[#allocation10 + $0x600] sm:$0xff]  ;;  %v1044_v42 = vld [vmem:[#allocation10 + $0x688] sm:$0xff]  ;;  %v17676_v47 = vcombine.low %v1028_v35, %v1036_v36 }
  0xa3   :  { %13264 = vmatpush1.bf16.msra.mxu0 %v17482_v14  ;;  %v17610_v14 = vcombine.low %v963_v62, %v971_v63  ;;  %v1035_v32 = vld [vmem:[#allocation10 + $0x640] sm:$0xff]  ;;  %v1052_v43 = vld [vmem:[#allocation10 + $0x6c8] sm:$0xff] }
  0xa4   :  { %17457 = vmatmul.mubr.msk.bf16.vlgmr.msra.gmra.mrb[12].mxu1 %vm405_vm0, %v20616_v25  ;;  %13265 = vmatprep.subr.bf16.mxu0 %v17499_v17  ;;  %v17533_v25 = vcombine.high %v884_v27, %v892_v28  ;;  %v17627_v17 = vcombine.high %v979_v7, %v987_v8  ;;  %v1012_v27 = vld [vmem:[#allocation10 + $0x588] sm:$0xff]  ;;  %v1043_v38 = vld [vmem:[#allocation10 + $0x680] sm:$0xff]  ;;  %v17692_v50 = vcombine.low %v1044_v42, %v1052_v43 }
  0xa5   :  { %13592 = vmatpush1.bf16.msra.mxu1 %v17484_v18  ;;  %v17612_v18 = vcombine.low %v964_v3, %v972_v4  ;;  %v1020_v28 = vld [vmem:[#allocation10 + $0x5c8] sm:$0xff]  ;;  %v1051_v39 = vld [vmem:[#allocation10 + $0x6c0] sm:$0xff] }
  0xa6   :  { %13593 = vmatprep.subr.bf16.mxu1 %v17501_v21  ;;  %v17629_v21 = vcombine.high %v980_v11, %v988_v12  ;;  %v17691_v46 = vcombine.high %v1043_v38, %v1051_v39  ;;  %v1059_v51 = vld [vmem:[#allocation10 + $0x700] sm:$0xff]  ;;  %v1068_v55 = vld [vmem:[#allocation10 + $0x748] sm:$0xff] }
  0xa7   :  { %13266 = vmatpush1.bf16.msra.mxu0 %v17498_v0  ;;  %v17626_v0 = vcombine.low %v979_v7, %v987_v8  ;;  %v1075_v59 = vld [vmem:[#allocation10 + $0x780] sm:$0xff]  ;;  %v1084_v63 = vld [vmem:[#allocation10 + $0x7c8] sm:$0xff] }
  0xa8   :  { %13267 = vmatprep.subr.bf16.mxu0 %v17515_v24  ;;  %v17643_v24 = vcombine.high %v995_v15, %v1003_v16  ;;  %v1091_v4 = vld [vmem:[#allocation10 + $0x800] sm:$0xff]  ;;  %v1100_v8 = vld [vmem:[#allocation10 + $0x848] sm:$0xff] }
  0xa9   :  { %13594 = vmatpush1.bf16.msra.mxu1 %v17500_v26  ;;  %v17628_v26 = vcombine.low %v980_v11, %v988_v12  ;;  %v165_v12 = vlaneseq }
  0xaa   :  { %13595 = vmatprep.subr.bf16.mxu1 %v17517_v29  ;;  %v17645_v29 = vcombine.high %v996_v19, %v1004_v20 }
  0xab   :  { %13268 = vmatpush1.bf16.msra.mxu0 %v17514_v30  ;;  %v17642_v30 = vcombine.low %v995_v15, %v1003_v16  ;;  %v20646_v15 = vld [vmem:[#allocation9] sm:$0xff] }
  0xac   :  { %13269 = vmatprep.subr.bf16.mxu0 %v17531_v33  ;;  %v17659_v33 = vcombine.high %v1011_v22, %v1019_v23 }
  0xad   :  { %13596 = vmatpush1.bf16.msra.mxu1 %v17516_v34  ;;  %v17644_v34 = vcombine.low %v996_v19, %v1004_v20 }
  0xae   :  { %13597 = vmatprep.subr.bf16.mxu1 %v17533_v25  ;;  %v17661_v25 = vcombine.high %v1012_v27, %v1020_v28 }
  0xaf   :  { %13270 = vmatpush1.bf16.msra.mxu0 %v17530_v37  ;;  %v17658_v37 = vcombine.low %v1011_v22, %v1019_v23 }
  0xb0   :  { %13271 = vmatprep.subr.bf16.mxu0 %v17547_v40  ;;  %v17675_v40 = vcombine.high %v1027_v31, %v1035_v32 }
  0xb1   :  { %13598 = vmatpush1.bf16.msra.mxu1 %v17532_v41  ;;  %v17660_v41 = vcombine.low %v1012_v27, %v1020_v28 }
  0xb2   :  { %13599 = vmatprep.subr.bf16.mxu1 %v17549_v44  ;;  %v17677_v44 = vcombine.high %v1028_v35, %v1036_v36 }
  0xb3   :  { %13272 = vmatpush1.bf16.msra.mxu0 %v17546_v45  ;;  %v17674_v45 = vcombine.low %v1027_v31, %v1035_v32  ;;  %v1115_v32 = vld [vmem:[#allocation10 + $0x8c0] sm:$0xff] }
  0xb4   :  { %13273 = vmatprep.subr.bf16.mxu0 %v17563_v48  ;;  %v17693_v48 = vcombine.high %v1044_v42, %v1052_v43  ;;  %v1123_v42 = vld [vmem:[#allocation10 + $0x900] sm:$0xff] }
  0xb5   :  { %13600 = vmatpush1.bf16.msra.mxu1 %v17548_v49  ;;  %v17690_v49 = vcombine.low %v1043_v38, %v1051_v39  ;;  %v1131_v43 = vld [vmem:[#allocation10 + $0x940] sm:$0xff] }
  0xb6   :  { %13601 = vmatprep.subr.bf16.mxu1 %v17565_v52  ;;  %v1067_v52 = vld [vmem:[#allocation10 + $0x740] sm:$0xff] }
  0xb7   :  { %13274 = vmatpush1.bf16.msra.mxu0 %v17562_v53  ;;  %v1060_v53 = vld [vmem:[#allocation10 + $0x708] sm:$0xff]  ;;  %v17707_v54 = vcombine.high %v1059_v51, %v1067_v52 }
  0xb8   :  { %13275 = vmatprep.subr.bf16.mxu0 %v17579_v56  ;;  %v17706_v56 = vcombine.low %v1059_v51, %v1067_v52  ;;  %v17709_v58 = vcombine.high %v1060_v53, %v1068_v55  ;;  %v17771_v52 = vcombine.high %v1123_v42, %v1131_v43 }
  0xb9   :  { %13602 = vmatpush1.bf16.msra.mxu1 %v17564_v57  ;;  %v17708_v57 = vcombine.low %v1060_v53, %v1068_v55 }
  0xba   :  { %13603 = vmatprep.subr.bf16.mxu1 %v17581_v60  ;;  %v1083_v60 = vld [vmem:[#allocation10 + $0x7c0] sm:$0xff] }
  0xbb   :  { %13276 = vmatpush1.bf16.msra.mxu0 %v17578_v61  ;;  %v1076_v61 = vld [vmem:[#allocation10 + $0x788] sm:$0xff]  ;;  %v17723_v62 = vcombine.high %v1075_v59, %v1083_v60 }
  0xbc   :  { %13277 = vmatprep.subr.bf16.mxu0 %v17595_v1  ;;  %v17722_v1 = vcombine.low %v1075_v59, %v1083_v60  ;;  %v17725_v3 = vcombine.high %v1076_v61, %v1084_v63  ;;  %v17770_v59 = vcombine.low %v1123_v42, %v1131_v43  ;;  %v1212_v42 = vld [vmem:[#allocation10 + $0xbc8] sm:$0xff] }
  0xbd   :  { %13604 = vmatpush1.bf16.msra.mxu1 %v17580_v2  ;;  %v17724_v2 = vcombine.low %v1076_v61, %v1084_v63  ;;  %v1155_v63 = vld [vmem:[#allocation10 + $0xa00] sm:$0xff] }
  0xbe   :  { %13605 = vmatprep.subr.bf16.mxu1 %v17597_v5  ;;  %v1099_v5 = vld [vmem:[#allocation10 + $0x840] sm:$0xff] }
  0xbf   :  { %13278 = vmatpush1.bf16.msra.mxu0 %v17594_v6  ;;  %v1092_v6 = vld [vmem:[#allocation10 + $0x808] sm:$0xff]  ;;  %v17739_v7 = vcombine.high %v1091_v4, %v1099_v5 }
  0xc0   :  { %13279 = vmatprep.subr.bf16.mxu0 %v17611_v9  ;;  %v17738_v9 = vcombine.low %v1091_v4, %v1099_v5  ;;  %v17741_v11 = vcombine.high %v1092_v6, %v1100_v8 }
  0xc1   :  { %13606 = vmatpush1.bf16.msra.mxu1 %v17596_v10  ;;  %v17740_v10 = vcombine.low %v1092_v6, %v1100_v8 }
  0xc2   :  { %13607 = vmatprep.subr.bf16.mxu1 %v17613_v13  ;;  %v20641_v13 = vshrl.u32 %v165_v12, 7 }
  0xc3   :  { %13280 = vmatpush1.bf16.msra.mxu0 %v17610_v14 }
  0xc4   :  { %13281 = vmatprep.subr.bf16.mxu0 %v17627_v17  ;;  %v20644_v14 = vsub.s32 0, %v20641_v13  ;;  %v20649_v16 = vsub.s32 1, %v20641_v13  ;;  %v20652_v17 = vsub.s32 3, %v20641_v13 }
  0xc5   :  { %13608 = vmatpush1.bf16.msra.mxu1 %v17612_v18 }
  0xc6   :  { %13609 = vmatprep.subr.bf16.mxu1 %v17629_v21  ;;  %v168_v18 = vrot.slane %v20646_v15, %v20644_v14  ;;  %v172_v19 = vrot.slane %v20646_v15, %v20649_v16  ;;  %v180_v21 = vrot.slane %v20646_v15, %v20652_v17 }
  0xc7   :  { %13282 = vmatpush1.bf16.msra.mxu0 %v17626_v0 }
  0xc8   :  { %13283 = vmatprep.subr.bf16.mxu0 %v17643_v24 }
  0xc9   :  { %13610 = vmatpush1.bf16.msra.mxu1 %v17628_v26 }
  0xca   :  { %13611 = vmatprep.subr.bf16.mxu1 %v17645_v29  ;;  %v1107_v29 = vld [vmem:[#allocation10 + $0x880] sm:$0xff] }
  0xcb   :  { %13284 = vmatpush1.bf16.msra.mxu0 %v17642_v30 }
  0xcc   :  { %13285 = vmatprep.subr.bf16.mxu0 %v17659_v33  ;;  %v1108_v33 = vld [vmem:[#allocation10 + $0x888] sm:$0xff] }
  0xcd   :  { %13612 = vmatpush1.bf16.msra.mxu1 %v17644_v34  ;;  %v1116_v34 = vld [vmem:[#allocation10 + $0x8c8] sm:$0xff] }
  0xce   :  { %13613 = vmatprep.subr.bf16.mxu1 %v17661_v25 }
  0xcf   :  { %13286 = vmatpush1.bf16.msra.mxu0 %v17658_v37 }
  0xd0   :  { %13287 = vmatprep.subr.bf16.mxu0 %v17675_v40  ;;  %v17755_v40 = vcombine.high %v1107_v29, %v1115_v32 }
  0xd1   :  { %13614 = vmatpush1.bf16.msra.mxu1 %v17660_v41  ;;  %v17757_v41 = vcombine.high %v1108_v33, %v1116_v34 }
  0xd2   :  { %13615 = vmatprep.subr.bf16.mxu1 %v17677_v44  ;;  %v1124_v44 = vld [vmem:[#allocation10 + $0x908] sm:$0xff] }
  0xd3   :  { %13288 = vmatpush1.bf16.msra.mxu0 %v17674_v45  ;;  %v1132_v45 = vld [vmem:[#allocation10 + $0x948] sm:$0xff] }
  0xd4   :  { %13289 = vmatprep.subr.bf16.mxu0 %v17691_v46  ;;  %v17773_v53 = vcombine.high %v1124_v44, %v1132_v45  ;;  %v17772_v60 = vcombine.low %v1124_v44, %v1132_v45 }
  0xd5   :  { %13616 = vmatpush1.bf16.msra.mxu1 %v17676_v47 }
  0xd6   :  { %13617 = vmatprep.subr.bf16.mxu1 %v17693_v48 }
  0xd7   :  { %13290 = vmatpush1.bf16.msra.mxu0 %v17690_v49  ;;  %v17754_v49 = vcombine.low %v1107_v29, %v1115_v32  ;;  %v1188_v29 = vld [vmem:[#allocation10 + $0xb08] sm:$0xff] }
  0xd8   :  { %13291 = vmatprep.subr.bf16.mxu0 %v17707_v54  ;;  %v1139_v54 = vld [vmem:[#allocation10 + $0x980] sm:$0xff] }
  0xd9   :  { %13618 = vmatpush1.bf16.msra.mxu1 %v17692_v50  ;;  %v17756_v50 = vcombine.low %v1108_v33, %v1116_v34 }
  0xda   :  { %13619 = vmatprep.subr.bf16.mxu1 %v17709_v58  ;;  %v1148_v58 = vld [vmem:[#allocation10 + $0x9c8] sm:$0xff] }
  0xdb   :  { %13292 = vmatpush1.bf16.msra.mxu0 %v17706_v56  ;;  %v1147_v56 = vld [vmem:[#allocation10 + $0x9c0] sm:$0xff] }
  0xdc   :  { %13293 = vmatprep.subr.bf16.mxu0 %v17723_v62  ;;  %v17787_v61 = vcombine.high %v1139_v54, %v1147_v56  ;;  %v17786_v5 = vcombine.low %v1139_v54, %v1147_v56  ;;  %v1228_v54 = vld [vmem:[#allocation10 + $0xc48] sm:$0xff] }
  0xdd   :  { %13620 = vmatpush1.bf16.msra.mxu1 %v17708_v57  ;;  %v1140_v57 = vld [vmem:[#allocation10 + $0x988] sm:$0xff] }
  0xde   :  { %13621 = vmatprep.subr.bf16.mxu1 %v17725_v3  ;;  %v17789_v62 = vcombine.high %v1140_v57, %v1148_v58  ;;  %v1164_v3 = vld [vmem:[#allocation10 + $0xa48] sm:$0xff]  ;;  %v17788_v6 = vcombine.low %v1140_v57, %v1148_v58 }
  0xdf   :  { %13294 = vmatpush1.bf16.msra.mxu0 %v17722_v1  ;;  %v1163_v1 = vld [vmem:[#allocation10 + $0xa40] sm:$0xff] }
  0xe0   :  { %13304 = vmatprep.subr.bf16.mxu0 %v17739_v7  ;;  %v17803_v8 = vcombine.high %v1155_v63, %v1163_v1 }
  0xe1   :  { %13622 = vmatpush1.bf16.msra.mxu1 %v17724_v2  ;;  %v1156_v2 = vld [vmem:[#allocation10 + $0xa08] sm:$0xff] }
  0xe2   :  { %13632 = vmatprep.subr.bf16.mxu1 %v17741_v11 }
 0x15d   :  { %v443_v20 = vpop.f32.mrb[0].mxu0  ;;  %v20660_v26 = vpop.f32.mrb[0].mxu1 }
 0x15e   :  { %v444_v0 = vadd.f32 %v443_v20, %v168_v18  ;;  %v445_v22 = vpop.f32.mrb[1].mxu0  ;;  %v486_v30 = vpop.f32.mrb[1].mxu1  ;;  %v1179_v18 = vld [vmem:[#allocation10 + $0xac0] sm:$0xff]  ;;  %v1180_v20 = vld [vmem:[#allocation10 + $0xac8] sm:$0xff] }
 0x15f   :  { %v446_v23 = vadd.f32 %v445_v22, %v172_v19  ;;  %v447_v24 = vpop.f32.mrb[2].mxu0  ;;  %v487_v35 = vadd.f32 %v486_v30, %v180_v21  ;;  %v488_v36 = vpop.f32.mrb[2].mxu1  ;;  %v1172_v19 = vld [vmem:[#allocation10 + $0xa88] sm:$0xff]  ;;  %v17804_v22 = vcombine.low %v1156_v2, %v1164_v3 }
 0x160   :  { %v737_v27 = vmax.f32 %v444_v0, 0.0  ;;  %v448_v28 = vpop.f32.mrb[3].mxu0  ;;  %v489_v25 = vpop.f32.mrb[3].mxu1  ;;  %v17802_v0 = vcombine.low %v1155_v63, %v1163_v1  ;;  %v17821_v24 = vcombine.high %v1172_v19, %v1180_v20  ;;  %v1196_v30 = vld [vmem:[#allocation10 + $0xb48] sm:$0xff]  ;;  %v17820_v33 = vcombine.low %v1172_v19, %v1180_v20  ;;  %v1267_v20 = vld [vmem:[#allocation10 + $0xd80] sm:$0xff] }
 0x161   :  { %v738_v31 = vmax.f32 %v446_v23, 0.0  ;;  %v740_v38 = vmax.f32 %v487_v35, 0.0  ;;  %v1195_v28 = vld [vmem:[#allocation10 + $0xb40] sm:$0xff]  ;;  %v17837_v36 = vcombine.high %v1188_v29, %v1196_v30  ;;  %v17836_v45 = vcombine.low %v1188_v29, %v1196_v30 }
 0x162   :  { %v20664_v39 = vpack.c.bf16 %v737_v27, %v737_v27  ;;  %v1187_v27 = vld [vmem:[#allocation10 + $0xb00] sm:$0xff] }
 0x163   :  { %v20662_v37 = vpack.c.bf16 %v738_v31, %v738_v31  ;;  %v20668_v46 = vpack.c.bf16 %v740_v38, %v740_v38  ;;  %v17835_v35 = vcombine.high %v1187_v27, %v1195_v28  ;;  %v1203_v25 = vld [vmem:[#allocation10 + $0xb80] sm:$0xff]  ;;  %v17834_v44 = vcombine.low %v1187_v27, %v1195_v28 }
 0x164   :  { %v1283_v29 = vld [vmem:[#allocation10 + $0xe00] sm:$0xff] }
 0x165   :  { %13295 = vmatprep.mubr.bf16.mxu0 %v20662_v37  ;;  %13623 = vmatprep.mubr.bf16.mxu1 %v20662_v37  ;;  %v20670_v47 = vpop.f32.mrb[4].mxu0  ;;  %v1291_v30 = vld [vmem:[#allocation10 + $0xe40] sm:$0xff] }
 0x166   :  { %13296 = vmatmul.mubr.bf16.vlgmr.msra.gmra.mrb[16].mxu0 %v20664_v39  ;;  %13624 = vmatmul.mubr.bf16.vlgmr.msra.gmra.mrb[16].mxu1 %v20664_v39  ;;  %v20674_v48 = vpop.f32.mrb[5].mxu0 }
 0x167   :  { %13305 = vmatpush1.bf16.msra.mxu0 %v17738_v9  ;;  %13633 = vmatpush1.bf16.msra.mxu1 %v17740_v10  ;;  %v529_v51 = vpop.f32.mrb[6].mxu0  ;;  %v17805_v9 = vcombine.high %v1156_v2, %v1164_v3  ;;  %v1171_v10 = vld [vmem:[#allocation10 + $0xa80] sm:$0xff] }
 0x168   :  { %13306 = vmatprep.subr.bf16.mxu0 %v17755_v40  ;;  %13634 = vmatprep.subr.bf16.mxu1 %v17757_v41  ;;  %v530_v55 = vpop.f32.mrb[7].mxu0  ;;  %v17819_v23 = vcombine.high %v1171_v10, %v1179_v18  ;;  %v17818_v32 = vcombine.low %v1171_v10, %v1179_v18  ;;  %v1211_v40 = vld [vmem:[#allocation10 + $0xbc0] sm:$0xff]  ;;  %v1204_v41 = vld [vmem:[#allocation10 + $0xb88] sm:$0xff] }
 0x169   :  { %13336 = vmatprep.mubr.bf16.mxu0 %v20668_v46  ;;  %13664 = vmatprep.mubr.bf16.mxu1 %v20668_v46  ;;  %v1219_v51 = vld [vmem:[#allocation10 + $0xc00] sm:$0xff]  ;;  %v17850_v55 = vcombine.low %v1203_v25, %v1211_v40  ;;  %v17852_v56 = vcombine.low %v1204_v41, %v1212_v42 }
 0x16b   :  { %13307 = vmatpush1.bf16.msra.mxu0 %v17754_v49  ;;  %13635 = vmatpush1.bf16.msra.mxu1 %v17756_v50  ;;  %v17851_v49 = vcombine.high %v1203_v25, %v1211_v40  ;;  %v17853_v50 = vcombine.high %v1204_v41, %v1212_v42  ;;  %v17931_v25 = vcombine.high %v1283_v29, %v1291_v30  ;;  %v1299_v40 = vld [vmem:[#allocation10 + $0xe80] sm:$0xff]  ;;  %v1300_v42 = vld [vmem:[#allocation10 + $0xe88] sm:$0xff] }
 0x16c   :  { %13308 = vmatprep.subr.bf16.mxu0 %v17771_v52  ;;  %13636 = vmatprep.subr.bf16.mxu1 %v17773_v53  ;;  %v1227_v52 = vld [vmem:[#allocation10 + $0xc40] sm:$0xff]  ;;  %v1220_v53 = vld [vmem:[#allocation10 + $0xc08] sm:$0xff] }
 0x16d   :  { %v20678_v4 = vpop.f32.mrb[8].mxu0  ;;  %v17867_v57 = vcombine.high %v1219_v51, %v1227_v52  ;;  %v17869_v58 = vcombine.high %v1220_v53, %v1228_v54  ;;  %v17866_v63 = vcombine.low %v1219_v51, %v1227_v52  ;;  %v17868_v1 = vcombine.low %v1220_v53, %v1228_v54  ;;  %v1307_v41 = vld [vmem:[#allocation10 + $0xec0] sm:$0xff]  ;;  %v1316_v54 = vld [vmem:[#allocation10 + $0xf08] sm:$0xff] }
 0x16e   :  { %v20680_v7 = vpop.f32.mrb[9].mxu0  ;;  %v1315_v52 = vld [vmem:[#allocation10 + $0xf00] sm:$0xff] }
 0x16f   :  { %13309 = vmatpush1.bf16.msra.mxu0 %v17770_v59  ;;  %13637 = vmatpush1.bf16.msra.mxu1 %v17772_v60  ;;  %v611_v11 = vpop.f32.mrb[10].mxu0  ;;  %v1235_v59 = vld [vmem:[#allocation10 + $0xc80] sm:$0xff] }
 0x170   :  { %13310 = vmatprep.subr.bf16.mxu0 %v17787_v61  ;;  %13638 = vmatprep.subr.bf16.mxu1 %v17789_v62  ;;  %v612_v21 = vpop.f32.mrb[11].mxu0  ;;  %v1243_v60 = vld [vmem:[#allocation10 + $0xcc0] sm:$0xff]  ;;  %v1236_v61 = vld [vmem:[#allocation10 + $0xc88] sm:$0xff] }
 0x171   :  { %v1244_v62 = vld [vmem:[#allocation10 + $0xcc8] sm:$0xff]  ;;  %v17883_v2 = vcombine.high %v1235_v59, %v1243_v60  ;;  %v17882_v10 = vcombine.low %v1235_v59, %v1243_v60  ;;  %v1275_v21 = vld [vmem:[#allocation10 + $0xdc0] sm:$0xff] }
 0x172   :  { %v17885_v3 = vcombine.high %v1236_v61, %v1244_v62  ;;  %v17884_v11 = vcombine.low %v1236_v61, %v1244_v62  ;;  %v17915_v27 = vcombine.high %v1267_v20, %v1275_v21  ;;  %v1323_v53 = vld [vmem:[#allocation10 + $0xf40] sm:$0xff] }
 0x173   :  { %13311 = vmatpush1.bf16.msra.mxu0 %v17786_v5  ;;  %13639 = vmatpush1.bf16.msra.mxu1 %v17788_v6  ;;  %v1251_v5 = vld [vmem:[#allocation10 + $0xd00] sm:$0xff]  ;;  %v17963_v60 = vcombine.high %v1315_v52, %v1323_v53 }
 0x174   :  { %13312 = vmatprep.subr.bf16.mxu0 %v17803_v8  ;;  %13640 = vmatprep.subr.bf16.mxu1 %v17805_v9  ;;  %v1259_v6 = vld [vmem:[#allocation10 + $0xd40] sm:$0xff]  ;;  %v1252_v8 = vld [vmem:[#allocation10 + $0xd08] sm:$0xff] }
 0x175   :  { %v20682_v31 = vpop.f32.mrb[12].mxu0  ;;  %v1260_v9 = vld [vmem:[#allocation10 + $0xd48] sm:$0xff]  ;;  %v17899_v18 = vcombine.high %v1251_v5, %v1259_v6  ;;  %v1331_v62 = vld [vmem:[#allocation10 + $0xf80] sm:$0xff] }
 0x176   :  { %v20684_v34 = vpop.f32.mrb[13].mxu0  ;;  %v17901_v19 = vcombine.high %v1252_v8, %v1260_v9 }
 0x177   :  { %13313 = vmatpush1.bf16.msra.mxu0 %v17802_v0  ;;  %13641 = vmatpush1.bf16.msra.mxu1 %v17804_v22  ;;  %v693_v38 = vpop.f32.mrb[14].mxu0  ;;  %v1268_v0 = vld [vmem:[#allocation10 + $0xd88] sm:$0xff] }
 0x178   :  { %13314 = vmatprep.subr.bf16.mxu0 %v17819_v23  ;;  %13642 = vmatprep.subr.bf16.mxu1 %v17821_v24  ;;  %v694_v43 = vpop.f32.mrb[15].mxu0  ;;  %v1276_v22 = vld [vmem:[#allocation10 + $0xdc8] sm:$0xff]  ;;  %v17898_v23 = vcombine.low %v1251_v5, %v1259_v6  ;;  %v17900_v24 = vcombine.low %v1252_v8, %v1260_v9  ;;  %v17962_v8 = vcombine.low %v1315_v52, %v1323_v53 }
 0x179   :  { %v17917_v28 = vcombine.high %v1268_v0, %v1276_v22  ;;  %v1308_v43 = vld [vmem:[#allocation10 + $0xec8] sm:$0xff] }
 0x17a   :  { %v17949_v51 = vcombine.high %v1300_v42, %v1308_v43  ;;  %v17948_v59 = vcombine.low %v1300_v42, %v1308_v43  ;;  %v1379_v43 = vld [vmem:[#allocation10 + $0x1100] sm:$0xff] }
 0x17b   :  { %13315 = vmatpush1.bf16.msra.mxu0 %v17818_v32  ;;  %13643 = vmatpush1.bf16.msra.mxu1 %v17820_v33  ;;  %v1284_v32 = vld [vmem:[#allocation10 + $0xe08] sm:$0xff] }
 0x17c   :  { %13316 = vmatprep.subr.bf16.mxu0 %v17835_v35  ;;  %13644 = vmatprep.subr.bf16.mxu1 %v17837_v36  ;;  %v1292_v33 = vld [vmem:[#allocation10 + $0xe48] sm:$0xff]  ;;  %v17914_v35 = vcombine.low %v1267_v20, %v1275_v21  ;;  %v17916_v36 = vcombine.low %v1268_v0, %v1276_v22  ;;  %v1355_v21 = vld [vmem:[#allocation10 + $0x1040] sm:$0xff] }
 0x17d   :  { %v17933_v38 = vcombine.high %v1284_v32, %v1292_v33  ;;  %v1348_v0 = vld [vmem:[#allocation10 + $0x1008] sm:$0xff] }
 0x17e   :  { %v1356_v22 = vld [vmem:[#allocation10 + $0x1048] sm:$0xff] }
 0x17f   :  { %13317 = vmatpush1.bf16.msra.mxu0 %v17834_v44  ;;  %13645 = vmatpush1.bf16.msra.mxu1 %v17836_v45  ;;  %v20687_v44 = vsub.s32 2, %v20641_v13  ;;  %v17930_v45 = vcombine.low %v1283_v29, %v1291_v30  ;;  %v17997_v30 = vcombine.high %v1348_v0, %v1356_v22 }
 0x180   :  { %13318 = vmatprep.subr.bf16.mxu0 %v17851_v49  ;;  %13646 = vmatprep.subr.bf16.mxu1 %v17853_v50  ;;  %v17932_v49 = vcombine.low %v1284_v32, %v1292_v33  ;;  %v17947_v50 = vcombine.high %v1299_v40, %v1307_v41  ;;  %v1363_v32 = vld [vmem:[#allocation10 + $0x1080] sm:$0xff] }
 0x181   :  { %v1371_v33 = vld [vmem:[#allocation10 + $0x10c0] sm:$0xff] }
 0x182   :  { %v18010_v52 = vcombine.low %v1363_v32, %v1371_v33 }
 0x183   :  { %13319 = vmatpush1.bf16.msra.mxu0 %v17850_v55  ;;  %13647 = vmatpush1.bf16.msra.mxu1 %v17852_v56  ;;  %v1324_v55 = vld [vmem:[#allocation10 + $0xf48] sm:$0xff]  ;;  %v20690_v56 = vsub.s32 5, %v20641_v13 }
 0x184   :  { %13320 = vmatprep.subr.bf16.mxu0 %v17867_v57  ;;  %13648 = vmatprep.subr.bf16.mxu1 %v17869_v58  ;;  %v176_v57 = vrot.slane %v20646_v15, %v20687_v44  ;;  %v17946_v58 = vcombine.low %v1299_v40, %v1307_v41  ;;  %v17965_v61 = vcombine.high %v1316_v54, %v1324_v55 }
 0x185   :  { %v188_v5 = vrot.slane %v20646_v15, %v20690_v56  ;;  %v17964_v9 = vcombine.low %v1316_v54, %v1324_v55  ;;  %v17996_v40 = vcombine.low %v1348_v0, %v1356_v22  ;;  %v18011_v41 = vcombine.high %v1363_v32, %v1371_v33  ;;  %v1428_v0 = vld [vmem:[#allocation10 + $0x1288] sm:$0xff] }
 0x186   :  { %v485_v6 = vadd.f32 %v20660_v26, %v176_v57  ;;  %v1395_v57 = vld [vmem:[#allocation10 + $0x1180] sm:$0xff]  ;;  %v1436_v22 = vld [vmem:[#allocation10 + $0x12c8] sm:$0xff] }
 0x187   :  { %13321 = vmatpush1.bf16.msra.mxu0 %v17866_v63  ;;  %13649 = vmatpush1.bf16.msra.mxu1 %v17868_v1  ;;  %v20694_v63 = vpop.f32.mrb[4].mxu1  ;;  %v1339_v1 = vld [vmem:[#allocation10 + $0xfc0] sm:$0xff]  ;;  %v1452_v32 = vld [vmem:[#allocation10 + $0x1348] sm:$0xff] }
 0x188   :  { %13322 = vmatprep.subr.bf16.mxu0 %v17883_v2  ;;  %13650 = vmatprep.subr.bf16.mxu1 %v17885_v3  ;;  %v1332_v2 = vld [vmem:[#allocation10 + $0xf88] sm:$0xff]  ;;  %v17978_v26 = vcombine.low %v1331_v62, %v1339_v1 }
 0x189   :  { %v1340_v3 = vld [vmem:[#allocation10 + $0xfc8] sm:$0xff] }
 0x18b   :  { %13323 = vmatpush1.bf16.msra.mxu0 %v17882_v10  ;;  %13651 = vmatpush1.bf16.msra.mxu1 %v17884_v11  ;;  %v20699_v10 = vpop.f32.mrb[5].mxu1  ;;  %v17979_v11 = vcombine.high %v1331_v62, %v1339_v1 }
 0x18c   :  { %13324 = vmatprep.subr.bf16.mxu0 %v17899_v18  ;;  %13652 = vmatprep.subr.bf16.mxu1 %v17901_v19  ;;  %v17981_v18 = vcombine.high %v1332_v2, %v1340_v3  ;;  %v1347_v19 = vld [vmem:[#allocation10 + $0x1000] sm:$0xff]  ;;  %v570_v20 = vpop.f32.mrb[6].mxu1 }
 0x18d   :  { %v17995_v29 = vcombine.high %v1347_v19, %v1355_v21  ;;  %v1427_v20 = vld [vmem:[#allocation10 + $0x1280] sm:$0xff] }
 0x18f   :  { %13325 = vmatpush1.bf16.msra.mxu0 %v17898_v23  ;;  %13653 = vmatpush1.bf16.msra.mxu1 %v17900_v24  ;;  %v528_v23 = vadd.f32 %v20674_v48, %v188_v5  ;;  %v571_v24 = vpop.f32.mrb[7].mxu1  ;;  %v17994_v48 = vcombine.low %v1347_v19, %v1355_v21  ;;  %v1419_v5 = vld [vmem:[#allocation10 + $0x1240] sm:$0xff] }
 0x190   :  { %13326 = vmatprep.subr.bf16.mxu0 %v17915_v27  ;;  %13654 = vmatprep.subr.bf16.mxu1 %v17917_v28  ;;  %v739_v27 = vmax.f32 %v485_v6, 0.0  ;;  %v17980_v28 = vcombine.low %v1332_v2, %v1340_v3  ;;  %v1411_v3 = vld [vmem:[#allocation10 + $0x1200] sm:$0xff]  ;;  %v1412_v6 = vld [vmem:[#allocation10 + $0x1208] sm:$0xff] }
 0x191   :  { %v1435_v21 = vld [vmem:[#allocation10 + $0x12c0] sm:$0xff] }
 0x192   :  { %v18074_v33 = vcombine.low %v1427_v20, %v1435_v21 }
 0x193   :  { %13327 = vmatpush1.bf16.msra.mxu0 %v17914_v35  ;;  %13655 = vmatpush1.bf16.msra.mxu1 %v17916_v36  ;;  %v1364_v35 = vld [vmem:[#allocation10 + $0x1088] sm:$0xff] }
 0x194   :  { %13328 = vmatprep.subr.bf16.mxu0 %v17931_v25  ;;  %13656 = vmatprep.subr.bf16.mxu1 %v17933_v38  ;;  %v1372_v36 = vld [vmem:[#allocation10 + $0x10c8] sm:$0xff]  ;;  %v742_v25 = vmax.f32 %v528_v23, 0.0  ;;  %v20702_v38 = vpack.c.bf16 %v739_v27, %v739_v27  ;;  %v18058_v23 = vcombine.low %v1411_v3, %v1419_v5  ;;  %v18075_v27 = vcombine.high %v1427_v20, %v1435_v21 }
 0x195   :  { %v18013_v42 = vcombine.high %v1364_v35, %v1372_v36  ;;  %v18012_v53 = vcombine.low %v1364_v35, %v1372_v36  ;;  %v18076_v35 = vcombine.low %v1428_v0, %v1436_v22 }
 0x197   :  { %13329 = vmatpush1.bf16.msra.mxu0 %v17930_v45  ;;  %13657 = vmatpush1.bf16.msra.mxu1 %v17932_v49  ;;  %v1387_v45 = vld [vmem:[#allocation10 + $0x1140] sm:$0xff]  ;;  %v1380_v49 = vld [vmem:[#allocation10 + $0x1108] sm:$0xff] }
 0x198   :  { %13330 = vmatprep.subr.bf16.mxu0 %v17947_v50  ;;  %13658 = vmatprep.subr.bf16.mxu1 %v17949_v51  ;;  %v1388_v50 = vld [vmem:[#allocation10 + $0x1148] sm:$0xff]  ;;  %v20704_v51 = vpack.c.bf16 %v742_v25, %v742_v25  ;;  %v18027_v54 = vcombine.high %v1379_v43, %v1387_v45 }
 0x199   :  { %v18029_v55 = vcombine.high %v1380_v49, %v1388_v50  ;;  %v18028_v62 = vcombine.low %v1380_v49, %v1388_v50 }
 0x19b   :  { %13331 = vmatpush1.bf16.msra.mxu0 %v17946_v58  ;;  %13659 = vmatpush1.bf16.msra.mxu1 %v17948_v59  ;;  %v1403_v58 = vld [vmem:[#allocation10 + $0x11c0] sm:$0xff]  ;;  %v1396_v59 = vld [vmem:[#allocation10 + $0x1188] sm:$0xff] }
 0x19c   :  { %13332 = vmatprep.subr.bf16.mxu0 %v17963_v60  ;;  %13660 = vmatprep.subr.bf16.mxu1 %v17965_v61  ;;  %v1404_v60 = vld [vmem:[#allocation10 + $0x11c8] sm:$0xff]  ;;  %v18026_v61 = vcombine.low %v1379_v43, %v1387_v45  ;;  %v18043_v1 = vcombine.high %v1395_v57, %v1403_v58 }
 0x19d   :  { %v18045_v2 = vcombine.high %v1396_v59, %v1404_v60 }
 0x19f   :  { %13333 = vmatpush1.bf16.msra.mxu0 %v17962_v8  ;;  %13661 = vmatpush1.bf16.msra.mxu1 %v17964_v9  ;;  %v1420_v8 = vld [vmem:[#allocation10 + $0x1248] sm:$0xff]  ;;  %v18042_v9 = vcombine.low %v1395_v57, %v1403_v58 }
 0x1a0   :  { %13334 = vmatprep.subr.bf16.mxu0 %v17979_v11  ;;  %13662 = vmatprep.subr.bf16.mxu1 %v17981_v18  ;;  %v18044_v11 = vcombine.low %v1396_v59, %v1404_v60  ;;  %v18059_v18 = vcombine.high %v1411_v3, %v1419_v5  ;;  %v18061_v19 = vcombine.high %v1412_v6, %v1420_v8 }
 0x1a1   :  { %v18060_v24 = vcombine.low %v1412_v6, %v1420_v8 }
 0x1a3   :  { %13335 = vmatpush1.bf16.msra.mxu0 %v17978_v26  ;;  %13663 = vmatpush1.bf16.msra.mxu1 %v17980_v28  ;;  %v18077_v26 = vcombine.high %v1428_v0, %v1436_v22  ;;  %v1443_v28 = vld [vmem:[#allocation10 + $0x1300] sm:$0xff] }
 0x1a4   :  { %13345 = vmatprep.subr.bf16.mxu0 %v17995_v29  ;;  %13673 = vmatprep.subr.bf16.mxu1 %v17997_v30  ;;  %v1451_v29 = vld [vmem:[#allocation10 + $0x1340] sm:$0xff]  ;;  %v1444_v30 = vld [vmem:[#allocation10 + $0x1308] sm:$0xff] }
 0x1a5   :  { %v18091_v36 = vcombine.high %v1443_v28, %v1451_v29  ;;  %v18093_v25 = vcombine.high %v1444_v30, %v1452_v32  ;;  %v18090_v43 = vcombine.low %v1443_v28, %v1451_v29  ;;  %v18092_v45 = vcombine.low %v1444_v30, %v1452_v32 }
 0x1a6   :  { %13337 = vmatmul.mubr.bf16.vlgmr.msra.gmra.mrb[16].mxu0 %v20702_v38  ;;  %13665 = vmatmul.mubr.bf16.vlgmr.msra.gmra.mrb[16].mxu1 %v20702_v38 }
 0x1a7   :  { %13346 = vmatpush1.bf16.msra.mxu0 %v17994_v48  ;;  %13674 = vmatpush1.bf16.msra.mxu1 %v17996_v40  ;;  %v1459_v48 = vld [vmem:[#allocation10 + $0x1380] sm:$0xff] }
 0x1a8   :  { %13347 = vmatprep.subr.bf16.mxu0 %v18011_v41  ;;  %13675 = vmatprep.subr.bf16.mxu1 %v18013_v42  ;;  %v1467_v40 = vld [vmem:[#allocation10 + $0x13c0] sm:$0xff]  ;;  %v1460_v41 = vld [vmem:[#allocation10 + $0x1388] sm:$0xff] }
 0x1a9   :  { %13377 = vmatprep.mubr.bf16.mxu0 %v20704_v51  ;;  %13705 = vmatprep.mubr.bf16.mxu1 %v20704_v51  ;;  %v1468_v42 = vld [vmem:[#allocation10 + $0x13c8] sm:$0xff]  ;;  %v18107_v49 = vcombine.high %v1459_v48, %v1467_v40  ;;  %v18106_v57 = vcombine.low %v1459_v48, %v1467_v40 }
 0x1aa   :  { %v18109_v50 = vcombine.high %v1460_v41, %v1468_v42  ;;  %v18108_v58 = vcombine.low %v1460_v41, %v1468_v42 }
 0x1ab   :  { %13348 = vmatpush1.bf16.msra.mxu0 %v18010_v52  ;;  %13676 = vmatpush1.bf16.msra.mxu1 %v18012_v53  ;;  %v1475_v52 = vld [vmem:[#allocation10 + $0x1400] sm:$0xff] }
 0x1ac   :  { %13349 = vmatprep.subr.bf16.mxu0 %v18027_v54  ;;  %13677 = vmatprep.subr.bf16.mxu1 %v18029_v55  ;;  %v1483_v53 = vld [vmem:[#allocation10 + $0x1440] sm:$0xff]  ;;  %v1476_v54 = vld [vmem:[#allocation10 + $0x1408] sm:$0xff] }
 0x1ad   :  { %v1484_v55 = vld [vmem:[#allocation10 + $0x1448] sm:$0xff]  ;;  %v18123_v59 = vcombine.high %v1475_v52, %v1483_v53  ;;  %v18122_v3 = vcombine.low %v1475_v52, %v1483_v53  ;;  %v20711_v52 = vsub.s32 4, %v20641_v13 }
 0x1ae   :  { %v18125_v60 = vcombine.high %v1476_v54, %v1484_v55  ;;  %v18124_v5 = vcombine.low %v1476_v54, %v1484_v55 }
 0x1af   :  { %13350 = vmatpush1.bf16.msra.mxu0 %v18026_v61  ;;  %13678 = vmatpush1.bf16.msra.mxu1 %v18028_v62  ;;  %v1491_v61 = vld [vmem:[#allocation10 + $0x1480] sm:$0xff] }
 0x1b0   :  { %13351 = vmatprep.subr.bf16.mxu0 %v18043_v1  ;;  %13679 = vmatprep.subr.bf16.mxu1 %v18045_v2  ;;  %v1499_v62 = vld [vmem:[#allocation10 + $0x14c0] sm:$0xff]  ;;  %v1492_v1 = vld [vmem:[#allocation10 + $0x1488] sm:$0xff] }
 0x1b1   :  { %v1500_v2 = vld [vmem:[#allocation10 + $0x14c8] sm:$0xff]  ;;  %v18139_v6 = vcombine.high %v1491_v61, %v1499_v62  ;;  %v18138_v20 = vcombine.low %v1491_v61, %v1499_v62  ;;  %v20714_v62 = vsub.s32 7, %v20641_v13 }
 0x1b2   :  { %v18141_v8 = vcombine.high %v1492_v1, %v1500_v2  ;;  %v18140_v21 = vcombine.low %v1492_v1, %v1500_v2  ;;  %v1580_v61 = vld [vmem:[#allocation10 + $0x1748] sm:$0xff]  ;;  %v184_v1 = vrot.slane %v20646_v15, %v20711_v52 }
 0x1b3   :  { %13352 = vmatpush1.bf16.msra.mxu0 %v18042_v9  ;;  %13680 = vmatpush1.bf16.msra.mxu1 %v18044_v11  ;;  %v1507_v9 = vld [vmem:[#allocation10 + $0x1500] sm:$0xff] }
 0x1b4   :  { %13353 = vmatprep.subr.bf16.mxu0 %v18059_v18  ;;  %13681 = vmatprep.subr.bf16.mxu1 %v18061_v19  ;;  %v1515_v11 = vld [vmem:[#allocation10 + $0x1540] sm:$0xff]  ;;  %v1508_v18 = vld [vmem:[#allocation10 + $0x1508] sm:$0xff] }
 0x1b5   :  { %v1516_v19 = vld [vmem:[#allocation10 + $0x1548] sm:$0xff]  ;;  %v18155_v0 = vcombine.high %v1507_v9, %v1515_v11  ;;  %v18154_v28 = vcombine.low %v1507_v9, %v1515_v11  ;;  %v1595_v9 = vld [vmem:[#allocation10 + $0x17c0] sm:$0xff] }
 0x1b6   :  { %v18157_v22 = vcombine.high %v1508_v18, %v1516_v19  ;;  %v18156_v29 = vcombine.low %v1508_v18, %v1516_v19  ;;  %v1588_v11 = vld [vmem:[#allocation10 + $0x1788] sm:$0xff]  ;;  %v196_v19 = vrot.slane %v20646_v15, %v20714_v62 }
 0x1b7   :  { %13354 = vmatpush1.bf16.msra.mxu0 %v18058_v23  ;;  %13682 = vmatpush1.bf16.msra.mxu1 %v18060_v24  ;;  %v1523_v23 = vld [vmem:[#allocation10 + $0x1580] sm:$0xff]  ;;  %v1596_v18 = vld [vmem:[#allocation10 + $0x17c8] sm:$0xff] }
 0x1b8   :  { %13355 = vmatprep.subr.bf16.mxu0 %v18075_v27  ;;  %13683 = vmatprep.subr.bf16.mxu1 %v18077_v26  ;;  %v1531_v24 = vld [vmem:[#allocation10 + $0x15c0] sm:$0xff]  ;;  %v1524_v27 = vld [vmem:[#allocation10 + $0x1588] sm:$0xff] }
 0x1b9   :  { %v1532_v26 = vld [vmem:[#allocation10 + $0x15c8] sm:$0xff]  ;;  %v18171_v30 = vcombine.high %v1523_v23, %v1531_v24  ;;  %v18170_v48 = vcombine.low %v1523_v23, %v1531_v24  ;;  %v18237_v23 = vcombine.high %v1588_v11, %v1596_v18  ;;  %v1603_v24 = vld [vmem:[#allocation10 + $0x1800] sm:$0xff] }
 0x1ba   :  { %v18173_v32 = vcombine.high %v1524_v27, %v1532_v26  ;;  %v18172_v40 = vcombine.low %v1524_v27, %v1532_v26  ;;  %v1611_v27 = vld [vmem:[#allocation10 + $0x1840] sm:$0xff]  ;;  %v1604_v26 = vld [vmem:[#allocation10 + $0x1808] sm:$0xff] }
 0x1bb   :  { %13356 = vmatpush1.bf16.msra.mxu0 %v18074_v33  ;;  %13684 = vmatpush1.bf16.msra.mxu1 %v18076_v35  ;;  %v1539_v33 = vld [vmem:[#allocation10 + $0x1600] sm:$0xff] }
 0x1bc   :  { %13357 = vmatprep.subr.bf16.mxu0 %v18091_v36  ;;  %13685 = vmatprep.subr.bf16.mxu1 %v18093_v25  ;;  %v1547_v35 = vld [vmem:[#allocation10 + $0x1640] sm:$0xff]  ;;  %v1540_v36 = vld [vmem:[#allocation10 + $0x1608] sm:$0xff] }
 0x1bd   :  { %v1548_v25 = vld [vmem:[#allocation10 + $0x1648] sm:$0xff]  ;;  %v18187_v41 = vcombine.high %v1539_v33, %v1547_v35  ;;  %v18186_v53 = vcombine.low %v1539_v33, %v1547_v35  ;;  %v1619_v35 = vld [vmem:[#allocation10 + $0x1880] sm:$0xff] }
 0x1be   :  { %v18189_v42 = vcombine.high %v1540_v36, %v1548_v25  ;;  %v18188_v54 = vcombine.low %v1540_v36, %v1548_v25  ;;  %v1627_v36 = vld [vmem:[#allocation10 + $0x18c0] sm:$0xff]  ;;  %v1620_v25 = vld [vmem:[#allocation10 + $0x1888] sm:$0xff] }
 0x1bf   :  { %13358 = vmatpush1.bf16.msra.mxu0 %v18090_v43  ;;  %13686 = vmatpush1.bf16.msra.mxu1 %v18092_v45  ;;  %v1555_v43 = vld [vmem:[#allocation10 + $0x1680] sm:$0xff] }
 0x1c0   :  { %13359 = vmatprep.subr.bf16.mxu0 %v18107_v49  ;;  %13687 = vmatprep.subr.bf16.mxu1 %v18109_v50  ;;  %v1563_v45 = vld [vmem:[#allocation10 + $0x16c0] sm:$0xff]  ;;  %v1556_v49 = vld [vmem:[#allocation10 + $0x1688] sm:$0xff] }
 0x1c1   :  { %v1564_v50 = vld [vmem:[#allocation10 + $0x16c8] sm:$0xff]  ;;  %v18203_v55 = vcombine.high %v1555_v43, %v1563_v45  ;;  %v18202_v2 = vcombine.low %v1555_v43, %v1563_v45  ;;  %v18267_v43 = vcombine.high %v1619_v35, %v1627_v36 }
 0x1c3   :  { %13360 = vmatpush1.bf16.msra.mxu0 %v18106_v57  ;;  %13688 = vmatpush1.bf16.msra.mxu1 %v18108_v58  ;;  %v18205_v57 = vcombine.high %v1556_v49, %v1564_v50  ;;  %v1571_v58 = vld [vmem:[#allocation10 + $0x1700] sm:$0xff] }
 0x1c4   :  { %13361 = vmatprep.subr.bf16.mxu0 %v18123_v59  ;;  %13689 = vmatprep.subr.bf16.mxu1 %v18125_v60  ;;  %v1579_v59 = vld [vmem:[#allocation10 + $0x1740] sm:$0xff]  ;;  %v1572_v60 = vld [vmem:[#allocation10 + $0x1708] sm:$0xff] }
 0x1c7   :  { %13362 = vmatpush1.bf16.msra.mxu0 %v18122_v3  ;;  %13690 = vmatpush1.bf16.msra.mxu1 %v18124_v5  ;;  %v18204_v3 = vcombine.low %v1556_v49, %v1564_v50  ;;  %v18219_v5 = vcombine.high %v1571_v58, %v1579_v59  ;;  %v1635_v49 = vld [vmem:[#allocation10 + $0x1900] sm:$0xff] }
 0x1c8   :  { %13363 = vmatprep.subr.bf16.mxu0 %v18139_v6  ;;  %13691 = vmatprep.subr.bf16.mxu1 %v18141_v8  ;;  %v18221_v6 = vcombine.high %v1572_v60, %v1580_v61  ;;  %v1587_v8 = vld [vmem:[#allocation10 + $0x1780] sm:$0xff] }
 0x1c9   :  { %v18234_v15 = vcombine.low %v1587_v8, %v1595_v9  ;;  %v1643_v50 = vld [vmem:[#allocation10 + $0x1940] sm:$0xff] }
 0x1cb   :  { %13364 = vmatpush1.bf16.msra.mxu0 %v18138_v20  ;;  %13692 = vmatpush1.bf16.msra.mxu1 %v18140_v21  ;;  %v526_v20 = vadd.f32 %v20670_v47, %v184_v1  ;;  %v18218_v21 = vcombine.low %v1571_v58, %v1579_v59  ;;  %v18251_v47 = vcombine.high %v1603_v24, %v1611_v27  ;;  %v1659_v1 = vld [vmem:[#allocation10 + $0x19c0] sm:$0xff] }
 0x1cc   :  { %13365 = vmatprep.subr.bf16.mxu0 %v18155_v0  ;;  %13693 = vmatprep.subr.bf16.mxu1 %v18157_v22  ;;  %v18220_v0 = vcombine.low %v1572_v60, %v1580_v61  ;;  %v18235_v22 = vcombine.high %v1587_v8, %v1595_v9  ;;  %v18283_v59 = vcombine.high %v1635_v49, %v1643_v50  ;;  %v1651_v61 = vld [vmem:[#allocation10 + $0x1980] sm:$0xff] }
 0x1cd   :  { %v18299_v8 = vcombine.high %v1651_v61, %v1659_v1 }
 0x1cf   :  { %13366 = vmatpush1.bf16.msra.mxu0 %v18154_v28  ;;  %13694 = vmatpush1.bf16.msra.mxu1 %v18156_v29  ;;  %v1612_v28 = vld [vmem:[#allocation10 + $0x1848] sm:$0xff]  ;;  %v569_v29 = vadd.f32 %v20699_v10, %v196_v19 }
 0x1d0   :  { %13367 = vmatprep.subr.bf16.mxu0 %v18171_v30  ;;  %13695 = vmatprep.subr.bf16.mxu1 %v18173_v32  ;;  %v741_v30 = vmax.f32 %v526_v20, 0.0  ;;  %v18236_v32 = vcombine.low %v1588_v11, %v1596_v18  ;;  %v18253_v33 = vcombine.high %v1604_v26, %v1612_v28  ;;  %v18252_v10 = vcombine.low %v1604_v26, %v1612_v28  ;;  %v1667_v11 = vld [vmem:[#allocation10 + $0x1a00] sm:$0xff]  ;;  %v1668_v19 = vld [vmem:[#allocation10 + $0x1a08] sm:$0xff] }
 0x1d1   :  { %v1675_v18 = vld [vmem:[#allocation10 + $0x1a40] sm:$0xff]  ;;  %v1676_v20 = vld [vmem:[#allocation10 + $0x1a48] sm:$0xff] }
 0x1d2   :  { %v1684_v26 = vld [vmem:[#allocation10 + $0x1a88] sm:$0xff] }
 0x1d3   :  { %13368 = vmatpush1.bf16.msra.mxu0 %v18170_v48  ;;  %13696 = vmatpush1.bf16.msra.mxu1 %v18172_v40  ;;  %v1628_v48 = vld [vmem:[#allocation10 + $0x18c8] sm:$0xff]  ;;  %v744_v40 = vmax.f32 %v569_v29, 0.0  ;;  %v18314_v29 = vcombine.low %v1667_v11, %v1675_v18 }
 0x1d4   :  { %13369 = vmatprep.subr.bf16.mxu0 %v18187_v41  ;;  %13697 = vmatprep.subr.bf16.mxu1 %v18189_v42  ;;  %v20722_v41 = vpack.c.bf16 %v741_v30, %v741_v30  ;;  %v18250_v42 = vcombine.low %v1603_v24, %v1611_v27  ;;  %v18269_v45 = vcombine.high %v1620_v25, %v1628_v48  ;;  %v1683_v24 = vld [vmem:[#allocation10 + $0x1a80] sm:$0xff]  ;;  %v1692_v28 = vld [vmem:[#allocation10 + $0x1ac8] sm:$0xff] }
 0x1d5   :  { %v18268_v58 = vcombine.low %v1620_v25, %v1628_v48  ;;  %v1691_v27 = vld [vmem:[#allocation10 + $0x1ac0] sm:$0xff]  ;;  %v18316_v30 = vcombine.low %v1668_v19, %v1676_v20  ;;  %v18332_v48 = vcombine.low %v1684_v26, %v1692_v28 }
 0x1d6   :  { %v18330_v25 = vcombine.low %v1683_v24, %v1691_v27 }
 0x1d7   :  { %13370 = vmatpush1.bf16.msra.mxu0 %v18186_v53  ;;  %13698 = vmatpush1.bf16.msra.mxu1 %v18188_v54  ;;  %v1636_v53 = vld [vmem:[#allocation10 + $0x1908] sm:$0xff] }
 0x1d8   :  { %13371 = vmatprep.subr.bf16.mxu0 %v18203_v55  ;;  %13699 = vmatprep.subr.bf16.mxu1 %v18205_v57  ;;  %v1644_v54 = vld [vmem:[#allocation10 + $0x1948] sm:$0xff]  ;;  %v20724_v55 = vpack.c.bf16 %v744_v40, %v744_v40  ;;  %v18266_v57 = vcombine.low %v1619_v35, %v1627_v36 }
 0x1d9   :  { %v18285_v60 = vcombine.high %v1636_v53, %v1644_v54  ;;  %v1700_v35 = vld [vmem:[#allocation10 + $0x1b08] sm:$0xff] }
 0x1da   :  { %v1708_v36 = vld [vmem:[#allocation10 + $0x1b48] sm:$0xff] }
 0x1db   :  { %13372 = vmatpush1.bf16.msra.mxu0 %v18202_v2  ;;  %13700 = vmatpush1.bf16.msra.mxu1 %v18204_v3  ;;  %v1652_v2 = vld [vmem:[#allocation10 + $0x1988] sm:$0xff] }
 0x1dc   :  { %13373 = vmatprep.subr.bf16.mxu0 %v18219_v5  ;;  %13701 = vmatprep.subr.bf16.mxu1 %v18221_v6  ;;  %v1660_v3 = vld [vmem:[#allocation10 + $0x19c8] sm:$0xff]  ;;  %v18282_v5 = vcombine.low %v1635_v49, %v1643_v50  ;;  %v18284_v6 = vcombine.low %v1636_v53, %v1644_v54  ;;  %v18348_v53 = vcombine.low %v1700_v35, %v1708_v36 }
 0x1dd   :  { %v18301_v9 = vcombine.high %v1652_v2, %v1660_v3  ;;  %v1724_v49 = vld [vmem:[#allocation10 + $0x1bc8] sm:$0xff] }
 0x1df   :  { %13374 = vmatpush1.bf16.msra.mxu0 %v18218_v21  ;;  %13702 = vmatpush1.bf16.msra.mxu1 %v18220_v0  ;;  %v18298_v21 = vcombine.low %v1651_v61, %v1659_v1  ;;  %v18300_v0 = vcombine.low %v1652_v2, %v1660_v3  ;;  %v1740_v61 = vld [vmem:[#allocation10 + $0x1c48] sm:$0xff] }
 0x1e0   :  { %13375 = vmatprep.subr.bf16.mxu0 %v18235_v22  ;;  %13703 = vmatprep.subr.bf16.mxu1 %v18237_v23  ;;  %v18315_v22 = vcombine.high %v1667_v11, %v1675_v18  ;;  %v18317_v23 = vcombine.high %v1668_v19, %v1676_v20  ;;  %v1756_v11 = vld [vmem:[#allocation10 + $0x1cc8] sm:$0xff] }
 0x1e3   :  { %13376 = vmatpush1.bf16.msra.mxu0 %v18234_v15  ;;  %13704 = vmatpush1.bf16.msra.mxu1 %v18236_v32  ;;  %v18331_v15 = vcombine.high %v1683_v24, %v1691_v27  ;;  %v18333_v32 = vcombine.high %v1684_v26, %v1692_v28  ;;  %v1772_v24 = vld [vmem:[#allocation10 + $0x1d48] sm:$0xff] }
 0x1e4   :  { %13386 = vmatprep.subr.bf16.mxu0 %v18251_v47  ;;  %13714 = vmatprep.subr.bf16.mxu1 %v18253_v33  ;;  %v1699_v47 = vld [vmem:[#allocation10 + $0x1b00] sm:$0xff] }
 0x1e5   :  { %v1707_v33 = vld [vmem:[#allocation10 + $0x1b40] sm:$0xff] }
 0x1e6   :  { %13378 = vmatmul.mubr.bf16.vlgmr.msra.gmra.mrb[16].mxu0 %v20722_v41  ;;  %13706 = vmatmul.mubr.bf16.vlgmr.msra.gmra.mrb[16].mxu1 %v20722_v41  ;;  %v18347_v40 = vcombine.high %v1699_v47, %v1707_v33  ;;  %v18346_v50 = vcombine.low %v1699_v47, %v1707_v33  ;;  %v1788_v47 = vld [vmem:[#allocation10 + $0x1dc8] sm:$0xff] }
 0x1e7   :  { %13387 = vmatpush1.bf16.msra.mxu0 %v18250_v42  ;;  %13715 = vmatpush1.bf16.msra.mxu1 %v18252_v10  ;;  %v18349_v42 = vcombine.high %v1700_v35, %v1708_v36  ;;  %v1715_v10 = vld [vmem:[#allocation10 + $0x1b80] sm:$0xff] }
 0x1e8   :  { %13388 = vmatprep.subr.bf16.mxu0 %v18267_v43  ;;  %13716 = vmatprep.subr.bf16.mxu1 %v18269_v45  ;;  %v1723_v43 = vld [vmem:[#allocation10 + $0x1bc0] sm:$0xff]  ;;  %v1716_v45 = vld [vmem:[#allocation10 + $0x1b88] sm:$0xff] }
 0x1e9   :  { %13418 = vmatprep.mubr.bf16.mxu0 %v20724_v55  ;;  %13746 = vmatprep.mubr.bf16.mxu1 %v20724_v55  ;;  %v18363_v54 = vcombine.high %v1715_v10, %v1723_v43  ;;  %v18362_v1 = vcombine.low %v1715_v10, %v1723_v43  ;;  %v18364_v2 = vcombine.low %v1716_v45, %v1724_v49  ;;  %v1804_v10 = vld [vmem:[#allocation10 + $0x1e48] sm:$0xff] }
 0x1eb   :  { %13389 = vmatpush1.bf16.msra.mxu0 %v18266_v57  ;;  %13717 = vmatpush1.bf16.msra.mxu1 %v18268_v58  ;;  %v18365_v57 = vcombine.high %v1716_v45, %v1724_v49  ;;  %v1731_v58 = vld [vmem:[#allocation10 + $0x1c00] sm:$0xff] }
 0x1ec   :  { %13390 = vmatprep.subr.bf16.mxu0 %v18283_v59  ;;  %13718 = vmatprep.subr.bf16.mxu1 %v18285_v60  ;;  %v1739_v59 = vld [vmem:[#allocation10 + $0x1c40] sm:$0xff]  ;;  %v1732_v60 = vld [vmem:[#allocation10 + $0x1c08] sm:$0xff] }
 0x1ed   :  { %v18379_v3 = vcombine.high %v1731_v58, %v1739_v59  ;;  %v18378_v18 = vcombine.low %v1731_v58, %v1739_v59  ;;  %v18380_v19 = vcombine.low %v1732_v60, %v1740_v61  ;;  %v1820_v58 = vld [vmem:[#allocation10 + $0x1ec8] sm:$0xff]  ;;  %v20731_v59 = vsub.s32 6, %v20641_v13 }
 0x1ef   :  { %13391 = vmatpush1.bf16.msra.mxu0 %v18282_v5  ;;  %13719 = vmatpush1.bf16.msra.mxu1 %v18284_v6  ;;  %v18381_v5 = vcombine.high %v1732_v60, %v1740_v61  ;;  %v1747_v6 = vld [vmem:[#allocation10 + $0x1c80] sm:$0xff] }
 0x1f0   :  { %13392 = vmatprep.subr.bf16.mxu0 %v18299_v8  ;;  %13720 = vmatprep.subr.bf16.mxu1 %v18301_v9  ;;  %v1755_v8 = vld [vmem:[#allocation10 + $0x1cc0] sm:$0xff]  ;;  %v1748_v9 = vld [vmem:[#allocation10 + $0x1c88] sm:$0xff] }
 0x1f1   :  { %v18395_v20 = vcombine.high %v1747_v6, %v1755_v8  ;;  %v18394_v27 = vcombine.low %v1747_v6, %v1755_v8  ;;  %v18396_v26 = vcombine.low %v1748_v9, %v1756_v11  ;;  %v1828_v6 = vld [vmem:[#allocation10 + $0x1f08] sm:$0xff] }
 0x1f2   :  { %v1836_v8 = vld [vmem:[#allocation10 + $0x1f48] sm:$0xff] }
 0x1f3   :  { %13393 = vmatpush1.bf16.msra.mxu0 %v18298_v21  ;;  %13721 = vmatpush1.bf16.msra.mxu1 %v18300_v0  ;;  %v18397_v21 = vcombine.high %v1748_v9, %v1756_v11  ;;  %v1763_v0 = vld [vmem:[#allocation10 + $0x1d00] sm:$0xff]  ;;  %v20733_v9 = vld [vmem:[#allocation9 + $0x8] sm:$0xff]  ;;  %v20271_v11 = vld [vmem:[#allocation9] sm:$0xff] }
 0x1f4   :  { %13394 = vmatprep.subr.bf16.mxu0 %v18315_v22  ;;  %13722 = vmatprep.subr.bf16.mxu1 %v18317_v23  ;;  %v1771_v22 = vld [vmem:[#allocation10 + $0x1d40] sm:$0xff]  ;;  %v1764_v23 = vld [vmem:[#allocation10 + $0x1d08] sm:$0xff] }
 0x1f5   :  { %v18411_v28 = vcombine.high %v1763_v0, %v1771_v22  ;;  %v18410_v33 = vcombine.low %v1763_v0, %v1771_v22  ;;  %v18412_v35 = vcombine.low %v1764_v23, %v1772_v24  ;;  %v18477_v0 = vcombine.high %v1828_v6, %v1836_v8  ;;  %v1843_v22 = vld [vmem:[#allocation10 + $0x1f80] sm:$0xff] }
 0x1f7   :  { %13395 = vmatpush1.bf16.msra.mxu0 %v18314_v29  ;;  %13723 = vmatpush1.bf16.msra.mxu1 %v18316_v30  ;;  %v18413_v29 = vcombine.high %v1764_v23, %v1772_v24  ;;  %v1779_v30 = vld [vmem:[#allocation10 + $0x1d80] sm:$0xff]  ;;  %v204_v23 = vrot.slane %v20733_v9, %v20649_v16 }
 0x1f8   :  { %13396 = vmatprep.subr.bf16.mxu0 %v18331_v15  ;;  %13724 = vmatprep.subr.bf16.mxu1 %v18333_v32  ;;  %v1787_v15 = vld [vmem:[#allocation10 + $0x1dc0] sm:$0xff]  ;;  %v1780_v32 = vld [vmem:[#allocation10 + $0x1d88] sm:$0xff] }
 0x1f9   :  { %v18427_v36 = vcombine.high %v1779_v30, %v1787_v15  ;;  %v18426_v43 = vcombine.low %v1779_v30, %v1787_v15  ;;  %v18428_v45 = vcombine.low %v1780_v32, %v1788_v47  ;;  %v1851_v24 = vld [vmem:[#allocation10 + $0x1fc0] sm:$0xff]  ;;  %v18476_v15 = vcombine.low %v1828_v6, %v1836_v8 }
 0x1fa   :  { %v1891_v6 = vld [vmem:[#allocation10 + $0x2100] sm:$0xff] }
 0x1fb   :  { %13397 = vmatpush1.bf16.msra.mxu0 %v18330_v25  ;;  %13725 = vmatpush1.bf16.msra.mxu1 %v18332_v48  ;;  %v18429_v25 = vcombine.high %v1780_v32, %v1788_v47  ;;  %v1795_v48 = vld [vmem:[#allocation10 + $0x1e00] sm:$0xff]  ;;  %v18491_v32 = vcombine.high %v1843_v22, %v1851_v24 }
 0x1fc   :  { %13398 = vmatprep.subr.bf16.mxu0 %v18347_v40  ;;  %13726 = vmatprep.subr.bf16.mxu1 %v18349_v42  ;;  %v1803_v40 = vld [vmem:[#allocation10 + $0x1e40] sm:$0xff]  ;;  %v1796_v42 = vld [vmem:[#allocation10 + $0x1e08] sm:$0xff] }
 0x1fd   :  { %v18443_v49 = vcombine.high %v1795_v48, %v1803_v40  ;;  %v18442_v60 = vcombine.low %v1795_v48, %v1803_v40  ;;  %v18444_v61 = vcombine.low %v1796_v42, %v1804_v10  ;;  %v1860_v48 = vld [vmem:[#allocation10 + $0x2008] sm:$0xff]  ;;  %v1899_v8 = vld [vmem:[#allocation10 + $0x2140] sm:$0xff] }
 0x1fe   :  { %v1868_v40 = vld [vmem:[#allocation10 + $0x2048] sm:$0xff] }
 0x1ff   :  { %13399 = vmatpush1.bf16.msra.mxu0 %v18346_v50  ;;  %13727 = vmatpush1.bf16.msra.mxu1 %v18348_v53  ;;  %v18445_v50 = vcombine.high %v1796_v42, %v1804_v10  ;;  %v1811_v53 = vld [vmem:[#allocation10 + $0x1e80] sm:$0xff] }
 0x200   :  { %13400 = vmatprep.subr.bf16.mxu0 %v18363_v54  ;;  %13728 = vmatprep.subr.bf16.mxu1 %v18365_v57  ;;  %v1819_v54 = vld [vmem:[#allocation10 + $0x1ec0] sm:$0xff]  ;;  %v1812_v57 = vld [vmem:[#allocation10 + $0x1e88] sm:$0xff] }
 0x203   :  { %13401 = vmatpush1.bf16.msra.mxu0 %v18362_v1  ;;  %13729 = vmatpush1.bf16.msra.mxu1 %v18364_v2  ;;  %v18459_v1 = vcombine.high %v1811_v53, %v1819_v54  ;;  %v18461_v2 = vcombine.high %v1812_v57, %v1820_v58 }
 0x204   :  { %13402 = vmatprep.subr.bf16.mxu0 %v18379_v3  ;;  %13730 = vmatprep.subr.bf16.mxu1 %v18381_v5  ;;  %v1827_v3 = vld [vmem:[#allocation10 + $0x1f00] sm:$0xff] }
 0x205   :  { %v1835_v5 = vld [vmem:[#allocation10 + $0x1f40] sm:$0xff] }
 0x206   :  { %v18474_v30 = vcombine.low %v1827_v3, %v1835_v5 }
 0x207   :  { %13403 = vmatpush1.bf16.msra.mxu0 %v18378_v18  ;;  %13731 = vmatpush1.bf16.msra.mxu1 %v18380_v19  ;;  %v192_v18 = vrot.slane %v20271_v11, %v20731_v59  ;;  %v18458_v19 = vcombine.low %v1811_v53, %v1819_v54  ;;  %v1875_v54 = vld [vmem:[#allocation10 + $0x2080] sm:$0xff]  ;;  %v1892_v11 = vld [vmem:[#allocation10 + $0x2108] sm:$0xff] }
 0x208   :  { %13404 = vmatprep.subr.bf16.mxu0 %v18395_v20  ;;  %13732 = vmatprep.subr.bf16.mxu1 %v18397_v21  ;;  %v18460_v20 = vcombine.low %v1812_v57, %v1820_v58  ;;  %v18475_v21 = vcombine.high %v1827_v3, %v1835_v5  ;;  %v1883_v58 = vld [vmem:[#allocation10 + $0x20c0] sm:$0xff] }
 0x209   :  { %v18523_v3 = vcombine.high %v1875_v54, %v1883_v58 }
 0x20b   :  { %13405 = vmatpush1.bf16.msra.mxu0 %v18394_v27  ;;  %13733 = vmatpush1.bf16.msra.mxu1 %v18396_v26  ;;  %v1844_v27 = vld [vmem:[#allocation10 + $0x1f88] sm:$0xff] }
 0x20c   :  { %13406 = vmatprep.subr.bf16.mxu0 %v18411_v28  ;;  %13734 = vmatprep.subr.bf16.mxu1 %v18413_v29  ;;  %v1852_v26 = vld [vmem:[#allocation10 + $0x1fc8] sm:$0xff]  ;;  %v20738_v28 = vpop.f32.mrb[8].mxu1  ;;  %v567_v29 = vadd.f32 %v20694_v63, %v192_v18  ;;  %v18490_v63 = vcombine.low %v1843_v22, %v1851_v24  ;;  %v1907_v22 = vld [vmem:[#allocation10 + $0x2180] sm:$0xff] }
 0x20d   :  { %v18493_v47 = vcombine.high %v1844_v27, %v1852_v26  ;;  %v1900_v18 = vld [vmem:[#allocation10 + $0x2148] sm:$0xff] }
 0x20e   :  { %v743_v10 = vmax.f32 %v567_v29, 0.0  ;;  %v1908_v24 = vld [vmem:[#allocation10 + $0x2188] sm:$0xff]  ;;  %v18540_v29 = vcombine.low %v1892_v11, %v1900_v18 }
 0x20f   :  { %13407 = vmatpush1.bf16.msra.mxu0 %v18410_v33  ;;  %13735 = vmatpush1.bf16.msra.mxu1 %v18412_v35  ;;  %v1859_v33 = vld [vmem:[#allocation10 + $0x2000] sm:$0xff]  ;;  %v20741_v35 = vpop.f32.mrb[9].mxu1 }
 0x210   :  { %13408 = vmatprep.subr.bf16.mxu0 %v18427_v36  ;;  %13736 = vmatprep.subr.bf16.mxu1 %v18429_v25  ;;  %v610_v36 = vadd.f32 %v20680_v7, %v204_v23  ;;  %v1867_v25 = vld [vmem:[#allocation10 + $0x2040] sm:$0xff]  ;;  %v652_v42 = vpop.f32.mrb[10].mxu1  ;;  %v20744_v57 = vpack.c.bf16 %v743_v10, %v743_v10  ;;  %v1876_v7 = vld [vmem:[#allocation10 + $0x2088] sm:$0xff] }
 0x211   :  { %v1915_v23 = vld [vmem:[#allocation10 + $0x21c0] sm:$0xff] }
 0x212   :  { %v746_v53 = vmax.f32 %v610_v36, 0.0  ;;  %v1932_v36 = vld [vmem:[#allocation10 + $0x2248] sm:$0xff]  ;;  %v1939_v10 = vld [vmem:[#allocation10 + $0x2280] sm:$0xff] }
 0x213   :  { %13409 = vmatpush1.bf16.msra.mxu0 %v18426_v43  ;;  %13737 = vmatpush1.bf16.msra.mxu1 %v18428_v45  ;;  %v653_v43 = vpop.f32.mrb[11].mxu1  ;;  %v18492_v45 = vcombine.low %v1844_v27, %v1852_v26  ;;  %v1916_v27 = vld [vmem:[#allocation10 + $0x21c8] sm:$0xff]  ;;  %v18538_v26 = vcombine.low %v1891_v6, %v1899_v8 }
 0x214   :  { %13410 = vmatprep.subr.bf16.mxu0 %v18443_v49  ;;  %13738 = vmatprep.subr.bf16.mxu1 %v18445_v50  ;;  %v18507_v49 = vcombine.high %v1859_v33, %v1867_v25  ;;  %v18509_v50 = vcombine.high %v1860_v48, %v1868_v40  ;;  %v1947_v43 = vld [vmem:[#allocation10 + $0x22c0] sm:$0xff] }
 0x217   :  { %13411 = vmatpush1.bf16.msra.mxu0 %v18442_v60  ;;  %13739 = vmatpush1.bf16.msra.mxu1 %v18444_v61  ;;  %v1884_v60 = vld [vmem:[#allocation10 + $0x20c8] sm:$0xff]  ;;  %v18506_v61 = vcombine.low %v1859_v33, %v1867_v25  ;;  %v18554_v25 = vcombine.low %v1907_v22, %v1915_v23 }
 0x218   :  { %13412 = vmatprep.subr.bf16.mxu0 %v18459_v1  ;;  %13740 = vmatprep.subr.bf16.mxu1 %v18461_v2  ;;  %v18508_v1 = vcombine.low %v1860_v48, %v1868_v40  ;;  %v20746_v2 = vpack.c.bf16 %v746_v53, %v746_v53  ;;  %v18525_v5 = vcombine.high %v1876_v7, %v1884_v60  ;;  %v1924_v33 = vld [vmem:[#allocation10 + $0x2208] sm:$0xff] }
 0x219   :  { %v18556_v48 = vcombine.low %v1908_v24, %v1916_v27  ;;  %v18573_v42 = vcombine.high %v1924_v33, %v1932_v36  ;;  %v18587_v53 = vcombine.high %v1939_v10, %v1947_v43 }
 0x21b   :  { %13413 = vmatpush1.bf16.msra.mxu0 %v18458_v19  ;;  %13741 = vmatpush1.bf16.msra.mxu1 %v18460_v20  ;;  %v18522_v19 = vcombine.low %v1875_v54, %v1883_v58  ;;  %v18524_v20 = vcombine.low %v1876_v7, %v1884_v60  ;;  %v1955_v58 = vld [vmem:[#allocation10 + $0x2300] sm:$0xff]  ;;  %v1956_v60 = vld [vmem:[#allocation10 + $0x2308] sm:$0xff] }
 0x21c   :  { %13414 = vmatprep.subr.bf16.mxu0 %v18475_v21  ;;  %13742 = vmatprep.subr.bf16.mxu1 %v18477_v0  ;;  %v18539_v21 = vcombine.high %v1891_v6, %v1899_v8  ;;  %v18541_v0 = vcombine.high %v1892_v11, %v1900_v18  ;;  %v1963_v7 = vld [vmem:[#allocation10 + $0x2340] sm:$0xff]  ;;  %v1972_v18 = vld [vmem:[#allocation10 + $0x2388] sm:$0xff] }
 0x21d   :  { %v1971_v8 = vld [vmem:[#allocation10 + $0x2380] sm:$0xff] }
 0x21e   :  { %v1979_v11 = vld [vmem:[#allocation10 + $0x23c0] sm:$0xff] }
 0x21f   :  { %13415 = vmatpush1.bf16.msra.mxu0 %v18474_v30  ;;  %13743 = vmatpush1.bf16.msra.mxu1 %v18476_v15  ;;  %v18555_v30 = vcombine.high %v1907_v22, %v1915_v23  ;;  %v18557_v15 = vcombine.high %v1908_v24, %v1916_v27  ;;  %v1987_v23 = vld [vmem:[#allocation10 + $0x2400] sm:$0xff]  ;;  %v1988_v27 = vld [vmem:[#allocation10 + $0x2408] sm:$0xff] }
 0x220   :  { %13416 = vmatprep.subr.bf16.mxu0 %v18491_v32  ;;  %13744 = vmatprep.subr.bf16.mxu1 %v18493_v47  ;;  %v1923_v32 = vld [vmem:[#allocation10 + $0x2200] sm:$0xff] }
 0x221   :  { %v1931_v47 = vld [vmem:[#allocation10 + $0x2240] sm:$0xff] }
 0x222   :  { %v18571_v40 = vcombine.high %v1923_v32, %v1931_v47  ;;  %v1995_v24 = vld [vmem:[#allocation10 + $0x2440] sm:$0xff] }
 0x223   :  { %13417 = vmatpush1.bf16.msra.mxu0 %v18490_v63  ;;  %13745 = vmatpush1.bf16.msra.mxu1 %v18492_v45  ;;  %v1940_v63 = vld [vmem:[#allocation10 + $0x2288] sm:$0xff] }
 0x224   :  { %13427 = vmatprep.subr.bf16.mxu0 %v18507_v49  ;;  %13755 = vmatprep.subr.bf16.mxu1 %v18509_v50  ;;  %v1948_v45 = vld [vmem:[#allocation10 + $0x22c8] sm:$0xff]  ;;  %v18570_v49 = vcombine.low %v1923_v32, %v1931_v47  ;;  %v18572_v50 = vcombine.low %v1924_v33, %v1932_v36  ;;  %v2003_v47 = vld [vmem:[#allocation10 + $0x2480] sm:$0xff] }
 0x225   :  { %v18589_v54 = vcombine.high %v1940_v63, %v1948_v45  ;;  %v2011_v33 = vld [vmem:[#allocation10 + $0x24c0] sm:$0xff]  ;;  %v2004_v36 = vld [vmem:[#allocation10 + $0x2488] sm:$0xff] }
 0x226   :  { %13419 = vmatmul.mubr.bf16.vlgmr.msra.gmra.mrb[16].mxu0 %v20744_v57  ;;  %13747 = vmatmul.mubr.bf16.vlgmr.msra.gmra.mrb[16].mxu1 %v20744_v57 }
 0x227   :  { %13428 = vmatpush1.bf16.msra.mxu0 %v18506_v61  ;;  %13459 = vmatprep.mubr.bf16.mxu0 %v20746_v2  ;;  %v1964_v61 = vld [vmem:[#allocation10 + $0x2348] sm:$0xff] }
 0x228   :  { %13756 = vmatpush1.bf16.msra.mxu1 %v18508_v1  ;;  %13787 = vmatprep.mubr.bf16.mxu1 %v20746_v2  ;;  %v18586_v1 = vcombine.low %v1939_v10, %v1947_v43  ;;  %v18605_v6 = vcombine.high %v1956_v60, %v1964_v61  ;;  %v2019_v43 = vld [vmem:[#allocation10 + $0x2500] sm:$0xff] }
 0x229   :  { %13429 = vmatprep.subr.bf16.mxu0 %v18523_v3  ;;  %13757 = vmatprep.subr.bf16.mxu1 %v18525_v5  ;;  %v18588_v3 = vcombine.low %v1940_v63, %v1948_v45  ;;  %v18603_v5 = vcombine.high %v1955_v58, %v1963_v7  ;;  %v2027_v63 = vld [vmem:[#allocation10 + $0x2540] sm:$0xff]  ;;  %v2020_v45 = vld [vmem:[#allocation10 + $0x2508] sm:$0xff] }
 0x22b   :  { %13430 = vmatpush1.bf16.msra.mxu0 %v18522_v19  ;;  %v1980_v19 = vld [vmem:[#allocation10 + $0x23c8] sm:$0xff] }
 0x22c   :  { %13758 = vmatpush1.bf16.msra.mxu1 %v18524_v20  ;;  %13431 = vmatprep.subr.bf16.mxu0 %v18539_v21  ;;  %v18602_v20 = vcombine.low %v1955_v58, %v1963_v7  ;;  %v18604_v21 = vcombine.low %v1956_v60, %v1964_v61  ;;  %v18621_v22 = vcombine.high %v1972_v18, %v1980_v19  ;;  %v2035_v7 = vld [vmem:[#allocation10 + $0x2580] sm:$0xff]  ;;  %v2036_v61 = vld [vmem:[#allocation10 + $0x2588] sm:$0xff] }
 0x22d   :  { %13759 = vmatprep.subr.bf16.mxu1 %v18541_v0  ;;  %v18619_v0 = vcombine.high %v1971_v8, %v1979_v11  ;;  %v2043_v60 = vld [vmem:[#allocation10 + $0x25c0] sm:$0xff] }
 0x22f   :  { %13432 = vmatpush1.bf16.msra.mxu0 %v18538_v26  ;;  %v1996_v26 = vld [vmem:[#allocation10 + $0x2448] sm:$0xff] }
 0x230   :  { %13760 = vmatpush1.bf16.msra.mxu1 %v18540_v29  ;;  %13433 = vmatprep.subr.bf16.mxu0 %v18555_v30  ;;  %v18618_v29 = vcombine.low %v1971_v8, %v1979_v11  ;;  %v18620_v30 = vcombine.low %v1972_v18, %v1980_v19  ;;  %v18637_v32 = vcombine.high %v1988_v27, %v1996_v26  ;;  %v2051_v11 = vld [vmem:[#allocation10 + $0x2600] sm:$0xff]  ;;  %v2052_v19 = vld [vmem:[#allocation10 + $0x2608] sm:$0xff] }
 0x231   :  { %13761 = vmatprep.subr.bf16.mxu1 %v18557_v15  ;;  %v18635_v15 = vcombine.high %v1987_v23, %v1995_v24  ;;  %v2059_v18 = vld [vmem:[#allocation10 + $0x2640] sm:$0xff] }
 0x233   :  { %13434 = vmatpush1.bf16.msra.mxu0 %v18554_v25  ;;  %v2012_v25 = vld [vmem:[#allocation10 + $0x24c8] sm:$0xff] }
 0x234   :  { %13762 = vmatpush1.bf16.msra.mxu1 %v18556_v48  ;;  %13435 = vmatprep.subr.bf16.mxu0 %v18571_v40  ;;  %v18634_v48 = vcombine.low %v1987_v23, %v1995_v24  ;;  %v18636_v40 = vcombine.low %v1988_v27, %v1996_v26  ;;  %v18653_v10 = vcombine.high %v2004_v36, %v2012_v25  ;;  %v2067_v24 = vld [vmem:[#allocation10 + $0x2680] sm:$0xff]  ;;  %v2068_v26 = vld [vmem:[#allocation10 + $0x2688] sm:$0xff] }
 0x235   :  { %13763 = vmatprep.subr.bf16.mxu1 %v18573_v42  ;;  %v18651_v42 = vcombine.high %v2003_v47, %v2011_v33  ;;  %v2075_v27 = vld [vmem:[#allocation10 + $0x26c0] sm:$0xff] }
 0x237   :  { %13436 = vmatpush1.bf16.msra.mxu0 %v18570_v49  ;;  %v2028_v49 = vld [vmem:[#allocation10 + $0x2548] sm:$0xff] }
 0x238   :  { %13764 = vmatpush1.bf16.msra.mxu1 %v18572_v50  ;;  %13437 = vmatprep.subr.bf16.mxu0 %v18587_v53  ;;  %v18650_v50 = vcombine.low %v2003_v47, %v2011_v33  ;;  %v18652_v53 = vcombine.low %v2004_v36, %v2012_v25  ;;  %v18669_v58 = vcombine.high %v2020_v45, %v2028_v49  ;;  %v2083_v33 = vld [vmem:[#allocation10 + $0x2700] sm:$0xff]  ;;  %v2084_v25 = vld [vmem:[#allocation10 + $0x2708] sm:$0xff] }
 0x239   :  { %13765 = vmatprep.subr.bf16.mxu1 %v18589_v54  ;;  %v18667_v54 = vcombine.high %v2019_v43, %v2027_v63  ;;  %v2091_v36 = vld [vmem:[#allocation10 + $0x2740] sm:$0xff] }
 0x23b   :  { %13438 = vmatpush1.bf16.msra.mxu0 %v18586_v1  ;;  %v2044_v1 = vld [vmem:[#allocation10 + $0x25c8] sm:$0xff] }
 0x23c   :  { %13766 = vmatpush1.bf16.msra.mxu1 %v18588_v3  ;;  %13439 = vmatprep.subr.bf16.mxu0 %v18603_v5  ;;  %v18666_v3 = vcombine.low %v2019_v43, %v2027_v63  ;;  %v18668_v5 = vcombine.low %v2020_v45, %v2028_v49  ;;  %v18685_v8 = vcombine.high %v2036_v61, %v2044_v1  ;;  %v2099_v45 = vld [vmem:[#allocation10 + $0x2780] sm:$0xff] }
 0x23d   :  { %13767 = vmatprep.subr.bf16.mxu1 %v18605_v6  ;;  %v18683_v6 = vcombine.high %v2035_v7, %v2043_v60  ;;  %v18731_v43 = vcombine.high %v2083_v33, %v2091_v36  ;;  %v2107_v49 = vld [vmem:[#allocation10 + $0x27c0] sm:$0xff] }
 0x23f   :  { %13440 = vmatpush1.bf16.msra.mxu0 %v18602_v20  ;;  %v2060_v20 = vld [vmem:[#allocation10 + $0x2648] sm:$0xff] }
 0x240   :  { %13768 = vmatpush1.bf16.msra.mxu1 %v18604_v21  ;;  %13441 = vmatprep.subr.bf16.mxu0 %v18619_v0  ;;  %v18682_v21 = vcombine.low %v2035_v7, %v2043_v60  ;;  %v18684_v0 = vcombine.low %v2036_v61, %v2044_v1  ;;  %v18701_v23 = vcombine.high %v2052_v19, %v2060_v20 }
 0x241   :  { %13769 = vmatprep.subr.bf16.mxu1 %v18621_v22  ;;  %v18699_v22 = vcombine.high %v2051_v11, %v2059_v18  ;;  %v18747_v61 = vcombine.high %v2099_v45, %v2107_v49 }
 0x243   :  { %13442 = vmatpush1.bf16.msra.mxu0 %v18618_v29  ;;  %v2076_v29 = vld [vmem:[#allocation10 + $0x26c8] sm:$0xff] }
 0x244   :  { %13770 = vmatpush1.bf16.msra.mxu1 %v18620_v30  ;;  %13443 = vmatprep.subr.bf16.mxu0 %v18635_v15  ;;  %v18698_v30 = vcombine.low %v2051_v11, %v2059_v18  ;;  %v18700_v15 = vcombine.low %v2052_v19, %v2060_v20  ;;  %v18717_v47 = vcombine.high %v2068_v26, %v2076_v29  ;;  %v2124_v11 = vld [vmem:[#allocation10 + $0x2848] sm:$0xff] }
 0x245   :  { %13771 = vmatprep.subr.bf16.mxu1 %v18637_v32  ;;  %v18715_v32 = vcombine.high %v2067_v24, %v2075_v27  ;;  %v18746_v18 = vcombine.low %v2099_v45, %v2107_v49  ;;  %v2164_v45 = vld [vmem:[#allocation10 + $0x2988] sm:$0xff] }
 0x246   :  { %v2172_v49 = vld [vmem:[#allocation10 + $0x29c8] sm:$0xff] }
 0x247   :  { %13444 = vmatpush1.bf16.msra.mxu0 %v18634_v48  ;;  %v2092_v48 = vld [vmem:[#allocation10 + $0x2748] sm:$0xff] }
 0x248   :  { %13772 = vmatpush1.bf16.msra.mxu1 %v18636_v40  ;;  %13445 = vmatprep.subr.bf16.mxu0 %v18651_v42  ;;  %v18714_v40 = vcombine.low %v2067_v24, %v2075_v27  ;;  %v200_v42 = vrot.slane %v20733_v9, %v20644_v14  ;;  %v18733_v63 = vcombine.high %v2084_v25, %v2092_v48  ;;  %v2132_v24 = vld [vmem:[#allocation10 + $0x2888] sm:$0xff] }
 0x249   :  { %13773 = vmatprep.subr.bf16.mxu1 %v18653_v10  ;;  %v18716_v10 = vcombine.low %v2068_v26, %v2076_v29  ;;  %v18732_v60 = vcombine.low %v2084_v25, %v2092_v48  ;;  %v2140_v27 = vld [vmem:[#allocation10 + $0x28c8] sm:$0xff] }
 0x24a   :  { %v608_v7 = vadd.f32 %v20678_v4, %v200_v42  ;;  %v2156_v25 = vld [vmem:[#allocation10 + $0x2948] sm:$0xff] }
 0x24b   :  { %13446 = vmatpush1.bf16.msra.mxu0 %v18650_v50  ;;  %v212_v50 = vrot.slane %v20733_v9, %v20652_v17 }
 0x24c   :  { %13774 = vmatpush1.bf16.msra.mxu1 %v18652_v53  ;;  %13447 = vmatprep.subr.bf16.mxu0 %v18667_v54  ;;  %v2100_v53 = vld [vmem:[#allocation10 + $0x2788] sm:$0xff]  ;;  %v745_v19 = vmax.f32 %v608_v7, 0.0  ;;  %v2179_v7 = vld [vmem:[#allocation10 + $0x2a00] sm:$0xff] }
 0x24d   :  { %13775 = vmatprep.subr.bf16.mxu1 %v18669_v58  ;;  %v2108_v54 = vld [vmem:[#allocation10 + $0x27c8] sm:$0xff]  ;;  %v18730_v58 = vcombine.low %v2083_v33, %v2091_v36 }
 0x24e   :  { %v18749_v1 = vcombine.high %v2100_v53, %v2108_v54  ;;  %v18748_v20 = vcombine.low %v2100_v53, %v2108_v54  ;;  %v20758_v29 = vpack.c.bf16 %v745_v19, %v745_v19  ;;  %v2148_v36 = vld [vmem:[#allocation10 + $0x2908] sm:$0xff] }
 0x24f   :  { %13448 = vmatpush1.bf16.msra.mxu0 %v18666_v3  ;;  %v2115_v3 = vld [vmem:[#allocation10 + $0x2800] sm:$0xff]  ;;  %v18796_v53 = vcombine.low %v2148_v36, %v2156_v25  ;;  %v2196_v19 = vld [vmem:[#allocation10 + $0x2a88] sm:$0xff] }
 0x250   :  { %13776 = vmatpush1.bf16.msra.mxu1 %v18668_v5  ;;  %13449 = vmatprep.subr.bf16.mxu0 %v18683_v6  ;;  %v2123_v5 = vld [vmem:[#allocation10 + $0x2840] sm:$0xff]  ;;  %v651_v6 = vadd.f32 %v20741_v35, %v212_v50 }
 0x251   :  { %13777 = vmatprep.subr.bf16.mxu1 %v18685_v8  ;;  %v2116_v8 = vld [vmem:[#allocation10 + $0x2808] sm:$0xff]  ;;  %v18762_v26 = vcombine.low %v2115_v3, %v2123_v5 }
 0x252   :  { %v18765_v4 = vcombine.high %v2116_v8, %v2124_v11  ;;  %v18764_v35 = vcombine.low %v2116_v8, %v2124_v11  ;;  %v2195_v11 = vld [vmem:[#allocation10 + $0x2a80] sm:$0xff] }
 0x253   :  { %13450 = vmatpush1.bf16.msra.mxu0 %v18682_v21  ;;  %v18763_v21 = vcombine.high %v2115_v3, %v2123_v5  ;;  %v18812_v5 = vcombine.low %v2164_v45, %v2172_v49 }
 0x254   :  { %13778 = vmatpush1.bf16.msra.mxu1 %v18684_v0  ;;  %13451 = vmatprep.subr.bf16.mxu0 %v18699_v22  ;;  %v2131_v0 = vld [vmem:[#allocation10 + $0x2880] sm:$0xff] }
 0x255   :  { %13779 = vmatprep.subr.bf16.mxu1 %v18701_v23  ;;  %v2139_v22 = vld [vmem:[#allocation10 + $0x28c0] sm:$0xff]  ;;  %v748_v23 = vmax.f32 %v651_v6, 0.0 }
 0x256   :  { %v18778_v48 = vcombine.low %v2131_v0, %v2139_v22 }
 0x257   :  { %13452 = vmatpush1.bf16.msra.mxu0 %v18698_v30  ;;  %v18779_v30 = vcombine.high %v2131_v0, %v2139_v22  ;;  %v20760_v33 = vpack.c.bf16 %v748_v23, %v748_v23  ;;  %v2211_v23 = vld [vmem:[#allocation10 + $0x2b00] sm:$0xff] }
 0x258   :  { %13780 = vmatpush1.bf16.msra.mxu1 %v18700_v15  ;;  %13453 = vmatprep.subr.bf16.mxu0 %v18715_v32  ;;  %v18781_v15 = vcombine.high %v2132_v24, %v2140_v27  ;;  %v2147_v32 = vld [vmem:[#allocation10 + $0x2900] sm:$0xff] }
 0x259   :  { %13781 = vmatprep.subr.bf16.mxu1 %v18717_v47  ;;  %v2155_v47 = vld [vmem:[#allocation10 + $0x2940] sm:$0xff] }
 0x25a   :  { %v18795_v42 = vcombine.high %v2147_v32, %v2155_v47  ;;  %v18794_v50 = vcombine.low %v2147_v32, %v2155_v47  ;;  %v2227_v47 = vld [vmem:[#allocation10 + $0x2b80] sm:$0xff] }
 0x25b   :  { %13454 = vmatpush1.bf16.msra.mxu0 %v18714_v40  ;;  %v18780_v40 = vcombine.low %v2132_v24, %v2140_v27  ;;  %v2219_v24 = vld [vmem:[#allocation10 + $0x2b40] sm:$0xff]  ;;  %v2212_v27 = vld [vmem:[#allocation10 + $0x2b08] sm:$0xff] }
 0x25c   :  { %13782 = vmatpush1.bf16.msra.mxu1 %v18716_v10  ;;  %13455 = vmatprep.subr.bf16.mxu0 %v18731_v43  ;;  %v18797_v10 = vcombine.high %v2148_v36, %v2156_v25  ;;  %v2163_v43 = vld [vmem:[#allocation10 + $0x2980] sm:$0xff]  ;;  %v2228_v25 = vld [vmem:[#allocation10 + $0x2b88] sm:$0xff] }
 0x25d   :  { %13783 = vmatprep.subr.bf16.mxu1 %v18733_v63  ;;  %v2171_v63 = vld [vmem:[#allocation10 + $0x29c0] sm:$0xff] }
 0x25e   :  { %v18811_v54 = vcombine.high %v2163_v43, %v2171_v63  ;;  %v18810_v3 = vcombine.low %v2163_v43, %v2171_v63  ;;  %v2235_v36 = vld [vmem:[#allocation10 + $0x2bc0] sm:$0xff] }
 0x25f   :  { %13456 = vmatpush1.bf16.msra.mxu0 %v18730_v58  ;;  %v18813_v58 = vcombine.high %v2164_v45, %v2172_v49  ;;  %v2243_v63 = vld [vmem:[#allocation10 + $0x2c00] sm:$0xff]  ;;  %v2244_v49 = vld [vmem:[#allocation10 + $0x2c08] sm:$0xff] }
 0x260   :  { %13784 = vmatpush1.bf16.msra.mxu1 %v18732_v60  ;;  %13457 = vmatprep.subr.bf16.mxu0 %v18747_v61  ;;  %v2187_v60 = vld [vmem:[#allocation10 + $0x2a40] sm:$0xff]  ;;  %v2180_v61 = vld [vmem:[#allocation10 + $0x2a08] sm:$0xff] }
 0x261   :  { %13785 = vmatprep.subr.bf16.mxu1 %v18749_v1  ;;  %v2188_v1 = vld [vmem:[#allocation10 + $0x2a48] sm:$0xff]  ;;  %v18827_v6 = vcombine.high %v2179_v7, %v2187_v60  ;;  %v2251_v45 = vld [vmem:[#allocation10 + $0x2c40] sm:$0xff] }
 0x262   :  { %v18829_v8 = vcombine.high %v2180_v61, %v2188_v1 }
 0x263   :  { %13458 = vmatpush1.bf16.msra.mxu0 %v18746_v18  ;;  %v2203_v18 = vld [vmem:[#allocation10 + $0x2ac0] sm:$0xff] }
 0x264   :  { %13786 = vmatpush1.bf16.msra.mxu1 %v18748_v20  ;;  %13468 = vmatprep.subr.bf16.mxu0 %v18763_v21  ;;  %v2204_v20 = vld [vmem:[#allocation10 + $0x2ac8] sm:$0xff]  ;;  %v18826_v21 = vcombine.low %v2179_v7, %v2187_v60  ;;  %v18843_v0 = vcombine.high %v2195_v11, %v2203_v18  ;;  %v2259_v60 = vld [vmem:[#allocation10 + $0x2c80] sm:$0xff] }
 0x265   :  { %13796 = vmatprep.subr.bf16.mxu1 %v18765_v4  ;;  %v18828_v4 = vcombine.low %v2180_v61, %v2188_v1  ;;  %v18845_v22 = vcombine.high %v2196_v19, %v2204_v20  ;;  %v2267_v61 = vld [vmem:[#allocation10 + $0x2cc0] sm:$0xff]  ;;  %v2260_v1 = vld [vmem:[#allocation10 + $0x2c88] sm:$0xff] }
 0x266   :  { %13460 = vmatmul.mubr.bf16.vlgmr.msra.gmra.mrb[16].mxu0 %v20758_v29 }
 0x267   :  { %13788 = vmatmul.mubr.bf16.vlgmr.msra.gmra.mrb[16].mxu1 %v20758_v29  ;;  %13469 = vmatpush1.bf16.msra.mxu0 %v18762_v26  ;;  %v2220_v26 = vld [vmem:[#allocation10 + $0x2b48] sm:$0xff] }
 0x268   :  { %13797 = vmatpush1.bf16.msra.mxu1 %v18764_v35  ;;  %13470 = vmatprep.subr.bf16.mxu0 %v18779_v30  ;;  %v18842_v35 = vcombine.low %v2195_v11, %v2203_v18  ;;  %v18844_v30 = vcombine.low %v2196_v19, %v2204_v20  ;;  %v18861_v32 = vcombine.high %v2212_v27, %v2220_v26  ;;  %v2275_v18 = vld [vmem:[#allocation10 + $0x2d00] sm:$0xff]  ;;  %v2276_v20 = vld [vmem:[#allocation10 + $0x2d08] sm:$0xff] }
 0x269   :  { %13798 = vmatprep.subr.bf16.mxu1 %v18781_v15  ;;  %13500 = vmatprep.mubr.bf16.mxu0 %v20760_v33  ;;  %v18859_v15 = vcombine.high %v2211_v23, %v2219_v24  ;;  %v2283_v19 = vld [vmem:[#allocation10 + $0x2d40] sm:$0xff] }
 0x26a   :  { %13828 = vmatprep.mubr.bf16.mxu1 %v20760_v33 }
 0x26b   :  { %13471 = vmatpush1.bf16.msra.mxu0 %v18778_v48  ;;  %v2236_v48 = vld [vmem:[#allocation10 + $0x2bc8] sm:$0xff] }
 0x26c   :  { %13799 = vmatpush1.bf16.msra.mxu1 %v18780_v40  ;;  %13472 = vmatprep.subr.bf16.mxu0 %v18795_v42  ;;  %v18858_v40 = vcombine.low %v2211_v23, %v2219_v24  ;;  %v18860_v42 = vcombine.low %v2212_v27, %v2220_v26  ;;  %v18877_v43 = vcombine.high %v2228_v25, %v2236_v48  ;;  %v2291_v24 = vld [vmem:[#allocation10 + $0x2d80] sm:$0xff]  ;;  %v2292_v26 = vld [vmem:[#allocation10 + $0x2d88] sm:$0xff] }
 0x26d   :  { %13800 = vmatprep.subr.bf16.mxu1 %v18797_v10  ;;  %v18875_v10 = vcombine.high %v2227_v47, %v2235_v36  ;;  %v2299_v27 = vld [vmem:[#allocation10 + $0x2dc0] sm:$0xff] }
 0x26f   :  { %13473 = vmatpush1.bf16.msra.mxu0 %v18794_v50  ;;  %v2252_v50 = vld [vmem:[#allocation10 + $0x2c48] sm:$0xff] }
 0x270   :  { %13801 = vmatpush1.bf16.msra.mxu1 %v18796_v53  ;;  %13474 = vmatprep.subr.bf16.mxu0 %v18811_v54  ;;  %v18874_v53 = vcombine.low %v2227_v47, %v2235_v36  ;;  %v18876_v54 = vcombine.low %v2228_v25, %v2236_v48  ;;  %v18893_v7 = vcombine.high %v2244_v49, %v2252_v50  ;;  %v20766_v47 = vpop.f32.mrb[12].mxu1  ;;  %v2307_v25 = vld [vmem:[#allocation10 + $0x2e00] sm:$0xff] }
 0x271   :  { %13802 = vmatprep.subr.bf16.mxu1 %v18813_v58  ;;  %v18891_v58 = vcombine.high %v2243_v63, %v2251_v45  ;;  %v2315_v48 = vld [vmem:[#allocation10 + $0x2e40] sm:$0xff] }
 0x273   :  { %13475 = vmatpush1.bf16.msra.mxu0 %v18810_v3  ;;  %v2268_v3 = vld [vmem:[#allocation10 + $0x2cc8] sm:$0xff] }
 0x274   :  { %13803 = vmatpush1.bf16.msra.mxu1 %v18812_v5  ;;  %13476 = vmatprep.subr.bf16.mxu0 %v18827_v6  ;;  %v18890_v5 = vcombine.low %v2243_v63, %v2251_v45  ;;  %v18892_v6 = vcombine.low %v2244_v49, %v2252_v50  ;;  %v18909_v11 = vcombine.high %v2260_v1, %v2268_v3 }
 0x275   :  { %13804 = vmatprep.subr.bf16.mxu1 %v18829_v8  ;;  %v18907_v8 = vcombine.high %v2259_v60, %v2267_v61  ;;  %v18938_v63 = vcombine.low %v2291_v24, %v2299_v27  ;;  %v18955_v50 = vcombine.high %v2307_v25, %v2315_v48 }
 0x277   :  { %13477 = vmatpush1.bf16.msra.mxu0 %v18826_v21  ;;  %v2284_v21 = vld [vmem:[#allocation10 + $0x2d48] sm:$0xff] }
 0x278   :  { %13805 = vmatpush1.bf16.msra.mxu1 %v18828_v4  ;;  %13478 = vmatprep.subr.bf16.mxu0 %v18843_v0  ;;  %v18906_v4 = vcombine.low %v2259_v60, %v2267_v61  ;;  %v18908_v0 = vcombine.low %v2260_v1, %v2268_v3  ;;  %v18925_v23 = vcombine.high %v2276_v20, %v2284_v21  ;;  %v2332_v60 = vld [vmem:[#allocation10 + $0x2ec8] sm:$0xff] }
 0x279   :  { %13806 = vmatprep.subr.bf16.mxu1 %v18845_v22  ;;  %v18923_v22 = vcombine.high %v2275_v18, %v2283_v19  ;;  %v18954_v61 = vcombine.low %v2307_v25, %v2315_v48  ;;  %v2371_v25 = vld [vmem:[#allocation10 + $0x3000] sm:$0xff] }
 0x27a   :  { %v2379_v48 = vld [vmem:[#allocation10 + $0x3040] sm:$0xff] }
 0x27b   :  { %13479 = vmatpush1.bf16.msra.mxu0 %v18842_v35  ;;  %v2300_v35 = vld [vmem:[#allocation10 + $0x2dc8] sm:$0xff] }
 0x27c   :  { %13807 = vmatpush1.bf16.msra.mxu1 %v18844_v30  ;;  %13480 = vmatprep.subr.bf16.mxu0 %v18859_v15  ;;  %v18922_v30 = vcombine.low %v2275_v18, %v2283_v19  ;;  %v18924_v15 = vcombine.low %v2276_v20, %v2284_v21  ;;  %v18941_v36 = vcombine.high %v2292_v26, %v2300_v35  ;;  %v2340_v18 = vld [vmem:[#allocation10 + $0x2f08] sm:$0xff] }
 0x27d   :  { %13808 = vmatprep.subr.bf16.mxu1 %v18861_v32  ;;  %v18939_v32 = vcombine.high %v2291_v24, %v2299_v27  ;;  %v18940_v49 = vcombine.low %v2292_v26, %v2300_v35  ;;  %v2348_v19 = vld [vmem:[#allocation10 + $0x2f48] sm:$0xff]  ;;  %v220_v24 = vrot.slane %v20733_v9, %v20690_v56 }
 0x27e   :  { %v2356_v26 = vld [vmem:[#allocation10 + $0x2f88] sm:$0xff] }
 0x27f   :  { %13481 = vmatpush1.bf16.msra.mxu0 %v18858_v40  ;;  %v20768_v40 = vpop.f32.mrb[13].mxu1  ;;  %v2364_v35 = vld [vmem:[#allocation10 + $0x2fc8] sm:$0xff] }
 0x280   :  { %13809 = vmatpush1.bf16.msra.mxu1 %v18860_v42  ;;  %13482 = vmatprep.subr.bf16.mxu0 %v18875_v10  ;;  %v2308_v42 = vld [vmem:[#allocation10 + $0x2e08] sm:$0xff] }
 0x281   :  { %13810 = vmatprep.subr.bf16.mxu1 %v18877_v43  ;;  %v2316_v10 = vld [vmem:[#allocation10 + $0x2e48] sm:$0xff]  ;;  %v734_v43 = vpop.f32.mrb[14].mxu1 }
 0x282   :  { %v735_v45 = vpop.f32.mrb[15].mxu1  ;;  %v18956_v1 = vcombine.low %v2308_v42, %v2316_v10  ;;  %v2372_v43 = vld [vmem:[#allocation10 + $0x3008] sm:$0xff] }
 0x283   :  { %13483 = vmatpush1.bf16.msra.mxu0 %v18874_v53  ;;  %v18957_v53 = vcombine.high %v2308_v42, %v2316_v10  ;;  %v692_v42 = vadd.f32 %v20684_v34, %v220_v24  ;;  %v19019_v45 = vcombine.high %v2371_v25, %v2379_v48  ;;  %v2396_v34 = vld [vmem:[#allocation10 + $0x30c8] sm:$0xff] }
 0x284   :  { %13811 = vmatpush1.bf16.msra.mxu1 %v18876_v54  ;;  %13484 = vmatprep.subr.bf16.mxu0 %v18891_v58  ;;  %v2323_v54 = vld [vmem:[#allocation10 + $0x2e80] sm:$0xff]  ;;  %v2428_v24 = vld [vmem:[#allocation10 + $0x31c8] sm:$0xff] }
 0x285   :  { %13812 = vmatprep.subr.bf16.mxu1 %v18893_v7  ;;  %v2331_v58 = vld [vmem:[#allocation10 + $0x2ec0] sm:$0xff]  ;;  %v2324_v7 = vld [vmem:[#allocation10 + $0x2e88] sm:$0xff] }
 0x286   :  { %v18971_v3 = vcombine.high %v2323_v54, %v2331_v58  ;;  %v18970_v20 = vcombine.low %v2323_v54, %v2331_v58  ;;  %v18972_v21 = vcombine.low %v2324_v7, %v2332_v60  ;;  %v2387_v54 = vld [vmem:[#allocation10 + $0x3080] sm:$0xff] }
 0x287   :  { %13485 = vmatpush1.bf16.msra.mxu0 %v18890_v5  ;;  %v18973_v5 = vcombine.high %v2324_v7, %v2332_v60  ;;  %v2395_v58 = vld [vmem:[#allocation10 + $0x30c0] sm:$0xff]  ;;  %v19018_v7 = vcombine.low %v2371_v25, %v2379_v48  ;;  %v2388_v60 = vld [vmem:[#allocation10 + $0x3088] sm:$0xff] }
 0x288   :  { %13813 = vmatpush1.bf16.msra.mxu1 %v18892_v6  ;;  %13486 = vmatprep.subr.bf16.mxu0 %v18907_v8  ;;  %v2339_v6 = vld [vmem:[#allocation10 + $0x2f00] sm:$0xff]  ;;  %v2444_v25 = vld [vmem:[#allocation10 + $0x3248] sm:$0xff] }
 0x289   :  { %13814 = vmatprep.subr.bf16.mxu1 %v18909_v11  ;;  %v2347_v8 = vld [vmem:[#allocation10 + $0x2f40] sm:$0xff]  ;;  %v208_v11 = vrot.slane %v20733_v9, %v20687_v44 }
 0x28b   :  { %13487 = vmatpush1.bf16.msra.mxu0 %v18906_v4  ;;  %v18987_v4 = vcombine.high %v2339_v6, %v2347_v8  ;;  %v649_v27 = vadd.f32 %v20738_v28, %v208_v11  ;;  %v19004_v28 = vcombine.low %v2356_v26, %v2364_v35  ;;  %v2404_v11 = vld [vmem:[#allocation10 + $0x3108] sm:$0xff] }
 0x28c   :  { %13815 = vmatpush1.bf16.msra.mxu1 %v18908_v0  ;;  %13488 = vmatprep.subr.bf16.mxu0 %v18923_v22  ;;  %v18989_v0 = vcombine.high %v2340_v18, %v2348_v19  ;;  %v2355_v22 = vld [vmem:[#allocation10 + $0x2f80] sm:$0xff] }
 0x28d   :  { %13816 = vmatprep.subr.bf16.mxu1 %v18925_v23  ;;  %v2363_v23 = vld [vmem:[#allocation10 + $0x2fc0] sm:$0xff]  ;;  %v747_v10 = vmax.f32 %v649_v27, 0.0 }
 0x28e   :  { %v19002_v9 = vcombine.low %v2355_v22, %v2363_v23 }
 0x28f   :  { %13489 = vmatpush1.bf16.msra.mxu0 %v18922_v30  ;;  %v18986_v30 = vcombine.low %v2339_v6, %v2347_v8  ;;  %v19037_v8 = vcombine.high %v2388_v60, %v2396_v34 }
 0x290   :  { %13817 = vmatpush1.bf16.msra.mxu1 %v18924_v15  ;;  %13490 = vmatprep.subr.bf16.mxu0 %v18939_v32  ;;  %v18988_v15 = vcombine.low %v2340_v18, %v2348_v19  ;;  %v19003_v32 = vcombine.high %v2355_v22, %v2363_v23  ;;  %v2412_v18 = vld [vmem:[#allocation10 + $0x3148] sm:$0xff]  ;;  %v19034_v19 = vcombine.low %v2387_v54, %v2395_v58  ;;  %v2427_v22 = vld [vmem:[#allocation10 + $0x31c0] sm:$0xff] }
 0x291   :  { %13818 = vmatprep.subr.bf16.mxu1 %v18941_v36  ;;  %v19005_v36 = vcombine.high %v2356_v26, %v2364_v35  ;;  %v2420_v23 = vld [vmem:[#allocation10 + $0x3188] sm:$0xff]  ;;  %v19052_v26 = vcombine.low %v2404_v11, %v2412_v18 }
 0x293   :  { %13491 = vmatpush1.bf16.msra.mxu0 %v18938_v63  ;;  %v2380_v63 = vld [vmem:[#allocation10 + $0x3048] sm:$0xff] }
 0x294   :  { %13819 = vmatpush1.bf16.msra.mxu1 %v18940_v49  ;;  %13492 = vmatprep.subr.bf16.mxu0 %v18955_v50  ;;  %v19021_v49 = vcombine.high %v2372_v43, %v2380_v63  ;;  %v750_v50 = vmax.f32 %v692_v42, 0.0  ;;  %v19068_v42 = vcombine.low %v2420_v23, %v2428_v24 }
 0x295   :  { %13820 = vmatprep.subr.bf16.mxu1 %v18957_v53  ;;  %v20776_v53 = vpack.c.bf16 %v747_v10, %v747_v10 }
 0x296   :  { %v20778_v6 = vpack.c.bf16 %v750_v50, %v750_v50 }
 0x297   :  { %13493 = vmatpush1.bf16.msra.mxu0 %v18954_v61  ;;  %v19020_v61 = vcombine.low %v2372_v43, %v2380_v63  ;;  %v2451_v63 = vld [vmem:[#allocation10 + $0x3280] sm:$0xff] }
 0x298   :  { %13821 = vmatpush1.bf16.msra.mxu1 %v18956_v1  ;;  %13494 = vmatprep.subr.bf16.mxu0 %v18971_v3  ;;  %v19035_v1 = vcombine.high %v2387_v54, %v2395_v58  ;;  %v2403_v3 = vld [vmem:[#allocation10 + $0x3100] sm:$0xff] }
 0x299   :  { %13822 = vmatprep.subr.bf16.mxu1 %v18973_v5  ;;  %v2411_v5 = vld [vmem:[#allocation10 + $0x3140] sm:$0xff] }
 0x29a   :  { %v19050_v27 = vcombine.low %v2403_v3, %v2411_v5 }
 0x29b   :  { %13495 = vmatpush1.bf16.msra.mxu0 %v18970_v20  ;;  %v19036_v20 = vcombine.low %v2388_v60, %v2396_v34  ;;  %v2475_v60 = vld [vmem:[#allocation10 + $0x3340] sm:$0xff]  ;;  %v2468_v34 = vld [vmem:[#allocation10 + $0x3308] sm:$0xff] }
 0x29c   :  { %13823 = vmatpush1.bf16.msra.mxu1 %v18972_v21  ;;  %13496 = vmatprep.subr.bf16.mxu0 %v18987_v4  ;;  %v19051_v21 = vcombine.high %v2403_v3, %v2411_v5  ;;  %v19053_v4 = vcombine.high %v2404_v11, %v2412_v18  ;;  %v2483_v11 = vld [vmem:[#allocation10 + $0x3380] sm:$0xff] }
 0x29d   :  { %13824 = vmatprep.subr.bf16.mxu1 %v18989_v0  ;;  %v2419_v0 = vld [vmem:[#allocation10 + $0x3180] sm:$0xff] }
 0x29e   :  { %v19067_v35 = vcombine.high %v2419_v0, %v2427_v22  ;;  %v19066_v48 = vcombine.low %v2419_v0, %v2427_v22  ;;  %v2491_v18 = vld [vmem:[#allocation10 + $0x33c0] sm:$0xff] }
 0x29f   :  { %13497 = vmatpush1.bf16.msra.mxu0 %v18986_v30  ;;  %v19069_v30 = vcombine.high %v2420_v23, %v2428_v24  ;;  %v19131_v0 = vcombine.high %v2483_v11, %v2491_v18  ;;  %v2499_v23 = vld [vmem:[#allocation10 + $0x3400] sm:$0xff] }
 0x2a0   :  { %13825 = vmatpush1.bf16.msra.mxu1 %v18988_v15  ;;  %13498 = vmatprep.subr.bf16.mxu0 %v19003_v32  ;;  %v2435_v15 = vld [vmem:[#allocation10 + $0x3200] sm:$0xff] }
 0x2a1   :  { %13826 = vmatprep.subr.bf16.mxu1 %v19005_v36  ;;  %v2443_v32 = vld [vmem:[#allocation10 + $0x3240] sm:$0xff]  ;;  %v2436_v36 = vld [vmem:[#allocation10 + $0x3208] sm:$0xff] }
 0x2a2   :  { %v19083_v10 = vcombine.high %v2435_v15, %v2443_v32  ;;  %v19085_v43 = vcombine.high %v2436_v36, %v2444_v25  ;;  %v19084_v50 = vcombine.low %v2436_v36, %v2444_v25  ;;  %v2507_v24 = vld [vmem:[#allocation10 + $0x3440] sm:$0xff] }
 0x2a3   :  { %13499 = vmatpush1.bf16.msra.mxu0 %v19002_v9  ;;  %v2459_v9 = vld [vmem:[#allocation10 + $0x32c0] sm:$0xff] }
 0x2a4   :  { %13827 = vmatpush1.bf16.msra.mxu1 %v19004_v28  ;;  %13509 = vmatprep.subr.bf16.mxu0 %v19019_v45  ;;  %v2452_v28 = vld [vmem:[#allocation10 + $0x3288] sm:$0xff]  ;;  %v19099_v54 = vcombine.high %v2451_v63, %v2459_v9  ;;  %v2515_v36 = vld [vmem:[#allocation10 + $0x3480] sm:$0xff] }
 0x2a5   :  { %13837 = vmatprep.subr.bf16.mxu1 %v19021_v49  ;;  %v2460_v45 = vld [vmem:[#allocation10 + $0x32c8] sm:$0xff]  ;;  %v19082_v49 = vcombine.low %v2435_v15, %v2443_v32  ;;  %v19147_v15 = vcombine.high %v2499_v23, %v2507_v24  ;;  %v2523_v25 = vld [vmem:[#allocation10 + $0x34c0] sm:$0xff] }
 0x2a6   :  { %13501 = vmatmul.mubr.bf16.vlgmr.msra.gmra.mrb[16].mxu0 %v20776_v53  ;;  %v19101_v58 = vcombine.high %v2452_v28, %v2460_v45  ;;  %v19100_v3 = vcombine.low %v2452_v28, %v2460_v45  ;;  %v2531_v28 = vld [vmem:[#allocation10 + $0x3500] sm:$0xff] }
 0x2a7   :  { %13829 = vmatmul.mubr.bf16.vlgmr.msra.gmra.mrb[16].mxu1 %v20776_v53  ;;  %13510 = vmatpush1.bf16.msra.mxu0 %v19018_v7  ;;  %v2467_v7 = vld [vmem:[#allocation10 + $0x3300] sm:$0xff] }
 0x2a8   :  { %13541 = vmatprep.mubr.bf16.mxu0 %v20778_v6  ;;  %13838 = vmatpush1.bf16.msra.mxu1 %v19020_v61  ;;  %v2476_v61 = vld [vmem:[#allocation10 + $0x3348] sm:$0xff]  ;;  %v19115_v5 = vcombine.high %v2467_v7, %v2475_v60  ;;  %v2539_v45 = vld [vmem:[#allocation10 + $0x3540] sm:$0xff] }
 0x2a9   :  { %13869 = vmatprep.mubr.bf16.mxu1 %v20778_v6  ;;  %13511 = vmatprep.subr.bf16.mxu0 %v19035_v1  ;;  %v19098_v1 = vcombine.low %v2451_v63, %v2459_v9  ;;  %v19163_v63 = vcombine.high %v2515_v36, %v2523_v25 }
 0x2aa   :  { %13839 = vmatprep.subr.bf16.mxu1 %v19037_v8  ;;  %v19117_v8 = vcombine.high %v2468_v34, %v2476_v61 }
 0x2ab   :  { %13512 = vmatpush1.bf16.msra.mxu0 %v19034_v19  ;;  %v2484_v19 = vld [vmem:[#allocation10 + $0x3388] sm:$0xff] }
 0x2ac   :  { %13840 = vmatpush1.bf16.msra.mxu1 %v19036_v20  ;;  %13513 = vmatprep.subr.bf16.mxu0 %v19051_v21  ;;  %v2492_v20 = vld [vmem:[#allocation10 + $0x33c8] sm:$0xff]  ;;  %v19114_v21 = vcombine.low %v2467_v7, %v2475_v60  ;;  %v19179_v7 = vcombine.high %v2531_v28, %v2539_v45 }
 0x2ad   :  { %13841 = vmatprep.subr.bf16.mxu1 %v19053_v4  ;;  %v19116_v4 = vcombine.low %v2468_v34, %v2476_v61  ;;  %v19133_v22 = vcombine.high %v2484_v19, %v2492_v20  ;;  %v2547_v34 = vld [vmem:[#allocation10 + $0x3580] sm:$0xff] }
 0x2ae   :  { %v2555_v61 = vld [vmem:[#allocation10 + $0x35c0] sm:$0xff] }
 0x2af   :  { %13514 = vmatpush1.bf16.msra.mxu0 %v19050_v27  ;;  %v2500_v27 = vld [vmem:[#allocation10 + $0x3408] sm:$0xff] }
 0x2b0   :  { %13842 = vmatpush1.bf16.msra.mxu1 %v19052_v26  ;;  %13515 = vmatprep.subr.bf16.mxu0 %v19067_v35  ;;  %v2508_v26 = vld [vmem:[#allocation10 + $0x3448] sm:$0xff]  ;;  %v19130_v35 = vcombine.low %v2483_v11, %v2491_v18  ;;  %v19195_v11 = vcombine.high %v2547_v34, %v2555_v61 }
 0x2b1   :  { %13843 = vmatprep.subr.bf16.mxu1 %v19069_v30  ;;  %v19132_v30 = vcombine.low %v2484_v19, %v2492_v20  ;;  %v19149_v32 = vcombine.high %v2500_v27, %v2508_v26  ;;  %v2563_v19 = vld [vmem:[#allocation10 + $0x3600] sm:$0xff] }
 0x2b2   :  { %v2571_v20 = vld [vmem:[#allocation10 + $0x3640] sm:$0xff] }
 0x2b3   :  { %13516 = vmatpush1.bf16.msra.mxu0 %v19066_v48  ;;  %v2516_v48 = vld [vmem:[#allocation10 + $0x3488] sm:$0xff] }
 0x2b4   :  { %13844 = vmatpush1.bf16.msra.mxu1 %v19068_v42  ;;  %13517 = vmatprep.subr.bf16.mxu0 %v19083_v10  ;;  %v2524_v42 = vld [vmem:[#allocation10 + $0x34c8] sm:$0xff]  ;;  %v19146_v10 = vcombine.low %v2499_v23, %v2507_v24  ;;  %v19211_v23 = vcombine.high %v2563_v19, %v2571_v20 }
 0x2b5   :  { %13845 = vmatprep.subr.bf16.mxu1 %v19085_v43  ;;  %v19148_v43 = vcombine.low %v2500_v27, %v2508_v26  ;;  %v19165_v9 = vcombine.high %v2516_v48, %v2524_v42  ;;  %v2579_v27 = vld [vmem:[#allocation10 + $0x3680] sm:$0xff] }
 0x2b6   :  { %v2587_v26 = vld [vmem:[#allocation10 + $0x36c0] sm:$0xff] }
 0x2b7   :  { %13518 = vmatpush1.bf16.msra.mxu0 %v19082_v49  ;;  %v2532_v49 = vld [vmem:[#allocation10 + $0x3508] sm:$0xff] }
 0x2b8   :  { %13846 = vmatpush1.bf16.msra.mxu1 %v19084_v50  ;;  %13519 = vmatprep.subr.bf16.mxu0 %v19099_v54  ;;  %v2540_v50 = vld [vmem:[#allocation10 + $0x3548] sm:$0xff]  ;;  %v19162_v54 = vcombine.low %v2515_v36, %v2523_v25  ;;  %v19227_v36 = vcombine.high %v2579_v27, %v2587_v26 }
 0x2b9   :  { %13847 = vmatprep.subr.bf16.mxu1 %v19101_v58  ;;  %v19164_v58 = vcombine.low %v2516_v48, %v2524_v42  ;;  %v19181_v60 = vcombine.high %v2532_v49, %v2540_v50  ;;  %v2595_v48 = vld [vmem:[#allocation10 + $0x3700] sm:$0xff] }
 0x2ba   :  { %v2603_v42 = vld [vmem:[#allocation10 + $0x3740] sm:$0xff] }
 0x2bb   :  { %13520 = vmatpush1.bf16.msra.mxu0 %v19098_v1  ;;  %v2548_v1 = vld [vmem:[#allocation10 + $0x3588] sm:$0xff] }
 0x2bc   :  { %13848 = vmatpush1.bf16.msra.mxu1 %v19100_v3  ;;  %13521 = vmatprep.subr.bf16.mxu0 %v19115_v5  ;;  %v2556_v3 = vld [vmem:[#allocation10 + $0x35c8] sm:$0xff]  ;;  %v19178_v5 = vcombine.low %v2531_v28, %v2539_v45 }
 0x2bd   :  { %13849 = vmatprep.subr.bf16.mxu1 %v19117_v8  ;;  %v19180_v8 = vcombine.low %v2532_v49, %v2540_v50  ;;  %v19197_v18 = vcombine.high %v2548_v1, %v2556_v3  ;;  %v19243_v49 = vcombine.high %v2595_v48, %v2603_v42 }
 0x2bf   :  { %13522 = vmatpush1.bf16.msra.mxu0 %v19114_v21  ;;  %v2564_v21 = vld [vmem:[#allocation10 + $0x3608] sm:$0xff] }
 0x2c0   :  { %13850 = vmatpush1.bf16.msra.mxu1 %v19116_v4  ;;  %13523 = vmatprep.subr.bf16.mxu0 %v19131_v0  ;;  %v2572_v4 = vld [vmem:[#allocation10 + $0x3648] sm:$0xff]  ;;  %v19194_v0 = vcombine.low %v2547_v34, %v2555_v61  ;;  %v19242_v61 = vcombine.low %v2595_v48, %v2603_v42  ;;  %v2659_v48 = vld [vmem:[#allocation10 + $0x3900] sm:$0xff] }
 0x2c1   :  { %13851 = vmatprep.subr.bf16.mxu1 %v19133_v22  ;;  %v19196_v22 = vcombine.low %v2548_v1, %v2556_v3  ;;  %v19213_v24 = vcombine.high %v2564_v21, %v2572_v4  ;;  %v2620_v34 = vld [vmem:[#allocation10 + $0x37c8] sm:$0xff]  ;;  %v2667_v42 = vld [vmem:[#allocation10 + $0x3940] sm:$0xff] }
 0x2c3   :  { %13524 = vmatpush1.bf16.msra.mxu0 %v19130_v35  ;;  %v2580_v35 = vld [vmem:[#allocation10 + $0x3688] sm:$0xff] }
 0x2c4   :  { %13852 = vmatpush1.bf16.msra.mxu1 %v19132_v30  ;;  %13525 = vmatprep.subr.bf16.mxu0 %v19147_v15  ;;  %v2588_v30 = vld [vmem:[#allocation10 + $0x36c8] sm:$0xff]  ;;  %v19210_v15 = vcombine.low %v2563_v19, %v2571_v20 }
 0x2c5   :  { %13853 = vmatprep.subr.bf16.mxu1 %v19149_v32  ;;  %v19212_v32 = vcombine.low %v2564_v21, %v2572_v4  ;;  %v19229_v25 = vcombine.high %v2580_v35, %v2588_v30  ;;  %v19228_v45 = vcombine.low %v2580_v35, %v2588_v30  ;;  %v2628_v20 = vld [vmem:[#allocation10 + $0x3808] sm:$0xff] }
 0x2c6   :  { %v2636_v21 = vld [vmem:[#allocation10 + $0x3848] sm:$0xff] }
 0x2c7   :  { %13526 = vmatpush1.bf16.msra.mxu0 %v19146_v10  ;;  %v2596_v10 = vld [vmem:[#allocation10 + $0x3708] sm:$0xff] }
 0x2c8   :  { %13854 = vmatpush1.bf16.msra.mxu1 %v19148_v43  ;;  %13527 = vmatprep.subr.bf16.mxu0 %v19163_v63  ;;  %v2604_v43 = vld [vmem:[#allocation10 + $0x3748] sm:$0xff]  ;;  %v19226_v63 = vcombine.low %v2579_v27, %v2587_v26  ;;  %v2651_v27 = vld [vmem:[#allocation10 + $0x38c0] sm:$0xff] }
 0x2c9   :  { %13855 = vmatprep.subr.bf16.mxu1 %v19165_v9  ;;  %v20784_v9 = vld [vmem:[#allocation9 + $0x8] sm:$0xff]  ;;  %v19245_v50 = vcombine.high %v2596_v10, %v2604_v43  ;;  %v19244_v3 = vcombine.low %v2596_v10, %v2604_v43  ;;  %v2644_v35 = vld [vmem:[#allocation10 + $0x3888] sm:$0xff] }
 0x2ca   :  { %v216_v28 = vrot.slane %v20784_v9, %v20711_v52  ;;  %v2652_v30 = vld [vmem:[#allocation10 + $0x38c8] sm:$0xff] }
 0x2cb   :  { %13528 = vmatpush1.bf16.msra.mxu0 %v19162_v54  ;;  %v2611_v54 = vld [vmem:[#allocation10 + $0x3780] sm:$0xff]  ;;  %v2660_v43 = vld [vmem:[#allocation10 + $0x3908] sm:$0xff] }
 0x2cc   :  { %13856 = vmatpush1.bf16.msra.mxu1 %v19164_v58  ;;  %13529 = vmatprep.subr.bf16.mxu0 %v19179_v7  ;;  %v2619_v58 = vld [vmem:[#allocation10 + $0x37c0] sm:$0xff]  ;;  %v228_v7 = vrot.slane %v20784_v9, %v20714_v62  ;;  %v690_v1 = vadd.f32 %v20682_v31, %v216_v28  ;;  %v19277_v31 = vcombine.high %v2628_v20, %v2636_v21 }
 0x2cd   :  { %13857 = vmatprep.subr.bf16.mxu1 %v19181_v60  ;;  %v2612_v60 = vld [vmem:[#allocation10 + $0x3788] sm:$0xff]  ;;  %v19258_v4 = vcombine.low %v2611_v54, %v2619_v58 }
 0x2ce   :  { %v733_v19 = vadd.f32 %v20768_v40, %v228_v7  ;;  %v19276_v40 = vcombine.low %v2628_v20, %v2636_v21  ;;  %v2676_v7 = vld [vmem:[#allocation10 + $0x3988] sm:$0xff] }
 0x2cf   :  { %13530 = vmatpush1.bf16.msra.mxu0 %v19178_v5  ;;  %v19259_v5 = vcombine.high %v2611_v54, %v2619_v58  ;;  %v2675_v54 = vld [vmem:[#allocation10 + $0x3980] sm:$0xff] }
 0x2d0   :  { %13858 = vmatpush1.bf16.msra.mxu1 %v19180_v8  ;;  %13531 = vmatprep.subr.bf16.mxu0 %v19195_v11  ;;  %v19261_v8 = vcombine.high %v2612_v60, %v2620_v34  ;;  %v2627_v11 = vld [vmem:[#allocation10 + $0x3800] sm:$0xff]  ;;  %v752_v26 = vmax.f32 %v733_v19, 0.0 }
 0x2d1   :  { %13859 = vmatprep.subr.bf16.mxu1 %v19197_v18  ;;  %v2635_v18 = vld [vmem:[#allocation10 + $0x3840] sm:$0xff] }
 0x2d2   :  { %v20794_v10 = vpack.c.bf16 %v752_v26, %v752_v26  ;;  %v2683_v58 = vld [vmem:[#allocation10 + $0x39c0] sm:$0xff] }
 0x2d3   :  { %13532 = vmatpush1.bf16.msra.mxu0 %v19194_v0  ;;  %v749_v0 = vmax.f32 %v690_v1, 0.0  ;;  %v19323_v1 = vcombine.high %v2675_v54, %v2683_v58  ;;  %v19322_v19 = vcombine.low %v2675_v54, %v2683_v58 }
 0x2d4   :  { %13860 = vmatpush1.bf16.msra.mxu1 %v19196_v22  ;;  %13533 = vmatprep.subr.bf16.mxu0 %v19211_v23  ;;  %v19260_v22 = vcombine.low %v2612_v60, %v2620_v34  ;;  %v19275_v23 = vcombine.high %v2627_v11, %v2635_v18  ;;  %v2684_v60 = vld [vmem:[#allocation10 + $0x39c8] sm:$0xff]  ;;  %v19306_v34 = vcombine.low %v2659_v48, %v2667_v42 }
 0x2d5   :  { %13861 = vmatprep.subr.bf16.mxu1 %v19213_v24  ;;  %v2643_v24 = vld [vmem:[#allocation10 + $0x3880] sm:$0xff]  ;;  %v19324_v20 = vcombine.low %v2676_v7, %v2684_v60 }
 0x2d6   :  { %v19290_v28 = vcombine.low %v2643_v24, %v2651_v27 }
 0x2d7   :  { %13534 = vmatpush1.bf16.msra.mxu0 %v19210_v15  ;;  %v19274_v15 = vcombine.low %v2627_v11, %v2635_v18  ;;  %v2692_v11 = vld [vmem:[#allocation10 + $0x3a08] sm:$0xff] }
 0x2d8   :  { %13862 = vmatpush1.bf16.msra.mxu1 %v19212_v32  ;;  %13535 = vmatprep.subr.bf16.mxu0 %v19227_v36  ;;  %v20792_v32 = vpack.c.bf16 %v749_v0, %v749_v0  ;;  %v19291_v36 = vcombine.high %v2643_v24, %v2651_v27  ;;  %v2700_v18 = vld [vmem:[#allocation10 + $0x3a48] sm:$0xff]  ;;  %v2707_v0 = vld [vmem:[#allocation10 + $0x3a80] sm:$0xff] }
 0x2d9   :  { %13863 = vmatprep.subr.bf16.mxu1 %v19229_v25  ;;  %v19293_v25 = vcombine.high %v2644_v35, %v2652_v30  ;;  %v19340_v27 = vcombine.low %v2692_v11, %v2700_v18 }
 0x2db   :  { %13536 = vmatpush1.bf16.msra.mxu0 %v19226_v63  ;;  %v2668_v63 = vld [vmem:[#allocation10 + $0x3948] sm:$0xff] }
 0x2dc   :  { %13864 = vmatpush1.bf16.msra.mxu1 %v19228_v45  ;;  %13537 = vmatprep.subr.bf16.mxu0 %v19243_v49  ;;  %v19292_v45 = vcombine.low %v2644_v35, %v2652_v30  ;;  %v19307_v49 = vcombine.high %v2659_v48, %v2667_v42  ;;  %v2723_v30 = vld [vmem:[#allocation10 + $0x3b00] sm:$0xff] }
 0x2dd   :  { %13865 = vmatprep.subr.bf16.mxu1 %v19245_v50  ;;  %v19309_v50 = vcombine.high %v2660_v43, %v2668_v63 }
 0x2df   :  { %13538 = vmatpush1.bf16.msra.mxu0 %v19242_v61  ;;  %v19308_v61 = vcombine.low %v2660_v43, %v2668_v63  ;;  %v2739_v63 = vld [vmem:[#allocation10 + $0x3b80] sm:$0xff] }
 0x2e0   :  { %13866 = vmatpush1.bf16.msra.mxu1 %v19244_v3  ;;  %13539 = vmatprep.subr.bf16.mxu0 %v19259_v5  ;;  %v19325_v3 = vcombine.high %v2676_v7, %v2684_v60  ;;  %v2691_v5 = vld [vmem:[#allocation10 + $0x3a00] sm:$0xff] }
 0x2e1   :  { %13867 = vmatprep.subr.bf16.mxu1 %v19261_v8  ;;  %v2699_v8 = vld [vmem:[#allocation10 + $0x3a40] sm:$0xff] }
 0x2e2   :  { %v19339_v21 = vcombine.high %v2691_v5, %v2699_v8  ;;  %v19338_v24 = vcombine.low %v2691_v5, %v2699_v8  ;;  %v2755_v60 = vld [vmem:[#allocation10 + $0x3c00] sm:$0xff] }
 0x2e3   :  { %13540 = vmatpush1.bf16.msra.mxu0 %v19258_v4  ;;  %v19341_v4 = vcombine.high %v2692_v11, %v2700_v18  ;;  %v2771_v18 = vld [vmem:[#allocation10 + $0x3c80] sm:$0xff] }
 0x2e4   :  { %13868 = vmatpush1.bf16.msra.mxu1 %v19260_v22  ;;  %13550 = vmatprep.subr.bf16.mxu0 %v19275_v23  ;;  %v2715_v22 = vld [vmem:[#allocation10 + $0x3ac0] sm:$0xff]  ;;  %v2708_v23 = vld [vmem:[#allocation10 + $0x3a88] sm:$0xff] }
 0x2e5   :  { %13878 = vmatprep.subr.bf16.mxu1 %v19277_v31  ;;  %v2716_v31 = vld [vmem:[#allocation10 + $0x3ac8] sm:$0xff]  ;;  %v19355_v26 = vcombine.high %v2707_v0, %v2715_v22 }
 0x2e6   :  { %13542 = vmatmul.mubr.bf16.vlgmr.msra.gmra.mrb[16].mxu0 %v20792_v32  ;;  %v19357_v35 = vcombine.high %v2708_v23, %v2716_v31  ;;  %v19356_v48 = vcombine.low %v2708_v23, %v2716_v31  ;;  %v2787_v31 = vld [vmem:[#allocation10 + $0x3d00] sm:$0xff] }
 0x2e7   :  { %13870 = vmatmul.mubr.bf16.vlgmr.msra.gmra.mrb[16].mxu1 %v20792_v32  ;;  %13551 = vmatpush1.bf16.msra.mxu0 %v19274_v15  ;;  %v2731_v15 = vld [vmem:[#allocation10 + $0x3b40] sm:$0xff] }
 0x2e8   :  { %13879 = vmatpush1.bf16.msra.mxu1 %v19276_v40  ;;  %13552 = vmatprep.subr.bf16.mxu0 %v19291_v36  ;;  %v2724_v40 = vld [vmem:[#allocation10 + $0x3b08] sm:$0xff]  ;;  %v19371_v42 = vcombine.high %v2723_v30, %v2731_v15 }
 0x2e9   :  { %13880 = vmatprep.subr.bf16.mxu1 %v19293_v25  ;;  %13582 = vmatprep.mubr.bf16.mxu0 %v20794_v10  ;;  %v2732_v36 = vld [vmem:[#allocation10 + $0x3b48] sm:$0xff]  ;;  %v19354_v25 = vcombine.low %v2707_v0, %v2715_v22 }
 0x2ea   :  { %13910 = vmatprep.mubr.bf16.mxu1 %v20794_v10  ;;  %v19373_v43 = vcombine.high %v2724_v40, %v2732_v36  ;;  %v19372_v54 = vcombine.low %v2724_v40, %v2732_v36  ;;  %v2803_v36 = vld [vmem:[#allocation10 + $0x3d80] sm:$0xff] }
 0x2eb   :  { %13553 = vmatpush1.bf16.msra.mxu0 %v19290_v28  ;;  %v2747_v28 = vld [vmem:[#allocation10 + $0x3bc0] sm:$0xff] }
 0x2ec   :  { %13881 = vmatpush1.bf16.msra.mxu1 %v19292_v45  ;;  %13554 = vmatprep.subr.bf16.mxu0 %v19307_v49  ;;  %v2740_v45 = vld [vmem:[#allocation10 + $0x3b88] sm:$0xff]  ;;  %v19387_v58 = vcombine.high %v2739_v63, %v2747_v28 }
 0x2ed   :  { %13882 = vmatprep.subr.bf16.mxu1 %v19309_v50  ;;  %v2748_v49 = vld [vmem:[#allocation10 + $0x3bc8] sm:$0xff]  ;;  %v19370_v50 = vcombine.low %v2723_v30, %v2731_v15 }
 0x2ee   :  { %v19389_v7 = vcombine.high %v2740_v45, %v2748_v49  ;;  %v19388_v5 = vcombine.low %v2740_v45, %v2748_v49  ;;  %v2819_v49 = vld [vmem:[#allocation10 + $0x3e00] sm:$0xff] }
 0x2ef   :  { %13555 = vmatpush1.bf16.msra.mxu0 %v19306_v34  ;;  %v2763_v34 = vld [vmem:[#allocation10 + $0x3c40] sm:$0xff] }
 0x2f0   :  { %13883 = vmatpush1.bf16.msra.mxu1 %v19308_v61  ;;  %13556 = vmatprep.subr.bf16.mxu0 %v19323_v1  ;;  %v2756_v61 = vld [vmem:[#allocation10 + $0x3c08] sm:$0xff]  ;;  %v19403_v8 = vcombine.high %v2755_v60, %v2763_v34 }
 0x2f1   :  { %13884 = vmatprep.subr.bf16.mxu1 %v19325_v3  ;;  %v2764_v1 = vld [vmem:[#allocation10 + $0x3c48] sm:$0xff]  ;;  %v19386_v3 = vcombine.low %v2739_v63, %v2747_v28 }
 0x2f2   :  { %v19405_v11 = vcombine.high %v2756_v61, %v2764_v1  ;;  %v19404_v0 = vcombine.low %v2756_v61, %v2764_v1  ;;  %v2835_v1 = vld [vmem:[#allocation10 + $0x3e80] sm:$0xff] }
 0x2f3   :  { %13557 = vmatpush1.bf16.msra.mxu0 %v19322_v19  ;;  %v2779_v19 = vld [vmem:[#allocation10 + $0x3cc0] sm:$0xff] }
 0x2f4   :  { %13885 = vmatpush1.bf16.msra.mxu1 %v19324_v20  ;;  %13558 = vmatprep.subr.bf16.mxu0 %v19339_v21  ;;  %v2772_v20 = vld [vmem:[#allocation10 + $0x3c88] sm:$0xff]  ;;  %v19419_v22 = vcombine.high %v2771_v18, %v2779_v19 }
 0x2f5   :  { %13886 = vmatprep.subr.bf16.mxu1 %v19341_v4  ;;  %v2780_v21 = vld [vmem:[#allocation10 + $0x3cc8] sm:$0xff]  ;;  %v19402_v4 = vcombine.low %v2755_v60, %v2763_v34 }
 0x2f6   :  { %v19421_v23 = vcombine.high %v2772_v20, %v2780_v21  ;;  %v19420_v30 = vcombine.low %v2772_v20, %v2780_v21  ;;  %v2851_v21 = vld [vmem:[#allocation10 + $0x3f00] sm:$0xff] }
 0x2f7   :  { %13559 = vmatpush1.bf16.msra.mxu0 %v19338_v24  ;;  %v2795_v24 = vld [vmem:[#allocation10 + $0x3d40] sm:$0xff] }
 0x2f8   :  { %13887 = vmatpush1.bf16.msra.mxu1 %v19340_v27  ;;  %13560 = vmatprep.subr.bf16.mxu0 %v19355_v26  ;;  %v2788_v27 = vld [vmem:[#allocation10 + $0x3d08] sm:$0xff]  ;;  %v19435_v15 = vcombine.high %v2787_v31, %v2795_v24 }
 0x2f9   :  { %13888 = vmatprep.subr.bf16.mxu1 %v19357_v35  ;;  %v2796_v26 = vld [vmem:[#allocation10 + $0x3d48] sm:$0xff]  ;;  %v19418_v35 = vcombine.low %v2771_v18, %v2779_v19 }
 0x2fa   :  { %v19437_v40 = vcombine.high %v2788_v27, %v2796_v26  ;;  %v19436_v63 = vcombine.low %v2788_v27, %v2796_v26 }
 0x2fb   :  { %13561 = vmatpush1.bf16.msra.mxu0 %v19354_v25  ;;  %v2811_v25 = vld [vmem:[#allocation10 + $0x3dc0] sm:$0xff] }
 0x2fc   :  { %13889 = vmatpush1.bf16.msra.mxu1 %v19356_v48  ;;  %13562 = vmatprep.subr.bf16.mxu0 %v19371_v42  ;;  %v2804_v48 = vld [vmem:[#allocation10 + $0x3d88] sm:$0xff]  ;;  %v19451_v28 = vcombine.high %v2803_v36, %v2811_v25 }
 0x2fd   :  { %13890 = vmatprep.subr.bf16.mxu1 %v19373_v43  ;;  %v2812_v42 = vld [vmem:[#allocation10 + $0x3dc8] sm:$0xff]  ;;  %v19434_v43 = vcombine.low %v2787_v31, %v2795_v24  ;;  %v224_v31 = vrot.slane %v20784_v9, %v20731_v59 }
 0x2fe   :  { %v19453_v45 = vcombine.high %v2804_v48, %v2812_v42  ;;  %v19452_v60 = vcombine.low %v2804_v48, %v2812_v42 }
 0x2ff   :  { %13563 = vmatpush1.bf16.msra.mxu0 %v19370_v50  ;;  %v2827_v50 = vld [vmem:[#allocation10 + $0x3e40] sm:$0xff] }
 0x300   :  { %13891 = vmatpush1.bf16.msra.mxu1 %v19372_v54  ;;  %13564 = vmatprep.subr.bf16.mxu0 %v19387_v58  ;;  %v2820_v54 = vld [vmem:[#allocation10 + $0x3e08] sm:$0xff]  ;;  %v19467_v34 = vcombine.high %v2819_v49, %v2827_v50 }
 0x301   :  { %13892 = vmatprep.subr.bf16.mxu1 %v19389_v7  ;;  %v2828_v58 = vld [vmem:[#allocation10 + $0x3e48] sm:$0xff]  ;;  %v19450_v7 = vcombine.low %v2803_v36, %v2811_v25  ;;  %v731_v25 = vadd.f32 %v20766_v47, %v224_v31  ;;  %v853_v47 = vld [vmem:[#allocation10 + $0x90] sm:$0xff] }
 0x302   :  { %v19469_v61 = vcombine.high %v2820_v54, %v2828_v58  ;;  %v19468_v18 = vcombine.low %v2820_v54, %v2828_v58  ;;  %v885_v31 = vld [vmem:[#allocation10 + $0x190] sm:$0xff] }
 0x303   :  { %13565 = vmatpush1.bf16.msra.mxu0 %v19386_v3  ;;  %v2843_v3 = vld [vmem:[#allocation10 + $0x3ec0] sm:$0xff] }
 0x304   :  { %13893 = vmatpush1.bf16.msra.mxu1 %v19388_v5  ;;  %13566 = vmatprep.subr.bf16.mxu0 %v19403_v8  ;;  %v2836_v5 = vld [vmem:[#allocation10 + $0x3e88] sm:$0xff]  ;;  %v19483_v19 = vcombine.high %v2835_v1, %v2843_v3 }
 0x305   :  { %13894 = vmatprep.subr.bf16.mxu1 %v19405_v11  ;;  %v2844_v8 = vld [vmem:[#allocation10 + $0x3ec8] sm:$0xff]  ;;  %v19466_v11 = vcombine.low %v2819_v49, %v2827_v50  ;;  %v751_v50 = vmax.f32 %v731_v25, 0.0  ;;  %v909_v25 = vld [vmem:[#allocation10 + $0x250] sm:$0xff] }
 0x306   :  { %v19485_v20 = vcombine.high %v2836_v5, %v2844_v8  ;;  %v19484_v24 = vcombine.low %v2836_v5, %v2844_v8 }
 0x307   :  { %13567 = vmatpush1.bf16.msra.mxu0 %v19402_v4  ;;  %v2859_v4 = vld [vmem:[#allocation10 + $0x3f40] sm:$0xff] }
 0x308   :  { %13895 = vmatpush1.bf16.msra.mxu1 %v19404_v0  ;;  %13568 = vmatprep.subr.bf16.mxu0 %v19419_v22  ;;  %v2852_v0 = vld [vmem:[#allocation10 + $0x3f08] sm:$0xff]  ;;  %v19499_v27 = vcombine.high %v2851_v21, %v2859_v4  ;;  %v19498_v36 = vcombine.low %v2851_v21, %v2859_v4  ;;  %v878_v21 = vld [vmem:[#allocation10 + $0x158] sm:$0xff] }
 0x309   :  { %13896 = vmatprep.subr.bf16.mxu1 %v19421_v23  ;;  %v2860_v22 = vld [vmem:[#allocation10 + $0x3f48] sm:$0xff]  ;;  %v19482_v23 = vcombine.low %v2835_v1, %v2843_v3  ;;  %v862_v1 = vld [vmem:[#allocation10 + $0xd8] sm:$0xff]  ;;  %v20803_v3 = vpack.c.bf16 %v751_v50, %v751_v50 }
 0x30a   :  { %v19501_v26 = vcombine.high %v2852_v0, %v2860_v22  ;;  %v19500_v48 = vcombine.low %v2852_v0, %v2860_v22  ;;  %v918_v50 = vld [vmem:[#allocation10 + $0x298] sm:$0xff] }
 0x30b   :  { %13569 = vmatpush1.bf16.msra.mxu0 %v19418_v35  ;;  %v2867_v35 = vld [vmem:[#allocation10 + $0x3f80] sm:$0xff] }
 0x30c   :  { %13897 = vmatpush1.bf16.msra.mxu1 %v19420_v30  ;;  %13570 = vmatprep.subr.bf16.mxu0 %v19435_v15  ;;  %v2875_v30 = vld [vmem:[#allocation10 + $0x3fc0] sm:$0xff]  ;;  %v2868_v15 = vld [vmem:[#allocation10 + $0x3f88] sm:$0xff] }
 0x30d   :  { %13898 = vmatprep.subr.bf16.mxu1 %v19437_v40  ;;  %v2876_v40 = vld [vmem:[#allocation10 + $0x3fc8] sm:$0xff]  ;;  %v19515_v42 = vcombine.high %v2867_v35, %v2875_v30  ;;  %v19514_v49 = vcombine.low %v2867_v35, %v2875_v30 }
 0x30e   :  { %v19517_v9 = vcombine.high %v2868_v15, %v2876_v40  ;;  %v19516_v54 = vcombine.low %v2868_v15, %v2876_v40 }
 0x30f   :  { %13571 = vmatpush1.bf16.msra.mxu0 %v19434_v43  ;;  %v837_v43 = vld [vmem:[#allocation10 + $0x10] sm:$0xff] }
 0x310   :  { %13899 = vmatpush1.bf16.msra.mxu1 %v19436_v63  ;;  %13572 = vmatprep.subr.bf16.mxu0 %v19451_v28  ;;  %v845_v63 = vld [vmem:[#allocation10 + $0x50] sm:$0xff]  ;;  %v838_v28 = vld [vmem:[#allocation10 + $0x18] sm:$0xff] }
 0x311   :  { %13900 = vmatprep.subr.bf16.mxu1 %v19453_v45  ;;  %v846_v45 = vld [vmem:[#allocation10 + $0x58] sm:$0xff]  ;;  %v17487_v58 = vcombine.high %v837_v43, %v845_v63 }
 0x312   :  { %v17488_v5 = vcombine.low %v838_v28, %v846_v45 }
 0x313   :  { %13573 = vmatpush1.bf16.msra.mxu0 %v19450_v7  ;;  %v17489_v7 = vcombine.high %v838_v28, %v846_v45  ;;  %v917_v45 = vld [vmem:[#allocation10 + $0x290] sm:$0xff] }
 0x314   :  { %13901 = vmatpush1.bf16.msra.mxu1 %v19452_v60  ;;  %13574 = vmatprep.subr.bf16.mxu0 %v19467_v34  ;;  %v861_v60 = vld [vmem:[#allocation10 + $0xd0] sm:$0xff]  ;;  %v17486_v34 = vcombine.low %v837_v43, %v845_v63 }
 0x315   :  { %13902 = vmatprep.subr.bf16.mxu1 %v19469_v61  ;;  %v854_v61 = vld [vmem:[#allocation10 + $0x98] sm:$0xff]  ;;  %v17503_v8 = vcombine.high %v853_v47, %v861_v60  ;;  %v17502_v4 = vcombine.low %v853_v47, %v861_v60 }
 0x316   :  { %v17504_v0 = vcombine.low %v854_v61, %v862_v1 }
 0x317   :  { %13575 = vmatpush1.bf16.msra.mxu0 %v19466_v11  ;;  %v869_v11 = vld [vmem:[#allocation10 + $0x110] sm:$0xff] }
 0x318   :  { %13903 = vmatpush1.bf16.msra.mxu1 %v19468_v18  ;;  %13576 = vmatprep.subr.bf16.mxu0 %v19483_v19  ;;  %v877_v18 = vld [vmem:[#allocation10 + $0x150] sm:$0xff]  ;;  %v17505_v19 = vcombine.high %v854_v61, %v862_v1  ;;  %v934_v1 = vld [vmem:[#allocation10 + $0x318] sm:$0xff] }
 0x319   :  { %13904 = vmatprep.subr.bf16.mxu1 %v19485_v20  ;;  %v870_v20 = vld [vmem:[#allocation10 + $0x118] sm:$0xff]  ;;  %v17519_v22 = vcombine.high %v869_v11, %v877_v18  ;;  %v17518_v35 = vcombine.low %v869_v11, %v877_v18  ;;  %v941_v61 = vld [vmem:[#allocation10 + $0x350] sm:$0xff] }
 0x31a   :  { %v17520_v30 = vcombine.low %v870_v20, %v878_v21 }
 0x31b   :  { %13577 = vmatpush1.bf16.msra.mxu0 %v19482_v23  ;;  %v17521_v23 = vcombine.high %v870_v20, %v878_v21  ;;  %v949_v20 = vld [vmem:[#allocation10 + $0x390] sm:$0xff] }
 0x31c   :  { %13905 = vmatpush1.bf16.msra.mxu1 %v19484_v24  ;;  %13578 = vmatprep.subr.bf16.mxu0 %v19499_v27  ;;  %v893_v24 = vld [vmem:[#allocation10 + $0x1d0] sm:$0xff]  ;;  %v886_v27 = vld [vmem:[#allocation10 + $0x198] sm:$0xff] }
 0x31d   :  { %13906 = vmatprep.subr.bf16.mxu1 %v19501_v26  ;;  %v894_v26 = vld [vmem:[#allocation10 + $0x1d8] sm:$0xff]  ;;  %v17535_v15 = vcombine.high %v885_v31, %v893_v24  ;;  %v957_v21 = vld [vmem:[#allocation10 + $0x3d0] sm:$0xff] }
 0x31e   :  { %v17537_v40 = vcombine.high %v886_v27, %v894_v26  ;;  %v17536_v43 = vcombine.low %v886_v27, %v894_v26  ;;  %v965_v27 = vld [vmem:[#allocation10 + $0x410] sm:$0xff] }
 0x31f   :  { %13579 = vmatpush1.bf16.msra.mxu0 %v19498_v36  ;;  %v901_v36 = vld [vmem:[#allocation10 + $0x210] sm:$0xff] }
 0x320   :  { %13907 = vmatpush1.bf16.msra.mxu1 %v19500_v48  ;;  %13580 = vmatprep.subr.bf16.mxu0 %v19515_v42  ;;  %v902_v48 = vld [vmem:[#allocation10 + $0x218] sm:$0xff]  ;;  %v17551_v63 = vcombine.high %v901_v36, %v909_v25  ;;  %v973_v26 = vld [vmem:[#allocation10 + $0x450] sm:$0xff] }
 0x321   :  { %13908 = vmatprep.subr.bf16.mxu1 %v19517_v9  ;;  %v910_v42 = vld [vmem:[#allocation10 + $0x258] sm:$0xff]  ;;  %v17534_v9 = vcombine.low %v885_v31, %v893_v24  ;;  %v17599_v31 = vcombine.high %v949_v20, %v957_v21 }
 0x322   :  { %v17553_v28 = vcombine.high %v902_v48, %v910_v42 }
 0x323   :  { %13581 = vmatpush1.bf16.msra.mxu0 %v19514_v49  ;;  %v925_v49 = vld [vmem:[#allocation10 + $0x2d0] sm:$0xff] }
 0x324   :  { %13909 = vmatpush1.bf16.msra.mxu1 %v19516_v54  ;;  %13919 = vmatprep.subr.bf16.mxu0 %v17487_v58  ;;  %v926_v54 = vld [vmem:[#allocation10 + $0x2d8] sm:$0xff]  ;;  %v17550_v58 = vcombine.low %v901_v36, %v909_v25  ;;  %v17567_v47 = vcombine.high %v917_v45, %v925_v49  ;;  %v17615_v36 = vcombine.high %v965_v27, %v973_v26 }
 0x325   :  { %14247 = vmatprep.subr.bf16.mxu1 %v17489_v7  ;;  %v17552_v7 = vcombine.low %v902_v48, %v910_v42  ;;  %v17569_v60 = vcombine.high %v918_v50, %v926_v54  ;;  %v17568_v11 = vcombine.low %v918_v50, %v926_v54  ;;  %v981_v48 = vld [vmem:[#allocation10 + $0x490] sm:$0xff] }
 0x326   :  { %13583 = vmatmul.mubr.bf16.vlgmr.msra.gmra.mrb[16].mxu0 %v20803_v3  ;;  %v989_v42 = vld [vmem:[#allocation10 + $0x4d0] sm:$0xff] }
 0x327   :  { %13911 = vmatmul.mubr.bf16.vlgmr.msra.gmra.mrb[16].mxu1 %v20803_v3  ;;  %13920 = vmatpush1.bf16.msra.mxu0 %v17486_v34  ;;  %v933_v34 = vld [vmem:[#allocation10 + $0x310] sm:$0xff] }
 0x328   :  { %13951 = vmatprep.mubr.bf16.mxu0 %v20662_v37  ;;  %14248 = vmatpush1.bf16.msra.mxu1 %v17488_v5  ;;  %v942_v5 = vld [vmem:[#allocation10 + $0x358] sm:$0xff]  ;;  %v17583_v18 = vcombine.high %v933_v34, %v941_v61  ;;  %v997_v50 = vld [vmem:[#allocation10 + $0x510] sm:$0xff] }
 0x329   :  { %14279 = vmatprep.mubr.bf16.mxu1 %v20662_v37  ;;  %13921 = vmatprep.subr.bf16.mxu0 %v17503_v8  ;;  %v17566_v8 = vcombine.low %v917_v45, %v925_v49  ;;  %v17631_v45 = vcombine.high %v981_v48, %v989_v42  ;;  %v1005_v54 = vld [vmem:[#allocation10 + $0x550] sm:$0xff] }
 0x32a   :  { %14249 = vmatprep.subr.bf16.mxu1 %v17505_v19  ;;  %v17585_v19 = vcombine.high %v934_v1, %v942_v5 }
 0x32b   :  { %13922 = vmatpush1.bf16.msra.mxu0 %v17502_v4  ;;  %v950_v4 = vld [vmem:[#allocation10 + $0x398] sm:$0xff] }
 0x32c   :  { %14250 = vmatpush1.bf16.msra.mxu1 %v17504_v0  ;;  %13923 = vmatprep.subr.bf16.mxu0 %v17519_v22  ;;  %v958_v0 = vld [vmem:[#allocation10 + $0x3d8] sm:$0xff]  ;;  %v17582_v22 = vcombine.low %v933_v34, %v941_v61  ;;  %v17647_v34 = vcombine.high %v997_v50, %v1005_v54 }
 0x32d   :  { %14251 = vmatprep.subr.bf16.mxu1 %v17521_v23  ;;  %v17584_v23 = vcombine.low %v934_v1, %v942_v5  ;;  %v17601_v24 = vcombine.high %v950_v4, %v958_v0  ;;  %v1013_v1 = vld [vmem:[#allocation10 + $0x590] sm:$0xff] }
 0x32e   :  { %v1021_v5 = vld [vmem:[#allocation10 + $0x5d0] sm:$0xff] }
 0x32f   :  { %13924 = vmatpush1.bf16.msra.mxu0 %v17518_v35  ;;  %v966_v35 = vld [vmem:[#allocation10 + $0x418] sm:$0xff] }
 0x330   :  { %14252 = vmatpush1.bf16.msra.mxu1 %v17520_v30  ;;  %13925 = vmatprep.subr.bf16.mxu0 %v17535_v15  ;;  %v974_v30 = vld [vmem:[#allocation10 + $0x458] sm:$0xff]  ;;  %v17598_v15 = vcombine.low %v949_v20, %v957_v21  ;;  %v17663_v20 = vcombine.high %v1013_v1, %v1021_v5 }
 0x331   :  { %14253 = vmatprep.subr.bf16.mxu1 %v17537_v40  ;;  %v17600_v40 = vcombine.low %v950_v4, %v958_v0  ;;  %v17617_v25 = vcombine.high %v966_v35, %v974_v30  ;;  %v1029_v4 = vld [vmem:[#allocation10 + $0x610] sm:$0xff] }
 0x332   :  { %v1037_v0 = vld [vmem:[#allocation10 + $0x650] sm:$0xff] }
 0x333   :  { %13926 = vmatpush1.bf16.msra.mxu0 %v17534_v9  ;;  %v982_v9 = vld [vmem:[#allocation10 + $0x498] sm:$0xff] }
 0x334   :  { %14254 = vmatpush1.bf16.msra.mxu1 %v17536_v43  ;;  %13927 = vmatprep.subr.bf16.mxu0 %v17551_v63  ;;  %v990_v43 = vld [vmem:[#allocation10 + $0x4d8] sm:$0xff]  ;;  %v17614_v63 = vcombine.low %v965_v27, %v973_v26  ;;  %v17679_v27 = vcombine.high %v1029_v4, %v1037_v0 }
 0x335   :  { %14255 = vmatprep.subr.bf16.mxu1 %v17553_v28  ;;  %v17616_v28 = vcombine.low %v966_v35, %v974_v30  ;;  %v17633_v49 = vcombine.high %v982_v9, %v990_v43  ;;  %v1045_v35 = vld [vmem:[#allocation10 + $0x690] sm:$0xff] }
 0x336   :  { %v1053_v30 = vld [vmem:[#allocation10 + $0x6d0] sm:$0xff] }
 0x337   :  { %13928 = vmatpush1.bf16.msra.mxu0 %v17550_v58  ;;  %v998_v58 = vld [vmem:[#allocation10 + $0x518] sm:$0xff] }
 0x338   :  { %14256 = vmatpush1.bf16.msra.mxu1 %v17552_v7  ;;  %13929 = vmatprep.subr.bf16.mxu0 %v17567_v47  ;;  %v1006_v7 = vld [vmem:[#allocation10 + $0x558] sm:$0xff]  ;;  %v17630_v47 = vcombine.low %v981_v48, %v989_v42  ;;  %v17695_v48 = vcombine.high %v1045_v35, %v1053_v30 }
 0x339   :  { %14257 = vmatprep.subr.bf16.mxu1 %v17569_v60  ;;  %v17632_v60 = vcombine.low %v982_v9, %v990_v43  ;;  %v17649_v61 = vcombine.high %v998_v58, %v1006_v7  ;;  %v1061_v9 = vld [vmem:[#allocation10 + $0x710] sm:$0xff] }
 0x33a   :  { %v1069_v43 = vld [vmem:[#allocation10 + $0x750] sm:$0xff] }
 0x33b   :  { %13930 = vmatpush1.bf16.msra.mxu0 %v17566_v8  ;;  %v1014_v8 = vld [vmem:[#allocation10 + $0x598] sm:$0xff] }
 0x33c   :  { %14258 = vmatpush1.bf16.msra.mxu1 %v17568_v11  ;;  %13931 = vmatprep.subr.bf16.mxu0 %v17583_v18  ;;  %v1022_v11 = vld [vmem:[#allocation10 + $0x5d8] sm:$0xff]  ;;  %v17646_v18 = vcombine.low %v997_v50, %v1005_v54  ;;  %v17711_v50 = vcombine.high %v1061_v9, %v1069_v43 }
 0x33d   :  { %14259 = vmatprep.subr.bf16.mxu1 %v17585_v19  ;;  %v17648_v19 = vcombine.low %v998_v58, %v1006_v7  ;;  %v17665_v21 = vcombine.high %v1014_v8, %v1022_v11  ;;  %v1077_v58 = vld [vmem:[#allocation10 + $0x790] sm:$0xff] }
 0x33e   :  { %v1085_v7 = vld [vmem:[#allocation10 + $0x7d0] sm:$0xff] }
 0x33f   :  { %13932 = vmatpush1.bf16.msra.mxu0 %v17582_v22  ;;  %v1030_v22 = vld [vmem:[#allocation10 + $0x618] sm:$0xff] }
 0x340   :  { %14260 = vmatpush1.bf16.msra.mxu1 %v17584_v23  ;;  %13933 = vmatprep.subr.bf16.mxu0 %v17599_v31  ;;  %v1038_v23 = vld [vmem:[#allocation10 + $0x658] sm:$0xff]  ;;  %v17662_v31 = vcombine.low %v1013_v1, %v1021_v5  ;;  %v17727_v1 = vcombine.high %v1077_v58, %v1085_v7 }
 0x341   :  { %14261 = vmatprep.subr.bf16.mxu1 %v17601_v24  ;;  %v17664_v24 = vcombine.low %v1014_v8, %v1022_v11  ;;  %v17681_v26 = vcombine.high %v1030_v22, %v1038_v23  ;;  %v1093_v8 = vld [vmem:[#allocation10 + $0x810] sm:$0xff] }
 0x342   :  { %v1101_v11 = vld [vmem:[#allocation10 + $0x850] sm:$0xff] }
 0x343   :  { %13934 = vmatpush1.bf16.msra.mxu0 %v17598_v15  ;;  %v1046_v15 = vld [vmem:[#allocation10 + $0x698] sm:$0xff] }
 0x344   :  { %14262 = vmatpush1.bf16.msra.mxu1 %v17600_v40  ;;  %13935 = vmatprep.subr.bf16.mxu0 %v17615_v36  ;;  %v1054_v40 = vld [vmem:[#allocation10 + $0x6d8] sm:$0xff]  ;;  %v17678_v36 = vcombine.low %v1029_v4, %v1037_v0  ;;  %v17743_v4 = vcombine.high %v1093_v8, %v1101_v11 }
 0x345   :  { %14263 = vmatprep.subr.bf16.mxu1 %v17617_v25  ;;  %v17680_v25 = vcombine.low %v1030_v22, %v1038_v23  ;;  %v17697_v42 = vcombine.high %v1046_v15, %v1054_v40  ;;  %v1109_v22 = vld [vmem:[#allocation10 + $0x890] sm:$0xff] }
 0x346   :  { %v1117_v23 = vld [vmem:[#allocation10 + $0x8d0] sm:$0xff] }
 0x347   :  { %13936 = vmatpush1.bf16.msra.mxu0 %v17614_v63  ;;  %v1062_v63 = vld [vmem:[#allocation10 + $0x718] sm:$0xff] }
 0x348   :  { %14264 = vmatpush1.bf16.msra.mxu1 %v17616_v28  ;;  %13937 = vmatprep.subr.bf16.mxu0 %v17631_v45  ;;  %v1070_v28 = vld [vmem:[#allocation10 + $0x758] sm:$0xff]  ;;  %v17694_v45 = vcombine.low %v1045_v35, %v1053_v30  ;;  %v17759_v35 = vcombine.high %v1109_v22, %v1117_v23  ;;  %v1125_v30 = vld [vmem:[#allocation10 + $0x910] sm:$0xff] }
 0x349   :  { %14265 = vmatprep.subr.bf16.mxu1 %v17633_v49  ;;  %v17696_v49 = vcombine.low %v1046_v15, %v1054_v40  ;;  %v17713_v54 = vcombine.high %v1062_v63, %v1070_v28  ;;  %v1133_v15 = vld [vmem:[#allocation10 + $0x950] sm:$0xff] }
 0x34b   :  { %13938 = vmatpush1.bf16.msra.mxu0 %v17630_v47  ;;  %v1078_v47 = vld [vmem:[#allocation10 + $0x798] sm:$0xff] }
 0x34c   :  { %14266 = vmatpush1.bf16.msra.mxu1 %v17632_v60  ;;  %13939 = vmatprep.subr.bf16.mxu0 %v17647_v34  ;;  %v1086_v60 = vld [vmem:[#allocation10 + $0x7d8] sm:$0xff]  ;;  %v17710_v34 = vcombine.low %v1061_v9, %v1069_v43  ;;  %v17775_v9 = vcombine.high %v1125_v30, %v1133_v15 }
 0x34d   :  { %14267 = vmatprep.subr.bf16.mxu1 %v17649_v61  ;;  %v17712_v61 = vcombine.low %v1062_v63, %v1070_v28  ;;  %v17729_v5 = vcombine.high %v1078_v47, %v1086_v60  ;;  %v1141_v63 = vld [vmem:[#allocation10 + $0x990] sm:$0xff] }
 0x34e   :  { %v1149_v28 = vld [vmem:[#allocation10 + $0x9d0] sm:$0xff] }
 0x34f   :  { %13940 = vmatpush1.bf16.msra.mxu0 %v17646_v18  ;;  %v1094_v18 = vld [vmem:[#allocation10 + $0x818] sm:$0xff] }
 0x350   :  { %14268 = vmatpush1.bf16.msra.mxu1 %v17648_v19  ;;  %13941 = vmatprep.subr.bf16.mxu0 %v17663_v20  ;;  %v1102_v19 = vld [vmem:[#allocation10 + $0x858] sm:$0xff]  ;;  %v17726_v20 = vcombine.low %v1077_v58, %v1085_v7  ;;  %v17791_v58 = vcombine.high %v1141_v63, %v1149_v28 }
 0x351   :  { %14269 = vmatprep.subr.bf16.mxu1 %v17665_v21  ;;  %v17728_v21 = vcombine.low %v1078_v47, %v1086_v60  ;;  %v17745_v0 = vcombine.high %v1094_v18, %v1102_v19  ;;  %v1157_v47 = vld [vmem:[#allocation10 + $0xa10] sm:$0xff] }
 0x352   :  { %v1165_v60 = vld [vmem:[#allocation10 + $0xa50] sm:$0xff] }
 0x353   :  { %13942 = vmatpush1.bf16.msra.mxu0 %v17662_v31  ;;  %v17742_v31 = vcombine.low %v1093_v8, %v1101_v11  ;;  %v17807_v8 = vcombine.high %v1157_v47, %v1165_v60 }
 0x354   :  { %14270 = vmatpush1.bf16.msra.mxu1 %v17664_v24  ;;  %13943 = vmatprep.subr.bf16.mxu0 %v17679_v27  ;;  %v1110_v24 = vld [vmem:[#allocation10 + $0x898] sm:$0xff] }
 0x355   :  { %14271 = vmatprep.subr.bf16.mxu1 %v17681_v26  ;;  %v1118_v27 = vld [vmem:[#allocation10 + $0x8d8] sm:$0xff]  ;;  %v17744_v26 = vcombine.low %v1094_v18, %v1102_v19  ;;  %v1173_v18 = vld [vmem:[#allocation10 + $0xa90] sm:$0xff] }
 0x356   :  { %v17761_v40 = vcombine.high %v1110_v24, %v1118_v27  ;;  %v1181_v19 = vld [vmem:[#allocation10 + $0xad0] sm:$0xff] }
 0x357   :  { %13944 = vmatpush1.bf16.msra.mxu0 %v17678_v36  ;;  %v1126_v36 = vld [vmem:[#allocation10 + $0x918] sm:$0xff] }
 0x358   :  { %14272 = vmatpush1.bf16.msra.mxu1 %v17680_v25  ;;  %13945 = vmatprep.subr.bf16.mxu0 %v17695_v48  ;;  %v1134_v25 = vld [vmem:[#allocation10 + $0x958] sm:$0xff]  ;;  %v17758_v48 = vcombine.low %v1109_v22, %v1117_v23  ;;  %v17823_v22 = vcombine.high %v1173_v18, %v1181_v19 }
 0x359   :  { %14273 = vmatprep.subr.bf16.mxu1 %v17697_v42  ;;  %v17760_v42 = vcombine.low %v1110_v24, %v1118_v27  ;;  %v17777_v43 = vcombine.high %v1126_v36, %v1134_v25  ;;  %v1197_v24 = vld [vmem:[#allocation10 + $0xb50] sm:$0xff]  ;;  %v1190_v27 = vld [vmem:[#allocation10 + $0xb18] sm:$0xff] }
 0x35b   :  { %13946 = vmatpush1.bf16.msra.mxu0 %v17694_v45  ;;  %v1142_v45 = vld [vmem:[#allocation10 + $0x998] sm:$0xff] }
 0x35c   :  { %14274 = vmatpush1.bf16.msra.mxu1 %v17696_v49  ;;  %13947 = vmatprep.subr.bf16.mxu0 %v17711_v50  ;;  %v1150_v49 = vld [vmem:[#allocation10 + $0x9d8] sm:$0xff]  ;;  %v17774_v50 = vcombine.low %v1125_v30, %v1133_v15 }
 0x35d   :  { %14275 = vmatprep.subr.bf16.mxu1 %v17713_v54  ;;  %v17776_v54 = vcombine.low %v1126_v36, %v1134_v25  ;;  %v17793_v7 = vcombine.high %v1142_v45, %v1150_v49  ;;  %v1205_v36 = vld [vmem:[#allocation10 + $0xb90] sm:$0xff] }
 0x35e   :  { %v1213_v25 = vld [vmem:[#allocation10 + $0xbd0] sm:$0xff] }
 0x35f   :  { %13948 = vmatpush1.bf16.msra.mxu0 %v17710_v34  ;;  %v1158_v34 = vld [vmem:[#allocation10 + $0xa18] sm:$0xff] }
 0x360   :  { %14276 = vmatpush1.bf16.msra.mxu1 %v17712_v61  ;;  %13949 = vmatprep.subr.bf16.mxu0 %v17727_v1  ;;  %v1166_v61 = vld [vmem:[#allocation10 + $0xa58] sm:$0xff]  ;;  %v17790_v1 = vcombine.low %v1141_v63, %v1149_v28  ;;  %v17855_v63 = vcombine.high %v1205_v36, %v1213_v25 }
 0x361   :  { %14277 = vmatprep.subr.bf16.mxu1 %v17729_v5  ;;  %v17792_v5 = vcombine.low %v1142_v45, %v1150_v49  ;;  %v17809_v11 = vcombine.high %v1158_v34, %v1166_v61  ;;  %v1221_v45 = vld [vmem:[#allocation10 + $0xc10] sm:$0xff] }
 0x362   :  { %v1229_v49 = vld [vmem:[#allocation10 + $0xc50] sm:$0xff] }
 0x363   :  { %13950 = vmatpush1.bf16.msra.mxu0 %v17726_v20  ;;  %v1174_v20 = vld [vmem:[#allocation10 + $0xa98] sm:$0xff] }
 0x364   :  { %14278 = vmatpush1.bf16.msra.mxu1 %v17728_v21  ;;  %13960 = vmatprep.subr.bf16.mxu0 %v17743_v4  ;;  %v1182_v21 = vld [vmem:[#allocation10 + $0xad8] sm:$0xff]  ;;  %v17806_v4 = vcombine.low %v1157_v47, %v1165_v60  ;;  %v17871_v47 = vcombine.high %v1221_v45, %v1229_v49 }
 0x365   :  { %14288 = vmatprep.subr.bf16.mxu1 %v17745_v0  ;;  %v17808_v0 = vcombine.low %v1158_v34, %v1166_v61  ;;  %v17825_v23 = vcombine.high %v1174_v20, %v1182_v21  ;;  %v17824_v30 = vcombine.low %v1174_v20, %v1182_v21  ;;  %v1237_v34 = vld [vmem:[#allocation10 + $0xc90] sm:$0xff] }
 0x366   :  { %13952 = vmatmul.mubr.bf16.vlgmr.msra.gmra.mrb[20].mxu0 %v20664_v39  ;;  %v1245_v61 = vld [vmem:[#allocation10 + $0xcd0] sm:$0xff] }
 0x367   :  { %14280 = vmatmul.mubr.bf16.vlgmr.msra.gmra.mrb[20].mxu1 %v20664_v39  ;;  %13961 = vmatpush1.bf16.msra.mxu0 %v17742_v31  ;;  %v1189_v31 = vld [vmem:[#allocation10 + $0xb10] sm:$0xff] }
 0x368   :  { %13992 = vmatprep.mubr.bf16.mxu0 %v20668_v46  ;;  %14289 = vmatpush1.bf16.msra.mxu1 %v17744_v26  ;;  %v1198_v26 = vld [vmem:[#allocation10 + $0xb58] sm:$0xff]  ;;  %v17839_v15 = vcombine.high %v1189_v31, %v1197_v24  ;;  %v1253_v20 = vld [vmem:[#allocation10 + $0xd10] sm:$0xff] }
 0x369   :  { %14320 = vmatprep.mubr.bf16.mxu1 %v20668_v46  ;;  %13962 = vmatprep.subr.bf16.mxu0 %v17759_v35  ;;  %v17822_v35 = vcombine.low %v1173_v18, %v1181_v19  ;;  %v17887_v18 = vcombine.high %v1237_v34, %v1245_v61  ;;  %v1261_v21 = vld [vmem:[#allocation10 + $0xd50] sm:$0xff] }
 0x36a   :  { %14290 = vmatprep.subr.bf16.mxu1 %v17761_v40  ;;  %v17841_v40 = vcombine.high %v1190_v27, %v1198_v26 }
 0x36b   :  { %13963 = vmatpush1.bf16.msra.mxu0 %v17758_v48  ;;  %v1206_v48 = vld [vmem:[#allocation10 + $0xb98] sm:$0xff] }
 0x36c   :  { %14291 = vmatpush1.bf16.msra.mxu1 %v17760_v42  ;;  %13964 = vmatprep.subr.bf16.mxu0 %v17775_v9  ;;  %v1214_v42 = vld [vmem:[#allocation10 + $0xbd8] sm:$0xff]  ;;  %v17838_v9 = vcombine.low %v1189_v31, %v1197_v24  ;;  %v17903_v31 = vcombine.high %v1253_v20, %v1261_v21 }
 0x36d   :  { %14292 = vmatprep.subr.bf16.mxu1 %v17777_v43  ;;  %v17840_v43 = vcombine.low %v1190_v27, %v1198_v26  ;;  %v17857_v28 = vcombine.high %v1206_v48, %v1214_v42  ;;  %v1269_v27 = vld [vmem:[#allocation10 + $0xd90] sm:$0xff] }
 0x36e   :  { %v1277_v26 = vld [vmem:[#allocation10 + $0xdd0] sm:$0xff] }
 0x36f   :  { %13965 = vmatpush1.bf16.msra.mxu0 %v17774_v50  ;;  %v1222_v50 = vld [vmem:[#allocation10 + $0xc18] sm:$0xff] }
 0x370   :  { %14293 = vmatpush1.bf16.msra.mxu1 %v17776_v54  ;;  %13966 = vmatprep.subr.bf16.mxu0 %v17791_v58  ;;  %v1230_v54 = vld [vmem:[#allocation10 + $0xc58] sm:$0xff]  ;;  %v17854_v58 = vcombine.low %v1205_v36, %v1213_v25  ;;  %v17919_v36 = vcombine.high %v1269_v27, %v1277_v26 }
 0x371   :  { %14294 = vmatprep.subr.bf16.mxu1 %v17793_v7  ;;  %v17856_v7 = vcombine.low %v1206_v48, %v1214_v42  ;;  %v17873_v60 = vcombine.high %v1222_v50, %v1230_v54  ;;  %v1285_v48 = vld [vmem:[#allocation10 + $0xe10] sm:$0xff] }
 0x372   :  { %v1293_v42 = vld [vmem:[#allocation10 + $0xe50] sm:$0xff] }
 0x373   :  { %13967 = vmatpush1.bf16.msra.mxu0 %v17790_v1  ;;  %v1238_v1 = vld [vmem:[#allocation10 + $0xc98] sm:$0xff] }
 0x374   :  { %14295 = vmatpush1.bf16.msra.mxu1 %v17792_v5  ;;  %13968 = vmatprep.subr.bf16.mxu0 %v17807_v8  ;;  %v1246_v5 = vld [vmem:[#allocation10 + $0xcd8] sm:$0xff]  ;;  %v17870_v8 = vcombine.low %v1221_v45, %v1229_v49  ;;  %v17935_v45 = vcombine.high %v1285_v48, %v1293_v42 }
 0x375   :  { %14296 = vmatprep.subr.bf16.mxu1 %v17809_v11  ;;  %v17872_v11 = vcombine.low %v1222_v50, %v1230_v54  ;;  %v17889_v19 = vcombine.high %v1238_v1, %v1246_v5  ;;  %v1301_v50 = vld [vmem:[#allocation10 + $0xe90] sm:$0xff] }
 0x376   :  { %v1309_v54 = vld [vmem:[#allocation10 + $0xed0] sm:$0xff] }
 0x377   :  { %13969 = vmatpush1.bf16.msra.mxu0 %v17806_v4  ;;  %v1254_v4 = vld [vmem:[#allocation10 + $0xd18] sm:$0xff] }
 0x378   :  { %14297 = vmatpush1.bf16.msra.mxu1 %v17808_v0  ;;  %13970 = vmatprep.subr.bf16.mxu0 %v17823_v22  ;;  %v1262_v0 = vld [vmem:[#allocation10 + $0xd58] sm:$0xff]  ;;  %v17886_v22 = vcombine.low %v1237_v34, %v1245_v61  ;;  %v17951_v34 = vcombine.high %v1301_v50, %v1309_v54 }
 0x379   :  { %14298 = vmatprep.subr.bf16.mxu1 %v17825_v23  ;;  %v17888_v23 = vcombine.low %v1238_v1, %v1246_v5  ;;  %v17905_v24 = vcombine.high %v1254_v4, %v1262_v0  ;;  %v1317_v1 = vld [vmem:[#allocation10 + $0xf10] sm:$0xff] }
 0x37a   :  { %v1325_v5 = vld [vmem:[#allocation10 + $0xf50] sm:$0xff] }
 0x37b   :  { %13971 = vmatpush1.bf16.msra.mxu0 %v17822_v35  ;;  %v1270_v35 = vld [vmem:[#allocation10 + $0xd98] sm:$0xff] }
 0x37c   :  { %14299 = vmatpush1.bf16.msra.mxu1 %v17824_v30  ;;  %13972 = vmatprep.subr.bf16.mxu0 %v17839_v15  ;;  %v1278_v30 = vld [vmem:[#allocation10 + $0xdd8] sm:$0xff]  ;;  %v17902_v15 = vcombine.low %v1253_v20, %v1261_v21  ;;  %v17967_v20 = vcombine.high %v1317_v1, %v1325_v5 }
 0x37d   :  { %14300 = vmatprep.subr.bf16.mxu1 %v17841_v40  ;;  %v17904_v40 = vcombine.low %v1254_v4, %v1262_v0  ;;  %v17921_v25 = vcombine.high %v1270_v35, %v1278_v30  ;;  %v1333_v4 = vld [vmem:[#allocation10 + $0xf90] sm:$0xff] }
 0x37e   :  { %v1341_v0 = vld [vmem:[#allocation10 + $0xfd0] sm:$0xff] }
 0x37f   :  { %13973 = vmatpush1.bf16.msra.mxu0 %v17838_v9  ;;  %v1286_v9 = vld [vmem:[#allocation10 + $0xe18] sm:$0xff] }
 0x380   :  { %14301 = vmatpush1.bf16.msra.mxu1 %v17840_v43  ;;  %13974 = vmatprep.subr.bf16.mxu0 %v17855_v63  ;;  %v1294_v43 = vld [vmem:[#allocation10 + $0xe58] sm:$0xff]  ;;  %v17918_v63 = vcombine.low %v1269_v27, %v1277_v26  ;;  %v17983_v27 = vcombine.high %v1333_v4, %v1341_v0 }
 0x381   :  { %14302 = vmatprep.subr.bf16.mxu1 %v17857_v28  ;;  %v17920_v28 = vcombine.low %v1270_v35, %v1278_v30  ;;  %v17937_v49 = vcombine.high %v1286_v9, %v1294_v43  ;;  %v1349_v35 = vld [vmem:[#allocation10 + $0x1010] sm:$0xff] }
 0x382   :  { %v1357_v30 = vld [vmem:[#allocation10 + $0x1050] sm:$0xff] }
 0x383   :  { %13975 = vmatpush1.bf16.msra.mxu0 %v17854_v58  ;;  %v1302_v58 = vld [vmem:[#allocation10 + $0xe98] sm:$0xff] }
 0x384   :  { %14303 = vmatpush1.bf16.msra.mxu1 %v17856_v7  ;;  %13976 = vmatprep.subr.bf16.mxu0 %v17871_v47  ;;  %v1310_v7 = vld [vmem:[#allocation10 + $0xed8] sm:$0xff]  ;;  %v17934_v47 = vcombine.low %v1285_v48, %v1293_v42  ;;  %v17999_v48 = vcombine.high %v1349_v35, %v1357_v30 }
 0x385   :  { %14304 = vmatprep.subr.bf16.mxu1 %v17873_v60  ;;  %v17936_v60 = vcombine.low %v1286_v9, %v1294_v43  ;;  %v17953_v61 = vcombine.high %v1302_v58, %v1310_v7  ;;  %v1365_v9 = vld [vmem:[#allocation10 + $0x1090] sm:$0xff] }
 0x386   :  { %v1373_v43 = vld [vmem:[#allocation10 + $0x10d0] sm:$0xff] }
 0x387   :  { %13977 = vmatpush1.bf16.msra.mxu0 %v17870_v8  ;;  %v1318_v8 = vld [vmem:[#allocation10 + $0xf18] sm:$0xff] }
 0x388   :  { %14305 = vmatpush1.bf16.msra.mxu1 %v17872_v11  ;;  %13978 = vmatprep.subr.bf16.mxu0 %v17887_v18  ;;  %v1326_v11 = vld [vmem:[#allocation10 + $0xf58] sm:$0xff]  ;;  %v17950_v18 = vcombine.low %v1301_v50, %v1309_v54  ;;  %v18015_v50 = vcombine.high %v1365_v9, %v1373_v43  ;;  %v1381_v54 = vld [vmem:[#allocation10 + $0x1110] sm:$0xff] }
 0x389   :  { %14306 = vmatprep.subr.bf16.mxu1 %v17889_v19  ;;  %v17952_v19 = vcombine.low %v1302_v58, %v1310_v7  ;;  %v17969_v21 = vcombine.high %v1318_v8, %v1326_v11  ;;  %v1389_v58 = vld [vmem:[#allocation10 + $0x1150] sm:$0xff] }
 0x38b   :  { %13979 = vmatpush1.bf16.msra.mxu0 %v17886_v22  ;;  %v1334_v22 = vld [vmem:[#allocation10 + $0xf98] sm:$0xff] }
 0x38c   :  { %14307 = vmatpush1.bf16.msra.mxu1 %v17888_v23  ;;  %13980 = vmatprep.subr.bf16.mxu0 %v17903_v31  ;;  %v1342_v23 = vld [vmem:[#allocation10 + $0xfd8] sm:$0xff]  ;;  %v17966_v31 = vcombine.low %v1317_v1, %v1325_v5  ;;  %v18031_v1 = vcombine.high %v1381_v54, %v1389_v58 }
 0x38d   :  { %14308 = vmatprep.subr.bf16.mxu1 %v17905_v24  ;;  %v17968_v24 = vcombine.low %v1318_v8, %v1326_v11  ;;  %v17985_v26 = vcombine.high %v1334_v22, %v1342_v23  ;;  %v1397_v8 = vld [vmem:[#allocation10 + $0x1190] sm:$0xff] }
 0x38e   :  { %v1405_v11 = vld [vmem:[#allocation10 + $0x11d0] sm:$0xff] }
 0x38f   :  { %13981 = vmatpush1.bf16.msra.mxu0 %v17902_v15  ;;  %v1350_v15 = vld [vmem:[#allocation10 + $0x1018] sm:$0xff] }
 0x390   :  { %14309 = vmatpush1.bf16.msra.mxu1 %v17904_v40  ;;  %13982 = vmatprep.subr.bf16.mxu0 %v17919_v36  ;;  %v1358_v40 = vld [vmem:[#allocation10 + $0x1058] sm:$0xff]  ;;  %v17982_v36 = vcombine.low %v1333_v4, %v1341_v0  ;;  %v18047_v4 = vcombine.high %v1397_v8, %v1405_v11 }
 0x391   :  { %14310 = vmatprep.subr.bf16.mxu1 %v17921_v25  ;;  %v17984_v25 = vcombine.low %v1334_v22, %v1342_v23  ;;  %v18001_v42 = vcombine.high %v1350_v15, %v1358_v40  ;;  %v1413_v22 = vld [vmem:[#allocation10 + $0x1210] sm:$0xff] }
 0x392   :  { %v1421_v23 = vld [vmem:[#allocation10 + $0x1250] sm:$0xff] }
 0x393   :  { %13983 = vmatpush1.bf16.msra.mxu0 %v17918_v63  ;;  %v17998_v63 = vcombine.low %v1349_v35, %v1357_v30  ;;  %v18063_v35 = vcombine.high %v1413_v22, %v1421_v23 }
 0x394   :  { %14311 = vmatpush1.bf16.msra.mxu1 %v17920_v28  ;;  %13984 = vmatprep.subr.bf16.mxu0 %v17935_v45  ;;  %v1366_v28 = vld [vmem:[#allocation10 + $0x1098] sm:$0xff] }
 0x395   :  { %14312 = vmatprep.subr.bf16.mxu1 %v17937_v49  ;;  %v1374_v45 = vld [vmem:[#allocation10 + $0x10d8] sm:$0xff]  ;;  %v18000_v49 = vcombine.low %v1350_v15, %v1358_v40  ;;  %v1429_v15 = vld [vmem:[#allocation10 + $0x1290] sm:$0xff] }
 0x396   :  { %v18017_v7 = vcombine.high %v1366_v28, %v1374_v45  ;;  %v1437_v40 = vld [vmem:[#allocation10 + $0x12d0] sm:$0xff] }
 0x397   :  { %13985 = vmatpush1.bf16.msra.mxu0 %v17934_v47  ;;  %v1382_v47 = vld [vmem:[#allocation10 + $0x1118] sm:$0xff] }
 0x398   :  { %14313 = vmatpush1.bf16.msra.mxu1 %v17936_v60  ;;  %13986 = vmatprep.subr.bf16.mxu0 %v17951_v34  ;;  %v1390_v60 = vld [vmem:[#allocation10 + $0x1158] sm:$0xff]  ;;  %v18014_v34 = vcombine.low %v1365_v9, %v1373_v43  ;;  %v18079_v9 = vcombine.high %v1429_v15, %v1437_v40 }
 0x399   :  { %14314 = vmatprep.subr.bf16.mxu1 %v17953_v61  ;;  %v18016_v61 = vcombine.low %v1366_v28, %v1374_v45  ;;  %v18033_v5 = vcombine.high %v1382_v47, %v1390_v60  ;;  %v1453_v28 = vld [vmem:[#allocation10 + $0x1350] sm:$0xff]  ;;  %v1446_v45 = vld [vmem:[#allocation10 + $0x1318] sm:$0xff] }
 0x39b   :  { %13987 = vmatpush1.bf16.msra.mxu0 %v17950_v18  ;;  %v1398_v18 = vld [vmem:[#allocation10 + $0x1198] sm:$0xff] }
 0x39c   :  { %14315 = vmatpush1.bf16.msra.mxu1 %v17952_v19  ;;  %13988 = vmatprep.subr.bf16.mxu0 %v17967_v20  ;;  %v1406_v19 = vld [vmem:[#allocation10 + $0x11d8] sm:$0xff]  ;;  %v18030_v20 = vcombine.low %v1381_v54, %v1389_v58 }
 0x39d   :  { %14316 = vmatprep.subr.bf16.mxu1 %v17969_v21  ;;  %v18032_v21 = vcombine.low %v1382_v47, %v1390_v60  ;;  %v18049_v0 = vcombine.high %v1398_v18, %v1406_v19  ;;  %v1461_v47 = vld [vmem:[#allocation10 + $0x1390] sm:$0xff] }
 0x39e   :  { %v1469_v60 = vld [vmem:[#allocation10 + $0x13d0] sm:$0xff] }
 0x39f   :  { %13989 = vmatpush1.bf16.msra.mxu0 %v17966_v31  ;;  %v1414_v31 = vld [vmem:[#allocation10 + $0x1218] sm:$0xff] }
 0x3a0   :  { %14317 = vmatpush1.bf16.msra.mxu1 %v17968_v24  ;;  %13990 = vmatprep.subr.bf16.mxu0 %v17983_v27  ;;  %v1422_v24 = vld [vmem:[#allocation10 + $0x1258] sm:$0xff]  ;;  %v18046_v27 = vcombine.low %v1397_v8, %v1405_v11  ;;  %v18111_v8 = vcombine.high %v1461_v47, %v1469_v60 }
 0x3a1   :  { %14318 = vmatprep.subr.bf16.mxu1 %v17985_v26  ;;  %v18048_v26 = vcombine.low %v1398_v18, %v1406_v19  ;;  %v18065_v30 = vcombine.high %v1414_v31, %v1422_v24  ;;  %v1477_v18 = vld [vmem:[#allocation10 + $0x1410] sm:$0xff] }
 0x3a2   :  { %v1485_v19 = vld [vmem:[#allocation10 + $0x1450] sm:$0xff] }
 0x3a3   :  { %13991 = vmatpush1.bf16.msra.mxu0 %v17982_v36  ;;  %v1430_v36 = vld [vmem:[#allocation10 + $0x1298] sm:$0xff] }
 0x3a4   :  { %14319 = vmatpush1.bf16.msra.mxu1 %v17984_v25  ;;  %14001 = vmatprep.subr.bf16.mxu0 %v17999_v48  ;;  %v1438_v25 = vld [vmem:[#allocation10 + $0x12d8] sm:$0xff]  ;;  %v18062_v48 = vcombine.low %v1413_v22, %v1421_v23  ;;  %v18127_v22 = vcombine.high %v1477_v18, %v1485_v19 }
 0x3a5   :  { %14329 = vmatprep.subr.bf16.mxu1 %v18001_v42  ;;  %v18064_v42 = vcombine.low %v1414_v31, %v1422_v24  ;;  %v18081_v43 = vcombine.high %v1430_v36, %v1438_v25  ;;  %v18080_v54 = vcombine.low %v1430_v36, %v1438_v25  ;;  %v1493_v31 = vld [vmem:[#allocation10 + $0x1490] sm:$0xff] }
 0x3a6   :  { %13993 = vmatmul.mubr.bf16.vlgmr.msra.gmra.mrb[20].mxu0 %v20702_v38  ;;  %v1501_v24 = vld [vmem:[#allocation10 + $0x14d0] sm:$0xff] }
 0x3a7   :  { %14321 = vmatmul.mubr.bf16.vlgmr.msra.gmra.mrb[20].mxu1 %v20702_v38  ;;  %14002 = vmatpush1.bf16.msra.mxu0 %v17998_v63  ;;  %v1445_v63 = vld [vmem:[#allocation10 + $0x1310] sm:$0xff] }
 0x3a8   :  { %14033 = vmatprep.mubr.bf16.mxu0 %v20704_v51  ;;  %14330 = vmatpush1.bf16.msra.mxu1 %v18000_v49  ;;  %v1454_v49 = vld [vmem:[#allocation10 + $0x1358] sm:$0xff]  ;;  %v18095_v58 = vcombine.high %v1445_v63, %v1453_v28  ;;  %v1509_v36 = vld [vmem:[#allocation10 + $0x1510] sm:$0xff] }
 0x3a9   :  { %14361 = vmatprep.mubr.bf16.mxu1 %v20704_v51  ;;  %14003 = vmatprep.subr.bf16.mxu0 %v18015_v50  ;;  %v18078_v50 = vcombine.low %v1429_v15, %v1437_v40  ;;  %v18143_v15 = vcombine.high %v1493_v31, %v1501_v24  ;;  %v1517_v25 = vld [vmem:[#allocation10 + $0x1550] sm:$0xff] }
 0x3aa   :  { %14331 = vmatprep.subr.bf16.mxu1 %v18017_v7  ;;  %v18097_v7 = vcombine.high %v1446_v45, %v1454_v49 }
 0x3ab   :  { %14004 = vmatpush1.bf16.msra.mxu0 %v18014_v34  ;;  %v1462_v34 = vld [vmem:[#allocation10 + $0x1398] sm:$0xff] }
 0x3ac   :  { %14332 = vmatpush1.bf16.msra.mxu1 %v18016_v61  ;;  %14005 = vmatprep.subr.bf16.mxu0 %v18031_v1  ;;  %v1470_v61 = vld [vmem:[#allocation10 + $0x13d8] sm:$0xff]  ;;  %v18094_v1 = vcombine.low %v1445_v63, %v1453_v28  ;;  %v18159_v63 = vcombine.high %v1509_v36, %v1517_v25 }
 0x3ad   :  { %14333 = vmatprep.subr.bf16.mxu1 %v18033_v5  ;;  %v18096_v5 = vcombine.low %v1446_v45, %v1454_v49  ;;  %v18113_v11 = vcombine.high %v1462_v34, %v1470_v61  ;;  %v1525_v45 = vld [vmem:[#allocation10 + $0x1590] sm:$0xff] }
 0x3ae   :  { %v1533_v49 = vld [vmem:[#allocation10 + $0x15d0] sm:$0xff] }
 0x3af   :  { %14006 = vmatpush1.bf16.msra.mxu0 %v18030_v20  ;;  %v1478_v20 = vld [vmem:[#allocation10 + $0x1418] sm:$0xff] }
 0x3b0   :  { %14334 = vmatpush1.bf16.msra.mxu1 %v18032_v21  ;;  %14007 = vmatprep.subr.bf16.mxu0 %v18047_v4  ;;  %v1486_v21 = vld [vmem:[#allocation10 + $0x1458] sm:$0xff]  ;;  %v18110_v4 = vcombine.low %v1461_v47, %v1469_v60  ;;  %v18175_v47 = vcombine.high %v1525_v45, %v1533_v49 }
 0x3b1   :  { %14335 = vmatprep.subr.bf16.mxu1 %v18049_v0  ;;  %v18112_v0 = vcombine.low %v1462_v34, %v1470_v61  ;;  %v18129_v23 = vcombine.high %v1478_v20, %v1486_v21  ;;  %v1541_v34 = vld [vmem:[#allocation10 + $0x1610] sm:$0xff] }
 0x3b2   :  { %v1549_v61 = vld [vmem:[#allocation10 + $0x1650] sm:$0xff] }
 0x3b3   :  { %14008 = vmatpush1.bf16.msra.mxu0 %v18046_v27  ;;  %v1494_v27 = vld [vmem:[#allocation10 + $0x1498] sm:$0xff] }
 0x3b4   :  { %14336 = vmatpush1.bf16.msra.mxu1 %v18048_v26  ;;  %14009 = vmatprep.subr.bf16.mxu0 %v18063_v35  ;;  %v1502_v26 = vld [vmem:[#allocation10 + $0x14d8] sm:$0xff]  ;;  %v18126_v35 = vcombine.low %v1477_v18, %v1485_v19  ;;  %v18191_v18 = vcombine.high %v1541_v34, %v1549_v61 }
 0x3b5   :  { %14337 = vmatprep.subr.bf16.mxu1 %v18065_v30  ;;  %v18128_v30 = vcombine.low %v1478_v20, %v1486_v21  ;;  %v18145_v40 = vcombine.high %v1494_v27, %v1502_v26  ;;  %v1557_v20 = vld [vmem:[#allocation10 + $0x1690] sm:$0xff] }
 0x3b6   :  { %v1565_v21 = vld [vmem:[#allocation10 + $0x16d0] sm:$0xff] }
 0x3b7   :  { %14010 = vmatpush1.bf16.msra.mxu0 %v18062_v48  ;;  %v1510_v48 = vld [vmem:[#allocation10 + $0x1518] sm:$0xff] }
 0x3b8   :  { %14338 = vmatpush1.bf16.msra.mxu1 %v18064_v42  ;;  %14011 = vmatprep.subr.bf16.mxu0 %v18079_v9  ;;  %v1518_v42 = vld [vmem:[#allocation10 + $0x1558] sm:$0xff]  ;;  %v18142_v9 = vcombine.low %v1493_v31, %v1501_v24  ;;  %v18207_v31 = vcombine.high %v1557_v20, %v1565_v21 }
 0x3b9   :  { %14339 = vmatprep.subr.bf16.mxu1 %v18081_v43  ;;  %v18144_v43 = vcombine.low %v1494_v27, %v1502_v26  ;;  %v18161_v28 = vcombine.high %v1510_v48, %v1518_v42  ;;  %v1573_v27 = vld [vmem:[#allocation10 + $0x1710] sm:$0xff] }
 0x3ba   :  { %v1581_v26 = vld [vmem:[#allocation10 + $0x1750] sm:$0xff] }
 0x3bb   :  { %14012 = vmatpush1.bf16.msra.mxu0 %v18078_v50  ;;  %v1526_v50 = vld [vmem:[#allocation10 + $0x1598] sm:$0xff] }
 0x3bc   :  { %14340 = vmatpush1.bf16.msra.mxu1 %v18080_v54  ;;  %14013 = vmatprep.subr.bf16.mxu0 %v18095_v58  ;;  %v1534_v54 = vld [vmem:[#allocation10 + $0x15d8] sm:$0xff]  ;;  %v18158_v58 = vcombine.low %v1509_v36, %v1517_v25  ;;  %v18223_v36 = vcombine.high %v1573_v27, %v1581_v26 }
 0x3bd   :  { %14341 = vmatprep.subr.bf16.mxu1 %v18097_v7  ;;  %v18160_v7 = vcombine.low %v1510_v48, %v1518_v42  ;;  %v18177_v60 = vcombine.high %v1526_v50, %v1534_v54  ;;  %v1589_v48 = vld [vmem:[#allocation10 + $0x1790] sm:$0xff] }
 0x3be   :  { %v1597_v42 = vld [vmem:[#allocation10 + $0x17d0] sm:$0xff] }
 0x3bf   :  { %14014 = vmatpush1.bf16.msra.mxu0 %v18094_v1  ;;  %v1542_v1 = vld [vmem:[#allocation10 + $0x1618] sm:$0xff] }
 0x3c0   :  { %14342 = vmatpush1.bf16.msra.mxu1 %v18096_v5  ;;  %14015 = vmatprep.subr.bf16.mxu0 %v18111_v8  ;;  %v1550_v5 = vld [vmem:[#allocation10 + $0x1658] sm:$0xff]  ;;  %v18174_v8 = vcombine.low %v1525_v45, %v1533_v49  ;;  %v18239_v45 = vcombine.high %v1589_v48, %v1597_v42 }
 0x3c1   :  { %14343 = vmatprep.subr.bf16.mxu1 %v18113_v11  ;;  %v18176_v11 = vcombine.low %v1526_v50, %v1534_v54  ;;  %v18193_v19 = vcombine.high %v1542_v1, %v1550_v5  ;;  %v1605_v50 = vld [vmem:[#allocation10 + $0x1810] sm:$0xff] }
 0x3c2   :  { %v1613_v54 = vld [vmem:[#allocation10 + $0x1850] sm:$0xff] }
 0x3c3   :  { %14016 = vmatpush1.bf16.msra.mxu0 %v18110_v4  ;;  %v1558_v4 = vld [vmem:[#allocation10 + $0x1698] sm:$0xff] }
 0x3c4   :  { %14344 = vmatpush1.bf16.msra.mxu1 %v18112_v0  ;;  %14017 = vmatprep.subr.bf16.mxu0 %v18127_v22  ;;  %v1566_v0 = vld [vmem:[#allocation10 + $0x16d8] sm:$0xff]  ;;  %v18190_v22 = vcombine.low %v1541_v34, %v1549_v61  ;;  %v18255_v34 = vcombine.high %v1605_v50, %v1613_v54 }
 0x3c5   :  { %14345 = vmatprep.subr.bf16.mxu1 %v18129_v23  ;;  %v18192_v23 = vcombine.low %v1542_v1, %v1550_v5  ;;  %v18209_v24 = vcombine.high %v1558_v4, %v1566_v0  ;;  %v1621_v1 = vld [vmem:[#allocation10 + $0x1890] sm:$0xff] }
 0x3c6   :  { %v1629_v5 = vld [vmem:[#allocation10 + $0x18d0] sm:$0xff] }
 0x3c7   :  { %14018 = vmatpush1.bf16.msra.mxu0 %v18126_v35  ;;  %v1574_v35 = vld [vmem:[#allocation10 + $0x1718] sm:$0xff] }
 0x3c8   :  { %14346 = vmatpush1.bf16.msra.mxu1 %v18128_v30  ;;  %14019 = vmatprep.subr.bf16.mxu0 %v18143_v15  ;;  %v1582_v30 = vld [vmem:[#allocation10 + $0x1758] sm:$0xff]  ;;  %v18206_v15 = vcombine.low %v1557_v20, %v1565_v21  ;;  %v18271_v20 = vcombine.high %v1621_v1, %v1629_v5  ;;  %v1637_v21 = vld [vmem:[#allocation10 + $0x1910] sm:$0xff] }
 0x3c9   :  { %14347 = vmatprep.subr.bf16.mxu1 %v18145_v40  ;;  %v18208_v40 = vcombine.low %v1558_v4, %v1566_v0  ;;  %v18225_v25 = vcombine.high %v1574_v35, %v1582_v30  ;;  %v1645_v4 = vld [vmem:[#allocation10 + $0x1950] sm:$0xff] }
 0x3cb   :  { %14020 = vmatpush1.bf16.msra.mxu0 %v18142_v9  ;;  %v1590_v9 = vld [vmem:[#allocation10 + $0x1798] sm:$0xff] }
 0x3cc   :  { %14348 = vmatpush1.bf16.msra.mxu1 %v18144_v43  ;;  %14021 = vmatprep.subr.bf16.mxu0 %v18159_v63  ;;  %v1598_v43 = vld [vmem:[#allocation10 + $0x17d8] sm:$0xff]  ;;  %v18222_v63 = vcombine.low %v1573_v27, %v1581_v26  ;;  %v18287_v27 = vcombine.high %v1637_v21, %v1645_v4 }
 0x3cd   :  { %14349 = vmatprep.subr.bf16.mxu1 %v18161_v28  ;;  %v18224_v28 = vcombine.low %v1574_v35, %v1582_v30  ;;  %v18241_v49 = vcombine.high %v1590_v9, %v1598_v43  ;;  %v1653_v35 = vld [vmem:[#allocation10 + $0x1990] sm:$0xff] }
 0x3ce   :  { %v1661_v30 = vld [vmem:[#allocation10 + $0x19d0] sm:$0xff] }
 0x3cf   :  { %14022 = vmatpush1.bf16.msra.mxu0 %v18158_v58  ;;  %v1606_v58 = vld [vmem:[#allocation10 + $0x1818] sm:$0xff] }
 0x3d0   :  { %14350 = vmatpush1.bf16.msra.mxu1 %v18160_v7  ;;  %14023 = vmatprep.subr.bf16.mxu0 %v18175_v47  ;;  %v1614_v7 = vld [vmem:[#allocation10 + $0x1858] sm:$0xff]  ;;  %v18238_v47 = vcombine.low %v1589_v48, %v1597_v42  ;;  %v18303_v48 = vcombine.high %v1653_v35, %v1661_v30 }
 0x3d1   :  { %14351 = vmatprep.subr.bf16.mxu1 %v18177_v60  ;;  %v18240_v60 = vcombine.low %v1590_v9, %v1598_v43  ;;  %v18257_v61 = vcombine.high %v1606_v58, %v1614_v7  ;;  %v1669_v9 = vld [vmem:[#allocation10 + $0x1a10] sm:$0xff] }
 0x3d2   :  { %v1677_v43 = vld [vmem:[#allocation10 + $0x1a50] sm:$0xff] }
 0x3d3   :  { %14024 = vmatpush1.bf16.msra.mxu0 %v18174_v8  ;;  %v18254_v8 = vcombine.low %v1605_v50, %v1613_v54  ;;  %v18319_v50 = vcombine.high %v1669_v9, %v1677_v43 }
 0x3d4   :  { %14352 = vmatpush1.bf16.msra.mxu1 %v18176_v11  ;;  %14025 = vmatprep.subr.bf16.mxu0 %v18191_v18  ;;  %v1622_v11 = vld [vmem:[#allocation10 + $0x1898] sm:$0xff] }
 0x3d5   :  { %14353 = vmatprep.subr.bf16.mxu1 %v18193_v19  ;;  %v1630_v18 = vld [vmem:[#allocation10 + $0x18d8] sm:$0xff]  ;;  %v18256_v19 = vcombine.low %v1606_v58, %v1614_v7  ;;  %v1685_v58 = vld [vmem:[#allocation10 + $0x1a90] sm:$0xff] }
 0x3d6   :  { %v18273_v0 = vcombine.high %v1622_v11, %v1630_v18  ;;  %v1693_v7 = vld [vmem:[#allocation10 + $0x1ad0] sm:$0xff] }
 0x3d7   :  { %14026 = vmatpush1.bf16.msra.mxu0 %v18190_v22  ;;  %v1638_v22 = vld [vmem:[#allocation10 + $0x1918] sm:$0xff] }
 0x3d8   :  { %14354 = vmatpush1.bf16.msra.mxu1 %v18192_v23  ;;  %14027 = vmatprep.subr.bf16.mxu0 %v18207_v31  ;;  %v1646_v23 = vld [vmem:[#allocation10 + $0x1958] sm:$0xff]  ;;  %v18270_v31 = vcombine.low %v1621_v1, %v1629_v5  ;;  %v18335_v1 = vcombine.high %v1685_v58, %v1693_v7 }
 0x3d9   :  { %14355 = vmatprep.subr.bf16.mxu1 %v18209_v24  ;;  %v18272_v24 = vcombine.low %v1622_v11, %v1630_v18  ;;  %v18289_v26 = vcombine.high %v1638_v22, %v1646_v23  ;;  %v1709_v11 = vld [vmem:[#allocation10 + $0x1b50] sm:$0xff]  ;;  %v1702_v18 = vld [vmem:[#allocation10 + $0x1b18] sm:$0xff] }
 0x3db   :  { %14028 = vmatpush1.bf16.msra.mxu0 %v18206_v15  ;;  %v1654_v15 = vld [vmem:[#allocation10 + $0x1998] sm:$0xff] }
 0x3dc   :  { %14356 = vmatpush1.bf16.msra.mxu1 %v18208_v40  ;;  %14029 = vmatprep.subr.bf16.mxu0 %v18223_v36  ;;  %v1662_v40 = vld [vmem:[#allocation10 + $0x19d8] sm:$0xff]  ;;  %v18286_v36 = vcombine.low %v1637_v21, %v1645_v4 }
 0x3dd   :  { %14357 = vmatprep.subr.bf16.mxu1 %v18225_v25  ;;  %v18288_v25 = vcombine.low %v1638_v22, %v1646_v23  ;;  %v18305_v42 = vcombine.high %v1654_v15, %v1662_v40  ;;  %v1717_v23 = vld [vmem:[#allocation10 + $0x1b90] sm:$0xff] }
 0x3df   :  { %14030 = vmatpush1.bf16.msra.mxu0 %v18222_v63  ;;  %v1670_v63 = vld [vmem:[#allocation10 + $0x1a18] sm:$0xff] }
 0x3e0   :  { %14358 = vmatpush1.bf16.msra.mxu1 %v18224_v28  ;;  %14031 = vmatprep.subr.bf16.mxu0 %v18239_v45  ;;  %v1678_v28 = vld [vmem:[#allocation10 + $0x1a58] sm:$0xff]  ;;  %v18302_v45 = vcombine.low %v1653_v35, %v1661_v30 }
 0x3e1   :  { %14359 = vmatprep.subr.bf16.mxu1 %v18241_v49  ;;  %v18304_v49 = vcombine.low %v1654_v15, %v1662_v40  ;;  %v18321_v54 = vcombine.high %v1670_v63, %v1678_v28  ;;  %v1726_v35 = vld [vmem:[#allocation10 + $0x1bd8] sm:$0xff] }
 0x3e3   :  { %14032 = vmatpush1.bf16.msra.mxu0 %v18238_v47  ;;  %v1686_v47 = vld [vmem:[#allocation10 + $0x1a98] sm:$0xff] }
 0x3e4   :  { %14360 = vmatpush1.bf16.msra.mxu1 %v18240_v60  ;;  %14042 = vmatprep.subr.bf16.mxu0 %v18255_v34  ;;  %v1694_v60 = vld [vmem:[#allocation10 + $0x1ad8] sm:$0xff]  ;;  %v18318_v34 = vcombine.low %v1669_v9, %v1677_v43 }
 0x3e5   :  { %14370 = vmatprep.subr.bf16.mxu1 %v18257_v61  ;;  %v18320_v61 = vcombine.low %v1670_v63, %v1678_v28  ;;  %v18337_v5 = vcombine.high %v1686_v47, %v1694_v60  ;;  %v18336_v21 = vcombine.low %v1686_v47, %v1694_v60  ;;  %v1733_v63 = vld [vmem:[#allocation10 + $0x1c10] sm:$0xff] }
 0x3e6   :  { %14034 = vmatmul.mubr.bf16.vlgmr.msra.gmra.mrb[20].mxu0 %v20722_v41  ;;  %v1741_v28 = vld [vmem:[#allocation10 + $0x1c50] sm:$0xff] }
 0x3e7   :  { %14362 = vmatmul.mubr.bf16.vlgmr.msra.gmra.mrb[20].mxu1 %v20722_v41  ;;  %14043 = vmatpush1.bf16.msra.mxu0 %v18254_v8  ;;  %v1701_v8 = vld [vmem:[#allocation10 + $0x1b10] sm:$0xff] }
 0x3e8   :  { %14074 = vmatprep.mubr.bf16.mxu0 %v20724_v55  ;;  %14371 = vmatpush1.bf16.msra.mxu1 %v18256_v19  ;;  %v1710_v19 = vld [vmem:[#allocation10 + $0x1b58] sm:$0xff]  ;;  %v18351_v4 = vcombine.high %v1701_v8, %v1709_v11  ;;  %v18350_v40 = vcombine.low %v1701_v8, %v1709_v11  ;;  %v1749_v47 = vld [vmem:[#allocation10 + $0x1c90] sm:$0xff] }
 0x3e9   :  { %14402 = vmatprep.mubr.bf16.mxu1 %v20724_v55  ;;  %14044 = vmatprep.subr.bf16.mxu0 %v18271_v20  ;;  %v18334_v20 = vcombine.low %v1685_v58, %v1693_v7  ;;  %v18353_v22 = vcombine.high %v1702_v18, %v1710_v19  ;;  %v18383_v58 = vcombine.high %v1733_v63, %v1741_v28  ;;  %v1757_v60 = vld [vmem:[#allocation10 + $0x1cd0] sm:$0xff] }
 0x3ea   :  { %14372 = vmatprep.subr.bf16.mxu1 %v18273_v0  ;;  %v18399_v8 = vcombine.high %v1749_v47, %v1757_v60 }
 0x3eb   :  { %14045 = vmatpush1.bf16.msra.mxu0 %v18270_v31  ;;  %v1725_v31 = vld [vmem:[#allocation10 + $0x1bd0] sm:$0xff] }
 0x3ec   :  { %14373 = vmatpush1.bf16.msra.mxu1 %v18272_v24  ;;  %14046 = vmatprep.subr.bf16.mxu0 %v18287_v27 }
 0x3ed   :  { %14374 = vmatprep.subr.bf16.mxu1 %v18289_v26  ;;  %v1718_v26 = vld [vmem:[#allocation10 + $0x1b98] sm:$0xff] }
 0x3ee   :  { %v18369_v43 = vcombine.high %v1718_v26, %v1726_v35 }
 0x3ef   :  { %14047 = vmatpush1.bf16.msra.mxu0 %v18286_v36 }
 0x3f0   :  { %14375 = vmatpush1.bf16.msra.mxu1 %v18288_v25  ;;  %14048 = vmatprep.subr.bf16.mxu0 %v18303_v48  ;;  %v18352_v48 = vcombine.low %v1702_v18, %v1710_v19  ;;  %v1765_v18 = vld [vmem:[#allocation10 + $0x1d10] sm:$0xff] }
 0x3f1   :  { %14376 = vmatprep.subr.bf16.mxu1 %v18305_v42  ;;  %v18367_v42 = vcombine.high %v1717_v23, %v1725_v31  ;;  %v1773_v19 = vld [vmem:[#allocation10 + $0x1d50] sm:$0xff] }
 0x3f3   :  { %14049 = vmatpush1.bf16.msra.mxu0 %v18302_v45  ;;  %v1734_v45 = vld [vmem:[#allocation10 + $0x1c18] sm:$0xff] }
 0x3f4   :  { %14377 = vmatpush1.bf16.msra.mxu1 %v18304_v49  ;;  %14050 = vmatprep.subr.bf16.mxu0 %v18319_v50  ;;  %v1742_v49 = vld [vmem:[#allocation10 + $0x1c58] sm:$0xff]  ;;  %v18366_v50 = vcombine.low %v1717_v23, %v1725_v31  ;;  %v18415_v23 = vcombine.high %v1765_v18, %v1773_v19 }
 0x3f5   :  { %14378 = vmatprep.subr.bf16.mxu1 %v18321_v54  ;;  %v18368_v54 = vcombine.low %v1718_v26, %v1726_v35  ;;  %v18385_v7 = vcombine.high %v1734_v45, %v1742_v49  ;;  %v1781_v26 = vld [vmem:[#allocation10 + $0x1d90] sm:$0xff] }
 0x3f6   :  { %v1789_v35 = vld [vmem:[#allocation10 + $0x1dd0] sm:$0xff] }
 0x3f7   :  { %14051 = vmatpush1.bf16.msra.mxu0 %v18318_v34  ;;  %v1750_v34 = vld [vmem:[#allocation10 + $0x1c98] sm:$0xff] }
 0x3f8   :  { %14379 = vmatpush1.bf16.msra.mxu1 %v18320_v61  ;;  %14052 = vmatprep.subr.bf16.mxu0 %v18335_v1  ;;  %v1758_v61 = vld [vmem:[#allocation10 + $0x1cd8] sm:$0xff]  ;;  %v18382_v1 = vcombine.low %v1733_v63, %v1741_v28 }
 0x3f9   :  { %v20821_v0 = vpop.f32.mrb[16].mxu0  ;;  %14380 = vmatprep.subr.bf16.mxu1 %v18337_v5  ;;  %v18384_v5 = vcombine.low %v1734_v45, %v1742_v49  ;;  %v18401_v11 = vcombine.high %v1750_v34, %v1758_v61  ;;  %v1798_v63 = vld [vmem:[#allocation10 + $0x1e18] sm:$0xff]  ;;  %v18430_v45 = vcombine.low %v1781_v26, %v1789_v35 }
 0x3fa   :  { %v20823_v24 = vpop.f32.mrb[16].mxu1  ;;  %v20825_v27 = vpop.f32.mrb[17].mxu0  ;;  %v1806_v28 = vld [vmem:[#allocation10 + $0x1e58] sm:$0xff] }
 0x3fb   :  { %v20827_v30 = vpop.f32.mrb[17].mxu1  ;;  %v13588_v15 = vpop.f32.mrb[18].mxu0  ;;  %14053 = vmatpush1.bf16.msra.mxu0 %v18334_v20  ;;  %v1766_v20 = vld [vmem:[#allocation10 + $0x1d18] sm:$0xff] }
 0x3fc   :  { %v13916_v36 = vpop.f32.mrb[18].mxu1  ;;  %14381 = vmatpush1.bf16.msra.mxu1 %v18336_v21  ;;  %v13589_v25 = vpop.f32.mrb[19].mxu0  ;;  %14054 = vmatprep.subr.bf16.mxu0 %v18351_v4  ;;  %v1774_v21 = vld [vmem:[#allocation10 + $0x1d58] sm:$0xff]  ;;  %v18398_v4 = vcombine.low %v1749_v47, %v1757_v60 }
 0x3fd   :  { %v13917_v9 = vpop.f32.mrb[19].mxu1  ;;  %14382 = vmatprep.subr.bf16.mxu1 %v18353_v22  ;;  %v18400_v22 = vcombine.low %v1750_v34, %v1758_v61  ;;  %v18417_v31 = vcombine.high %v1766_v20, %v1774_v21  ;;  %v1782_v15 = vld [vmem:[#allocation10 + $0x1d98] sm:$0xff]  ;;  %v18414_v36 = vcombine.low %v1765_v18, %v1773_v19  ;;  %v18416_v25 = vcombine.low %v1766_v20, %v1774_v21 }
 0x3fe   :  { %v1797_v9 = vld [vmem:[#allocation10 + $0x1e10] sm:$0xff]  ;;  %v1814_v47 = vld [vmem:[#allocation10 + $0x1e98] sm:$0xff]  ;;  %v18448_v61 = vcombine.low %v1798_v63, %v1806_v28 }
 0x3ff   :  { %14055 = vmatpush1.bf16.msra.mxu0 %v18350_v40  ;;  %v1790_v40 = vld [vmem:[#allocation10 + $0x1dd8] sm:$0xff] }
 0x400   :  { %14383 = vmatpush1.bf16.msra.mxu1 %v18352_v48  ;;  %14056 = vmatprep.subr.bf16.mxu0 %v18367_v42  ;;  %v18431_v48 = vcombine.high %v1781_v26, %v1789_v35  ;;  %v18433_v42 = vcombine.high %v1782_v15, %v1790_v40  ;;  %v18432_v49 = vcombine.low %v1782_v15, %v1790_v40  ;;  %v1822_v60 = vld [vmem:[#allocation10 + $0x1ed8] sm:$0xff] }
 0x401   :  { %14384 = vmatprep.subr.bf16.mxu1 %v18369_v43  ;;  %v1805_v43 = vld [vmem:[#allocation10 + $0x1e50] sm:$0xff]  ;;  %v1830_v18 = vld [vmem:[#allocation10 + $0x1f18] sm:$0xff]  ;;  %v18464_v21 = vcombine.low %v1814_v47, %v1822_v60 }
 0x402   :  { %v18446_v34 = vcombine.low %v1797_v9, %v1805_v43  ;;  %v1838_v19 = vld [vmem:[#allocation10 + $0x1f58] sm:$0xff] }
 0x403   :  { %14057 = vmatpush1.bf16.msra.mxu0 %v18366_v50  ;;  %v18447_v50 = vcombine.high %v1797_v9, %v1805_v43  ;;  %v1846_v26 = vld [vmem:[#allocation10 + $0x1f98] sm:$0xff]  ;;  %v18480_v40 = vcombine.low %v1830_v18, %v1838_v19 }
 0x404   :  { %14385 = vmatpush1.bf16.msra.mxu1 %v18368_v54  ;;  %14058 = vmatprep.subr.bf16.mxu0 %v18383_v58  ;;  %v18449_v54 = vcombine.high %v1798_v63, %v1806_v28  ;;  %v1813_v58 = vld [vmem:[#allocation10 + $0x1e90] sm:$0xff]  ;;  %v1854_v35 = vld [vmem:[#allocation10 + $0x1fd8] sm:$0xff] }
 0x405   :  { %14386 = vmatprep.subr.bf16.mxu1 %v18385_v7  ;;  %v1821_v7 = vld [vmem:[#allocation10 + $0x1ed0] sm:$0xff]  ;;  %v1862_v9 = vld [vmem:[#allocation10 + $0x2018] sm:$0xff]  ;;  %v18496_v28 = vcombine.low %v1846_v26, %v1854_v35 }
 0x406   :  { %v18462_v20 = vcombine.low %v1813_v58, %v1821_v7  ;;  %v1870_v43 = vld [vmem:[#allocation10 + $0x2058] sm:$0xff] }
 0x407   :  { %14059 = vmatpush1.bf16.msra.mxu0 %v18382_v1  ;;  %v18463_v1 = vcombine.high %v1813_v58, %v1821_v7  ;;  %v1878_v7 = vld [vmem:[#allocation10 + $0x2098] sm:$0xff] }
 0x408   :  { %14387 = vmatpush1.bf16.msra.mxu1 %v18384_v5  ;;  %14060 = vmatprep.subr.bf16.mxu0 %v18399_v8  ;;  %v18465_v5 = vcombine.high %v1814_v47, %v1822_v60  ;;  %v1829_v8 = vld [vmem:[#allocation10 + $0x1f10] sm:$0xff]  ;;  %v1886_v47 = vld [vmem:[#allocation10 + $0x20d8] sm:$0xff]  ;;  %v18512_v60 = vcombine.low %v1862_v9, %v1870_v43 }
 0x409   :  { %14388 = vmatprep.subr.bf16.mxu1 %v18401_v11  ;;  %v1837_v11 = vld [vmem:[#allocation10 + $0x1f50] sm:$0xff] }
 0x40a   :  { %v18478_v15 = vcombine.low %v1829_v8, %v1837_v11 }
 0x40b   :  { %14061 = vmatpush1.bf16.msra.mxu0 %v18398_v4  ;;  %v18479_v4 = vcombine.high %v1829_v8, %v1837_v11  ;;  %v1894_v8 = vld [vmem:[#allocation10 + $0x2118] sm:$0xff] }
 0x40c   :  { %14389 = vmatpush1.bf16.msra.mxu1 %v18400_v22  ;;  %14062 = vmatprep.subr.bf16.mxu0 %v18415_v23  ;;  %v18481_v22 = vcombine.high %v1830_v18, %v1838_v19  ;;  %v1845_v23 = vld [vmem:[#allocation10 + $0x1f90] sm:$0xff]  ;;  %v1902_v11 = vld [vmem:[#allocation10 + $0x2158] sm:$0xff]  ;;  %v18528_v19 = vcombine.low %v1878_v7, %v1886_v47 }
 0x40d   :  { %14390 = vmatprep.subr.bf16.mxu1 %v18417_v31  ;;  %v1853_v31 = vld [vmem:[#allocation10 + $0x1fd0] sm:$0xff] }
 0x40e   :  { %v18494_v63 = vcombine.low %v1845_v23, %v1853_v31 }
 0x40f   :  { %14063 = vmatpush1.bf16.msra.mxu0 %v18414_v36  ;;  %v18495_v36 = vcombine.high %v1845_v23, %v1853_v31  ;;  %v1910_v23 = vld [vmem:[#allocation10 + $0x2198] sm:$0xff] }
 0x410   :  { %14391 = vmatpush1.bf16.msra.mxu1 %v18416_v25  ;;  %14064 = vmatprep.subr.bf16.mxu0 %v18431_v48  ;;  %v18497_v25 = vcombine.high %v1846_v26, %v1854_v35  ;;  %v1861_v48 = vld [vmem:[#allocation10 + $0x2010] sm:$0xff]  ;;  %v1918_v31 = vld [vmem:[#allocation10 + $0x21d8] sm:$0xff]  ;;  %v18544_v35 = vcombine.low %v1894_v8, %v1902_v11 }
 0x411   :  { %14392 = vmatprep.subr.bf16.mxu1 %v18433_v42  ;;  %v1869_v42 = vld [vmem:[#allocation10 + $0x2050] sm:$0xff] }
 0x412   :  { %v18510_v58 = vcombine.low %v1861_v48, %v1869_v42 }
 0x413   :  { %14065 = vmatpush1.bf16.msra.mxu0 %v18430_v45  ;;  %v18511_v45 = vcombine.high %v1861_v48, %v1869_v42  ;;  %v1926_v48 = vld [vmem:[#allocation10 + $0x2218] sm:$0xff] }
 0x414   :  { %14393 = vmatpush1.bf16.msra.mxu1 %v18432_v49  ;;  %14066 = vmatprep.subr.bf16.mxu0 %v18447_v50  ;;  %v18513_v49 = vcombine.high %v1862_v9, %v1870_v43  ;;  %v1877_v50 = vld [vmem:[#allocation10 + $0x2090] sm:$0xff]  ;;  %v1934_v42 = vld [vmem:[#allocation10 + $0x2258] sm:$0xff]  ;;  %v18560_v43 = vcombine.low %v1910_v23, %v1918_v31 }
 0x415   :  { %14394 = vmatprep.subr.bf16.mxu1 %v18449_v54  ;;  %v1885_v54 = vld [vmem:[#allocation10 + $0x20d0] sm:$0xff] }
 0x416   :  { %v18526_v18 = vcombine.low %v1877_v50, %v1885_v54 }
 0x417   :  { %14067 = vmatpush1.bf16.msra.mxu0 %v18446_v34  ;;  %v18527_v34 = vcombine.high %v1877_v50, %v1885_v54  ;;  %v1942_v50 = vld [vmem:[#allocation10 + $0x2298] sm:$0xff] }
 0x418   :  { %14395 = vmatpush1.bf16.msra.mxu1 %v18448_v61  ;;  %14068 = vmatprep.subr.bf16.mxu0 %v18463_v1  ;;  %v1893_v61 = vld [vmem:[#allocation10 + $0x2110] sm:$0xff]  ;;  %v1950_v54 = vld [vmem:[#allocation10 + $0x22d8] sm:$0xff] }
 0x419   :  { %14396 = vmatprep.subr.bf16.mxu1 %v18465_v5  ;;  %v1901_v1 = vld [vmem:[#allocation10 + $0x2150] sm:$0xff]  ;;  %v18529_v5 = vcombine.high %v1878_v7, %v1886_v47  ;;  %v18576_v7 = vcombine.low %v1926_v48, %v1934_v42 }
 0x41a   :  { %v18542_v26 = vcombine.low %v1893_v61, %v1901_v1 }
 0x41b   :  { %14069 = vmatpush1.bf16.msra.mxu0 %v18462_v20  ;;  %v18543_v20 = vcombine.high %v1893_v61, %v1901_v1  ;;  %v1965_v61 = vld [vmem:[#allocation10 + $0x2350] sm:$0xff]  ;;  %v1958_v1 = vld [vmem:[#allocation10 + $0x2318] sm:$0xff] }
 0x41c   :  { %14397 = vmatpush1.bf16.msra.mxu1 %v18464_v21  ;;  %14070 = vmatprep.subr.bf16.mxu0 %v18479_v4  ;;  %v18545_v21 = vcombine.high %v1894_v8, %v1902_v11  ;;  %v1909_v4 = vld [vmem:[#allocation10 + $0x2190] sm:$0xff]  ;;  %v18592_v11 = vcombine.low %v1942_v50, %v1950_v54 }
 0x41d   :  { %14398 = vmatprep.subr.bf16.mxu1 %v18481_v22  ;;  %v1917_v22 = vld [vmem:[#allocation10 + $0x21d0] sm:$0xff] }
 0x41e   :  { %v18558_v9 = vcombine.low %v1909_v4, %v1917_v22 }
 0x41f   :  { %14071 = vmatpush1.bf16.msra.mxu0 %v18478_v15  ;;  %v18559_v15 = vcombine.high %v1909_v4, %v1917_v22  ;;  %v1974_v4 = vld [vmem:[#allocation10 + $0x2398] sm:$0xff] }
 0x420   :  { %14399 = vmatpush1.bf16.msra.mxu1 %v18480_v40  ;;  %14072 = vmatprep.subr.bf16.mxu0 %v18495_v36  ;;  %v18561_v40 = vcombine.high %v1910_v23, %v1918_v31  ;;  %v1925_v36 = vld [vmem:[#allocation10 + $0x2210] sm:$0xff]  ;;  %v1982_v22 = vld [vmem:[#allocation10 + $0x23d8] sm:$0xff] }
 0x421   :  { %14400 = vmatprep.subr.bf16.mxu1 %v18497_v25  ;;  %v1933_v25 = vld [vmem:[#allocation10 + $0x2250] sm:$0xff] }
 0x423   :  { %14073 = vmatpush1.bf16.msra.mxu0 %v18494_v63  ;;  %v18575_v63 = vcombine.high %v1925_v36, %v1933_v25 }
 0x424   :  { %14401 = vmatpush1.bf16.msra.mxu1 %v18496_v28  ;;  %14083 = vmatprep.subr.bf16.mxu0 %v18511_v45  ;;  %v18577_v28 = vcombine.high %v1926_v48, %v1934_v42  ;;  %v1941_v45 = vld [vmem:[#allocation10 + $0x2290] sm:$0xff]  ;;  %v18624_v42 = vcombine.low %v1974_v4, %v1982_v22 }
 0x425   :  { %14411 = vmatprep.subr.bf16.mxu1 %v18513_v49  ;;  %v1949_v49 = vld [vmem:[#allocation10 + $0x22d0] sm:$0xff] }
 0x426   :  { %14075 = vmatmul.mubr.bf16.vlgmr.msra.gmra.mrb[20].mxu0 %v20744_v57  ;;  %v18591_v47 = vcombine.high %v1941_v45, %v1949_v49  ;;  %v18590_v8 = vcombine.low %v1941_v45, %v1949_v49  ;;  %v2006_v45 = vld [vmem:[#allocation10 + $0x2498] sm:$0xff] }
 0x427   :  { %14403 = vmatmul.mubr.bf16.vlgmr.msra.gmra.mrb[20].mxu1 %v20744_v57  ;;  %14084 = vmatpush1.bf16.msra.mxu0 %v18510_v58  ;;  %v18574_v58 = vcombine.low %v1925_v36, %v1933_v25  ;;  %v1990_v36 = vld [vmem:[#allocation10 + $0x2418] sm:$0xff] }
 0x428   :  { %14115 = vmatprep.mubr.bf16.mxu0 %v20746_v2  ;;  %14412 = vmatpush1.bf16.msra.mxu1 %v18512_v60  ;;  %v18593_v60 = vcombine.high %v1942_v50, %v1950_v54  ;;  %v1998_v25 = vld [vmem:[#allocation10 + $0x2458] sm:$0xff] }
 0x429   :  { %14443 = vmatprep.mubr.bf16.mxu1 %v20746_v2  ;;  %14085 = vmatprep.subr.bf16.mxu0 %v18527_v34  ;;  %v1957_v34 = vld [vmem:[#allocation10 + $0x2310] sm:$0xff]  ;;  %v2014_v49 = vld [vmem:[#allocation10 + $0x24d8] sm:$0xff]  ;;  %v18640_v54 = vcombine.low %v1990_v36, %v1998_v25 }
 0x42a   :  { %14413 = vmatprep.subr.bf16.mxu1 %v18529_v5  ;;  %v1966_v5 = vld [vmem:[#allocation10 + $0x2358] sm:$0xff]  ;;  %v18606_v23 = vcombine.low %v1957_v34, %v1965_v61 }
 0x42b   :  { %14086 = vmatpush1.bf16.msra.mxu0 %v18526_v18  ;;  %v18607_v18 = vcombine.high %v1957_v34, %v1965_v61  ;;  %v18608_v31 = vcombine.low %v1958_v1, %v1966_v5  ;;  %v2022_v34 = vld [vmem:[#allocation10 + $0x2518] sm:$0xff] }
 0x42c   :  { %14414 = vmatpush1.bf16.msra.mxu1 %v18528_v19  ;;  %14087 = vmatprep.subr.bf16.mxu0 %v18543_v20  ;;  %v18609_v19 = vcombine.high %v1958_v1, %v1966_v5  ;;  %v1973_v20 = vld [vmem:[#allocation10 + $0x2390] sm:$0xff]  ;;  %v2030_v61 = vld [vmem:[#allocation10 + $0x2558] sm:$0xff]  ;;  %v18656_v5 = vcombine.low %v2006_v45, %v2014_v49 }
 0x42d   :  { %14415 = vmatprep.subr.bf16.mxu1 %v18545_v21  ;;  %v1981_v21 = vld [vmem:[#allocation10 + $0x23d0] sm:$0xff] }
 0x42e   :  { %v18622_v48 = vcombine.low %v1973_v20, %v1981_v21 }
 0x42f   :  { %14088 = vmatpush1.bf16.msra.mxu0 %v18542_v26  ;;  %v18623_v26 = vcombine.high %v1973_v20, %v1981_v21  ;;  %v2038_v20 = vld [vmem:[#allocation10 + $0x2598] sm:$0xff] }
 0x430   :  { %14416 = vmatpush1.bf16.msra.mxu1 %v18544_v35  ;;  %14089 = vmatprep.subr.bf16.mxu0 %v18559_v15  ;;  %v18625_v35 = vcombine.high %v1974_v4, %v1982_v22  ;;  %v1989_v15 = vld [vmem:[#allocation10 + $0x2410] sm:$0xff]  ;;  %v2046_v21 = vld [vmem:[#allocation10 + $0x25d8] sm:$0xff]  ;;  %v18672_v22 = vcombine.low %v2022_v34, %v2030_v61 }
 0x431   :  { %14417 = vmatprep.subr.bf16.mxu1 %v18561_v40  ;;  %v1997_v40 = vld [vmem:[#allocation10 + $0x2450] sm:$0xff] }
 0x432   :  { %v18638_v50 = vcombine.low %v1989_v15, %v1997_v40 }
 0x433   :  { %14090 = vmatpush1.bf16.msra.mxu0 %v18558_v9  ;;  %v18639_v9 = vcombine.high %v1989_v15, %v1997_v40  ;;  %v2054_v15 = vld [vmem:[#allocation10 + $0x2618] sm:$0xff] }
 0x434   :  { %14418 = vmatpush1.bf16.msra.mxu1 %v18560_v43  ;;  %14091 = vmatprep.subr.bf16.mxu0 %v18575_v63  ;;  %v18641_v43 = vcombine.high %v1990_v36, %v1998_v25  ;;  %v2005_v63 = vld [vmem:[#allocation10 + $0x2490] sm:$0xff]  ;;  %v2062_v40 = vld [vmem:[#allocation10 + $0x2658] sm:$0xff]  ;;  %v18688_v25 = vcombine.low %v2038_v20, %v2046_v21 }
 0x435   :  { %14419 = vmatprep.subr.bf16.mxu1 %v18577_v28  ;;  %v2013_v28 = vld [vmem:[#allocation10 + $0x24d0] sm:$0xff] }
 0x436   :  { %v18654_v1 = vcombine.low %v2005_v63, %v2013_v28 }
 0x437   :  { %14092 = vmatpush1.bf16.msra.mxu0 %v18574_v58  ;;  %v18655_v58 = vcombine.high %v2005_v63, %v2013_v28  ;;  %v2070_v63 = vld [vmem:[#allocation10 + $0x2698] sm:$0xff] }
 0x438   :  { %14420 = vmatpush1.bf16.msra.mxu1 %v18576_v7  ;;  %14093 = vmatprep.subr.bf16.mxu0 %v18591_v47  ;;  %v18657_v7 = vcombine.high %v2006_v45, %v2014_v49  ;;  %v2021_v47 = vld [vmem:[#allocation10 + $0x2510] sm:$0xff]  ;;  %v2078_v28 = vld [vmem:[#allocation10 + $0x26d8] sm:$0xff]  ;;  %v18704_v49 = vcombine.low %v2054_v15, %v2062_v40 }
 0x439   :  { %14421 = vmatprep.subr.bf16.mxu1 %v18593_v60  ;;  %v2029_v60 = vld [vmem:[#allocation10 + $0x2550] sm:$0xff] }
 0x43a   :  { %v18670_v4 = vcombine.low %v2021_v47, %v2029_v60 }
 0x43b   :  { %14094 = vmatpush1.bf16.msra.mxu0 %v18590_v8  ;;  %v18671_v8 = vcombine.high %v2021_v47, %v2029_v60  ;;  %v2086_v47 = vld [vmem:[#allocation10 + $0x2718] sm:$0xff] }
 0x43c   :  { %14422 = vmatpush1.bf16.msra.mxu1 %v18592_v11  ;;  %14095 = vmatprep.subr.bf16.mxu0 %v18607_v18  ;;  %v18673_v11 = vcombine.high %v2022_v34, %v2030_v61  ;;  %v2037_v18 = vld [vmem:[#allocation10 + $0x2590] sm:$0xff]  ;;  %v2094_v60 = vld [vmem:[#allocation10 + $0x2758] sm:$0xff]  ;;  %v18720_v61 = vcombine.low %v2070_v63, %v2078_v28 }
 0x43d   :  { %14423 = vmatprep.subr.bf16.mxu1 %v18609_v19  ;;  %v2045_v19 = vld [vmem:[#allocation10 + $0x25d0] sm:$0xff] }
 0x43e   :  { %v18686_v36 = vcombine.low %v2037_v18, %v2045_v19 }
 0x43f   :  { %14096 = vmatpush1.bf16.msra.mxu0 %v18606_v23  ;;  %v18687_v23 = vcombine.high %v2037_v18, %v2045_v19  ;;  %v2102_v18 = vld [vmem:[#allocation10 + $0x2798] sm:$0xff] }
 0x440   :  { %14424 = vmatpush1.bf16.msra.mxu1 %v18608_v31  ;;  %14097 = vmatprep.subr.bf16.mxu0 %v18623_v26  ;;  %v18689_v31 = vcombine.high %v2038_v20, %v2046_v21  ;;  %v2053_v26 = vld [vmem:[#allocation10 + $0x2610] sm:$0xff]  ;;  %v2110_v19 = vld [vmem:[#allocation10 + $0x27d8] sm:$0xff]  ;;  %v18736_v21 = vcombine.low %v2086_v47, %v2094_v60 }
 0x441   :  { %14425 = vmatprep.subr.bf16.mxu1 %v18625_v35  ;;  %v2061_v35 = vld [vmem:[#allocation10 + $0x2650] sm:$0xff] }
 0x442   :  { %v18702_v45 = vcombine.low %v2053_v26, %v2061_v35 }
 0x443   :  { %14098 = vmatpush1.bf16.msra.mxu0 %v18622_v48  ;;  %v18703_v48 = vcombine.high %v2053_v26, %v2061_v35  ;;  %v2118_v26 = vld [vmem:[#allocation10 + $0x2818] sm:$0xff] }
 0x444   :  { %14426 = vmatpush1.bf16.msra.mxu1 %v18624_v42  ;;  %14099 = vmatprep.subr.bf16.mxu0 %v18639_v9  ;;  %v18705_v42 = vcombine.high %v2054_v15, %v2062_v40  ;;  %v2069_v9 = vld [vmem:[#allocation10 + $0x2690] sm:$0xff]  ;;  %v2126_v35 = vld [vmem:[#allocation10 + $0x2858] sm:$0xff]  ;;  %v18752_v40 = vcombine.low %v2102_v18, %v2110_v19 }
 0x445   :  { %14427 = vmatprep.subr.bf16.mxu1 %v18641_v43  ;;  %v2077_v43 = vld [vmem:[#allocation10 + $0x26d0] sm:$0xff] }
 0x446   :  { %v18718_v34 = vcombine.low %v2069_v9, %v2077_v43 }
 0x447   :  { %14100 = vmatpush1.bf16.msra.mxu0 %v18638_v50  ;;  %v18719_v50 = vcombine.high %v2069_v9, %v2077_v43  ;;  %v2134_v43 = vld [vmem:[#allocation10 + $0x2898] sm:$0xff] }
 0x448   :  { %14428 = vmatpush1.bf16.msra.mxu1 %v18640_v54  ;;  %14101 = vmatprep.subr.bf16.mxu0 %v18655_v58  ;;  %v18721_v54 = vcombine.high %v2070_v63, %v2078_v28  ;;  %v2085_v58 = vld [vmem:[#allocation10 + $0x2710] sm:$0xff]  ;;  %v2142_v63 = vld [vmem:[#allocation10 + $0x28d8] sm:$0xff]  ;;  %v18768_v28 = vcombine.low %v2118_v26, %v2126_v35 }
 0x449   :  { %14429 = vmatprep.subr.bf16.mxu1 %v18657_v7  ;;  %v2093_v7 = vld [vmem:[#allocation10 + $0x2750] sm:$0xff] }
 0x44a   :  { %v18734_v20 = vcombine.low %v2085_v58, %v2093_v7 }
 0x44b   :  { %14102 = vmatpush1.bf16.msra.mxu0 %v18654_v1  ;;  %v18735_v1 = vcombine.high %v2085_v58, %v2093_v7  ;;  %v2150_v58 = vld [vmem:[#allocation10 + $0x2918] sm:$0xff] }
 0x44c   :  { %14430 = vmatpush1.bf16.msra.mxu1 %v18656_v5  ;;  %14103 = vmatprep.subr.bf16.mxu0 %v18671_v8  ;;  %v18737_v5 = vcombine.high %v2086_v47, %v2094_v60  ;;  %v2101_v8 = vld [vmem:[#allocation10 + $0x2790] sm:$0xff]  ;;  %v2158_v7 = vld [vmem:[#allocation10 + $0x2958] sm:$0xff]  ;;  %v18784_v60 = vcombine.low %v2134_v43, %v2142_v63 }
 0x44d   :  { %14431 = vmatprep.subr.bf16.mxu1 %v18673_v11  ;;  %v2109_v11 = vld [vmem:[#allocation10 + $0x27d0] sm:$0xff] }
 0x44e   :  { %v18750_v15 = vcombine.low %v2101_v8, %v2109_v11 }
 0x44f   :  { %14104 = vmatpush1.bf16.msra.mxu0 %v18670_v4  ;;  %v18751_v4 = vcombine.high %v2101_v8, %v2109_v11  ;;  %v2166_v8 = vld [vmem:[#allocation10 + $0x2998] sm:$0xff] }
 0x450   :  { %14432 = vmatpush1.bf16.msra.mxu1 %v18672_v22  ;;  %14105 = vmatprep.subr.bf16.mxu0 %v18687_v23  ;;  %v18753_v22 = vcombine.high %v2102_v18, %v2110_v19  ;;  %v2117_v23 = vld [vmem:[#allocation10 + $0x2810] sm:$0xff]  ;;  %v2174_v11 = vld [vmem:[#allocation10 + $0x29d8] sm:$0xff]  ;;  %v18800_v19 = vcombine.low %v2150_v58, %v2158_v7 }
 0x451   :  { %14433 = vmatprep.subr.bf16.mxu1 %v18689_v31  ;;  %v2125_v31 = vld [vmem:[#allocation10 + $0x2850] sm:$0xff] }
 0x452   :  { %v18766_v9 = vcombine.low %v2117_v23, %v2125_v31 }
 0x453   :  { %14106 = vmatpush1.bf16.msra.mxu0 %v18686_v36  ;;  %v18767_v36 = vcombine.high %v2117_v23, %v2125_v31  ;;  %v2182_v23 = vld [vmem:[#allocation10 + $0x2a18] sm:$0xff] }
 0x454   :  { %14434 = vmatpush1.bf16.msra.mxu1 %v18688_v25  ;;  %14107 = vmatprep.subr.bf16.mxu0 %v18703_v48  ;;  %v18769_v25 = vcombine.high %v2118_v26, %v2126_v35  ;;  %v2133_v48 = vld [vmem:[#allocation10 + $0x2890] sm:$0xff]  ;;  %v2190_v31 = vld [vmem:[#allocation10 + $0x2a58] sm:$0xff]  ;;  %v18816_v35 = vcombine.low %v2166_v8, %v2174_v11 }
 0x455   :  { %14435 = vmatprep.subr.bf16.mxu1 %v18705_v42  ;;  %v2141_v42 = vld [vmem:[#allocation10 + $0x28d0] sm:$0xff] }
 0x456   :  { %v18782_v47 = vcombine.low %v2133_v48, %v2141_v42 }
 0x457   :  { %14108 = vmatpush1.bf16.msra.mxu0 %v18702_v45  ;;  %v18783_v45 = vcombine.high %v2133_v48, %v2141_v42  ;;  %v2198_v48 = vld [vmem:[#allocation10 + $0x2a98] sm:$0xff] }
 0x458   :  { %14436 = vmatpush1.bf16.msra.mxu1 %v18704_v49  ;;  %14109 = vmatprep.subr.bf16.mxu0 %v18719_v50  ;;  %v2149_v49 = vld [vmem:[#allocation10 + $0x2910] sm:$0xff]  ;;  %v2206_v42 = vld [vmem:[#allocation10 + $0x2ad8] sm:$0xff] }
 0x459   :  { %14437 = vmatprep.subr.bf16.mxu1 %v18721_v54  ;;  %v2157_v50 = vld [vmem:[#allocation10 + $0x2950] sm:$0xff]  ;;  %v18785_v54 = vcombine.high %v2134_v43, %v2142_v63  ;;  %v18832_v43 = vcombine.low %v2182_v23, %v2190_v31 }
 0x45a   :  { %v18798_v18 = vcombine.low %v2149_v49, %v2157_v50 }
 0x45b   :  { %14110 = vmatpush1.bf16.msra.mxu0 %v18718_v34  ;;  %v18799_v34 = vcombine.high %v2149_v49, %v2157_v50  ;;  %v2221_v49 = vld [vmem:[#allocation10 + $0x2b50] sm:$0xff]  ;;  %v2214_v50 = vld [vmem:[#allocation10 + $0x2b18] sm:$0xff] }
 0x45c   :  { %14438 = vmatpush1.bf16.msra.mxu1 %v18720_v61  ;;  %14111 = vmatprep.subr.bf16.mxu0 %v18735_v1  ;;  %v18801_v61 = vcombine.high %v2150_v58, %v2158_v7  ;;  %v2165_v1 = vld [vmem:[#allocation10 + $0x2990] sm:$0xff]  ;;  %v18848_v7 = vcombine.low %v2198_v48, %v2206_v42 }
 0x45d   :  { %14439 = vmatprep.subr.bf16.mxu1 %v18737_v5  ;;  %v2173_v5 = vld [vmem:[#allocation10 + $0x29d0] sm:$0xff] }
 0x45e   :  { %v18814_v26 = vcombine.low %v2165_v1, %v2173_v5 }
 0x45f   :  { %14112 = vmatpush1.bf16.msra.mxu0 %v18734_v20  ;;  %v18815_v20 = vcombine.high %v2165_v1, %v2173_v5  ;;  %v2230_v1 = vld [vmem:[#allocation10 + $0x2b98] sm:$0xff] }
 0x460   :  { %14440 = vmatpush1.bf16.msra.mxu1 %v18736_v21  ;;  %14113 = vmatprep.subr.bf16.mxu0 %v18751_v4  ;;  %v18817_v21 = vcombine.high %v2166_v8, %v2174_v11  ;;  %v2181_v4 = vld [vmem:[#allocation10 + $0x2a10] sm:$0xff]  ;;  %v2238_v5 = vld [vmem:[#allocation10 + $0x2bd8] sm:$0xff] }
 0x461   :  { %14441 = vmatprep.subr.bf16.mxu1 %v18753_v22  ;;  %v2189_v22 = vld [vmem:[#allocation10 + $0x2a50] sm:$0xff] }
 0x463   :  { %14114 = vmatpush1.bf16.msra.mxu0 %v18750_v15  ;;  %v18831_v15 = vcombine.high %v2181_v4, %v2189_v22 }
 0x464   :  { %14442 = vmatpush1.bf16.msra.mxu1 %v18752_v40  ;;  %14124 = vmatprep.subr.bf16.mxu0 %v18767_v36  ;;  %v18833_v40 = vcombine.high %v2182_v23, %v2190_v31  ;;  %v2197_v36 = vld [vmem:[#allocation10 + $0x2a90] sm:$0xff]  ;;  %v18880_v31 = vcombine.low %v2230_v1, %v2238_v5 }
 0x465   :  { %14452 = vmatprep.subr.bf16.mxu1 %v18769_v25  ;;  %v2205_v25 = vld [vmem:[#allocation10 + $0x2ad0] sm:$0xff] }
 0x466   :  { %14116 = vmatmul.mubr.bf16.vlgmr.msra.gmra.mrb[20].mxu0 %v20758_v29  ;;  %v18847_v63 = vcombine.high %v2197_v36, %v2205_v25  ;;  %v18846_v58 = vcombine.low %v2197_v36, %v2205_v25  ;;  %v2262_v36 = vld [vmem:[#allocation10 + $0x2c98] sm:$0xff] }
 0x467   :  { %14444 = vmatmul.mubr.bf16.vlgmr.msra.gmra.mrb[20].mxu1 %v20758_v29  ;;  %14125 = vmatpush1.bf16.msra.mxu0 %v18766_v9  ;;  %v18830_v9 = vcombine.low %v2181_v4, %v2189_v22  ;;  %v2246_v4 = vld [vmem:[#allocation10 + $0x2c18] sm:$0xff] }
 0x468   :  { %14156 = vmatprep.mubr.bf16.mxu0 %v20760_v33  ;;  %14453 = vmatpush1.bf16.msra.mxu1 %v18768_v28  ;;  %v18849_v28 = vcombine.high %v2198_v48, %v2206_v42  ;;  %v2254_v22 = vld [vmem:[#allocation10 + $0x2c58] sm:$0xff] }
 0x469   :  { %14484 = vmatprep.mubr.bf16.mxu1 %v20760_v33  ;;  %14126 = vmatprep.subr.bf16.mxu0 %v18783_v45  ;;  %v2213_v45 = vld [vmem:[#allocation10 + $0x2b10] sm:$0xff]  ;;  %v2270_v25 = vld [vmem:[#allocation10 + $0x2cd8] sm:$0xff]  ;;  %v18896_v42 = vcombine.low %v2246_v4, %v2254_v22 }
 0x46a   :  { %14454 = vmatprep.subr.bf16.mxu1 %v18785_v54  ;;  %v2222_v54 = vld [vmem:[#allocation10 + $0x2b58] sm:$0xff]  ;;  %v18862_v8 = vcombine.low %v2213_v45, %v2221_v49 }
 0x46b   :  { %14127 = vmatpush1.bf16.msra.mxu0 %v18782_v47  ;;  %v18863_v47 = vcombine.high %v2213_v45, %v2221_v49  ;;  %v18864_v11 = vcombine.low %v2214_v50, %v2222_v54  ;;  %v2278_v45 = vld [vmem:[#allocation10 + $0x2d18] sm:$0xff] }
 0x46c   :  { %14455 = vmatpush1.bf16.msra.mxu1 %v18784_v60  ;;  %14128 = vmatprep.subr.bf16.mxu0 %v18799_v34  ;;  %v18865_v60 = vcombine.high %v2214_v50, %v2222_v54  ;;  %v2229_v34 = vld [vmem:[#allocation10 + $0x2b90] sm:$0xff]  ;;  %v2286_v49 = vld [vmem:[#allocation10 + $0x2d58] sm:$0xff]  ;;  %v18912_v54 = vcombine.low %v2262_v36, %v2270_v25 }
 0x46d   :  { %14456 = vmatprep.subr.bf16.mxu1 %v18801_v61  ;;  %v2237_v61 = vld [vmem:[#allocation10 + $0x2bd0] sm:$0xff] }
 0x46e   :  { %v18878_v23 = vcombine.low %v2229_v34, %v2237_v61 }
 0x46f   :  { %14129 = vmatpush1.bf16.msra.mxu0 %v18798_v18  ;;  %v18879_v18 = vcombine.high %v2229_v34, %v2237_v61  ;;  %v2294_v34 = vld [vmem:[#allocation10 + $0x2d98] sm:$0xff] }
 0x470   :  { %14457 = vmatpush1.bf16.msra.mxu1 %v18800_v19  ;;  %14130 = vmatprep.subr.bf16.mxu0 %v18815_v20  ;;  %v18881_v19 = vcombine.high %v2230_v1, %v2238_v5  ;;  %v2245_v20 = vld [vmem:[#allocation10 + $0x2c10] sm:$0xff]  ;;  %v2302_v61 = vld [vmem:[#allocation10 + $0x2dd8] sm:$0xff]  ;;  %v18928_v5 = vcombine.low %v2278_v45, %v2286_v49 }
 0x471   :  { %14458 = vmatprep.subr.bf16.mxu1 %v18817_v21  ;;  %v2253_v21 = vld [vmem:[#allocation10 + $0x2c50] sm:$0xff] }
 0x472   :  { %v18894_v48 = vcombine.low %v2245_v20, %v2253_v21 }
 0x473   :  { %14131 = vmatpush1.bf16.msra.mxu0 %v18814_v26  ;;  %v18895_v26 = vcombine.high %v2245_v20, %v2253_v21  ;;  %v2310_v20 = vld [vmem:[#allocation10 + $0x2e18] sm:$0xff] }
 0x474   :  { %14459 = vmatpush1.bf16.msra.mxu1 %v18816_v35  ;;  %14132 = vmatprep.subr.bf16.mxu0 %v18831_v15  ;;  %v18897_v35 = vcombine.high %v2246_v4, %v2254_v22  ;;  %v2261_v15 = vld [vmem:[#allocation10 + $0x2c90] sm:$0xff]  ;;  %v2318_v21 = vld [vmem:[#allocation10 + $0x2e58] sm:$0xff]  ;;  %v18944_v22 = vcombine.low %v2294_v34, %v2302_v61 }
 0x475   :  { %14460 = vmatprep.subr.bf16.mxu1 %v18833_v40  ;;  %v2269_v40 = vld [vmem:[#allocation10 + $0x2cd0] sm:$0xff] }
 0x476   :  { %v18910_v50 = vcombine.low %v2261_v15, %v2269_v40 }
 0x477   :  { %14133 = vmatpush1.bf16.msra.mxu0 %v18830_v9  ;;  %v18911_v9 = vcombine.high %v2261_v15, %v2269_v40  ;;  %v2326_v15 = vld [vmem:[#allocation10 + $0x2e98] sm:$0xff] }
 0x478   :  { %14461 = vmatpush1.bf16.msra.mxu1 %v18832_v43  ;;  %14134 = vmatprep.subr.bf16.mxu0 %v18847_v63  ;;  %v18913_v43 = vcombine.high %v2262_v36, %v2270_v25  ;;  %v2277_v63 = vld [vmem:[#allocation10 + $0x2d10] sm:$0xff]  ;;  %v2334_v40 = vld [vmem:[#allocation10 + $0x2ed8] sm:$0xff]  ;;  %v18960_v25 = vcombine.low %v2310_v20, %v2318_v21 }
 0x479   :  { %14462 = vmatprep.subr.bf16.mxu1 %v18849_v28  ;;  %v2285_v28 = vld [vmem:[#allocation10 + $0x2d50] sm:$0xff] }
 0x47a   :  { %v18926_v1 = vcombine.low %v2277_v63, %v2285_v28 }
 0x47b   :  { %14135 = vmatpush1.bf16.msra.mxu0 %v18846_v58  ;;  %v18927_v58 = vcombine.high %v2277_v63, %v2285_v28  ;;  %v2342_v63 = vld [vmem:[#allocation10 + $0x2f18] sm:$0xff] }
 0x47c   :  { %14463 = vmatpush1.bf16.msra.mxu1 %v18848_v7  ;;  %14136 = vmatprep.subr.bf16.mxu0 %v18863_v47  ;;  %v18929_v7 = vcombine.high %v2278_v45, %v2286_v49  ;;  %v2293_v47 = vld [vmem:[#allocation10 + $0x2d90] sm:$0xff]  ;;  %v2350_v28 = vld [vmem:[#allocation10 + $0x2f58] sm:$0xff]  ;;  %v18976_v49 = vcombine.low %v2326_v15, %v2334_v40 }
 0x47d   :  { %14464 = vmatprep.subr.bf16.mxu1 %v18865_v60  ;;  %v2301_v60 = vld [vmem:[#allocation10 + $0x2dd0] sm:$0xff] }
 0x47e   :  { %v18942_v4 = vcombine.low %v2293_v47, %v2301_v60 }
 0x47f   :  { %14137 = vmatpush1.bf16.msra.mxu0 %v18862_v8  ;;  %v18943_v8 = vcombine.high %v2293_v47, %v2301_v60  ;;  %v2358_v47 = vld [vmem:[#allocation10 + $0x2f98] sm:$0xff] }
 0x480   :  { %14465 = vmatpush1.bf16.msra.mxu1 %v18864_v11  ;;  %14138 = vmatprep.subr.bf16.mxu0 %v18879_v18  ;;  %v18945_v11 = vcombine.high %v2294_v34, %v2302_v61  ;;  %v2309_v18 = vld [vmem:[#allocation10 + $0x2e10] sm:$0xff]  ;;  %v2366_v60 = vld [vmem:[#allocation10 + $0x2fd8] sm:$0xff]  ;;  %v18992_v61 = vcombine.low %v2342_v63, %v2350_v28 }
 0x481   :  { %14466 = vmatprep.subr.bf16.mxu1 %v18881_v19  ;;  %v2317_v19 = vld [vmem:[#allocation10 + $0x2e50] sm:$0xff] }
 0x482   :  { %v18958_v36 = vcombine.low %v2309_v18, %v2317_v19 }
 0x483   :  { %14139 = vmatpush1.bf16.msra.mxu0 %v18878_v23  ;;  %v18959_v23 = vcombine.high %v2309_v18, %v2317_v19  ;;  %v2374_v18 = vld [vmem:[#allocation10 + $0x3018] sm:$0xff] }
 0x484   :  { %14467 = vmatpush1.bf16.msra.mxu1 %v18880_v31  ;;  %14140 = vmatprep.subr.bf16.mxu0 %v18895_v26  ;;  %v18961_v31 = vcombine.high %v2310_v20, %v2318_v21  ;;  %v2325_v26 = vld [vmem:[#allocation10 + $0x2e90] sm:$0xff]  ;;  %v2382_v19 = vld [vmem:[#allocation10 + $0x3058] sm:$0xff]  ;;  %v19008_v21 = vcombine.low %v2358_v47, %v2366_v60 }
 0x485   :  { %14468 = vmatprep.subr.bf16.mxu1 %v18897_v35  ;;  %v2333_v35 = vld [vmem:[#allocation10 + $0x2ed0] sm:$0xff] }
 0x486   :  { %v18974_v45 = vcombine.low %v2325_v26, %v2333_v35 }
 0x487   :  { %14141 = vmatpush1.bf16.msra.mxu0 %v18894_v48  ;;  %v18975_v48 = vcombine.high %v2325_v26, %v2333_v35  ;;  %v2390_v35 = vld [vmem:[#allocation10 + $0x3098] sm:$0xff] }
 0x488   :  { %14469 = vmatpush1.bf16.msra.mxu1 %v18896_v42  ;;  %14142 = vmatprep.subr.bf16.mxu0 %v18911_v9  ;;  %v18977_v42 = vcombine.high %v2326_v15, %v2334_v40  ;;  %v2341_v9 = vld [vmem:[#allocation10 + $0x2f10] sm:$0xff]  ;;  %v2398_v15 = vld [vmem:[#allocation10 + $0x30d8] sm:$0xff]  ;;  %v19024_v40 = vcombine.low %v2374_v18, %v2382_v19 }
 0x489   :  { %14470 = vmatprep.subr.bf16.mxu1 %v18913_v43  ;;  %v2349_v43 = vld [vmem:[#allocation10 + $0x2f50] sm:$0xff] }
 0x48a   :  { %v18990_v34 = vcombine.low %v2341_v9, %v2349_v43 }
 0x48b   :  { %14143 = vmatpush1.bf16.msra.mxu0 %v18910_v50  ;;  %v18991_v50 = vcombine.high %v2341_v9, %v2349_v43  ;;  %v2406_v9 = vld [vmem:[#allocation10 + $0x3118] sm:$0xff] }
 0x48c   :  { %14471 = vmatpush1.bf16.msra.mxu1 %v18912_v54  ;;  %14144 = vmatprep.subr.bf16.mxu0 %v18927_v58  ;;  %v18993_v54 = vcombine.high %v2342_v63, %v2350_v28  ;;  %v2357_v58 = vld [vmem:[#allocation10 + $0x2f90] sm:$0xff]  ;;  %v2414_v43 = vld [vmem:[#allocation10 + $0x3158] sm:$0xff]  ;;  %v19040_v28 = vcombine.low %v2390_v35, %v2398_v15 }
 0x48d   :  { %14472 = vmatprep.subr.bf16.mxu1 %v18929_v7  ;;  %v2365_v7 = vld [vmem:[#allocation10 + $0x2fd0] sm:$0xff] }
 0x48e   :  { %v19006_v20 = vcombine.low %v2357_v58, %v2365_v7 }
 0x48f   :  { %14145 = vmatpush1.bf16.msra.mxu0 %v18926_v1  ;;  %v19007_v1 = vcombine.high %v2357_v58, %v2365_v7  ;;  %v2422_v58 = vld [vmem:[#allocation10 + $0x3198] sm:$0xff] }
 0x490   :  { %14473 = vmatpush1.bf16.msra.mxu1 %v18928_v5  ;;  %14146 = vmatprep.subr.bf16.mxu0 %v18943_v8  ;;  %v19009_v5 = vcombine.high %v2358_v47, %v2366_v60  ;;  %v2373_v8 = vld [vmem:[#allocation10 + $0x3010] sm:$0xff]  ;;  %v2430_v7 = vld [vmem:[#allocation10 + $0x31d8] sm:$0xff]  ;;  %v19056_v60 = vcombine.low %v2406_v9, %v2414_v43 }
 0x491   :  { %14474 = vmatprep.subr.bf16.mxu1 %v18945_v11  ;;  %v2381_v11 = vld [vmem:[#allocation10 + $0x3050] sm:$0xff] }
 0x492   :  { %v19022_v26 = vcombine.low %v2373_v8, %v2381_v11 }
 0x493   :  { %14147 = vmatpush1.bf16.msra.mxu0 %v18942_v4  ;;  %v19023_v4 = vcombine.high %v2373_v8, %v2381_v11  ;;  %v2438_v8 = vld [vmem:[#allocation10 + $0x3218] sm:$0xff] }
 0x494   :  { %14475 = vmatpush1.bf16.msra.mxu1 %v18944_v22  ;;  %14148 = vmatprep.subr.bf16.mxu0 %v18959_v23  ;;  %v19025_v22 = vcombine.high %v2374_v18, %v2382_v19  ;;  %v2389_v23 = vld [vmem:[#allocation10 + $0x3090] sm:$0xff]  ;;  %v2446_v11 = vld [vmem:[#allocation10 + $0x3258] sm:$0xff]  ;;  %v19072_v19 = vcombine.low %v2422_v58, %v2430_v7 }
 0x495   :  { %14476 = vmatprep.subr.bf16.mxu1 %v18961_v31  ;;  %v2397_v31 = vld [vmem:[#allocation10 + $0x30d0] sm:$0xff] }
 0x496   :  { %v19038_v63 = vcombine.low %v2389_v23, %v2397_v31 }
 0x497   :  { %14149 = vmatpush1.bf16.msra.mxu0 %v18958_v36  ;;  %v19039_v36 = vcombine.high %v2389_v23, %v2397_v31  ;;  %v2454_v23 = vld [vmem:[#allocation10 + $0x3298] sm:$0xff] }
 0x498   :  { %14477 = vmatpush1.bf16.msra.mxu1 %v18960_v25  ;;  %14150 = vmatprep.subr.bf16.mxu0 %v18975_v48  ;;  %v2405_v25 = vld [vmem:[#allocation10 + $0x3110] sm:$0xff]  ;;  %v2462_v31 = vld [vmem:[#allocation10 + $0x32d8] sm:$0xff] }
 0x499   :  { %14478 = vmatprep.subr.bf16.mxu1 %v18977_v42  ;;  %v2413_v48 = vld [vmem:[#allocation10 + $0x3150] sm:$0xff]  ;;  %v19041_v42 = vcombine.high %v2390_v35, %v2398_v15  ;;  %v19088_v35 = vcombine.low %v2438_v8, %v2446_v11 }
 0x49a   :  { %v19054_v47 = vcombine.low %v2405_v25, %v2413_v48 }
 0x49b   :  { %14151 = vmatpush1.bf16.msra.mxu0 %v18974_v45  ;;  %v19055_v45 = vcombine.high %v2405_v25, %v2413_v48  ;;  %v2477_v25 = vld [vmem:[#allocation10 + $0x3350] sm:$0xff]  ;;  %v2470_v48 = vld [vmem:[#allocation10 + $0x3318] sm:$0xff] }
 0x49c   :  { %14479 = vmatpush1.bf16.msra.mxu1 %v18976_v49  ;;  %14152 = vmatprep.subr.bf16.mxu0 %v18991_v50  ;;  %v19057_v49 = vcombine.high %v2406_v9, %v2414_v43  ;;  %v2421_v50 = vld [vmem:[#allocation10 + $0x3190] sm:$0xff]  ;;  %v19104_v43 = vcombine.low %v2454_v23, %v2462_v31 }
 0x49d   :  { %14480 = vmatprep.subr.bf16.mxu1 %v18993_v54  ;;  %v2429_v54 = vld [vmem:[#allocation10 + $0x31d0] sm:$0xff] }
 0x49e   :  { %v19070_v18 = vcombine.low %v2421_v50, %v2429_v54 }
 0x49f   :  { %14153 = vmatpush1.bf16.msra.mxu0 %v18990_v34  ;;  %v19071_v34 = vcombine.high %v2421_v50, %v2429_v54  ;;  %v2486_v50 = vld [vmem:[#allocation10 + $0x3398] sm:$0xff] }
 0x4a0   :  { %14481 = vmatpush1.bf16.msra.mxu1 %v18992_v61  ;;  %14154 = vmatprep.subr.bf16.mxu0 %v19007_v1  ;;  %v19073_v61 = vcombine.high %v2422_v58, %v2430_v7  ;;  %v2437_v1 = vld [vmem:[#allocation10 + $0x3210] sm:$0xff]  ;;  %v2494_v54 = vld [vmem:[#allocation10 + $0x33d8] sm:$0xff] }
 0x4a1   :  { %14482 = vmatprep.subr.bf16.mxu1 %v19009_v5  ;;  %v2445_v5 = vld [vmem:[#allocation10 + $0x3250] sm:$0xff] }
 0x4a3   :  { %14155 = vmatpush1.bf16.msra.mxu0 %v19006_v20  ;;  %v19087_v20 = vcombine.high %v2437_v1, %v2445_v5 }
 0x4a4   :  { %14483 = vmatpush1.bf16.msra.mxu1 %v19008_v21  ;;  %14165 = vmatprep.subr.bf16.mxu0 %v19023_v4  ;;  %v19089_v21 = vcombine.high %v2438_v8, %v2446_v11  ;;  %v2453_v4 = vld [vmem:[#allocation10 + $0x3290] sm:$0xff]  ;;  %v19136_v11 = vcombine.low %v2486_v50, %v2494_v54 }
 0x4a5   :  { %14493 = vmatprep.subr.bf16.mxu1 %v19025_v22  ;;  %v2461_v22 = vld [vmem:[#allocation10 + $0x32d0] sm:$0xff] }
 0x4a6   :  { %14157 = vmatmul.mubr.bf16.vlgmr.msra.gmra.mrb[20].mxu0 %v20776_v53  ;;  %v19103_v15 = vcombine.high %v2453_v4, %v2461_v22  ;;  %v19102_v9 = vcombine.low %v2453_v4, %v2461_v22  ;;  %v2518_v4 = vld [vmem:[#allocation10 + $0x3498] sm:$0xff] }
 0x4a7   :  { %14485 = vmatmul.mubr.bf16.vlgmr.msra.gmra.mrb[20].mxu1 %v20776_v53  ;;  %14166 = vmatpush1.bf16.msra.mxu0 %v19022_v26  ;;  %v19086_v26 = vcombine.low %v2437_v1, %v2445_v5  ;;  %v2502_v1 = vld [vmem:[#allocation10 + $0x3418] sm:$0xff] }
 0x4a8   :  { %14197 = vmatprep.mubr.bf16.mxu0 %v20778_v6  ;;  %14494 = vmatpush1.bf16.msra.mxu1 %v19024_v40  ;;  %v19105_v40 = vcombine.high %v2454_v23, %v2462_v31  ;;  %v2510_v5 = vld [vmem:[#allocation10 + $0x3458] sm:$0xff] }
 0x4a9   :  { %14525 = vmatprep.mubr.bf16.mxu1 %v20778_v6  ;;  %14167 = vmatprep.subr.bf16.mxu0 %v19039_v36  ;;  %v2469_v36 = vld [vmem:[#allocation10 + $0x3310] sm:$0xff]  ;;  %v2526_v22 = vld [vmem:[#allocation10 + $0x34d8] sm:$0xff]  ;;  %v19152_v31 = vcombine.low %v2502_v1, %v2510_v5 }
 0x4aa   :  { %14495 = vmatprep.subr.bf16.mxu1 %v19041_v42  ;;  %v2478_v42 = vld [vmem:[#allocation10 + $0x3358] sm:$0xff]  ;;  %v19118_v58 = vcombine.low %v2469_v36, %v2477_v25 }
 0x4ab   :  { %14168 = vmatpush1.bf16.msra.mxu0 %v19038_v63  ;;  %v19119_v63 = vcombine.high %v2469_v36, %v2477_v25  ;;  %v19120_v7 = vcombine.low %v2470_v48, %v2478_v42  ;;  %v2534_v36 = vld [vmem:[#allocation10 + $0x3518] sm:$0xff] }
 0x4ac   :  { %14496 = vmatpush1.bf16.msra.mxu1 %v19040_v28  ;;  %14169 = vmatprep.subr.bf16.mxu0 %v19055_v45  ;;  %v19121_v28 = vcombine.high %v2470_v48, %v2478_v42  ;;  %v2485_v45 = vld [vmem:[#allocation10 + $0x3390] sm:$0xff]  ;;  %v2542_v25 = vld [vmem:[#allocation10 + $0x3558] sm:$0xff]  ;;  %v19168_v42 = vcombine.low %v2518_v4, %v2526_v22 }
 0x4ad   :  { %14497 = vmatprep.subr.bf16.mxu1 %v19057_v49  ;;  %v2493_v49 = vld [vmem:[#allocation10 + $0x33d0] sm:$0xff] }
 0x4ae   :  { %v19134_v8 = vcombine.low %v2485_v45, %v2493_v49 }
 0x4af   :  { %14170 = vmatpush1.bf16.msra.mxu0 %v19054_v47  ;;  %v19135_v47 = vcombine.high %v2485_v45, %v2493_v49  ;;  %v2550_v45 = vld [vmem:[#allocation10 + $0x3598] sm:$0xff] }
 0x4b0   :  { %14498 = vmatpush1.bf16.msra.mxu1 %v19056_v60  ;;  %14171 = vmatprep.subr.bf16.mxu0 %v19071_v34  ;;  %v19137_v60 = vcombine.high %v2486_v50, %v2494_v54  ;;  %v2501_v34 = vld [vmem:[#allocation10 + $0x3410] sm:$0xff]  ;;  %v2558_v49 = vld [vmem:[#allocation10 + $0x35d8] sm:$0xff]  ;;  %v19184_v54 = vcombine.low %v2534_v36, %v2542_v25 }
 0x4b1   :  { %14499 = vmatprep.subr.bf16.mxu1 %v19073_v61  ;;  %v2509_v61 = vld [vmem:[#allocation10 + $0x3450] sm:$0xff] }
 0x4b2   :  { %v19150_v23 = vcombine.low %v2501_v34, %v2509_v61 }
 0x4b3   :  { %14172 = vmatpush1.bf16.msra.mxu0 %v19070_v18  ;;  %v19151_v18 = vcombine.high %v2501_v34, %v2509_v61  ;;  %v2566_v34 = vld [vmem:[#allocation10 + $0x3618] sm:$0xff] }
 0x4b4   :  { %14500 = vmatpush1.bf16.msra.mxu1 %v19072_v19  ;;  %14173 = vmatprep.subr.bf16.mxu0 %v19087_v20  ;;  %v19153_v19 = vcombine.high %v2502_v1, %v2510_v5  ;;  %v2517_v20 = vld [vmem:[#allocation10 + $0x3490] sm:$0xff]  ;;  %v2574_v61 = vld [vmem:[#allocation10 + $0x3658] sm:$0xff]  ;;  %v19200_v5 = vcombine.low %v2550_v45, %v2558_v49 }
 0x4b5   :  { %14501 = vmatprep.subr.bf16.mxu1 %v19089_v21  ;;  %v2525_v21 = vld [vmem:[#allocation10 + $0x34d0] sm:$0xff] }
 0x4b6   :  { %v19166_v48 = vcombine.low %v2517_v20, %v2525_v21 }
 0x4b7   :  { %14174 = vmatpush1.bf16.msra.mxu0 %v19086_v26  ;;  %v19167_v26 = vcombine.high %v2517_v20, %v2525_v21  ;;  %v2582_v20 = vld [vmem:[#allocation10 + $0x3698] sm:$0xff] }
 0x4b8   :  { %14502 = vmatpush1.bf16.msra.mxu1 %v19088_v35  ;;  %14175 = vmatprep.subr.bf16.mxu0 %v19103_v15  ;;  %v19169_v35 = vcombine.high %v2518_v4, %v2526_v22  ;;  %v2533_v15 = vld [vmem:[#allocation10 + $0x3510] sm:$0xff]  ;;  %v2590_v21 = vld [vmem:[#allocation10 + $0x36d8] sm:$0xff]  ;;  %v19216_v22 = vcombine.low %v2566_v34, %v2574_v61 }
 0x4b9   :  { %14503 = vmatprep.subr.bf16.mxu1 %v19105_v40  ;;  %v2541_v40 = vld [vmem:[#allocation10 + $0x3550] sm:$0xff] }
 0x4ba   :  { %v19182_v50 = vcombine.low %v2533_v15, %v2541_v40 }
 0x4bb   :  { %14176 = vmatpush1.bf16.msra.mxu0 %v19102_v9  ;;  %v19183_v9 = vcombine.high %v2533_v15, %v2541_v40  ;;  %v2598_v15 = vld [vmem:[#allocation10 + $0x3718] sm:$0xff] }
 0x4bc   :  { %14504 = vmatpush1.bf16.msra.mxu1 %v19104_v43  ;;  %14177 = vmatprep.subr.bf16.mxu0 %v19119_v63  ;;  %v19185_v43 = vcombine.high %v2534_v36, %v2542_v25  ;;  %v2549_v63 = vld [vmem:[#allocation10 + $0x3590] sm:$0xff]  ;;  %v2606_v40 = vld [vmem:[#allocation10 + $0x3758] sm:$0xff]  ;;  %v19232_v25 = vcombine.low %v2582_v20, %v2590_v21 }
 0x4bd   :  { %14505 = vmatprep.subr.bf16.mxu1 %v19121_v28  ;;  %v2557_v28 = vld [vmem:[#allocation10 + $0x35d0] sm:$0xff] }
 0x4be   :  { %v19198_v1 = vcombine.low %v2549_v63, %v2557_v28 }
 0x4bf   :  { %14178 = vmatpush1.bf16.msra.mxu0 %v19118_v58  ;;  %v19199_v58 = vcombine.high %v2549_v63, %v2557_v28  ;;  %v2614_v63 = vld [vmem:[#allocation10 + $0x3798] sm:$0xff] }
 0x4c0   :  { %14506 = vmatpush1.bf16.msra.mxu1 %v19120_v7  ;;  %14179 = vmatprep.subr.bf16.mxu0 %v19135_v47  ;;  %v19201_v7 = vcombine.high %v2550_v45, %v2558_v49  ;;  %v2565_v47 = vld [vmem:[#allocation10 + $0x3610] sm:$0xff]  ;;  %v2622_v28 = vld [vmem:[#allocation10 + $0x37d8] sm:$0xff]  ;;  %v19248_v49 = vcombine.low %v2598_v15, %v2606_v40 }
 0x4c1   :  { %14507 = vmatprep.subr.bf16.mxu1 %v19137_v60  ;;  %v2573_v60 = vld [vmem:[#allocation10 + $0x3650] sm:$0xff] }
 0x4c2   :  { %v19214_v4 = vcombine.low %v2565_v47, %v2573_v60 }
 0x4c3   :  { %14180 = vmatpush1.bf16.msra.mxu0 %v19134_v8  ;;  %v19215_v8 = vcombine.high %v2565_v47, %v2573_v60  ;;  %v2630_v47 = vld [vmem:[#allocation10 + $0x3818] sm:$0xff] }
 0x4c4   :  { %14508 = vmatpush1.bf16.msra.mxu1 %v19136_v11  ;;  %14181 = vmatprep.subr.bf16.mxu0 %v19151_v18  ;;  %v19217_v11 = vcombine.high %v2566_v34, %v2574_v61  ;;  %v2581_v18 = vld [vmem:[#allocation10 + $0x3690] sm:$0xff]  ;;  %v2638_v60 = vld [vmem:[#allocation10 + $0x3858] sm:$0xff]  ;;  %v19264_v61 = vcombine.low %v2614_v63, %v2622_v28 }
 0x4c5   :  { %14509 = vmatprep.subr.bf16.mxu1 %v19153_v19  ;;  %v2589_v19 = vld [vmem:[#allocation10 + $0x36d0] sm:$0xff] }
 0x4c6   :  { %v19230_v36 = vcombine.low %v2581_v18, %v2589_v19 }
 0x4c7   :  { %14182 = vmatpush1.bf16.msra.mxu0 %v19150_v23  ;;  %v19231_v23 = vcombine.high %v2581_v18, %v2589_v19  ;;  %v2646_v19 = vld [vmem:[#allocation10 + $0x3898] sm:$0xff] }
 0x4c8   :  { %14510 = vmatpush1.bf16.msra.mxu1 %v19152_v31  ;;  %14183 = vmatprep.subr.bf16.mxu0 %v19167_v26  ;;  %v19233_v31 = vcombine.high %v2582_v20, %v2590_v21  ;;  %v2597_v26 = vld [vmem:[#allocation10 + $0x3710] sm:$0xff]  ;;  %v2654_v20 = vld [vmem:[#allocation10 + $0x38d8] sm:$0xff]  ;;  %v19280_v21 = vcombine.low %v2630_v47, %v2638_v60 }
 0x4c9   :  { %14511 = vmatprep.subr.bf16.mxu1 %v19169_v35  ;;  %v2605_v35 = vld [vmem:[#allocation10 + $0x3750] sm:$0xff] }
 0x4ca   :  { %v19246_v45 = vcombine.low %v2597_v26, %v2605_v35 }
 0x4cb   :  { %14184 = vmatpush1.bf16.msra.mxu0 %v19166_v48  ;;  %v19247_v48 = vcombine.high %v2597_v26, %v2605_v35  ;;  %v2662_v26 = vld [vmem:[#allocation10 + $0x3918] sm:$0xff] }
 0x4cc   :  { %14512 = vmatpush1.bf16.msra.mxu1 %v19168_v42  ;;  %14185 = vmatprep.subr.bf16.mxu0 %v19183_v9  ;;  %v19249_v42 = vcombine.high %v2598_v15, %v2606_v40  ;;  %v2613_v9 = vld [vmem:[#allocation10 + $0x3790] sm:$0xff]  ;;  %v2670_v35 = vld [vmem:[#allocation10 + $0x3958] sm:$0xff]  ;;  %v19296_v40 = vcombine.low %v2646_v19, %v2654_v20 }
 0x4cd   :  { %14513 = vmatprep.subr.bf16.mxu1 %v19185_v43  ;;  %v2621_v43 = vld [vmem:[#allocation10 + $0x37d0] sm:$0xff] }
 0x4ce   :  { %v19262_v34 = vcombine.low %v2613_v9, %v2621_v43 }
 0x4cf   :  { %14186 = vmatpush1.bf16.msra.mxu0 %v19182_v50  ;;  %v19263_v50 = vcombine.high %v2613_v9, %v2621_v43  ;;  %v2678_v9 = vld [vmem:[#allocation10 + $0x3998] sm:$0xff] }
 0x4d0   :  { %14514 = vmatpush1.bf16.msra.mxu1 %v19184_v54  ;;  %14187 = vmatprep.subr.bf16.mxu0 %v19199_v58  ;;  %v19265_v54 = vcombine.high %v2614_v63, %v2622_v28  ;;  %v2629_v58 = vld [vmem:[#allocation10 + $0x3810] sm:$0xff]  ;;  %v2686_v43 = vld [vmem:[#allocation10 + $0x39d8] sm:$0xff]  ;;  %v19312_v28 = vcombine.low %v2662_v26, %v2670_v35 }
 0x4d1   :  { %14515 = vmatprep.subr.bf16.mxu1 %v19201_v7  ;;  %v2637_v7 = vld [vmem:[#allocation10 + $0x3850] sm:$0xff] }
 0x4d2   :  { %v19278_v18 = vcombine.low %v2629_v58, %v2637_v7 }
 0x4d3   :  { %14188 = vmatpush1.bf16.msra.mxu0 %v19198_v1  ;;  %v19279_v1 = vcombine.high %v2629_v58, %v2637_v7  ;;  %v2694_v58 = vld [vmem:[#allocation10 + $0x3a18] sm:$0xff] }
 0x4d4   :  { %14516 = vmatpush1.bf16.msra.mxu1 %v19200_v5  ;;  %14189 = vmatprep.subr.bf16.mxu0 %v19215_v8  ;;  %v19281_v5 = vcombine.high %v2630_v47, %v2638_v60  ;;  %v2645_v8 = vld [vmem:[#allocation10 + $0x3890] sm:$0xff]  ;;  %v2702_v7 = vld [vmem:[#allocation10 + $0x3a58] sm:$0xff]  ;;  %v19328_v60 = vcombine.low %v2678_v9, %v2686_v43 }
 0x4d5   :  { %14517 = vmatprep.subr.bf16.mxu1 %v19217_v11  ;;  %v2653_v11 = vld [vmem:[#allocation10 + $0x38d0] sm:$0xff] }
 0x4d6   :  { %v19294_v15 = vcombine.low %v2645_v8, %v2653_v11 }
 0x4d7   :  { %14190 = vmatpush1.bf16.msra.mxu0 %v19214_v4  ;;  %v19295_v4 = vcombine.high %v2645_v8, %v2653_v11  ;;  %v2710_v8 = vld [vmem:[#allocation10 + $0x3a98] sm:$0xff] }
 0x4d8   :  { %14518 = vmatpush1.bf16.msra.mxu1 %v19216_v22  ;;  %14191 = vmatprep.subr.bf16.mxu0 %v19231_v23  ;;  %v2661_v22 = vld [vmem:[#allocation10 + $0x3910] sm:$0xff]  ;;  %v2718_v11 = vld [vmem:[#allocation10 + $0x3ad8] sm:$0xff] }
 0x4d9   :  { %14519 = vmatprep.subr.bf16.mxu1 %v19233_v31  ;;  %v2669_v23 = vld [vmem:[#allocation10 + $0x3950] sm:$0xff]  ;;  %v19297_v31 = vcombine.high %v2646_v19, %v2654_v20  ;;  %v19344_v19 = vcombine.low %v2694_v58, %v2702_v7 }
 0x4da   :  { %v19310_v63 = vcombine.low %v2661_v22, %v2669_v23 }
 0x4db   :  { %14192 = vmatpush1.bf16.msra.mxu0 %v19230_v36  ;;  %v19311_v36 = vcombine.high %v2661_v22, %v2669_v23  ;;  %v2733_v22 = vld [vmem:[#allocation10 + $0x3b50] sm:$0xff]  ;;  %v2726_v23 = vld [vmem:[#allocation10 + $0x3b18] sm:$0xff] }
 0x4dc   :  { %14520 = vmatpush1.bf16.msra.mxu1 %v19232_v25  ;;  %14193 = vmatprep.subr.bf16.mxu0 %v19247_v48  ;;  %v19313_v25 = vcombine.high %v2662_v26, %v2670_v35  ;;  %v2677_v48 = vld [vmem:[#allocation10 + $0x3990] sm:$0xff]  ;;  %v19360_v35 = vcombine.low %v2710_v8, %v2718_v11 }
 0x4dd   :  { %14521 = vmatprep.subr.bf16.mxu1 %v19249_v42  ;;  %v2685_v42 = vld [vmem:[#allocation10 + $0x39d0] sm:$0xff] }
 0x4de   :  { %v19326_v47 = vcombine.low %v2677_v48, %v2685_v42 }
 0x4df   :  { %14194 = vmatpush1.bf16.msra.mxu0 %v19246_v45  ;;  %v19327_v45 = vcombine.high %v2677_v48, %v2685_v42  ;;  %v2742_v48 = vld [vmem:[#allocation10 + $0x3b98] sm:$0xff] }
 0x4e0   :  { %14522 = vmatpush1.bf16.msra.mxu1 %v19248_v49  ;;  %14195 = vmatprep.subr.bf16.mxu0 %v19263_v50  ;;  %v19329_v49 = vcombine.high %v2678_v9, %v2686_v43  ;;  %v2693_v50 = vld [vmem:[#allocation10 + $0x3a10] sm:$0xff]  ;;  %v2750_v42 = vld [vmem:[#allocation10 + $0x3bd8] sm:$0xff] }
 0x4e1   :  { %14523 = vmatprep.subr.bf16.mxu1 %v19265_v54  ;;  %v2701_v54 = vld [vmem:[#allocation10 + $0x3a50] sm:$0xff] }
 0x4e3   :  { %14196 = vmatpush1.bf16.msra.mxu0 %v19262_v34  ;;  %v19343_v34 = vcombine.high %v2693_v50, %v2701_v54 }
 0x4e4   :  { %14524 = vmatpush1.bf16.msra.mxu1 %v19264_v61  ;;  %14206 = vmatprep.subr.bf16.mxu0 %v19279_v1  ;;  %v19345_v61 = vcombine.high %v2694_v58, %v2702_v7  ;;  %v2709_v1 = vld [vmem:[#allocation10 + $0x3a90] sm:$0xff]  ;;  %v19392_v7 = vcombine.low %v2742_v48, %v2750_v42 }
 0x4e5   :  { %14534 = vmatprep.subr.bf16.mxu1 %v19281_v5  ;;  %v2717_v5 = vld [vmem:[#allocation10 + $0x3ad0] sm:$0xff] }
 0x4e6   :  { %14198 = vmatmul.mubr.bf16.vlgmr.msra.gmra.mrb[20].mxu0 %v20792_v32  ;;  %v19359_v20 = vcombine.high %v2709_v1, %v2717_v5  ;;  %v19358_v26 = vcombine.low %v2709_v1, %v2717_v5  ;;  %v2774_v1 = vld [vmem:[#allocation10 + $0x3c98] sm:$0xff] }
 0x4e7   :  { %14526 = vmatmul.mubr.bf16.vlgmr.msra.gmra.mrb[20].mxu1 %v20792_v32  ;;  %14207 = vmatpush1.bf16.msra.mxu0 %v19278_v18  ;;  %v19342_v18 = vcombine.low %v2693_v50, %v2701_v54  ;;  %v2758_v50 = vld [vmem:[#allocation10 + $0x3c18] sm:$0xff] }
 0x4e8   :  { %14238 = vmatprep.mubr.bf16.mxu0 %v20794_v10  ;;  %14535 = vmatpush1.bf16.msra.mxu1 %v19280_v21  ;;  %v19361_v21 = vcombine.high %v2710_v8, %v2718_v11  ;;  %v2766_v54 = vld [vmem:[#allocation10 + $0x3c58] sm:$0xff] }
 0x4e9   :  { %14566 = vmatprep.mubr.bf16.mxu1 %v20794_v10  ;;  %14208 = vmatprep.subr.bf16.mxu0 %v19295_v4  ;;  %v2725_v4 = vld [vmem:[#allocation10 + $0x3b10] sm:$0xff]  ;;  %v2782_v5 = vld [vmem:[#allocation10 + $0x3cd8] sm:$0xff]  ;;  %v19408_v11 = vcombine.low %v2758_v50, %v2766_v54 }
 0x4ea   :  { %14536 = vmatprep.subr.bf16.mxu1 %v19297_v31  ;;  %v2734_v31 = vld [vmem:[#allocation10 + $0x3b58] sm:$0xff]  ;;  %v19374_v9 = vcombine.low %v2725_v4, %v2733_v22 }
 0x4eb   :  { %14209 = vmatpush1.bf16.msra.mxu0 %v19294_v15  ;;  %v19375_v15 = vcombine.high %v2725_v4, %v2733_v22  ;;  %v19376_v43 = vcombine.low %v2726_v23, %v2734_v31  ;;  %v2790_v4 = vld [vmem:[#allocation10 + $0x3d18] sm:$0xff] }
 0x4ec   :  { %14537 = vmatpush1.bf16.msra.mxu1 %v19296_v40  ;;  %14210 = vmatprep.subr.bf16.mxu0 %v19311_v36  ;;  %v19377_v40 = vcombine.high %v2726_v23, %v2734_v31  ;;  %v2741_v36 = vld [vmem:[#allocation10 + $0x3b90] sm:$0xff]  ;;  %v2798_v22 = vld [vmem:[#allocation10 + $0x3d58] sm:$0xff]  ;;  %v19424_v31 = vcombine.low %v2774_v1, %v2782_v5 }
 0x4ed   :  { %14538 = vmatprep.subr.bf16.mxu1 %v19313_v25  ;;  %v2749_v25 = vld [vmem:[#allocation10 + $0x3bd0] sm:$0xff] }
 0x4ee   :  { %v19390_v58 = vcombine.low %v2741_v36, %v2749_v25 }
 0x4ef   :  { %14211 = vmatpush1.bf16.msra.mxu0 %v19310_v63  ;;  %v19391_v63 = vcombine.high %v2741_v36, %v2749_v25  ;;  %v2806_v36 = vld [vmem:[#allocation10 + $0x3d98] sm:$0xff] }
 0x4f0   :  { %14539 = vmatpush1.bf16.msra.mxu1 %v19312_v28  ;;  %14212 = vmatprep.subr.bf16.mxu0 %v19327_v45  ;;  %v19393_v28 = vcombine.high %v2742_v48, %v2750_v42  ;;  %v2757_v45 = vld [vmem:[#allocation10 + $0x3c10] sm:$0xff]  ;;  %v2814_v25 = vld [vmem:[#allocation10 + $0x3dd8] sm:$0xff]  ;;  %v19440_v42 = vcombine.low %v2790_v4, %v2798_v22 }
 0x4f1   :  { %14540 = vmatprep.subr.bf16.mxu1 %v19329_v49  ;;  %v2765_v49 = vld [vmem:[#allocation10 + $0x3c50] sm:$0xff] }
 0x4f2   :  { %v19406_v8 = vcombine.low %v2757_v45, %v2765_v49 }
 0x4f3   :  { %14213 = vmatpush1.bf16.msra.mxu0 %v19326_v47  ;;  %v19407_v47 = vcombine.high %v2757_v45, %v2765_v49  ;;  %v2822_v45 = vld [vmem:[#allocation10 + $0x3e18] sm:$0xff] }
 0x4f4   :  { %14541 = vmatpush1.bf16.msra.mxu1 %v19328_v60  ;;  %14214 = vmatprep.subr.bf16.mxu0 %v19343_v34  ;;  %v19409_v60 = vcombine.high %v2758_v50, %v2766_v54  ;;  %v2773_v34 = vld [vmem:[#allocation10 + $0x3c90] sm:$0xff]  ;;  %v2830_v49 = vld [vmem:[#allocation10 + $0x3e58] sm:$0xff]  ;;  %v19456_v54 = vcombine.low %v2806_v36, %v2814_v25 }
 0x4f5   :  { %14542 = vmatprep.subr.bf16.mxu1 %v19345_v61  ;;  %v2781_v61 = vld [vmem:[#allocation10 + $0x3cd0] sm:$0xff] }
 0x4f6   :  { %v19422_v23 = vcombine.low %v2773_v34, %v2781_v61 }
 0x4f7   :  { %14215 = vmatpush1.bf16.msra.mxu0 %v19342_v18  ;;  %v19423_v18 = vcombine.high %v2773_v34, %v2781_v61  ;;  %v2838_v34 = vld [vmem:[#allocation10 + $0x3e98] sm:$0xff] }
 0x4f8   :  { %14543 = vmatpush1.bf16.msra.mxu1 %v19344_v19  ;;  %14216 = vmatprep.subr.bf16.mxu0 %v19359_v20  ;;  %v19425_v19 = vcombine.high %v2774_v1, %v2782_v5  ;;  %v2789_v20 = vld [vmem:[#allocation10 + $0x3d10] sm:$0xff]  ;;  %v2846_v61 = vld [vmem:[#allocation10 + $0x3ed8] sm:$0xff]  ;;  %v19472_v5 = vcombine.low %v2822_v45, %v2830_v49 }
 0x4f9   :  { %14544 = vmatprep.subr.bf16.mxu1 %v19361_v21  ;;  %v2797_v21 = vld [vmem:[#allocation10 + $0x3d50] sm:$0xff] }
 0x4fa   :  { %v19438_v48 = vcombine.low %v2789_v20, %v2797_v21 }
 0x4fb   :  { %14217 = vmatpush1.bf16.msra.mxu0 %v19358_v26  ;;  %v19439_v26 = vcombine.high %v2789_v20, %v2797_v21  ;;  %v2854_v20 = vld [vmem:[#allocation10 + $0x3f18] sm:$0xff] }
 0x4fc   :  { %14545 = vmatpush1.bf16.msra.mxu1 %v19360_v35  ;;  %14218 = vmatprep.subr.bf16.mxu0 %v19375_v15  ;;  %v19441_v35 = vcombine.high %v2790_v4, %v2798_v22  ;;  %v2805_v15 = vld [vmem:[#allocation10 + $0x3d90] sm:$0xff]  ;;  %v2862_v21 = vld [vmem:[#allocation10 + $0x3f58] sm:$0xff]  ;;  %v19488_v22 = vcombine.low %v2838_v34, %v2846_v61 }
 0x4fd   :  { %14546 = vmatprep.subr.bf16.mxu1 %v19377_v40  ;;  %v2813_v40 = vld [vmem:[#allocation10 + $0x3dd0] sm:$0xff] }
 0x4fe   :  { %v19454_v50 = vcombine.low %v2805_v15, %v2813_v40 }
 0x4ff   :  { %14219 = vmatpush1.bf16.msra.mxu0 %v19374_v9  ;;  %v19455_v9 = vcombine.high %v2805_v15, %v2813_v40  ;;  %v2870_v15 = vld [vmem:[#allocation10 + $0x3f98] sm:$0xff] }
 0x500   :  { %14547 = vmatpush1.bf16.msra.mxu1 %v19376_v43  ;;  %14220 = vmatprep.subr.bf16.mxu0 %v19391_v63  ;;  %v19457_v43 = vcombine.high %v2806_v36, %v2814_v25  ;;  %v2821_v63 = vld [vmem:[#allocation10 + $0x3e10] sm:$0xff]  ;;  %v2878_v40 = vld [vmem:[#allocation10 + $0x3fd8] sm:$0xff]  ;;  %v19504_v25 = vcombine.low %v2854_v20, %v2862_v21 }
 0x501   :  { %14548 = vmatprep.subr.bf16.mxu1 %v19393_v28  ;;  %v2829_v28 = vld [vmem:[#allocation10 + $0x3e50] sm:$0xff] }
 0x502   :  { %v19470_v1 = vcombine.low %v2821_v63, %v2829_v28 }
 0x503   :  { %14221 = vmatpush1.bf16.msra.mxu0 %v19390_v58  ;;  %v19471_v58 = vcombine.high %v2821_v63, %v2829_v28  ;;  %v840_v63 = vld [vmem:[#allocation10 + $0x28] sm:$0xff] }
 0x504   :  { %14549 = vmatpush1.bf16.msra.mxu1 %v19392_v7  ;;  %14222 = vmatprep.subr.bf16.mxu0 %v19407_v47  ;;  %v19473_v7 = vcombine.high %v2822_v45, %v2830_v49  ;;  %v2837_v47 = vld [vmem:[#allocation10 + $0x3e90] sm:$0xff]  ;;  %v848_v28 = vld [vmem:[#allocation10 + $0x68] sm:$0xff]  ;;  %v19520_v49 = vcombine.low %v2870_v15, %v2878_v40 }
 0x505   :  { %14550 = vmatprep.subr.bf16.mxu1 %v19409_v60  ;;  %v2845_v60 = vld [vmem:[#allocation10 + $0x3ed0] sm:$0xff] }
 0x506   :  { %v19486_v4 = vcombine.low %v2837_v47, %v2845_v60 }
 0x507   :  { %14223 = vmatpush1.bf16.msra.mxu0 %v19406_v8  ;;  %v19487_v8 = vcombine.high %v2837_v47, %v2845_v60  ;;  %v856_v60 = vld [vmem:[#allocation10 + $0xa8] sm:$0xff] }
 0x508   :  { %14551 = vmatpush1.bf16.msra.mxu1 %v19408_v11  ;;  %14224 = vmatprep.subr.bf16.mxu0 %v19423_v18  ;;  %v19489_v11 = vcombine.high %v2838_v34, %v2846_v61  ;;  %v2853_v18 = vld [vmem:[#allocation10 + $0x3f10] sm:$0xff]  ;;  %v864_v34 = vld [vmem:[#allocation10 + $0xe8] sm:$0xff]  ;;  %v17492_v61 = vcombine.low %v840_v63, %v848_v28 }
 0x509   :  { %14552 = vmatprep.subr.bf16.mxu1 %v19425_v19  ;;  %v2861_v19 = vld [vmem:[#allocation10 + $0x3f50] sm:$0xff] }
 0x50a   :  { %v19502_v36 = vcombine.low %v2853_v18, %v2861_v19 }
 0x50b   :  { %14225 = vmatpush1.bf16.msra.mxu0 %v19422_v23  ;;  %v19503_v23 = vcombine.high %v2853_v18, %v2861_v19  ;;  %v872_v18 = vld [vmem:[#allocation10 + $0x128] sm:$0xff] }
 0x50c   :  { %14553 = vmatpush1.bf16.msra.mxu1 %v19424_v31  ;;  %14226 = vmatprep.subr.bf16.mxu0 %v19439_v26  ;;  %v19505_v31 = vcombine.high %v2854_v20, %v2862_v21  ;;  %v2869_v26 = vld [vmem:[#allocation10 + $0x3f90] sm:$0xff]  ;;  %v880_v19 = vld [vmem:[#allocation10 + $0x168] sm:$0xff]  ;;  %v17508_v21 = vcombine.low %v856_v60, %v864_v34 }
 0x50d   :  { %14554 = vmatprep.subr.bf16.mxu1 %v19441_v35  ;;  %v2877_v35 = vld [vmem:[#allocation10 + $0x3fd0] sm:$0xff] }
 0x50e   :  { %v19518_v45 = vcombine.low %v2869_v26, %v2877_v35 }
 0x50f   :  { %14227 = vmatpush1.bf16.msra.mxu0 %v19438_v48  ;;  %v19519_v48 = vcombine.high %v2869_v26, %v2877_v35  ;;  %v888_v26 = vld [vmem:[#allocation10 + $0x1a8] sm:$0xff] }
 0x510   :  { %14555 = vmatpush1.bf16.msra.mxu1 %v19440_v42  ;;  %14228 = vmatprep.subr.bf16.mxu0 %v19455_v9  ;;  %v19521_v42 = vcombine.high %v2870_v15, %v2878_v40  ;;  %v839_v9 = vld [vmem:[#allocation10 + $0x20] sm:$0xff]  ;;  %v896_v35 = vld [vmem:[#allocation10 + $0x1e8] sm:$0xff]  ;;  %v17524_v40 = vcombine.low %v872_v18, %v880_v19 }
 0x511   :  { %14556 = vmatprep.subr.bf16.mxu1 %v19457_v43  ;;  %v847_v43 = vld [vmem:[#allocation10 + $0x60] sm:$0xff] }
 0x512   :  { %v17490_v47 = vcombine.low %v839_v9, %v847_v43 }
 0x513   :  { %14229 = vmatpush1.bf16.msra.mxu0 %v19454_v50  ;;  %v17491_v50 = vcombine.high %v839_v9, %v847_v43  ;;  %v904_v9 = vld [vmem:[#allocation10 + $0x228] sm:$0xff] }
 0x514   :  { %14557 = vmatpush1.bf16.msra.mxu1 %v19456_v54  ;;  %14230 = vmatprep.subr.bf16.mxu0 %v19471_v58  ;;  %v17493_v54 = vcombine.high %v840_v63, %v848_v28  ;;  %v855_v58 = vld [vmem:[#allocation10 + $0xa0] sm:$0xff]  ;;  %v912_v43 = vld [vmem:[#allocation10 + $0x268] sm:$0xff]  ;;  %v17540_v28 = vcombine.low %v888_v26, %v896_v35 }
 0x515   :  { %14558 = vmatprep.subr.bf16.mxu1 %v19473_v7  ;;  %v863_v7 = vld [vmem:[#allocation10 + $0xe0] sm:$0xff] }
 0x516   :  { %v17506_v20 = vcombine.low %v855_v58, %v863_v7 }
 0x517   :  { %14231 = vmatpush1.bf16.msra.mxu0 %v19470_v1  ;;  %v17507_v1 = vcombine.high %v855_v58, %v863_v7  ;;  %v920_v58 = vld [vmem:[#allocation10 + $0x2a8] sm:$0xff] }
 0x518   :  { %14559 = vmatpush1.bf16.msra.mxu1 %v19472_v5  ;;  %14232 = vmatprep.subr.bf16.mxu0 %v19487_v8  ;;  %v871_v5 = vld [vmem:[#allocation10 + $0x120] sm:$0xff]  ;;  %v928_v7 = vld [vmem:[#allocation10 + $0x2e8] sm:$0xff] }
 0x519   :  { %14560 = vmatprep.subr.bf16.mxu1 %v19489_v11  ;;  %v879_v8 = vld [vmem:[#allocation10 + $0x160] sm:$0xff]  ;;  %v17509_v11 = vcombine.high %v856_v60, %v864_v34  ;;  %v17556_v60 = vcombine.low %v904_v9, %v912_v43 }
 0x51a   :  { %v17522_v15 = vcombine.low %v871_v5, %v879_v8 }
 0x51b   :  { %14233 = vmatpush1.bf16.msra.mxu0 %v19486_v4  ;;  %v17523_v4 = vcombine.high %v871_v5, %v879_v8  ;;  %v943_v5 = vld [vmem:[#allocation10 + $0x360] sm:$0xff]  ;;  %v936_v8 = vld [vmem:[#allocation10 + $0x328] sm:$0xff] }
 0x51c   :  { %14561 = vmatpush1.bf16.msra.mxu1 %v19488_v22  ;;  %14234 = vmatprep.subr.bf16.mxu0 %v19503_v23  ;;  %v17525_v22 = vcombine.high %v872_v18, %v880_v19  ;;  %v887_v23 = vld [vmem:[#allocation10 + $0x1a0] sm:$0xff]  ;;  %v17572_v19 = vcombine.low %v920_v58, %v928_v7 }
 0x51d   :  { %14562 = vmatprep.subr.bf16.mxu1 %v19505_v31  ;;  %v895_v31 = vld [vmem:[#allocation10 + $0x1e0] sm:$0xff] }
 0x51e   :  { %v17538_v63 = vcombine.low %v887_v23, %v895_v31 }
 0x51f   :  { %14235 = vmatpush1.bf16.msra.mxu0 %v19502_v36  ;;  %v17539_v36 = vcombine.high %v887_v23, %v895_v31  ;;  %v952_v23 = vld [vmem:[#allocation10 + $0x3a8] sm:$0xff] }
 0x520   :  { %14563 = vmatpush1.bf16.msra.mxu1 %v19504_v25  ;;  %14236 = vmatprep.subr.bf16.mxu0 %v19519_v48  ;;  %v17541_v25 = vcombine.high %v888_v26, %v896_v35  ;;  %v903_v48 = vld [vmem:[#allocation10 + $0x220] sm:$0xff]  ;;  %v960_v31 = vld [vmem:[#allocation10 + $0x3e8] sm:$0xff] }
 0x521   :  { %14564 = vmatprep.subr.bf16.mxu1 %v19521_v42  ;;  %v911_v42 = vld [vmem:[#allocation10 + $0x260] sm:$0xff] }
 0x523   :  { %14237 = vmatpush1.bf16.msra.mxu0 %v19518_v45  ;;  %v17555_v45 = vcombine.high %v903_v48, %v911_v42 }
 0x524   :  { %14565 = vmatpush1.bf16.msra.mxu1 %v19520_v49  ;;  %14575 = vmatprep.subr.bf16.mxu0 %v17491_v50  ;;  %v17557_v49 = vcombine.high %v904_v9, %v912_v43  ;;  %v919_v50 = vld [vmem:[#allocation10 + $0x2a0] sm:$0xff]  ;;  %v17604_v43 = vcombine.low %v952_v23, %v960_v31 }
 0x525   :  { %14903 = vmatprep.subr.bf16.mxu1 %v17493_v54  ;;  %v927_v54 = vld [vmem:[#allocation10 + $0x2e0] sm:$0xff] }
 0x526   :  { %14239 = vmatmul.mubr.bf16.vlgmr.msra.gmra.mrb[20].mxu0 %v20803_v3  ;;  %v17571_v34 = vcombine.high %v919_v50, %v927_v54  ;;  %v17570_v18 = vcombine.low %v919_v50, %v927_v54  ;;  %v984_v50 = vld [vmem:[#allocation10 + $0x4a8] sm:$0xff] }
 0x527   :  { %14567 = vmatmul.mubr.bf16.vlgmr.msra.gmra.mrb[20].mxu1 %v20803_v3  ;;  %14576 = vmatpush1.bf16.msra.mxu0 %v17490_v47  ;;  %v17554_v47 = vcombine.low %v903_v48, %v911_v42  ;;  %v968_v48 = vld [vmem:[#allocation10 + $0x428] sm:$0xff] }
 0x528   :  { %14607 = vmatprep.mubr.bf16.mxu0 %v20662_v37  ;;  %14904 = vmatpush1.bf16.msra.mxu1 %v17492_v61  ;;  %v17573_v61 = vcombine.high %v920_v58, %v928_v7  ;;  %v976_v42 = vld [vmem:[#allocation10 + $0x468] sm:$0xff] }
 0x529   :  { %14935 = vmatprep.mubr.bf16.mxu1 %v20662_v37  ;;  %14577 = vmatprep.subr.bf16.mxu0 %v17507_v1  ;;  %v935_v1 = vld [vmem:[#allocation10 + $0x320] sm:$0xff]  ;;  %v992_v54 = vld [vmem:[#allocation10 + $0x4e8] sm:$0xff]  ;;  %v17620_v7 = vcombine.low %v968_v48, %v976_v42 }
 0x52a   :  { %14905 = vmatprep.subr.bf16.mxu1 %v17509_v11  ;;  %v944_v11 = vld [vmem:[#allocation10 + $0x368] sm:$0xff]  ;;  %v17586_v26 = vcombine.low %v935_v1, %v943_v5 }
 0x52b   :  { %14578 = vmatpush1.bf16.msra.mxu0 %v17506_v20  ;;  %v17587_v20 = vcombine.high %v935_v1, %v943_v5  ;;  %v17588_v35 = vcombine.low %v936_v8, %v944_v11  ;;  %v1000_v1 = vld [vmem:[#allocation10 + $0x528] sm:$0xff] }
 0x52c   :  { %14906 = vmatpush1.bf16.msra.mxu1 %v17508_v21  ;;  %14579 = vmatprep.subr.bf16.mxu0 %v17523_v4  ;;  %v17589_v21 = vcombine.high %v936_v8, %v944_v11  ;;  %v951_v4 = vld [vmem:[#allocation10 + $0x3a0] sm:$0xff]  ;;  %v1008_v5 = vld [vmem:[#allocation10 + $0x568] sm:$0xff]  ;;  %v17636_v11 = vcombine.low %v984_v50, %v992_v54 }
 0x52d   :  { %14907 = vmatprep.subr.bf16.mxu1 %v17525_v22  ;;  %v959_v22 = vld [vmem:[#allocation10 + $0x3e0] sm:$0xff] }
 0x52e   :  { %v17602_v9 = vcombine.low %v951_v4, %v959_v22 }
 0x52f   :  { %14580 = vmatpush1.bf16.msra.mxu0 %v17522_v15  ;;  %v17603_v15 = vcombine.high %v951_v4, %v959_v22  ;;  %v1016_v4 = vld [vmem:[#allocation10 + $0x5a8] sm:$0xff] }
 0x530   :  { %14908 = vmatpush1.bf16.msra.mxu1 %v17524_v40  ;;  %14581 = vmatprep.subr.bf16.mxu0 %v17539_v36  ;;  %v17605_v40 = vcombine.high %v952_v23, %v960_v31  ;;  %v967_v36 = vld [vmem:[#allocation10 + $0x420] sm:$0xff]  ;;  %v1024_v22 = vld [vmem:[#allocation10 + $0x5e8] sm:$0xff]  ;;  %v17652_v31 = vcombine.low %v1000_v1, %v1008_v5 }
 0x531   :  { %14909 = vmatprep.subr.bf16.mxu1 %v17541_v25  ;;  %v975_v25 = vld [vmem:[#allocation10 + $0x460] sm:$0xff] }
 0x532   :  { %v17618_v58 = vcombine.low %v967_v36, %v975_v25 }
 0x533   :  { %14582 = vmatpush1.bf16.msra.mxu0 %v17538_v63  ;;  %v17619_v63 = vcombine.high %v967_v36, %v975_v25  ;;  %v1032_v36 = vld [vmem:[#allocation10 + $0x628] sm:$0xff] }
 0x534   :  { %14910 = vmatpush1.bf16.msra.mxu1 %v17540_v28  ;;  %14583 = vmatprep.subr.bf16.mxu0 %v17555_v45  ;;  %v17621_v28 = vcombine.high %v968_v48, %v976_v42  ;;  %v983_v45 = vld [vmem:[#allocation10 + $0x4a0] sm:$0xff]  ;;  %v1040_v25 = vld [vmem:[#allocation10 + $0x668] sm:$0xff]  ;;  %v17668_v42 = vcombine.low %v1016_v4, %v1024_v22 }
 0x535   :  { %14911 = vmatprep.subr.bf16.mxu1 %v17557_v49  ;;  %v991_v49 = vld [vmem:[#allocation10 + $0x4e0] sm:$0xff] }
 0x536   :  { %v17634_v8 = vcombine.low %v983_v45, %v991_v49 }
 0x537   :  { %14584 = vmatpush1.bf16.msra.mxu0 %v17554_v47  ;;  %v17635_v47 = vcombine.high %v983_v45, %v991_v49  ;;  %v1048_v45 = vld [vmem:[#allocation10 + $0x6a8] sm:$0xff] }
 0x538   :  { %14912 = vmatpush1.bf16.msra.mxu1 %v17556_v60  ;;  %14585 = vmatprep.subr.bf16.mxu0 %v17571_v34  ;;  %v17637_v60 = vcombine.high %v984_v50, %v992_v54  ;;  %v999_v34 = vld [vmem:[#allocation10 + $0x520] sm:$0xff]  ;;  %v1056_v49 = vld [vmem:[#allocation10 + $0x6e8] sm:$0xff]  ;;  %v17684_v54 = vcombine.low %v1032_v36, %v1040_v25 }
 0x539   :  { %14913 = vmatprep.subr.bf16.mxu1 %v17573_v61  ;;  %v1007_v61 = vld [vmem:[#allocation10 + $0x560] sm:$0xff] }
 0x53a   :  { %v17650_v23 = vcombine.low %v999_v34, %v1007_v61 }
 0x53b   :  { %14586 = vmatpush1.bf16.msra.mxu0 %v17570_v18  ;;  %v17651_v18 = vcombine.high %v999_v34, %v1007_v61  ;;  %v1064_v34 = vld [vmem:[#allocation10 + $0x728] sm:$0xff] }
 0x53c   :  { %14914 = vmatpush1.bf16.msra.mxu1 %v17572_v19  ;;  %14587 = vmatprep.subr.bf16.mxu0 %v17587_v20  ;;  %v17653_v19 = vcombine.high %v1000_v1, %v1008_v5  ;;  %v1015_v20 = vld [vmem:[#allocation10 + $0x5a0] sm:$0xff]  ;;  %v1072_v61 = vld [vmem:[#allocation10 + $0x768] sm:$0xff]  ;;  %v17700_v5 = vcombine.low %v1048_v45, %v1056_v49 }
 0x53d   :  { %14915 = vmatprep.subr.bf16.mxu1 %v17589_v21  ;;  %v1023_v21 = vld [vmem:[#allocation10 + $0x5e0] sm:$0xff] }
 0x53e   :  { %v17666_v48 = vcombine.low %v1015_v20, %v1023_v21 }
 0x53f   :  { %14588 = vmatpush1.bf16.msra.mxu0 %v17586_v26  ;;  %v17667_v26 = vcombine.high %v1015_v20, %v1023_v21  ;;  %v1080_v20 = vld [vmem:[#allocation10 + $0x7a8] sm:$0xff] }
 0x540   :  { %14916 = vmatpush1.bf16.msra.mxu1 %v17588_v35  ;;  %14589 = vmatprep.subr.bf16.mxu0 %v17603_v15  ;;  %v17669_v35 = vcombine.high %v1016_v4, %v1024_v22  ;;  %v1031_v15 = vld [vmem:[#allocation10 + $0x620] sm:$0xff]  ;;  %v1088_v21 = vld [vmem:[#allocation10 + $0x7e8] sm:$0xff]  ;;  %v17716_v22 = vcombine.low %v1064_v34, %v1072_v61 }
 0x541   :  { %14917 = vmatprep.subr.bf16.mxu1 %v17605_v40  ;;  %v1039_v40 = vld [vmem:[#allocation10 + $0x660] sm:$0xff] }
 0x542   :  { %v17682_v50 = vcombine.low %v1031_v15, %v1039_v40 }
 0x543   :  { %14590 = vmatpush1.bf16.msra.mxu0 %v17602_v9  ;;  %v17683_v9 = vcombine.high %v1031_v15, %v1039_v40  ;;  %v1096_v15 = vld [vmem:[#allocation10 + $0x828] sm:$0xff] }
 0x544   :  { %14918 = vmatpush1.bf16.msra.mxu1 %v17604_v43  ;;  %14591 = vmatprep.subr.bf16.mxu0 %v17619_v63  ;;  %v17685_v43 = vcombine.high %v1032_v36, %v1040_v25  ;;  %v1047_v63 = vld [vmem:[#allocation10 + $0x6a0] sm:$0xff]  ;;  %v1104_v40 = vld [vmem:[#allocation10 + $0x868] sm:$0xff]  ;;  %v17732_v25 = vcombine.low %v1080_v20, %v1088_v21 }
 0x545   :  { %14919 = vmatprep.subr.bf16.mxu1 %v17621_v28  ;;  %v1055_v28 = vld [vmem:[#allocation10 + $0x6e0] sm:$0xff] }
 0x546   :  { %v17698_v1 = vcombine.low %v1047_v63, %v1055_v28 }
 0x547   :  { %14592 = vmatpush1.bf16.msra.mxu0 %v17618_v58  ;;  %v17699_v58 = vcombine.high %v1047_v63, %v1055_v28  ;;  %v1112_v28 = vld [vmem:[#allocation10 + $0x8a8] sm:$0xff] }
 0x548   :  { %14920 = vmatpush1.bf16.msra.mxu1 %v17620_v7  ;;  %14593 = vmatprep.subr.bf16.mxu0 %v17635_v47  ;;  %v17701_v7 = vcombine.high %v1048_v45, %v1056_v49  ;;  %v1063_v47 = vld [vmem:[#allocation10 + $0x720] sm:$0xff]  ;;  %v1120_v45 = vld [vmem:[#allocation10 + $0x8e8] sm:$0xff]  ;;  %v17748_v49 = vcombine.low %v1096_v15, %v1104_v40 }
 0x549   :  { %14921 = vmatprep.subr.bf16.mxu1 %v17637_v60  ;;  %v1071_v60 = vld [vmem:[#allocation10 + $0x760] sm:$0xff] }
 0x54a   :  { %v17714_v4 = vcombine.low %v1063_v47, %v1071_v60 }
 0x54b   :  { %14594 = vmatpush1.bf16.msra.mxu0 %v17634_v8  ;;  %v17715_v8 = vcombine.high %v1063_v47, %v1071_v60  ;;  %v1128_v47 = vld [vmem:[#allocation10 + $0x928] sm:$0xff] }
 0x54c   :  { %14922 = vmatpush1.bf16.msra.mxu1 %v17636_v11  ;;  %14595 = vmatprep.subr.bf16.mxu0 %v17651_v18  ;;  %v17717_v11 = vcombine.high %v1064_v34, %v1072_v61  ;;  %v1079_v18 = vld [vmem:[#allocation10 + $0x7a0] sm:$0xff]  ;;  %v1136_v60 = vld [vmem:[#allocation10 + $0x968] sm:$0xff]  ;;  %v17764_v61 = vcombine.low %v1112_v28, %v1120_v45 }
 0x54d   :  { %14923 = vmatprep.subr.bf16.mxu1 %v17653_v19  ;;  %v1087_v19 = vld [vmem:[#allocation10 + $0x7e0] sm:$0xff] }
 0x54e   :  { %v17730_v36 = vcombine.low %v1079_v18, %v1087_v19 }
 0x54f   :  { %14596 = vmatpush1.bf16.msra.mxu0 %v17650_v23  ;;  %v17731_v23 = vcombine.high %v1079_v18, %v1087_v19  ;;  %v1144_v18 = vld [vmem:[#allocation10 + $0x9a8] sm:$0xff] }
 0x550   :  { %14924 = vmatpush1.bf16.msra.mxu1 %v17652_v31  ;;  %14597 = vmatprep.subr.bf16.mxu0 %v17667_v26  ;;  %v17733_v31 = vcombine.high %v1080_v20, %v1088_v21  ;;  %v1095_v26 = vld [vmem:[#allocation10 + $0x820] sm:$0xff]  ;;  %v1152_v19 = vld [vmem:[#allocation10 + $0x9e8] sm:$0xff]  ;;  %v17780_v21 = vcombine.low %v1128_v47, %v1136_v60 }
 0x551   :  { %14925 = vmatprep.subr.bf16.mxu1 %v17669_v35  ;;  %v1103_v35 = vld [vmem:[#allocation10 + $0x860] sm:$0xff] }
 0x552   :  { %v17746_v63 = vcombine.low %v1095_v26, %v1103_v35 }
 0x553   :  { %14598 = vmatpush1.bf16.msra.mxu0 %v17666_v48  ;;  %v17747_v48 = vcombine.high %v1095_v26, %v1103_v35  ;;  %v1160_v26 = vld [vmem:[#allocation10 + $0xa28] sm:$0xff] }
 0x554   :  { %14926 = vmatpush1.bf16.msra.mxu1 %v17668_v42  ;;  %14599 = vmatprep.subr.bf16.mxu0 %v17683_v9  ;;  %v17749_v42 = vcombine.high %v1096_v15, %v1104_v40  ;;  %v1111_v9 = vld [vmem:[#allocation10 + $0x8a0] sm:$0xff]  ;;  %v1168_v35 = vld [vmem:[#allocation10 + $0xa68] sm:$0xff]  ;;  %v17796_v40 = vcombine.low %v1144_v18, %v1152_v19 }
 0x555   :  { %14927 = vmatprep.subr.bf16.mxu1 %v17685_v43  ;;  %v1119_v43 = vld [vmem:[#allocation10 + $0x8e0] sm:$0xff] }
 0x556   :  { %v17762_v34 = vcombine.low %v1111_v9, %v1119_v43 }
 0x557   :  { %14600 = vmatpush1.bf16.msra.mxu0 %v17682_v50  ;;  %v17763_v50 = vcombine.high %v1111_v9, %v1119_v43  ;;  %v1176_v9 = vld [vmem:[#allocation10 + $0xaa8] sm:$0xff] }
 0x558   :  { %14928 = vmatpush1.bf16.msra.mxu1 %v17684_v54  ;;  %14601 = vmatprep.subr.bf16.mxu0 %v17699_v58  ;;  %v1127_v54 = vld [vmem:[#allocation10 + $0x920] sm:$0xff]  ;;  %v1184_v43 = vld [vmem:[#allocation10 + $0xae8] sm:$0xff] }
 0x559   :  { %14929 = vmatprep.subr.bf16.mxu1 %v17701_v7  ;;  %v1135_v58 = vld [vmem:[#allocation10 + $0x960] sm:$0xff]  ;;  %v17765_v7 = vcombine.high %v1112_v28, %v1120_v45  ;;  %v17812_v28 = vcombine.low %v1160_v26, %v1168_v35 }
 0x55a   :  { %v17778_v20 = vcombine.low %v1127_v54, %v1135_v58 }
 0x55b   :  { %14602 = vmatpush1.bf16.msra.mxu0 %v17698_v1  ;;  %v17779_v1 = vcombine.high %v1127_v54, %v1135_v58  ;;  %v1199_v54 = vld [vmem:[#allocation10 + $0xb60] sm:$0xff]  ;;  %v1192_v58 = vld [vmem:[#allocation10 + $0xb28] sm:$0xff] }
 0x55c   :  { %14930 = vmatpush1.bf16.msra.mxu1 %v17700_v5  ;;  %14603 = vmatprep.subr.bf16.mxu0 %v17715_v8  ;;  %v17781_v5 = vcombine.high %v1128_v47, %v1136_v60  ;;  %v1143_v8 = vld [vmem:[#allocation10 + $0x9a0] sm:$0xff]  ;;  %v17828_v60 = vcombine.low %v1176_v9, %v1184_v43 }
 0x55d   :  { %14931 = vmatprep.subr.bf16.mxu1 %v17717_v11  ;;  %v1151_v11 = vld [vmem:[#allocation10 + $0x9e0] sm:$0xff] }
 0x55e   :  { %v17794_v15 = vcombine.low %v1143_v8, %v1151_v11 }
 0x55f   :  { %14604 = vmatpush1.bf16.msra.mxu0 %v17714_v4  ;;  %v17795_v4 = vcombine.high %v1143_v8, %v1151_v11  ;;  %v1208_v8 = vld [vmem:[#allocation10 + $0xba8] sm:$0xff] }
 0x560   :  { %14932 = vmatpush1.bf16.msra.mxu1 %v17716_v22  ;;  %14605 = vmatprep.subr.bf16.mxu0 %v17731_v23  ;;  %v17797_v22 = vcombine.high %v1144_v18, %v1152_v19  ;;  %v1159_v23 = vld [vmem:[#allocation10 + $0xa20] sm:$0xff]  ;;  %v1216_v11 = vld [vmem:[#allocation10 + $0xbe8] sm:$0xff] }
 0x561   :  { %14933 = vmatprep.subr.bf16.mxu1 %v17733_v31  ;;  %v1167_v31 = vld [vmem:[#allocation10 + $0xa60] sm:$0xff] }
 0x563   :  { %14606 = vmatpush1.bf16.msra.mxu0 %v17730_v36  ;;  %v17811_v36 = vcombine.high %v1159_v23, %v1167_v31 }
 0x564   :  { %14934 = vmatpush1.bf16.msra.mxu1 %v17732_v25  ;;  %14616 = vmatprep.subr.bf16.mxu0 %v17747_v48  ;;  %v17813_v25 = vcombine.high %v1160_v26, %v1168_v35  ;;  %v1175_v48 = vld [vmem:[#allocation10 + $0xaa0] sm:$0xff]  ;;  %v17860_v35 = vcombine.low %v1208_v8, %v1216_v11 }
 0x565   :  { %14944 = vmatprep.subr.bf16.mxu1 %v17749_v42  ;;  %v1183_v42 = vld [vmem:[#allocation10 + $0xae0] sm:$0xff] }
 0x566   :  { %14608 = vmatmul.mubr.bf16.vlgmr.msra.gmra.mrb[24].mxu0 %v20664_v39  ;;  %v17827_v45 = vcombine.high %v1175_v48, %v1183_v42  ;;  %v17826_v47 = vcombine.low %v1175_v48, %v1183_v42  ;;  %v1240_v48 = vld [vmem:[#allocation10 + $0xca8] sm:$0xff] }
 0x567   :  { %14936 = vmatmul.mubr.bf16.vlgmr.msra.gmra.mrb[24].mxu1 %v20664_v39  ;;  %14617 = vmatpush1.bf16.msra.mxu0 %v17746_v63  ;;  %v17810_v63 = vcombine.low %v1159_v23, %v1167_v31  ;;  %v1224_v23 = vld [vmem:[#allocation10 + $0xc28] sm:$0xff] }
 0x568   :  { %14648 = vmatprep.mubr.bf16.mxu0 %v20668_v46  ;;  %14945 = vmatpush1.bf16.msra.mxu1 %v17748_v49  ;;  %v17829_v49 = vcombine.high %v1176_v9, %v1184_v43  ;;  %v1232_v31 = vld [vmem:[#allocation10 + $0xc68] sm:$0xff] }
 0x569   :  { %14976 = vmatprep.mubr.bf16.mxu1 %v20668_v46  ;;  %14618 = vmatprep.subr.bf16.mxu0 %v17763_v50  ;;  %v1191_v50 = vld [vmem:[#allocation10 + $0xb20] sm:$0xff]  ;;  %v1248_v42 = vld [vmem:[#allocation10 + $0xce8] sm:$0xff]  ;;  %v17876_v43 = vcombine.low %v1224_v23, %v1232_v31 }
 0x56a   :  { %14946 = vmatprep.subr.bf16.mxu1 %v17765_v7  ;;  %v1200_v7 = vld [vmem:[#allocation10 + $0xb68] sm:$0xff]  ;;  %v17842_v18 = vcombine.low %v1191_v50, %v1199_v54 }
 0x56b   :  { %14619 = vmatpush1.bf16.msra.mxu0 %v17762_v34  ;;  %v17843_v34 = vcombine.high %v1191_v50, %v1199_v54  ;;  %v17844_v19 = vcombine.low %v1192_v58, %v1200_v7  ;;  %v1256_v50 = vld [vmem:[#allocation10 + $0xd28] sm:$0xff] }
 0x56c   :  { %14947 = vmatpush1.bf16.msra.mxu1 %v17764_v61  ;;  %14620 = vmatprep.subr.bf16.mxu0 %v17779_v1  ;;  %v17845_v61 = vcombine.high %v1192_v58, %v1200_v7  ;;  %v1207_v1 = vld [vmem:[#allocation10 + $0xba0] sm:$0xff]  ;;  %v1264_v54 = vld [vmem:[#allocation10 + $0xd68] sm:$0xff]  ;;  %v17892_v7 = vcombine.low %v1240_v48, %v1248_v42 }
 0x56d   :  { %14948 = vmatprep.subr.bf16.mxu1 %v17781_v5  ;;  %v1215_v5 = vld [vmem:[#allocation10 + $0xbe0] sm:$0xff] }
 0x56e   :  { %v17858_v26 = vcombine.low %v1207_v1, %v1215_v5 }
 0x56f   :  { %14621 = vmatpush1.bf16.msra.mxu0 %v17778_v20  ;;  %v17859_v20 = vcombine.high %v1207_v1, %v1215_v5  ;;  %v1272_v1 = vld [vmem:[#allocation10 + $0xda8] sm:$0xff] }
 0x570   :  { %14949 = vmatpush1.bf16.msra.mxu1 %v17780_v21  ;;  %14622 = vmatprep.subr.bf16.mxu0 %v17795_v4  ;;  %v17861_v21 = vcombine.high %v1208_v8, %v1216_v11  ;;  %v1223_v4 = vld [vmem:[#allocation10 + $0xc20] sm:$0xff]  ;;  %v1280_v5 = vld [vmem:[#allocation10 + $0xde8] sm:$0xff]  ;;  %v17908_v11 = vcombine.low %v1256_v50, %v1264_v54 }
 0x571   :  { %14950 = vmatprep.subr.bf16.mxu1 %v17797_v22  ;;  %v1231_v22 = vld [vmem:[#allocation10 + $0xc60] sm:$0xff] }
 0x572   :  { %v17874_v9 = vcombine.low %v1223_v4, %v1231_v22 }
 0x573   :  { %14623 = vmatpush1.bf16.msra.mxu0 %v17794_v15  ;;  %v17875_v15 = vcombine.high %v1223_v4, %v1231_v22  ;;  %v1288_v4 = vld [vmem:[#allocation10 + $0xe28] sm:$0xff] }
 0x574   :  { %14951 = vmatpush1.bf16.msra.mxu1 %v17796_v40  ;;  %14624 = vmatprep.subr.bf16.mxu0 %v17811_v36  ;;  %v17877_v40 = vcombine.high %v1224_v23, %v1232_v31  ;;  %v1239_v36 = vld [vmem:[#allocation10 + $0xca0] sm:$0xff]  ;;  %v1296_v22 = vld [vmem:[#allocation10 + $0xe68] sm:$0xff]  ;;  %v17924_v31 = vcombine.low %v1272_v1, %v1280_v5 }
 0x575   :  { %14952 = vmatprep.subr.bf16.mxu1 %v17813_v25  ;;  %v1247_v25 = vld [vmem:[#allocation10 + $0xce0] sm:$0xff] }
 0x576   :  { %v17890_v58 = vcombine.low %v1239_v36, %v1247_v25 }
 0x577   :  { %14625 = vmatpush1.bf16.msra.mxu0 %v17810_v63  ;;  %v17891_v63 = vcombine.high %v1239_v36, %v1247_v25  ;;  %v1304_v36 = vld [vmem:[#allocation10 + $0xea8] sm:$0xff] }
 0x578   :  { %14953 = vmatpush1.bf16.msra.mxu1 %v17812_v28  ;;  %14626 = vmatprep.subr.bf16.mxu0 %v17827_v45  ;;  %v17893_v28 = vcombine.high %v1240_v48, %v1248_v42  ;;  %v1255_v45 = vld [vmem:[#allocation10 + $0xd20] sm:$0xff]  ;;  %v1312_v25 = vld [vmem:[#allocation10 + $0xee8] sm:$0xff]  ;;  %v17940_v42 = vcombine.low %v1288_v4, %v1296_v22 }
 0x579   :  { %14954 = vmatprep.subr.bf16.mxu1 %v17829_v49  ;;  %v1263_v49 = vld [vmem:[#allocation10 + $0xd60] sm:$0xff] }
 0x57a   :  { %v17906_v8 = vcombine.low %v1255_v45, %v1263_v49 }
 0x57b   :  { %14627 = vmatpush1.bf16.msra.mxu0 %v17826_v47  ;;  %v17907_v47 = vcombine.high %v1255_v45, %v1263_v49  ;;  %v1320_v45 = vld [vmem:[#allocation10 + $0xf28] sm:$0xff] }
 0x57c   :  { %14955 = vmatpush1.bf16.msra.mxu1 %v17828_v60  ;;  %14628 = vmatprep.subr.bf16.mxu0 %v17843_v34  ;;  %v17909_v60 = vcombine.high %v1256_v50, %v1264_v54  ;;  %v1271_v34 = vld [vmem:[#allocation10 + $0xda0] sm:$0xff]  ;;  %v1328_v49 = vld [vmem:[#allocation10 + $0xf68] sm:$0xff]  ;;  %v17956_v54 = vcombine.low %v1304_v36, %v1312_v25 }
 0x57d   :  { %14956 = vmatprep.subr.bf16.mxu1 %v17845_v61  ;;  %v1279_v61 = vld [vmem:[#allocation10 + $0xde0] sm:$0xff] }
 0x57e   :  { %v17922_v23 = vcombine.low %v1271_v34, %v1279_v61 }
 0x57f   :  { %14629 = vmatpush1.bf16.msra.mxu0 %v17842_v18  ;;  %v17923_v18 = vcombine.high %v1271_v34, %v1279_v61  ;;  %v1336_v34 = vld [vmem:[#allocation10 + $0xfa8] sm:$0xff] }
 0x580   :  { %14957 = vmatpush1.bf16.msra.mxu1 %v17844_v19  ;;  %14630 = vmatprep.subr.bf16.mxu0 %v17859_v20  ;;  %v17925_v19 = vcombine.high %v1272_v1, %v1280_v5  ;;  %v1287_v20 = vld [vmem:[#allocation10 + $0xe20] sm:$0xff]  ;;  %v1344_v61 = vld [vmem:[#allocation10 + $0xfe8] sm:$0xff]  ;;  %v17972_v5 = vcombine.low %v1320_v45, %v1328_v49 }
 0x581   :  { %14958 = vmatprep.subr.bf16.mxu1 %v17861_v21  ;;  %v1295_v21 = vld [vmem:[#allocation10 + $0xe60] sm:$0xff] }
 0x582   :  { %v17938_v48 = vcombine.low %v1287_v20, %v1295_v21 }
 0x583   :  { %14631 = vmatpush1.bf16.msra.mxu0 %v17858_v26  ;;  %v17939_v26 = vcombine.high %v1287_v20, %v1295_v21  ;;  %v1352_v20 = vld [vmem:[#allocation10 + $0x1028] sm:$0xff] }
 0x584   :  { %14959 = vmatpush1.bf16.msra.mxu1 %v17860_v35  ;;  %14632 = vmatprep.subr.bf16.mxu0 %v17875_v15  ;;  %v17941_v35 = vcombine.high %v1288_v4, %v1296_v22  ;;  %v1303_v15 = vld [vmem:[#allocation10 + $0xea0] sm:$0xff]  ;;  %v1360_v21 = vld [vmem:[#allocation10 + $0x1068] sm:$0xff]  ;;  %v17988_v22 = vcombine.low %v1336_v34, %v1344_v61 }
 0x585   :  { %14960 = vmatprep.subr.bf16.mxu1 %v17877_v40  ;;  %v1311_v40 = vld [vmem:[#allocation10 + $0xee0] sm:$0xff] }
 0x586   :  { %v17954_v50 = vcombine.low %v1303_v15, %v1311_v40 }
 0x587   :  { %14633 = vmatpush1.bf16.msra.mxu0 %v17874_v9  ;;  %v17955_v9 = vcombine.high %v1303_v15, %v1311_v40  ;;  %v1368_v40 = vld [vmem:[#allocation10 + $0x10a8] sm:$0xff] }
 0x588   :  { %14961 = vmatpush1.bf16.msra.mxu1 %v17876_v43  ;;  %14634 = vmatprep.subr.bf16.mxu0 %v17891_v63  ;;  %v17957_v43 = vcombine.high %v1304_v36, %v1312_v25  ;;  %v1319_v63 = vld [vmem:[#allocation10 + $0xf20] sm:$0xff]  ;;  %v1376_v36 = vld [vmem:[#allocation10 + $0x10e8] sm:$0xff]  ;;  %v18004_v25 = vcombine.low %v1352_v20, %v1360_v21 }
 0x589   :  { %14962 = vmatprep.subr.bf16.mxu1 %v17893_v28  ;;  %v1327_v28 = vld [vmem:[#allocation10 + $0xf60] sm:$0xff] }
 0x58a   :  { %v17970_v1 = vcombine.low %v1319_v63, %v1327_v28 }
 0x58b   :  { %14635 = vmatpush1.bf16.msra.mxu0 %v17890_v58  ;;  %v17971_v58 = vcombine.high %v1319_v63, %v1327_v28  ;;  %v1384_v63 = vld [vmem:[#allocation10 + $0x1128] sm:$0xff] }
 0x58c   :  { %14963 = vmatpush1.bf16.msra.mxu1 %v17892_v7  ;;  %14636 = vmatprep.subr.bf16.mxu0 %v17907_v47  ;;  %v17973_v7 = vcombine.high %v1320_v45, %v1328_v49  ;;  %v1335_v47 = vld [vmem:[#allocation10 + $0xfa0] sm:$0xff]  ;;  %v1392_v28 = vld [vmem:[#allocation10 + $0x1168] sm:$0xff]  ;;  %v18020_v49 = vcombine.low %v1368_v40, %v1376_v36 }
 0x58d   :  { %14964 = vmatprep.subr.bf16.mxu1 %v17909_v60  ;;  %v1343_v60 = vld [vmem:[#allocation10 + $0xfe0] sm:$0xff] }
 0x58e   :  { %v17986_v4 = vcombine.low %v1335_v47, %v1343_v60 }
 0x58f   :  { %14637 = vmatpush1.bf16.msra.mxu0 %v17906_v8  ;;  %v17987_v8 = vcombine.high %v1335_v47, %v1343_v60  ;;  %v1400_v47 = vld [vmem:[#allocation10 + $0x11a8] sm:$0xff] }
 0x590   :  { %14965 = vmatpush1.bf16.msra.mxu1 %v17908_v11  ;;  %14638 = vmatprep.subr.bf16.mxu0 %v17923_v18  ;;  %v17989_v11 = vcombine.high %v1336_v34, %v1344_v61  ;;  %v1351_v18 = vld [vmem:[#allocation10 + $0x1020] sm:$0xff]  ;;  %v1408_v60 = vld [vmem:[#allocation10 + $0x11e8] sm:$0xff]  ;;  %v18036_v61 = vcombine.low %v1384_v63, %v1392_v28 }
 0x591   :  { %14966 = vmatprep.subr.bf16.mxu1 %v17925_v19  ;;  %v1359_v19 = vld [vmem:[#allocation10 + $0x1060] sm:$0xff] }
 0x592   :  { %v18002_v15 = vcombine.low %v1351_v18, %v1359_v19 }
 0x593   :  { %14639 = vmatpush1.bf16.msra.mxu0 %v17922_v23  ;;  %v18003_v23 = vcombine.high %v1351_v18, %v1359_v19  ;;  %v1416_v18 = vld [vmem:[#allocation10 + $0x1228] sm:$0xff] }
 0x594   :  { %14967 = vmatpush1.bf16.msra.mxu1 %v17924_v31  ;;  %14640 = vmatprep.subr.bf16.mxu0 %v17939_v26  ;;  %v18005_v31 = vcombine.high %v1352_v20, %v1360_v21  ;;  %v1367_v26 = vld [vmem:[#allocation10 + $0x10a0] sm:$0xff]  ;;  %v1424_v19 = vld [vmem:[#allocation10 + $0x1268] sm:$0xff]  ;;  %v18052_v21 = vcombine.low %v1400_v47, %v1408_v60 }
 0x595   :  { %14968 = vmatprep.subr.bf16.mxu1 %v17941_v35  ;;  %v1375_v35 = vld [vmem:[#allocation10 + $0x10e0] sm:$0xff] }
 0x596   :  { %v18018_v45 = vcombine.low %v1367_v26, %v1375_v35 }
 0x597   :  { %14641 = vmatpush1.bf16.msra.mxu0 %v17938_v48  ;;  %v18019_v48 = vcombine.high %v1367_v26, %v1375_v35  ;;  %v1432_v26 = vld [vmem:[#allocation10 + $0x12a8] sm:$0xff] }
 0x598   :  { %14969 = vmatpush1.bf16.msra.mxu1 %v17940_v42  ;;  %14642 = vmatprep.subr.bf16.mxu0 %v17955_v9  ;;  %v1383_v42 = vld [vmem:[#allocation10 + $0x1120] sm:$0xff]  ;;  %v1440_v35 = vld [vmem:[#allocation10 + $0x12e8] sm:$0xff] }
 0x599   :  { %14970 = vmatprep.subr.bf16.mxu1 %v17957_v43  ;;  %v1391_v9 = vld [vmem:[#allocation10 + $0x1160] sm:$0xff]  ;;  %v18021_v43 = vcombine.high %v1368_v40, %v1376_v36  ;;  %v18068_v40 = vcombine.low %v1416_v18, %v1424_v19 }
 0x59a   :  { %v18034_v34 = vcombine.low %v1383_v42, %v1391_v9 }
 0x59b   :  { %14643 = vmatpush1.bf16.msra.mxu0 %v17954_v50  ;;  %v18035_v50 = vcombine.high %v1383_v42, %v1391_v9  ;;  %v1455_v42 = vld [vmem:[#allocation10 + $0x1360] sm:$0xff]  ;;  %v1448_v9 = vld [vmem:[#allocation10 + $0x1328] sm:$0xff] }
 0x59c   :  { %14971 = vmatpush1.bf16.msra.mxu1 %v17956_v54  ;;  %14644 = vmatprep.subr.bf16.mxu0 %v17971_v58  ;;  %v18037_v54 = vcombine.high %v1384_v63, %v1392_v28  ;;  %v1399_v58 = vld [vmem:[#allocation10 + $0x11a0] sm:$0xff]  ;;  %v18084_v28 = vcombine.low %v1432_v26, %v1440_v35 }
 0x59d   :  { %14972 = vmatprep.subr.bf16.mxu1 %v17973_v7  ;;  %v1407_v7 = vld [vmem:[#allocation10 + $0x11e0] sm:$0xff] }
 0x59e   :  { %v18050_v20 = vcombine.low %v1399_v58, %v1407_v7 }
 0x59f   :  { %14645 = vmatpush1.bf16.msra.mxu0 %v17970_v1  ;;  %v18051_v1 = vcombine.high %v1399_v58, %v1407_v7  ;;  %v1464_v58 = vld [vmem:[#allocation10 + $0x13a8] sm:$0xff] }
 0x5a0   :  { %14973 = vmatpush1.bf16.msra.mxu1 %v17972_v5  ;;  %14646 = vmatprep.subr.bf16.mxu0 %v17987_v8  ;;  %v18053_v5 = vcombine.high %v1400_v47, %v1408_v60  ;;  %v1415_v8 = vld [vmem:[#allocation10 + $0x1220] sm:$0xff]  ;;  %v1472_v7 = vld [vmem:[#allocation10 + $0x13e8] sm:$0xff] }
 0x5a1   :  { %14974 = vmatprep.subr.bf16.mxu1 %v17989_v11  ;;  %v1423_v11 = vld [vmem:[#allocation10 + $0x1260] sm:$0xff] }
 0x5a3   :  { %14647 = vmatpush1.bf16.msra.mxu0 %v17986_v4  ;;  %v18067_v4 = vcombine.high %v1415_v8, %v1423_v11 }
 0x5a4   :  { %14975 = vmatpush1.bf16.msra.mxu1 %v17988_v22  ;;  %14657 = vmatprep.subr.bf16.mxu0 %v18003_v23  ;;  %v18069_v22 = vcombine.high %v1416_v18, %v1424_v19  ;;  %v1431_v23 = vld [vmem:[#allocation10 + $0x12a0] sm:$0xff]  ;;  %v18116_v19 = vcombine.low %v1464_v58, %v1472_v7 }
 0x5a5   :  { %14985 = vmatprep.subr.bf16.mxu1 %v18005_v31  ;;  %v1439_v31 = vld [vmem:[#allocation10 + $0x12e0] sm:$0xff] }
 0x5a6   :  { %14649 = vmatmul.mubr.bf16.vlgmr.msra.gmra.mrb[24].mxu0 %v20702_v38  ;;  %v18083_v36 = vcombine.high %v1431_v23, %v1439_v31  ;;  %v18082_v63 = vcombine.low %v1431_v23, %v1439_v31  ;;  %v1496_v23 = vld [vmem:[#allocation10 + $0x14a8] sm:$0xff] }
 0x5a7   :  { %14977 = vmatmul.mubr.bf16.vlgmr.msra.gmra.mrb[24].mxu1 %v20702_v38  ;;  %14658 = vmatpush1.bf16.msra.mxu0 %v18002_v15  ;;  %v18066_v15 = vcombine.low %v1415_v8, %v1423_v11  ;;  %v1480_v8 = vld [vmem:[#allocation10 + $0x1428] sm:$0xff] }
 0x5a8   :  { %14689 = vmatprep.mubr.bf16.mxu0 %v20704_v51  ;;  %14986 = vmatpush1.bf16.msra.mxu1 %v18004_v25  ;;  %v18085_v25 = vcombine.high %v1432_v26, %v1440_v35  ;;  %v1488_v11 = vld [vmem:[#allocation10 + $0x1468] sm:$0xff] }
 0x5a9   :  { %15017 = vmatprep.mubr.bf16.mxu1 %v20704_v51  ;;  %14659 = vmatprep.subr.bf16.mxu0 %v18019_v48  ;;  %v1447_v48 = vld [vmem:[#allocation10 + $0x1320] sm:$0xff]  ;;  %v1504_v31 = vld [vmem:[#allocation10 + $0x14e8] sm:$0xff]  ;;  %v18132_v35 = vcombine.low %v1480_v8, %v1488_v11 }
 0x5aa   :  { %14987 = vmatprep.subr.bf16.mxu1 %v18021_v43  ;;  %v1456_v43 = vld [vmem:[#allocation10 + $0x1368] sm:$0xff]  ;;  %v18098_v47 = vcombine.low %v1447_v48, %v1455_v42 }
 0x5ab   :  { %14660 = vmatpush1.bf16.msra.mxu0 %v18018_v45  ;;  %v18099_v45 = vcombine.high %v1447_v48, %v1455_v42  ;;  %v18100_v60 = vcombine.low %v1448_v9, %v1456_v43  ;;  %v1512_v48 = vld [vmem:[#allocation10 + $0x1528] sm:$0xff] }
 0x5ac   :  { %14988 = vmatpush1.bf16.msra.mxu1 %v18020_v49  ;;  %14661 = vmatprep.subr.bf16.mxu0 %v18035_v50  ;;  %v18101_v49 = vcombine.high %v1448_v9, %v1456_v43  ;;  %v1463_v50 = vld [vmem:[#allocation10 + $0x13a0] sm:$0xff]  ;;  %v1520_v42 = vld [vmem:[#allocation10 + $0x1568] sm:$0xff]  ;;  %v18148_v43 = vcombine.low %v1496_v23, %v1504_v31 }
 0x5ad   :  { %14989 = vmatprep.subr.bf16.mxu1 %v18037_v54  ;;  %v1471_v54 = vld [vmem:[#allocation10 + $0x13e0] sm:$0xff] }
 0x5ae   :  { %v18114_v18 = vcombine.low %v1463_v50, %v1471_v54 }
 0x5af   :  { %14662 = vmatpush1.bf16.msra.mxu0 %v18034_v34  ;;  %v18115_v34 = vcombine.high %v1463_v50, %v1471_v54  ;;  %v1528_v50 = vld [vmem:[#allocation10 + $0x15a8] sm:$0xff] }
 0x5b0   :  { %14990 = vmatpush1.bf16.msra.mxu1 %v18036_v61  ;;  %14663 = vmatprep.subr.bf16.mxu0 %v18051_v1  ;;  %v18117_v61 = vcombine.high %v1464_v58, %v1472_v7  ;;  %v1479_v1 = vld [vmem:[#allocation10 + $0x1420] sm:$0xff]  ;;  %v1536_v54 = vld [vmem:[#allocation10 + $0x15e8] sm:$0xff]  ;;  %v18164_v7 = vcombine.low %v1512_v48, %v1520_v42 }
 0x5b1   :  { %14991 = vmatprep.subr.bf16.mxu1 %v18053_v5  ;;  %v1487_v5 = vld [vmem:[#allocation10 + $0x1460] sm:$0xff] }
 0x5b2   :  { %v18130_v26 = vcombine.low %v1479_v1, %v1487_v5 }
 0x5b3   :  { %14664 = vmatpush1.bf16.msra.mxu0 %v18050_v20  ;;  %v18131_v20 = vcombine.high %v1479_v1, %v1487_v5  ;;  %v1544_v1 = vld [vmem:[#allocation10 + $0x1628] sm:$0xff] }
 0x5b4   :  { %14992 = vmatpush1.bf16.msra.mxu1 %v18052_v21  ;;  %14665 = vmatprep.subr.bf16.mxu0 %v18067_v4  ;;  %v18133_v21 = vcombine.high %v1480_v8, %v1488_v11  ;;  %v1495_v4 = vld [vmem:[#allocation10 + $0x14a0] sm:$0xff]  ;;  %v1552_v5 = vld [vmem:[#allocation10 + $0x1668] sm:$0xff]  ;;  %v18180_v11 = vcombine.low %v1528_v50, %v1536_v54 }
 0x5b5   :  { %14993 = vmatprep.subr.bf16.mxu1 %v18069_v22  ;;  %v1503_v22 = vld [vmem:[#allocation10 + $0x14e0] sm:$0xff] }
 0x5b6   :  { %v18146_v9 = vcombine.low %v1495_v4, %v1503_v22 }
 0x5b7   :  { %14666 = vmatpush1.bf16.msra.mxu0 %v18066_v15  ;;  %v18147_v15 = vcombine.high %v1495_v4, %v1503_v22  ;;  %v1560_v4 = vld [vmem:[#allocation10 + $0x16a8] sm:$0xff] }
 0x5b8   :  { %14994 = vmatpush1.bf16.msra.mxu1 %v18068_v40  ;;  %14667 = vmatprep.subr.bf16.mxu0 %v18083_v36  ;;  %v18149_v40 = vcombine.high %v1496_v23, %v1504_v31  ;;  %v1511_v36 = vld [vmem:[#allocation10 + $0x1520] sm:$0xff]  ;;  %v1568_v22 = vld [vmem:[#allocation10 + $0x16e8] sm:$0xff]  ;;  %v18196_v31 = vcombine.low %v1544_v1, %v1552_v5 }
 0x5b9   :  { %14995 = vmatprep.subr.bf16.mxu1 %v18085_v25  ;;  %v1519_v25 = vld [vmem:[#allocation10 + $0x1560] sm:$0xff] }
 0x5ba   :  { %v18162_v58 = vcombine.low %v1511_v36, %v1519_v25 }
 0x5bb   :  { %14668 = vmatpush1.bf16.msra.mxu0 %v18082_v63  ;;  %v18163_v63 = vcombine.high %v1511_v36, %v1519_v25  ;;  %v1576_v36 = vld [vmem:[#allocation10 + $0x1728] sm:$0xff] }
 0x5bc   :  { %14996 = vmatpush1.bf16.msra.mxu1 %v18084_v28  ;;  %14669 = vmatprep.subr.bf16.mxu0 %v18099_v45  ;;  %v18165_v28 = vcombine.high %v1512_v48, %v1520_v42  ;;  %v1527_v45 = vld [vmem:[#allocation10 + $0x15a0] sm:$0xff]  ;;  %v1584_v25 = vld [vmem:[#allocation10 + $0x1768] sm:$0xff]  ;;  %v18212_v42 = vcombine.low %v1560_v4, %v1568_v22 }
 0x5bd   :  { %14997 = vmatprep.subr.bf16.mxu1 %v18101_v49  ;;  %v1535_v49 = vld [vmem:[#allocation10 + $0x15e0] sm:$0xff] }
 0x5be   :  { %v18178_v8 = vcombine.low %v1527_v45, %v1535_v49 }
 0x5bf   :  { %14670 = vmatpush1.bf16.msra.mxu0 %v18098_v47  ;;  %v18179_v47 = vcombine.high %v1527_v45, %v1535_v49  ;;  %v1592_v45 = vld [vmem:[#allocation10 + $0x17a8] sm:$0xff] }
 0x5c0   :  { %14998 = vmatpush1.bf16.msra.mxu1 %v18100_v60  ;;  %14671 = vmatprep.subr.bf16.mxu0 %v18115_v34  ;;  %v18181_v60 = vcombine.high %v1528_v50, %v1536_v54  ;;  %v1543_v34 = vld [vmem:[#allocation10 + $0x1620] sm:$0xff]  ;;  %v1600_v49 = vld [vmem:[#allocation10 + $0x17e8] sm:$0xff]  ;;  %v18228_v54 = vcombine.low %v1576_v36, %v1584_v25 }
 0x5c1   :  { %14999 = vmatprep.subr.bf16.mxu1 %v18117_v61  ;;  %v1551_v61 = vld [vmem:[#allocation10 + $0x1660] sm:$0xff] }
 0x5c2   :  { %v18194_v23 = vcombine.low %v1543_v34, %v1551_v61 }
 0x5c3   :  { %14672 = vmatpush1.bf16.msra.mxu0 %v18114_v18  ;;  %v18195_v18 = vcombine.high %v1543_v34, %v1551_v61  ;;  %v1608_v34 = vld [vmem:[#allocation10 + $0x1828] sm:$0xff] }
 0x5c4   :  { %15000 = vmatpush1.bf16.msra.mxu1 %v18116_v19  ;;  %14673 = vmatprep.subr.bf16.mxu0 %v18131_v20  ;;  %v18197_v19 = vcombine.high %v1544_v1, %v1552_v5  ;;  %v1559_v20 = vld [vmem:[#allocation10 + $0x16a0] sm:$0xff]  ;;  %v1616_v61 = vld [vmem:[#allocation10 + $0x1868] sm:$0xff]  ;;  %v18244_v5 = vcombine.low %v1592_v45, %v1600_v49 }
 0x5c5   :  { %15001 = vmatprep.subr.bf16.mxu1 %v18133_v21  ;;  %v1567_v21 = vld [vmem:[#allocation10 + $0x16e0] sm:$0xff] }
 0x5c6   :  { %v18210_v48 = vcombine.low %v1559_v20, %v1567_v21 }
 0x5c7   :  { %14674 = vmatpush1.bf16.msra.mxu0 %v18130_v26  ;;  %v18211_v26 = vcombine.high %v1559_v20, %v1567_v21  ;;  %v1624_v21 = vld [vmem:[#allocation10 + $0x18a8] sm:$0xff] }
 0x5c8   :  { %15002 = vmatpush1.bf16.msra.mxu1 %v18132_v35  ;;  %14675 = vmatprep.subr.bf16.mxu0 %v18147_v15  ;;  %v18213_v35 = vcombine.high %v1560_v4, %v1568_v22  ;;  %v1575_v15 = vld [vmem:[#allocation10 + $0x1720] sm:$0xff]  ;;  %v1632_v4 = vld [vmem:[#allocation10 + $0x18e8] sm:$0xff]  ;;  %v18260_v22 = vcombine.low %v1608_v34, %v1616_v61 }
 0x5c9   :  { %15003 = vmatprep.subr.bf16.mxu1 %v18149_v40  ;;  %v1583_v40 = vld [vmem:[#allocation10 + $0x1760] sm:$0xff] }
 0x5ca   :  { %v18226_v50 = vcombine.low %v1575_v15, %v1583_v40 }
 0x5cb   :  { %14676 = vmatpush1.bf16.msra.mxu0 %v18146_v9  ;;  %v18227_v9 = vcombine.high %v1575_v15, %v1583_v40  ;;  %v1640_v15 = vld [vmem:[#allocation10 + $0x1928] sm:$0xff] }
 0x5cc   :  { %15004 = vmatpush1.bf16.msra.mxu1 %v18148_v43  ;;  %14677 = vmatprep.subr.bf16.mxu0 %v18163_v63  ;;  %v18229_v43 = vcombine.high %v1576_v36, %v1584_v25  ;;  %v1591_v63 = vld [vmem:[#allocation10 + $0x17a0] sm:$0xff]  ;;  %v1648_v40 = vld [vmem:[#allocation10 + $0x1968] sm:$0xff]  ;;  %v18276_v25 = vcombine.low %v1624_v21, %v1632_v4 }
 0x5cd   :  { %15005 = vmatprep.subr.bf16.mxu1 %v18165_v28  ;;  %v1599_v28 = vld [vmem:[#allocation10 + $0x17e0] sm:$0xff] }
 0x5ce   :  { %v18242_v1 = vcombine.low %v1591_v63, %v1599_v28 }
 0x5cf   :  { %14678 = vmatpush1.bf16.msra.mxu0 %v18162_v58  ;;  %v18243_v58 = vcombine.high %v1591_v63, %v1599_v28  ;;  %v1656_v63 = vld [vmem:[#allocation10 + $0x19a8] sm:$0xff] }
 0x5d0   :  { %15006 = vmatpush1.bf16.msra.mxu1 %v18164_v7  ;;  %14679 = vmatprep.subr.bf16.mxu0 %v18179_v47  ;;  %v18245_v7 = vcombine.high %v1592_v45, %v1600_v49  ;;  %v1607_v47 = vld [vmem:[#allocation10 + $0x1820] sm:$0xff]  ;;  %v1664_v28 = vld [vmem:[#allocation10 + $0x19e8] sm:$0xff]  ;;  %v18292_v49 = vcombine.low %v1640_v15, %v1648_v40 }
 0x5d1   :  { %15007 = vmatprep.subr.bf16.mxu1 %v18181_v60  ;;  %v1615_v60 = vld [vmem:[#allocation10 + $0x1860] sm:$0xff] }
 0x5d2   :  { %v18258_v20 = vcombine.low %v1607_v47, %v1615_v60 }
 0x5d3   :  { %14680 = vmatpush1.bf16.msra.mxu0 %v18178_v8  ;;  %v18259_v8 = vcombine.high %v1607_v47, %v1615_v60  ;;  %v1672_v47 = vld [vmem:[#allocation10 + $0x1a28] sm:$0xff] }
 0x5d4   :  { %15008 = vmatpush1.bf16.msra.mxu1 %v18180_v11  ;;  %14681 = vmatprep.subr.bf16.mxu0 %v18195_v18  ;;  %v18261_v11 = vcombine.high %v1608_v34, %v1616_v61  ;;  %v1623_v18 = vld [vmem:[#allocation10 + $0x18a0] sm:$0xff]  ;;  %v1680_v60 = vld [vmem:[#allocation10 + $0x1a68] sm:$0xff]  ;;  %v18308_v61 = vcombine.low %v1656_v63, %v1664_v28 }
 0x5d5   :  { %15009 = vmatprep.subr.bf16.mxu1 %v18197_v19  ;;  %v1631_v19 = vld [vmem:[#allocation10 + $0x18e0] sm:$0xff] }
 0x5d6   :  { %v18274_v36 = vcombine.low %v1623_v18, %v1631_v19 }
 0x5d7   :  { %14682 = vmatpush1.bf16.msra.mxu0 %v18194_v23  ;;  %v18275_v23 = vcombine.high %v1623_v18, %v1631_v19  ;;  %v1688_v18 = vld [vmem:[#allocation10 + $0x1aa8] sm:$0xff] }
 0x5d8   :  { %15010 = vmatpush1.bf16.msra.mxu1 %v18196_v31  ;;  %14683 = vmatprep.subr.bf16.mxu0 %v18211_v26  ;;  %v1639_v31 = vld [vmem:[#allocation10 + $0x1920] sm:$0xff]  ;;  %v1696_v19 = vld [vmem:[#allocation10 + $0x1ae8] sm:$0xff] }
 0x5d9   :  { %15011 = vmatprep.subr.bf16.mxu1 %v18213_v35  ;;  %v1647_v26 = vld [vmem:[#allocation10 + $0x1960] sm:$0xff]  ;;  %v18277_v35 = vcombine.high %v1624_v21, %v1632_v4  ;;  %v18324_v21 = vcombine.low %v1672_v47, %v1680_v60 }
 0x5da   :  { %v18290_v45 = vcombine.low %v1639_v31, %v1647_v26 }
 0x5db   :  { %14684 = vmatpush1.bf16.msra.mxu0 %v18210_v48  ;;  %v18291_v48 = vcombine.high %v1639_v31, %v1647_v26  ;;  %v1711_v31 = vld [vmem:[#allocation10 + $0x1b60] sm:$0xff]  ;;  %v1704_v26 = vld [vmem:[#allocation10 + $0x1b28] sm:$0xff] }
 0x5dc   :  { %15012 = vmatpush1.bf16.msra.mxu1 %v18212_v42  ;;  %14685 = vmatprep.subr.bf16.mxu0 %v18227_v9  ;;  %v18293_v42 = vcombine.high %v1640_v15, %v1648_v40  ;;  %v1655_v9 = vld [vmem:[#allocation10 + $0x19a0] sm:$0xff]  ;;  %v18340_v40 = vcombine.low %v1688_v18, %v1696_v19 }
 0x5dd   :  { %15013 = vmatprep.subr.bf16.mxu1 %v18229_v43  ;;  %v1663_v43 = vld [vmem:[#allocation10 + $0x19e0] sm:$0xff] }
 0x5de   :  { %v18306_v34 = vcombine.low %v1655_v9, %v1663_v43 }
 0x5df   :  { %14686 = vmatpush1.bf16.msra.mxu0 %v18226_v50  ;;  %v18307_v50 = vcombine.high %v1655_v9, %v1663_v43  ;;  %v1727_v9 = vld [vmem:[#allocation10 + $0x1be0] sm:$0xff] }
 0x5e0   :  { %15014 = vmatpush1.bf16.msra.mxu1 %v18228_v54  ;;  %14687 = vmatprep.subr.bf16.mxu0 %v18243_v58  ;;  %v18309_v54 = vcombine.high %v1656_v63, %v1664_v28  ;;  %v1671_v58 = vld [vmem:[#allocation10 + $0x1a20] sm:$0xff]  ;;  %v1720_v28 = vld [vmem:[#allocation10 + $0x1ba8] sm:$0xff] }
 0x5e1   :  { %15015 = vmatprep.subr.bf16.mxu1 %v18245_v7  ;;  %v1679_v7 = vld [vmem:[#allocation10 + $0x1a60] sm:$0xff] }
 0x5e3   :  { %14688 = vmatpush1.bf16.msra.mxu0 %v18242_v1  ;;  %v18323_v1 = vcombine.high %v1671_v58, %v1679_v7 }
 0x5e4   :  { %15016 = vmatpush1.bf16.msra.mxu1 %v18244_v5  ;;  %14698 = vmatprep.subr.bf16.mxu0 %v18259_v8  ;;  %v18325_v5 = vcombine.high %v1672_v47, %v1680_v60  ;;  %v1687_v8 = vld [vmem:[#allocation10 + $0x1aa0] sm:$0xff] }
 0x5e5   :  { %15026 = vmatprep.subr.bf16.mxu1 %v18261_v11  ;;  %v1695_v11 = vld [vmem:[#allocation10 + $0x1ae0] sm:$0xff] }
 0x5e6   :  { %14690 = vmatmul.mubr.bf16.vlgmr.msra.gmra.mrb[24].mxu0 %v20722_v41  ;;  %v18339_v4 = vcombine.high %v1687_v8, %v1695_v11  ;;  %v18338_v15 = vcombine.low %v1687_v8, %v1695_v11  ;;  %v1736_v8 = vld [vmem:[#allocation10 + $0x1c28] sm:$0xff] }
 0x5e7   :  { %15018 = vmatmul.mubr.bf16.vlgmr.msra.gmra.mrb[24].mxu1 %v20722_v41  ;;  %14699 = vmatpush1.bf16.msra.mxu0 %v18258_v20  ;;  %v18322_v20 = vcombine.low %v1671_v58, %v1679_v7  ;;  %v1744_v11 = vld [vmem:[#allocation10 + $0x1c68] sm:$0xff] }
 0x5e8   :  { %14730 = vmatprep.mubr.bf16.mxu0 %v20724_v55  ;;  %15027 = vmatpush1.bf16.msra.mxu1 %v18260_v22  ;;  %v18341_v22 = vcombine.high %v1688_v18, %v1696_v19 }
 0x5e9   :  { %15058 = vmatprep.mubr.bf16.mxu1 %v20724_v55  ;;  %14700 = vmatprep.subr.bf16.mxu0 %v18275_v23  ;;  %v1703_v23 = vld [vmem:[#allocation10 + $0x1b20] sm:$0xff] }
 0x5ea   :  { %15028 = vmatprep.subr.bf16.mxu1 %v18277_v35  ;;  %v1712_v35 = vld [vmem:[#allocation10 + $0x1b68] sm:$0xff] }
 0x5eb   :  { %14701 = vmatpush1.bf16.msra.mxu0 %v18274_v36  ;;  %v18355_v36 = vcombine.high %v1703_v23, %v1711_v31  ;;  %v18356_v47 = vcombine.low %v1704_v26, %v1712_v35 }
 0x5ec   :  { %15029 = vmatpush1.bf16.msra.mxu1 %v18276_v25  ;;  %14702 = vmatprep.subr.bf16.mxu0 %v18291_v48  ;;  %v18357_v48 = vcombine.high %v1704_v26, %v1712_v35  ;;  %v18388_v35 = vcombine.low %v1736_v8, %v1744_v11 }
 0x5ed   :  { %15030 = vmatprep.subr.bf16.mxu1 %v18293_v42  ;;  %v1719_v42 = vld [vmem:[#allocation10 + $0x1ba0] sm:$0xff] }
 0x5ee   :  { %v18371_v60 = vcombine.high %v1719_v42, %v1727_v9  ;;  %v18370_v18 = vcombine.low %v1719_v42, %v1727_v9  ;;  %v1768_v42 = vld [vmem:[#allocation10 + $0x1d28] sm:$0xff] }
 0x5ef   :  { %14703 = vmatpush1.bf16.msra.mxu0 %v18290_v45  ;;  %v1728_v45 = vld [vmem:[#allocation10 + $0x1be8] sm:$0xff] }
 0x5f0   :  { %15031 = vmatpush1.bf16.msra.mxu1 %v18292_v49  ;;  %14704 = vmatprep.subr.bf16.mxu0 %v18307_v50  ;;  %v18372_v19 = vcombine.low %v1720_v28, %v1728_v45  ;;  %v1776_v9 = vld [vmem:[#allocation10 + $0x1d68] sm:$0xff] }
 0x5f1   :  { %15032 = vmatprep.subr.bf16.mxu1 %v18309_v54  ;;  %v18354_v54 = vcombine.low %v1703_v23, %v1711_v31  ;;  %v1752_v23 = vld [vmem:[#allocation10 + $0x1ca8] sm:$0xff] }
 0x5f2   :  { %v1760_v31 = vld [vmem:[#allocation10 + $0x1ce8] sm:$0xff] }
 0x5f3   :  { %14705 = vmatpush1.bf16.msra.mxu0 %v18306_v34 }
 0x5f4   :  { %15033 = vmatpush1.bf16.msra.mxu1 %v18308_v61  ;;  %14706 = vmatprep.subr.bf16.mxu0 %v18323_v1  ;;  %v18373_v61 = vcombine.high %v1720_v28, %v1728_v45  ;;  %v1735_v1 = vld [vmem:[#allocation10 + $0x1c20] sm:$0xff]  ;;  %v18404_v45 = vcombine.low %v1752_v23, %v1760_v31 }
 0x5f5   :  { %15034 = vmatprep.subr.bf16.mxu1 %v18325_v5  ;;  %v1743_v5 = vld [vmem:[#allocation10 + $0x1c60] sm:$0xff] }
 0x5f6   :  { %v18386_v26 = vcombine.low %v1735_v1, %v1743_v5 }
 0x5f7   :  { %14707 = vmatpush1.bf16.msra.mxu0 %v18322_v20  ;;  %v18387_v20 = vcombine.high %v1735_v1, %v1743_v5 }
 0x5f8   :  { %15035 = vmatpush1.bf16.msra.mxu1 %v18324_v21  ;;  %14708 = vmatprep.subr.bf16.mxu0 %v18339_v4  ;;  %v18389_v21 = vcombine.high %v1736_v8, %v1744_v11  ;;  %v1751_v4 = vld [vmem:[#allocation10 + $0x1ca0] sm:$0xff] }
 0x5f9   :  { %v20861_v25 = vpop.f32.mrb[20].mxu0  ;;  %15036 = vmatprep.subr.bf16.mxu1 %v18341_v22  ;;  %v1759_v22 = vld [vmem:[#allocation10 + $0x1ce0] sm:$0xff] }
 0x5fa   :  { %v20863_v43 = vpop.f32.mrb[20].mxu1  ;;  %v20865_v63 = vpop.f32.mrb[21].mxu0  ;;  %v18402_v28 = vcombine.low %v1751_v4, %v1759_v22  ;;  %v1799_v8 = vld [vmem:[#allocation10 + $0x1e20] sm:$0xff] }
 0x5fb   :  { %v20867_v49 = vpop.f32.mrb[21].mxu1  ;;  %v14244_v50 = vpop.f32.mrb[22].mxu0  ;;  %14709 = vmatpush1.bf16.msra.mxu0 %v18338_v15  ;;  %v18403_v15 = vcombine.high %v1751_v4, %v1759_v22  ;;  %v1807_v11 = vld [vmem:[#allocation10 + $0x1e60] sm:$0xff] }
 0x5fc   :  { %v14572_v58 = vpop.f32.mrb[22].mxu1  ;;  %15037 = vmatpush1.bf16.msra.mxu1 %v18340_v40  ;;  %v14245_v7 = vpop.f32.mrb[23].mxu0  ;;  %14710 = vmatprep.subr.bf16.mxu0 %v18355_v36  ;;  %v18405_v40 = vcombine.high %v1752_v23, %v1760_v31  ;;  %v1767_v36 = vld [vmem:[#allocation10 + $0x1d20] sm:$0xff]  ;;  %v18451_v4 = vcombine.high %v1799_v8, %v1807_v11 }
 0x5fd   :  { %v14573_v34 = vpop.f32.mrb[23].mxu1  ;;  %15038 = vmatprep.subr.bf16.mxu1 %v18357_v48  ;;  %v1775_v48 = vld [vmem:[#allocation10 + $0x1d60] sm:$0xff] }
 0x5fe   :  { %v18419_v50 = vcombine.high %v1767_v36, %v1775_v48  ;;  %v1783_v58 = vld [vmem:[#allocation10 + $0x1da0] sm:$0xff]  ;;  %v18418_v34 = vcombine.low %v1767_v36, %v1775_v48 }
 0x5ff   :  { %14711 = vmatpush1.bf16.msra.mxu0 %v18354_v54  ;;  %v18421_v54 = vcombine.high %v1768_v42, %v1776_v9  ;;  %v1791_v7 = vld [vmem:[#allocation10 + $0x1de0] sm:$0xff] }
 0x600   :  { %15039 = vmatpush1.bf16.msra.mxu1 %v18356_v47  ;;  %14712 = vmatprep.subr.bf16.mxu0 %v18371_v60  ;;  %v1784_v47 = vld [vmem:[#allocation10 + $0x1da8] sm:$0xff]  ;;  %v18435_v1 = vcombine.high %v1783_v58, %v1791_v7  ;;  %v1815_v23 = vld [vmem:[#allocation10 + $0x1ea0] sm:$0xff] }
 0x601   :  { %15040 = vmatprep.subr.bf16.mxu1 %v18373_v61  ;;  %v1792_v60 = vld [vmem:[#allocation10 + $0x1de8] sm:$0xff]  ;;  %v18420_v61 = vcombine.low %v1768_v42, %v1776_v9  ;;  %v1823_v31 = vld [vmem:[#allocation10 + $0x1ee0] sm:$0xff] }
 0x602   :  { %v18437_v5 = vcombine.high %v1784_v47, %v1792_v60  ;;  %v18467_v36 = vcombine.high %v1815_v23, %v1823_v31  ;;  %v1831_v42 = vld [vmem:[#allocation10 + $0x1f20] sm:$0xff] }
 0x603   :  { %14713 = vmatpush1.bf16.msra.mxu0 %v18370_v18  ;;  %v1800_v18 = vld [vmem:[#allocation10 + $0x1e28] sm:$0xff]  ;;  %v1839_v9 = vld [vmem:[#allocation10 + $0x1f60] sm:$0xff] }
 0x604   :  { %15041 = vmatpush1.bf16.msra.mxu1 %v18372_v19  ;;  %14714 = vmatprep.subr.bf16.mxu0 %v18387_v20  ;;  %v1808_v19 = vld [vmem:[#allocation10 + $0x1e68] sm:$0xff]  ;;  %v18434_v20 = vcombine.low %v1783_v58, %v1791_v7  ;;  %v18483_v58 = vcombine.high %v1831_v42, %v1839_v9 }
 0x605   :  { %15042 = vmatprep.subr.bf16.mxu1 %v18389_v21  ;;  %v18436_v21 = vcombine.low %v1784_v47, %v1792_v60  ;;  %v18453_v22 = vcombine.high %v1800_v18, %v1808_v19  ;;  %v1847_v47 = vld [vmem:[#allocation10 + $0x1fa0] sm:$0xff] }
 0x606   :  { %v1855_v60 = vld [vmem:[#allocation10 + $0x1fe0] sm:$0xff] }
 0x607   :  { %14715 = vmatpush1.bf16.msra.mxu0 %v18386_v26  ;;  %v1816_v26 = vld [vmem:[#allocation10 + $0x1ea8] sm:$0xff] }
 0x608   :  { %15043 = vmatpush1.bf16.msra.mxu1 %v18388_v35  ;;  %14716 = vmatprep.subr.bf16.mxu0 %v18403_v15  ;;  %v1824_v35 = vld [vmem:[#allocation10 + $0x1ee8] sm:$0xff]  ;;  %v18450_v15 = vcombine.low %v1799_v8, %v1807_v11  ;;  %v18499_v8 = vcombine.high %v1847_v47, %v1855_v60 }
 0x609   :  { %15044 = vmatprep.subr.bf16.mxu1 %v18405_v40  ;;  %v18452_v40 = vcombine.low %v1800_v18, %v1808_v19  ;;  %v18469_v48 = vcombine.high %v1816_v26, %v1824_v35  ;;  %v1863_v18 = vld [vmem:[#allocation10 + $0x2020] sm:$0xff] }
 0x60a   :  { %v1871_v19 = vld [vmem:[#allocation10 + $0x2060] sm:$0xff] }
 0x60b   :  { %14717 = vmatpush1.bf16.msra.mxu0 %v18402_v28  ;;  %v1832_v28 = vld [vmem:[#allocation10 + $0x1f28] sm:$0xff] }
 0x60c   :  { %15045 = vmatpush1.bf16.msra.mxu1 %v18404_v45  ;;  %14718 = vmatprep.subr.bf16.mxu0 %v18419_v50  ;;  %v1840_v45 = vld [vmem:[#allocation10 + $0x1f68] sm:$0xff]  ;;  %v18466_v50 = vcombine.low %v1815_v23, %v1823_v31  ;;  %v18515_v23 = vcombine.high %v1863_v18, %v1871_v19 }
 0x60d   :  { %15046 = vmatprep.subr.bf16.mxu1 %v18421_v54  ;;  %v18468_v54 = vcombine.low %v1816_v26, %v1824_v35  ;;  %v18485_v7 = vcombine.high %v1832_v28, %v1840_v45  ;;  %v1879_v26 = vld [vmem:[#allocation10 + $0x20a0] sm:$0xff] }
 0x60e   :  { %v1887_v35 = vld [vmem:[#allocation10 + $0x20e0] sm:$0xff] }
 0x60f   :  { %14719 = vmatpush1.bf16.msra.mxu0 %v18418_v34  ;;  %v1848_v34 = vld [vmem:[#allocation10 + $0x1fa8] sm:$0xff] }
 0x610   :  { %15047 = vmatpush1.bf16.msra.mxu1 %v18420_v61  ;;  %14720 = vmatprep.subr.bf16.mxu0 %v18435_v1  ;;  %v1856_v61 = vld [vmem:[#allocation10 + $0x1fe8] sm:$0xff]  ;;  %v18482_v1 = vcombine.low %v1831_v42, %v1839_v9  ;;  %v18531_v42 = vcombine.high %v1879_v26, %v1887_v35  ;;  %v1895_v9 = vld [vmem:[#allocation10 + $0x2120] sm:$0xff] }
 0x611   :  { %15048 = vmatprep.subr.bf16.mxu1 %v18437_v5  ;;  %v18484_v5 = vcombine.low %v1832_v28, %v1840_v45  ;;  %v18501_v11 = vcombine.high %v1848_v34, %v1856_v61  ;;  %v1903_v28 = vld [vmem:[#allocation10 + $0x2160] sm:$0xff] }
 0x613   :  { %14721 = vmatpush1.bf16.msra.mxu0 %v18434_v20  ;;  %v1864_v20 = vld [vmem:[#allocation10 + $0x2028] sm:$0xff] }
 0x614   :  { %15049 = vmatpush1.bf16.msra.mxu1 %v18436_v21  ;;  %14722 = vmatprep.subr.bf16.mxu0 %v18451_v4  ;;  %v1872_v21 = vld [vmem:[#allocation10 + $0x2068] sm:$0xff]  ;;  %v18498_v4 = vcombine.low %v1847_v47, %v1855_v60  ;;  %v18547_v47 = vcombine.high %v1895_v9, %v1903_v28 }
 0x615   :  { %15050 = vmatprep.subr.bf16.mxu1 %v18453_v22  ;;  %v18500_v22 = vcombine.low %v1848_v34, %v1856_v61  ;;  %v18517_v31 = vcombine.high %v1864_v20, %v1872_v21  ;;  %v1911_v34 = vld [vmem:[#allocation10 + $0x21a0] sm:$0xff] }
 0x616   :  { %v1919_v61 = vld [vmem:[#allocation10 + $0x21e0] sm:$0xff] }
 0x617   :  { %14723 = vmatpush1.bf16.msra.mxu0 %v18450_v15  ;;  %v18514_v15 = vcombine.low %v1863_v18, %v1871_v19  ;;  %v18563_v18 = vcombine.high %v1911_v34, %v1919_v61 }
 0x618   :  { %15051 = vmatpush1.bf16.msra.mxu1 %v18452_v40  ;;  %14724 = vmatprep.subr.bf16.mxu0 %v18467_v36  ;;  %v1880_v40 = vld [vmem:[#allocation10 + $0x20a8] sm:$0xff] }
 0x619   :  { %15052 = vmatprep.subr.bf16.mxu1 %v18469_v48  ;;  %v1888_v36 = vld [vmem:[#allocation10 + $0x20e8] sm:$0xff]  ;;  %v18516_v48 = vcombine.low %v1864_v20, %v1872_v21  ;;  %v1927_v20 = vld [vmem:[#allocation10 + $0x2220] sm:$0xff] }
 0x61a   :  { %v18533_v45 = vcombine.high %v1880_v40, %v1888_v36  ;;  %v1935_v21 = vld [vmem:[#allocation10 + $0x2260] sm:$0xff] }
 0x61b   :  { %14725 = vmatpush1.bf16.msra.mxu0 %v18466_v50  ;;  %v1896_v50 = vld [vmem:[#allocation10 + $0x2128] sm:$0xff] }
 0x61c   :  { %15053 = vmatpush1.bf16.msra.mxu1 %v18468_v54  ;;  %14726 = vmatprep.subr.bf16.mxu0 %v18483_v58  ;;  %v1904_v54 = vld [vmem:[#allocation10 + $0x2168] sm:$0xff]  ;;  %v18530_v58 = vcombine.low %v1879_v26, %v1887_v35  ;;  %v18579_v26 = vcombine.high %v1927_v20, %v1935_v21 }
 0x61d   :  { %15054 = vmatprep.subr.bf16.mxu1 %v18485_v7  ;;  %v18532_v7 = vcombine.low %v1880_v40, %v1888_v36  ;;  %v18549_v60 = vcombine.high %v1896_v50, %v1904_v54  ;;  %v1951_v40 = vld [vmem:[#allocation10 + $0x22e0] sm:$0xff]  ;;  %v1944_v36 = vld [vmem:[#allocation10 + $0x22a8] sm:$0xff] }
 0x61f   :  { %14727 = vmatpush1.bf16.msra.mxu0 %v18482_v1  ;;  %v1912_v1 = vld [vmem:[#allocation10 + $0x21a8] sm:$0xff] }
 0x620   :  { %15055 = vmatpush1.bf16.msra.mxu1 %v18484_v5  ;;  %14728 = vmatprep.subr.bf16.mxu0 %v18499_v8  ;;  %v1920_v5 = vld [vmem:[#allocation10 + $0x21e8] sm:$0xff]  ;;  %v18546_v8 = vcombine.low %v1895_v9, %v1903_v28 }
 0x621   :  { %15056 = vmatprep.subr.bf16.mxu1 %v18501_v11  ;;  %v18548_v11 = vcombine.low %v1896_v50, %v1904_v54  ;;  %v18565_v19 = vcombine.high %v1912_v1, %v1920_v5  ;;  %v1959_v50 = vld [vmem:[#allocation10 + $0x2320] sm:$0xff] }
 0x622   :  { %v1967_v54 = vld [vmem:[#allocation10 + $0x2360] sm:$0xff] }
 0x623   :  { %14729 = vmatpush1.bf16.msra.mxu0 %v18498_v4  ;;  %v1928_v4 = vld [vmem:[#allocation10 + $0x2228] sm:$0xff] }
 0x624   :  { %15057 = vmatpush1.bf16.msra.mxu1 %v18500_v22  ;;  %14739 = vmatprep.subr.bf16.mxu0 %v18515_v23  ;;  %v1936_v22 = vld [vmem:[#allocation10 + $0x2268] sm:$0xff]  ;;  %v18562_v23 = vcombine.low %v1911_v34, %v1919_v61  ;;  %v18611_v34 = vcombine.high %v1959_v50, %v1967_v54 }
 0x625   :  { %15067 = vmatprep.subr.bf16.mxu1 %v18517_v31  ;;  %v18564_v31 = vcombine.low %v1912_v1, %v1920_v5  ;;  %v18581_v35 = vcombine.high %v1928_v4, %v1936_v22  ;;  %v18580_v9 = vcombine.low %v1928_v4, %v1936_v22  ;;  %v1975_v1 = vld [vmem:[#allocation10 + $0x23a0] sm:$0xff] }
 0x626   :  { %14731 = vmatmul.mubr.bf16.vlgmr.msra.gmra.mrb[24].mxu0 %v20744_v57  ;;  %v1983_v5 = vld [vmem:[#allocation10 + $0x23e0] sm:$0xff] }
 0x627   :  { %15059 = vmatmul.mubr.bf16.vlgmr.msra.gmra.mrb[24].mxu1 %v20744_v57  ;;  %14740 = vmatpush1.bf16.msra.mxu0 %v18514_v15  ;;  %v1943_v15 = vld [vmem:[#allocation10 + $0x22a0] sm:$0xff] }
 0x628   :  { %14771 = vmatprep.mubr.bf16.mxu0 %v20746_v2  ;;  %15068 = vmatpush1.bf16.msra.mxu1 %v18516_v48  ;;  %v1952_v48 = vld [vmem:[#allocation10 + $0x22e8] sm:$0xff]  ;;  %v18595_v28 = vcombine.high %v1943_v15, %v1951_v40  ;;  %v1991_v4 = vld [vmem:[#allocation10 + $0x2420] sm:$0xff] }
 0x629   :  { %15099 = vmatprep.mubr.bf16.mxu1 %v20746_v2  ;;  %14741 = vmatprep.subr.bf16.mxu0 %v18531_v42  ;;  %v18578_v42 = vcombine.low %v1927_v20, %v1935_v21  ;;  %v18627_v20 = vcombine.high %v1975_v1, %v1983_v5  ;;  %v1999_v22 = vld [vmem:[#allocation10 + $0x2460] sm:$0xff] }
 0x62a   :  { %15069 = vmatprep.subr.bf16.mxu1 %v18533_v45  ;;  %v18597_v45 = vcombine.high %v1944_v36, %v1952_v48 }
 0x62b   :  { %14742 = vmatpush1.bf16.msra.mxu0 %v18530_v58  ;;  %v1960_v58 = vld [vmem:[#allocation10 + $0x2328] sm:$0xff] }
 0x62c   :  { %15070 = vmatpush1.bf16.msra.mxu1 %v18532_v7  ;;  %14743 = vmatprep.subr.bf16.mxu0 %v18547_v47  ;;  %v1968_v7 = vld [vmem:[#allocation10 + $0x2368] sm:$0xff]  ;;  %v18594_v47 = vcombine.low %v1943_v15, %v1951_v40  ;;  %v18643_v15 = vcombine.high %v1991_v4, %v1999_v22 }
 0x62d   :  { %15071 = vmatprep.subr.bf16.mxu1 %v18549_v60  ;;  %v18596_v60 = vcombine.low %v1944_v36, %v1952_v48  ;;  %v18613_v61 = vcombine.high %v1960_v58, %v1968_v7  ;;  %v2007_v36 = vld [vmem:[#allocation10 + $0x24a0] sm:$0xff] }
 0x62e   :  { %v2015_v48 = vld [vmem:[#allocation10 + $0x24e0] sm:$0xff] }
 0x62f   :  { %14744 = vmatpush1.bf16.msra.mxu0 %v18546_v8  ;;  %v1976_v8 = vld [vmem:[#allocation10 + $0x23a8] sm:$0xff] }
 0x630   :  { %15072 = vmatpush1.bf16.msra.mxu1 %v18548_v11  ;;  %14745 = vmatprep.subr.bf16.mxu0 %v18563_v18  ;;  %v1984_v11 = vld [vmem:[#allocation10 + $0x23e8] sm:$0xff]  ;;  %v18610_v18 = vcombine.low %v1959_v50, %v1967_v54  ;;  %v18659_v50 = vcombine.high %v2007_v36, %v2015_v48 }
 0x631   :  { %15073 = vmatprep.subr.bf16.mxu1 %v18565_v19  ;;  %v18612_v19 = vcombine.low %v1960_v58, %v1968_v7  ;;  %v18629_v21 = vcombine.high %v1976_v8, %v1984_v11  ;;  %v2023_v58 = vld [vmem:[#allocation10 + $0x2520] sm:$0xff] }
 0x632   :  { %v2031_v7 = vld [vmem:[#allocation10 + $0x2560] sm:$0xff] }
 0x633   :  { %14746 = vmatpush1.bf16.msra.mxu0 %v18562_v23  ;;  %v1992_v23 = vld [vmem:[#allocation10 + $0x2428] sm:$0xff] }
 0x634   :  { %15074 = vmatpush1.bf16.msra.mxu1 %v18564_v31  ;;  %14747 = vmatprep.subr.bf16.mxu0 %v18579_v26  ;;  %v2000_v31 = vld [vmem:[#allocation10 + $0x2468] sm:$0xff]  ;;  %v18626_v26 = vcombine.low %v1975_v1, %v1983_v5  ;;  %v18675_v1 = vcombine.high %v2023_v58, %v2031_v7 }
 0x635   :  { %15075 = vmatprep.subr.bf16.mxu1 %v18581_v35  ;;  %v18628_v35 = vcombine.low %v1976_v8, %v1984_v11  ;;  %v18645_v40 = vcombine.high %v1992_v23, %v2000_v31  ;;  %v2039_v8 = vld [vmem:[#allocation10 + $0x25a0] sm:$0xff] }
 0x636   :  { %v2047_v11 = vld [vmem:[#allocation10 + $0x25e0] sm:$0xff] }
 0x637   :  { %14748 = vmatpush1.bf16.msra.mxu0 %v18578_v42  ;;  %v2008_v42 = vld [vmem:[#allocation10 + $0x24a8] sm:$0xff] }
 0x638   :  { %15076 = vmatpush1.bf16.msra.mxu1 %v18580_v9  ;;  %14749 = vmatprep.subr.bf16.mxu0 %v18595_v28  ;;  %v2016_v9 = vld [vmem:[#allocation10 + $0x24e8] sm:$0xff]  ;;  %v18642_v28 = vcombine.low %v1991_v4, %v1999_v22  ;;  %v18691_v4 = vcombine.high %v2039_v8, %v2047_v11 }
 0x639   :  { %15077 = vmatprep.subr.bf16.mxu1 %v18597_v45  ;;  %v18644_v45 = vcombine.low %v1992_v23, %v2000_v31  ;;  %v18661_v54 = vcombine.high %v2008_v42, %v2016_v9  ;;  %v2055_v23 = vld [vmem:[#allocation10 + $0x2620] sm:$0xff] }
 0x63a   :  { %v2063_v31 = vld [vmem:[#allocation10 + $0x2660] sm:$0xff] }
 0x63b   :  { %14750 = vmatpush1.bf16.msra.mxu0 %v18594_v47  ;;  %v2024_v47 = vld [vmem:[#allocation10 + $0x2528] sm:$0xff] }
 0x63c   :  { %15078 = vmatpush1.bf16.msra.mxu1 %v18596_v60  ;;  %14751 = vmatprep.subr.bf16.mxu0 %v18611_v34  ;;  %v2032_v60 = vld [vmem:[#allocation10 + $0x2568] sm:$0xff]  ;;  %v18658_v34 = vcombine.low %v2007_v36, %v2015_v48  ;;  %v18707_v36 = vcombine.high %v2055_v23, %v2063_v31 }
 0x63d   :  { %15079 = vmatprep.subr.bf16.mxu1 %v18613_v61  ;;  %v18660_v61 = vcombine.low %v2008_v42, %v2016_v9  ;;  %v18677_v5 = vcombine.high %v2024_v47, %v2032_v60  ;;  %v2071_v42 = vld [vmem:[#allocation10 + $0x26a0] sm:$0xff] }
 0x63e   :  { %v2079_v9 = vld [vmem:[#allocation10 + $0x26e0] sm:$0xff] }
 0x63f   :  { %14752 = vmatpush1.bf16.msra.mxu0 %v18610_v18  ;;  %v2040_v18 = vld [vmem:[#allocation10 + $0x25a8] sm:$0xff] }
 0x640   :  { %15080 = vmatpush1.bf16.msra.mxu1 %v18612_v19  ;;  %14753 = vmatprep.subr.bf16.mxu0 %v18627_v20  ;;  %v2048_v19 = vld [vmem:[#allocation10 + $0x25e8] sm:$0xff]  ;;  %v18674_v20 = vcombine.low %v2023_v58, %v2031_v7  ;;  %v18723_v58 = vcombine.high %v2071_v42, %v2079_v9 }
 0x641   :  { %15081 = vmatprep.subr.bf16.mxu1 %v18629_v21  ;;  %v18676_v21 = vcombine.low %v2024_v47, %v2032_v60  ;;  %v18693_v22 = vcombine.high %v2040_v18, %v2048_v19  ;;  %v2087_v47 = vld [vmem:[#allocation10 + $0x2720] sm:$0xff] }
 0x642   :  { %v2095_v60 = vld [vmem:[#allocation10 + $0x2760] sm:$0xff] }
 0x643   :  { %14754 = vmatpush1.bf16.msra.mxu0 %v18626_v26  ;;  %v2056_v26 = vld [vmem:[#allocation10 + $0x2628] sm:$0xff] }
 0x644   :  { %15082 = vmatpush1.bf16.msra.mxu1 %v18628_v35  ;;  %14755 = vmatprep.subr.bf16.mxu0 %v18643_v15  ;;  %v2064_v35 = vld [vmem:[#allocation10 + $0x2668] sm:$0xff]  ;;  %v18690_v15 = vcombine.low %v2039_v8, %v2047_v11  ;;  %v18739_v8 = vcombine.high %v2087_v47, %v2095_v60 }
 0x645   :  { %15083 = vmatprep.subr.bf16.mxu1 %v18645_v40  ;;  %v18692_v40 = vcombine.low %v2040_v18, %v2048_v19  ;;  %v18709_v48 = vcombine.high %v2056_v26, %v2064_v35  ;;  %v2103_v18 = vld [vmem:[#allocation10 + $0x27a0] sm:$0xff] }
 0x646   :  { %v2111_v19 = vld [vmem:[#allocation10 + $0x27e0] sm:$0xff] }
 0x647   :  { %14756 = vmatpush1.bf16.msra.mxu0 %v18642_v28  ;;  %v2072_v28 = vld [vmem:[#allocation10 + $0x26a8] sm:$0xff] }
 0x648   :  { %15084 = vmatpush1.bf16.msra.mxu1 %v18644_v45  ;;  %14757 = vmatprep.subr.bf16.mxu0 %v18659_v50  ;;  %v2080_v45 = vld [vmem:[#allocation10 + $0x26e8] sm:$0xff]  ;;  %v18706_v50 = vcombine.low %v2055_v23, %v2063_v31  ;;  %v18755_v23 = vcombine.high %v2103_v18, %v2111_v19 }
 0x649   :  { %15085 = vmatprep.subr.bf16.mxu1 %v18661_v54  ;;  %v18708_v54 = vcombine.low %v2056_v26, %v2064_v35  ;;  %v18725_v7 = vcombine.high %v2072_v28, %v2080_v45  ;;  %v2119_v26 = vld [vmem:[#allocation10 + $0x2820] sm:$0xff] }
 0x64a   :  { %v2127_v35 = vld [vmem:[#allocation10 + $0x2860] sm:$0xff] }
 0x64b   :  { %14758 = vmatpush1.bf16.msra.mxu0 %v18658_v34  ;;  %v2088_v34 = vld [vmem:[#allocation10 + $0x2728] sm:$0xff] }
 0x64c   :  { %15086 = vmatpush1.bf16.msra.mxu1 %v18660_v61  ;;  %14759 = vmatprep.subr.bf16.mxu0 %v18675_v1  ;;  %v2096_v61 = vld [vmem:[#allocation10 + $0x2768] sm:$0xff]  ;;  %v18722_v1 = vcombine.low %v2071_v42, %v2079_v9  ;;  %v18771_v42 = vcombine.high %v2119_v26, %v2127_v35 }
 0x64d   :  { %15087 = vmatprep.subr.bf16.mxu1 %v18677_v5  ;;  %v18724_v5 = vcombine.low %v2072_v28, %v2080_v45  ;;  %v18741_v11 = vcombine.high %v2088_v34, %v2096_v61  ;;  %v2135_v28 = vld [vmem:[#allocation10 + $0x28a0] sm:$0xff] }
 0x64e   :  { %v2143_v45 = vld [vmem:[#allocation10 + $0x28e0] sm:$0xff] }
 0x64f   :  { %14760 = vmatpush1.bf16.msra.mxu0 %v18674_v20  ;;  %v2104_v20 = vld [vmem:[#allocation10 + $0x27a8] sm:$0xff] }
 0x650   :  { %15088 = vmatpush1.bf16.msra.mxu1 %v18676_v21  ;;  %14761 = vmatprep.subr.bf16.mxu0 %v18691_v4  ;;  %v2112_v21 = vld [vmem:[#allocation10 + $0x27e8] sm:$0xff]  ;;  %v18738_v4 = vcombine.low %v2087_v47, %v2095_v60  ;;  %v18787_v47 = vcombine.high %v2135_v28, %v2143_v45  ;;  %v2151_v60 = vld [vmem:[#allocation10 + $0x2920] sm:$0xff] }
 0x651   :  { %15089 = vmatprep.subr.bf16.mxu1 %v18693_v22  ;;  %v18740_v22 = vcombine.low %v2088_v34, %v2096_v61  ;;  %v18757_v31 = vcombine.high %v2104_v20, %v2112_v21  ;;  %v2159_v34 = vld [vmem:[#allocation10 + $0x2960] sm:$0xff] }
 0x653   :  { %14762 = vmatpush1.bf16.msra.mxu0 %v18690_v15  ;;  %v2120_v15 = vld [vmem:[#allocation10 + $0x2828] sm:$0xff] }
 0x654   :  { %15090 = vmatpush1.bf16.msra.mxu1 %v18692_v40  ;;  %14763 = vmatprep.subr.bf16.mxu0 %v18707_v36  ;;  %v2128_v40 = vld [vmem:[#allocation10 + $0x2868] sm:$0xff]  ;;  %v18754_v36 = vcombine.low %v2103_v18, %v2111_v19  ;;  %v18803_v18 = vcombine.high %v2151_v60, %v2159_v34 }
 0x655   :  { %15091 = vmatprep.subr.bf16.mxu1 %v18709_v48  ;;  %v18756_v48 = vcombine.low %v2104_v20, %v2112_v21  ;;  %v18773_v9 = vcombine.high %v2120_v15, %v2128_v40  ;;  %v2167_v20 = vld [vmem:[#allocation10 + $0x29a0] sm:$0xff] }
 0x656   :  { %v2175_v21 = vld [vmem:[#allocation10 + $0x29e0] sm:$0xff] }
 0x657   :  { %14764 = vmatpush1.bf16.msra.mxu0 %v18706_v50  ;;  %v18770_v50 = vcombine.low %v2119_v26, %v2127_v35  ;;  %v18819_v26 = vcombine.high %v2167_v20, %v2175_v21 }
 0x658   :  { %15092 = vmatpush1.bf16.msra.mxu1 %v18708_v54  ;;  %14765 = vmatprep.subr.bf16.mxu0 %v18723_v58  ;;  %v2136_v54 = vld [vmem:[#allocation10 + $0x28a8] sm:$0xff] }
 0x659   :  { %15093 = vmatprep.subr.bf16.mxu1 %v18725_v7  ;;  %v2144_v58 = vld [vmem:[#allocation10 + $0x28e8] sm:$0xff]  ;;  %v18772_v7 = vcombine.low %v2120_v15, %v2128_v40  ;;  %v2183_v15 = vld [vmem:[#allocation10 + $0x2a20] sm:$0xff] }
 0x65a   :  { %v18789_v61 = vcombine.high %v2136_v54, %v2144_v58  ;;  %v2191_v40 = vld [vmem:[#allocation10 + $0x2a60] sm:$0xff] }
 0x65b   :  { %14766 = vmatpush1.bf16.msra.mxu0 %v18722_v1  ;;  %v2152_v1 = vld [vmem:[#allocation10 + $0x2928] sm:$0xff] }
 0x65c   :  { %15094 = vmatpush1.bf16.msra.mxu1 %v18724_v5  ;;  %14767 = vmatprep.subr.bf16.mxu0 %v18739_v8  ;;  %v2160_v5 = vld [vmem:[#allocation10 + $0x2968] sm:$0xff]  ;;  %v18786_v8 = vcombine.low %v2135_v28, %v2143_v45  ;;  %v18835_v28 = vcombine.high %v2183_v15, %v2191_v40 }
 0x65d   :  { %15095 = vmatprep.subr.bf16.mxu1 %v18741_v11  ;;  %v18788_v11 = vcombine.low %v2136_v54, %v2144_v58  ;;  %v18805_v19 = vcombine.high %v2152_v1, %v2160_v5  ;;  %v2207_v54 = vld [vmem:[#allocation10 + $0x2ae0] sm:$0xff]  ;;  %v2200_v58 = vld [vmem:[#allocation10 + $0x2aa8] sm:$0xff] }
 0x65f   :  { %14768 = vmatpush1.bf16.msra.mxu0 %v18738_v4  ;;  %v2168_v4 = vld [vmem:[#allocation10 + $0x29a8] sm:$0xff] }
 0x660   :  { %15096 = vmatpush1.bf16.msra.mxu1 %v18740_v22  ;;  %14769 = vmatprep.subr.bf16.mxu0 %v18755_v23  ;;  %v2176_v22 = vld [vmem:[#allocation10 + $0x29e8] sm:$0xff]  ;;  %v18802_v23 = vcombine.low %v2151_v60, %v2159_v34 }
 0x661   :  { %15097 = vmatprep.subr.bf16.mxu1 %v18757_v31  ;;  %v18804_v31 = vcombine.low %v2152_v1, %v2160_v5  ;;  %v18821_v35 = vcombine.high %v2168_v4, %v2176_v22  ;;  %v2215_v1 = vld [vmem:[#allocation10 + $0x2b20] sm:$0xff] }
 0x662   :  { %v2223_v5 = vld [vmem:[#allocation10 + $0x2b60] sm:$0xff] }
 0x663   :  { %14770 = vmatpush1.bf16.msra.mxu0 %v18754_v36  ;;  %v2184_v36 = vld [vmem:[#allocation10 + $0x2a28] sm:$0xff] }
 0x664   :  { %15098 = vmatpush1.bf16.msra.mxu1 %v18756_v48  ;;  %14780 = vmatprep.subr.bf16.mxu0 %v18771_v42  ;;  %v2192_v48 = vld [vmem:[#allocation10 + $0x2a68] sm:$0xff]  ;;  %v18818_v42 = vcombine.low %v2167_v20, %v2175_v21  ;;  %v18867_v20 = vcombine.high %v2215_v1, %v2223_v5 }
 0x665   :  { %15108 = vmatprep.subr.bf16.mxu1 %v18773_v9  ;;  %v18820_v9 = vcombine.low %v2168_v4, %v2176_v22  ;;  %v18837_v45 = vcombine.high %v2184_v36, %v2192_v48  ;;  %v18836_v60 = vcombine.low %v2184_v36, %v2192_v48  ;;  %v2231_v4 = vld [vmem:[#allocation10 + $0x2ba0] sm:$0xff] }
 0x666   :  { %14772 = vmatmul.mubr.bf16.vlgmr.msra.gmra.mrb[24].mxu0 %v20758_v29  ;;  %v2239_v22 = vld [vmem:[#allocation10 + $0x2be0] sm:$0xff] }
 0x667   :  { %15100 = vmatmul.mubr.bf16.vlgmr.msra.gmra.mrb[24].mxu1 %v20758_v29  ;;  %14781 = vmatpush1.bf16.msra.mxu0 %v18770_v50  ;;  %v2199_v50 = vld [vmem:[#allocation10 + $0x2aa0] sm:$0xff] }
 0x668   :  { %14812 = vmatprep.mubr.bf16.mxu0 %v20760_v33  ;;  %15109 = vmatpush1.bf16.msra.mxu1 %v18772_v7  ;;  %v2208_v7 = vld [vmem:[#allocation10 + $0x2ae8] sm:$0xff]  ;;  %v18851_v34 = vcombine.high %v2199_v50, %v2207_v54  ;;  %v2247_v36 = vld [vmem:[#allocation10 + $0x2c20] sm:$0xff] }
 0x669   :  { %15140 = vmatprep.mubr.bf16.mxu1 %v20760_v33  ;;  %14782 = vmatprep.subr.bf16.mxu0 %v18787_v47  ;;  %v18834_v47 = vcombine.low %v2183_v15, %v2191_v40  ;;  %v18883_v15 = vcombine.high %v2231_v4, %v2239_v22  ;;  %v2255_v48 = vld [vmem:[#allocation10 + $0x2c60] sm:$0xff] }
 0x66a   :  { %15110 = vmatprep.subr.bf16.mxu1 %v18789_v61  ;;  %v18853_v61 = vcombine.high %v2200_v58, %v2208_v7 }
 0x66b   :  { %14783 = vmatpush1.bf16.msra.mxu0 %v18786_v8  ;;  %v2216_v8 = vld [vmem:[#allocation10 + $0x2b28] sm:$0xff] }
 0x66c   :  { %15111 = vmatpush1.bf16.msra.mxu1 %v18788_v11  ;;  %14784 = vmatprep.subr.bf16.mxu0 %v18803_v18  ;;  %v2224_v11 = vld [vmem:[#allocation10 + $0x2b68] sm:$0xff]  ;;  %v18850_v18 = vcombine.low %v2199_v50, %v2207_v54  ;;  %v18899_v50 = vcombine.high %v2247_v36, %v2255_v48 }
 0x66d   :  { %15112 = vmatprep.subr.bf16.mxu1 %v18805_v19  ;;  %v18852_v19 = vcombine.low %v2200_v58, %v2208_v7  ;;  %v18869_v21 = vcombine.high %v2216_v8, %v2224_v11  ;;  %v2263_v58 = vld [vmem:[#allocation10 + $0x2ca0] sm:$0xff] }
 0x66e   :  { %v2271_v7 = vld [vmem:[#allocation10 + $0x2ce0] sm:$0xff] }
 0x66f   :  { %14785 = vmatpush1.bf16.msra.mxu0 %v18802_v23  ;;  %v2232_v23 = vld [vmem:[#allocation10 + $0x2ba8] sm:$0xff] }
 0x670   :  { %15113 = vmatpush1.bf16.msra.mxu1 %v18804_v31  ;;  %14786 = vmatprep.subr.bf16.mxu0 %v18819_v26  ;;  %v2240_v31 = vld [vmem:[#allocation10 + $0x2be8] sm:$0xff]  ;;  %v18866_v26 = vcombine.low %v2215_v1, %v2223_v5  ;;  %v18915_v1 = vcombine.high %v2263_v58, %v2271_v7 }
 0x671   :  { %15114 = vmatprep.subr.bf16.mxu1 %v18821_v35  ;;  %v18868_v35 = vcombine.low %v2216_v8, %v2224_v11  ;;  %v18885_v40 = vcombine.high %v2232_v23, %v2240_v31  ;;  %v2279_v8 = vld [vmem:[#allocation10 + $0x2d20] sm:$0xff] }
 0x672   :  { %v2287_v11 = vld [vmem:[#allocation10 + $0x2d60] sm:$0xff] }
 0x673   :  { %14787 = vmatpush1.bf16.msra.mxu0 %v18818_v42  ;;  %v2248_v42 = vld [vmem:[#allocation10 + $0x2c28] sm:$0xff] }
 0x674   :  { %15115 = vmatpush1.bf16.msra.mxu1 %v18820_v9  ;;  %14788 = vmatprep.subr.bf16.mxu0 %v18835_v28  ;;  %v2256_v9 = vld [vmem:[#allocation10 + $0x2c68] sm:$0xff]  ;;  %v18882_v28 = vcombine.low %v2231_v4, %v2239_v22  ;;  %v18931_v4 = vcombine.high %v2279_v8, %v2287_v11 }
 0x675   :  { %15116 = vmatprep.subr.bf16.mxu1 %v18837_v45  ;;  %v18884_v45 = vcombine.low %v2232_v23, %v2240_v31  ;;  %v18901_v54 = vcombine.high %v2248_v42, %v2256_v9  ;;  %v2295_v23 = vld [vmem:[#allocation10 + $0x2da0] sm:$0xff] }
 0x676   :  { %v2303_v31 = vld [vmem:[#allocation10 + $0x2de0] sm:$0xff] }
 0x677   :  { %14789 = vmatpush1.bf16.msra.mxu0 %v18834_v47  ;;  %v2264_v47 = vld [vmem:[#allocation10 + $0x2ca8] sm:$0xff] }
 0x678   :  { %15117 = vmatpush1.bf16.msra.mxu1 %v18836_v60  ;;  %14790 = vmatprep.subr.bf16.mxu0 %v18851_v34  ;;  %v2272_v60 = vld [vmem:[#allocation10 + $0x2ce8] sm:$0xff]  ;;  %v18898_v34 = vcombine.low %v2247_v36, %v2255_v48  ;;  %v18947_v36 = vcombine.high %v2295_v23, %v2303_v31 }
 0x679   :  { %15118 = vmatprep.subr.bf16.mxu1 %v18853_v61  ;;  %v18900_v61 = vcombine.low %v2248_v42, %v2256_v9  ;;  %v18917_v5 = vcombine.high %v2264_v47, %v2272_v60  ;;  %v2311_v42 = vld [vmem:[#allocation10 + $0x2e20] sm:$0xff] }
 0x67a   :  { %v2319_v9 = vld [vmem:[#allocation10 + $0x2e60] sm:$0xff] }
 0x67b   :  { %14791 = vmatpush1.bf16.msra.mxu0 %v18850_v18  ;;  %v2280_v18 = vld [vmem:[#allocation10 + $0x2d28] sm:$0xff] }
 0x67c   :  { %15119 = vmatpush1.bf16.msra.mxu1 %v18852_v19  ;;  %14792 = vmatprep.subr.bf16.mxu0 %v18867_v20  ;;  %v2288_v19 = vld [vmem:[#allocation10 + $0x2d68] sm:$0xff]  ;;  %v18914_v20 = vcombine.low %v2263_v58, %v2271_v7  ;;  %v18963_v58 = vcombine.high %v2311_v42, %v2319_v9 }
 0x67d   :  { %15120 = vmatprep.subr.bf16.mxu1 %v18869_v21  ;;  %v18916_v21 = vcombine.low %v2264_v47, %v2272_v60  ;;  %v18933_v22 = vcombine.high %v2280_v18, %v2288_v19  ;;  %v2327_v47 = vld [vmem:[#allocation10 + $0x2ea0] sm:$0xff] }
 0x67e   :  { %v2335_v60 = vld [vmem:[#allocation10 + $0x2ee0] sm:$0xff] }
 0x67f   :  { %14793 = vmatpush1.bf16.msra.mxu0 %v18866_v26  ;;  %v2296_v26 = vld [vmem:[#allocation10 + $0x2da8] sm:$0xff] }
 0x680   :  { %15121 = vmatpush1.bf16.msra.mxu1 %v18868_v35  ;;  %14794 = vmatprep.subr.bf16.mxu0 %v18883_v15  ;;  %v2304_v35 = vld [vmem:[#allocation10 + $0x2de8] sm:$0xff]  ;;  %v18930_v15 = vcombine.low %v2279_v8, %v2287_v11  ;;  %v18979_v8 = vcombine.high %v2327_v47, %v2335_v60 }
 0x681   :  { %15122 = vmatprep.subr.bf16.mxu1 %v18885_v40  ;;  %v18932_v40 = vcombine.low %v2280_v18, %v2288_v19  ;;  %v18949_v48 = vcombine.high %v2296_v26, %v2304_v35  ;;  %v2343_v18 = vld [vmem:[#allocation10 + $0x2f20] sm:$0xff] }
 0x682   :  { %v2351_v19 = vld [vmem:[#allocation10 + $0x2f60] sm:$0xff] }
 0x683   :  { %14795 = vmatpush1.bf16.msra.mxu0 %v18882_v28  ;;  %v2312_v28 = vld [vmem:[#allocation10 + $0x2e28] sm:$0xff] }
 0x684   :  { %15123 = vmatpush1.bf16.msra.mxu1 %v18884_v45  ;;  %14796 = vmatprep.subr.bf16.mxu0 %v18899_v50  ;;  %v2320_v45 = vld [vmem:[#allocation10 + $0x2e68] sm:$0xff]  ;;  %v18946_v50 = vcombine.low %v2295_v23, %v2303_v31  ;;  %v18995_v23 = vcombine.high %v2343_v18, %v2351_v19 }
 0x685   :  { %15124 = vmatprep.subr.bf16.mxu1 %v18901_v54  ;;  %v18948_v54 = vcombine.low %v2296_v26, %v2304_v35  ;;  %v18965_v7 = vcombine.high %v2312_v28, %v2320_v45  ;;  %v2359_v26 = vld [vmem:[#allocation10 + $0x2fa0] sm:$0xff] }
 0x686   :  { %v2367_v35 = vld [vmem:[#allocation10 + $0x2fe0] sm:$0xff] }
 0x687   :  { %14797 = vmatpush1.bf16.msra.mxu0 %v18898_v34  ;;  %v2328_v34 = vld [vmem:[#allocation10 + $0x2ea8] sm:$0xff] }
 0x688   :  { %15125 = vmatpush1.bf16.msra.mxu1 %v18900_v61  ;;  %14798 = vmatprep.subr.bf16.mxu0 %v18915_v1  ;;  %v2336_v61 = vld [vmem:[#allocation10 + $0x2ee8] sm:$0xff]  ;;  %v18962_v1 = vcombine.low %v2311_v42, %v2319_v9  ;;  %v19011_v42 = vcombine.high %v2359_v26, %v2367_v35 }
 0x689   :  { %15126 = vmatprep.subr.bf16.mxu1 %v18917_v5  ;;  %v18964_v5 = vcombine.low %v2312_v28, %v2320_v45  ;;  %v18981_v11 = vcombine.high %v2328_v34, %v2336_v61  ;;  %v2375_v28 = vld [vmem:[#allocation10 + $0x3020] sm:$0xff] }
 0x68a   :  { %v2383_v45 = vld [vmem:[#allocation10 + $0x3060] sm:$0xff] }
 0x68b   :  { %14799 = vmatpush1.bf16.msra.mxu0 %v18914_v20  ;;  %v2344_v20 = vld [vmem:[#allocation10 + $0x2f28] sm:$0xff] }
 0x68c   :  { %15127 = vmatpush1.bf16.msra.mxu1 %v18916_v21  ;;  %14800 = vmatprep.subr.bf16.mxu0 %v18931_v4  ;;  %v2352_v21 = vld [vmem:[#allocation10 + $0x2f68] sm:$0xff]  ;;  %v18978_v4 = vcombine.low %v2327_v47, %v2335_v60  ;;  %v19027_v47 = vcombine.high %v2375_v28, %v2383_v45 }
 0x68d   :  { %15128 = vmatprep.subr.bf16.mxu1 %v18933_v22  ;;  %v18980_v22 = vcombine.low %v2328_v34, %v2336_v61  ;;  %v18997_v31 = vcombine.high %v2344_v20, %v2352_v21  ;;  %v2391_v34 = vld [vmem:[#allocation10 + $0x30a0] sm:$0xff] }
 0x68e   :  { %v2399_v61 = vld [vmem:[#allocation10 + $0x30e0] sm:$0xff] }
 0x68f   :  { %14801 = vmatpush1.bf16.msra.mxu0 %v18930_v15  ;;  %v2360_v15 = vld [vmem:[#allocation10 + $0x2fa8] sm:$0xff] }
 0x690   :  { %15129 = vmatpush1.bf16.msra.mxu1 %v18932_v40  ;;  %14802 = vmatprep.subr.bf16.mxu0 %v18947_v36  ;;  %v2368_v40 = vld [vmem:[#allocation10 + $0x2fe8] sm:$0xff]  ;;  %v18994_v36 = vcombine.low %v2343_v18, %v2351_v19  ;;  %v19043_v18 = vcombine.high %v2391_v34, %v2399_v61  ;;  %v2407_v19 = vld [vmem:[#allocation10 + $0x3120] sm:$0xff] }
 0x691   :  { %15130 = vmatprep.subr.bf16.mxu1 %v18949_v48  ;;  %v18996_v48 = vcombine.low %v2344_v20, %v2352_v21  ;;  %v19013_v9 = vcombine.high %v2360_v15, %v2368_v40  ;;  %v2415_v20 = vld [vmem:[#allocation10 + $0x3160] sm:$0xff] }
 0x693   :  { %14803 = vmatpush1.bf16.msra.mxu0 %v18946_v50  ;;  %v2376_v50 = vld [vmem:[#allocation10 + $0x3028] sm:$0xff] }
 0x694   :  { %15131 = vmatpush1.bf16.msra.mxu1 %v18948_v54  ;;  %14804 = vmatprep.subr.bf16.mxu0 %v18963_v58  ;;  %v2384_v54 = vld [vmem:[#allocation10 + $0x3068] sm:$0xff]  ;;  %v19010_v58 = vcombine.low %v2359_v26, %v2367_v35  ;;  %v19059_v26 = vcombine.high %v2407_v19, %v2415_v20 }
 0x695   :  { %15132 = vmatprep.subr.bf16.mxu1 %v18965_v7  ;;  %v19012_v7 = vcombine.low %v2360_v15, %v2368_v40  ;;  %v19029_v60 = vcombine.high %v2376_v50, %v2384_v54  ;;  %v2423_v15 = vld [vmem:[#allocation10 + $0x31a0] sm:$0xff] }
 0x696   :  { %v2431_v40 = vld [vmem:[#allocation10 + $0x31e0] sm:$0xff] }
 0x697   :  { %14805 = vmatpush1.bf16.msra.mxu0 %v18962_v1  ;;  %v19026_v1 = vcombine.low %v2375_v28, %v2383_v45  ;;  %v19075_v28 = vcombine.high %v2423_v15, %v2431_v40 }
 0x698   :  { %15133 = vmatpush1.bf16.msra.mxu1 %v18964_v5  ;;  %14806 = vmatprep.subr.bf16.mxu0 %v18979_v8  ;;  %v2392_v5 = vld [vmem:[#allocation10 + $0x30a8] sm:$0xff] }
 0x699   :  { %15134 = vmatprep.subr.bf16.mxu1 %v18981_v11  ;;  %v2400_v8 = vld [vmem:[#allocation10 + $0x30e8] sm:$0xff]  ;;  %v19028_v11 = vcombine.low %v2376_v50, %v2384_v54  ;;  %v2439_v50 = vld [vmem:[#allocation10 + $0x3220] sm:$0xff] }
 0x69a   :  { %v19045_v21 = vcombine.high %v2392_v5, %v2400_v8  ;;  %v2447_v54 = vld [vmem:[#allocation10 + $0x3260] sm:$0xff] }
 0x69b   :  { %14807 = vmatpush1.bf16.msra.mxu0 %v18978_v4  ;;  %v2408_v4 = vld [vmem:[#allocation10 + $0x3128] sm:$0xff] }
 0x69c   :  { %15135 = vmatpush1.bf16.msra.mxu1 %v18980_v22  ;;  %14808 = vmatprep.subr.bf16.mxu0 %v18995_v23  ;;  %v2416_v22 = vld [vmem:[#allocation10 + $0x3168] sm:$0xff]  ;;  %v19042_v23 = vcombine.low %v2391_v34, %v2399_v61  ;;  %v19091_v34 = vcombine.high %v2439_v50, %v2447_v54 }
 0x69d   :  { %15136 = vmatprep.subr.bf16.mxu1 %v18997_v31  ;;  %v19044_v31 = vcombine.low %v2392_v5, %v2400_v8  ;;  %v19061_v35 = vcombine.high %v2408_v4, %v2416_v22  ;;  %v2463_v5 = vld [vmem:[#allocation10 + $0x32e0] sm:$0xff]  ;;  %v2456_v8 = vld [vmem:[#allocation10 + $0x32a8] sm:$0xff] }
 0x69f   :  { %14809 = vmatpush1.bf16.msra.mxu0 %v18994_v36  ;;  %v2424_v36 = vld [vmem:[#allocation10 + $0x31a8] sm:$0xff] }
 0x6a0   :  { %15137 = vmatpush1.bf16.msra.mxu1 %v18996_v48  ;;  %14810 = vmatprep.subr.bf16.mxu0 %v19011_v42  ;;  %v2432_v48 = vld [vmem:[#allocation10 + $0x31e8] sm:$0xff]  ;;  %v19058_v42 = vcombine.low %v2407_v19, %v2415_v20 }
 0x6a1   :  { %15138 = vmatprep.subr.bf16.mxu1 %v19013_v9  ;;  %v19060_v9 = vcombine.low %v2408_v4, %v2416_v22  ;;  %v19077_v45 = vcombine.high %v2424_v36, %v2432_v48  ;;  %v2471_v4 = vld [vmem:[#allocation10 + $0x3320] sm:$0xff] }
 0x6a2   :  { %v2479_v22 = vld [vmem:[#allocation10 + $0x3360] sm:$0xff] }
 0x6a3   :  { %14811 = vmatpush1.bf16.msra.mxu0 %v19010_v58  ;;  %v2440_v58 = vld [vmem:[#allocation10 + $0x3228] sm:$0xff] }
 0x6a4   :  { %15139 = vmatpush1.bf16.msra.mxu1 %v19012_v7  ;;  %14821 = vmatprep.subr.bf16.mxu0 %v19027_v47  ;;  %v2448_v7 = vld [vmem:[#allocation10 + $0x3268] sm:$0xff]  ;;  %v19074_v47 = vcombine.low %v2423_v15, %v2431_v40  ;;  %v19123_v15 = vcombine.high %v2471_v4, %v2479_v22 }
 0x6a5   :  { %15149 = vmatprep.subr.bf16.mxu1 %v19029_v60  ;;  %v19076_v60 = vcombine.low %v2424_v36, %v2432_v48  ;;  %v19093_v61 = vcombine.high %v2440_v58, %v2448_v7  ;;  %v19092_v19 = vcombine.low %v2440_v58, %v2448_v7  ;;  %v2487_v36 = vld [vmem:[#allocation10 + $0x33a0] sm:$0xff] }
 0x6a6   :  { %14813 = vmatmul.mubr.bf16.vlgmr.msra.gmra.mrb[24].mxu0 %v20776_v53  ;;  %v2495_v48 = vld [vmem:[#allocation10 + $0x33e0] sm:$0xff] }
 0x6a7   :  { %15141 = vmatmul.mubr.bf16.vlgmr.msra.gmra.mrb[24].mxu1 %v20776_v53  ;;  %14822 = vmatpush1.bf16.msra.mxu0 %v19026_v1  ;;  %v2455_v1 = vld [vmem:[#allocation10 + $0x32a0] sm:$0xff] }
 0x6a8   :  { %14853 = vmatprep.mubr.bf16.mxu0 %v20778_v6  ;;  %15150 = vmatpush1.bf16.msra.mxu1 %v19028_v11  ;;  %v2464_v11 = vld [vmem:[#allocation10 + $0x32e8] sm:$0xff]  ;;  %v19107_v20 = vcombine.high %v2455_v1, %v2463_v5  ;;  %v2503_v58 = vld [vmem:[#allocation10 + $0x3420] sm:$0xff] }
 0x6a9   :  { %15181 = vmatprep.mubr.bf16.mxu1 %v20778_v6  ;;  %14823 = vmatprep.subr.bf16.mxu0 %v19043_v18  ;;  %v19090_v18 = vcombine.low %v2439_v50, %v2447_v54  ;;  %v19139_v50 = vcombine.high %v2487_v36, %v2495_v48  ;;  %v2511_v7 = vld [vmem:[#allocation10 + $0x3460] sm:$0xff] }
 0x6aa   :  { %15151 = vmatprep.subr.bf16.mxu1 %v19045_v21  ;;  %v19109_v21 = vcombine.high %v2456_v8, %v2464_v11 }
 0x6ab   :  { %14824 = vmatpush1.bf16.msra.mxu0 %v19042_v23  ;;  %v2472_v23 = vld [vmem:[#allocation10 + $0x3328] sm:$0xff] }
 0x6ac   :  { %15152 = vmatpush1.bf16.msra.mxu1 %v19044_v31  ;;  %14825 = vmatprep.subr.bf16.mxu0 %v19059_v26  ;;  %v2480_v31 = vld [vmem:[#allocation10 + $0x3368] sm:$0xff]  ;;  %v19106_v26 = vcombine.low %v2455_v1, %v2463_v5  ;;  %v19155_v1 = vcombine.high %v2503_v58, %v2511_v7 }
 0x6ad   :  { %15153 = vmatprep.subr.bf16.mxu1 %v19061_v35  ;;  %v19108_v35 = vcombine.low %v2456_v8, %v2464_v11  ;;  %v19125_v40 = vcombine.high %v2472_v23, %v2480_v31  ;;  %v2519_v8 = vld [vmem:[#allocation10 + $0x34a0] sm:$0xff] }
 0x6ae   :  { %v2527_v11 = vld [vmem:[#allocation10 + $0x34e0] sm:$0xff] }
 0x6af   :  { %14826 = vmatpush1.bf16.msra.mxu0 %v19058_v42  ;;  %v2488_v42 = vld [vmem:[#allocation10 + $0x33a8] sm:$0xff] }
 0x6b0   :  { %15154 = vmatpush1.bf16.msra.mxu1 %v19060_v9  ;;  %14827 = vmatprep.subr.bf16.mxu0 %v19075_v28  ;;  %v2496_v9 = vld [vmem:[#allocation10 + $0x33e8] sm:$0xff]  ;;  %v19122_v28 = vcombine.low %v2471_v4, %v2479_v22  ;;  %v19171_v4 = vcombine.high %v2519_v8, %v2527_v11 }
 0x6b1   :  { %15155 = vmatprep.subr.bf16.mxu1 %v19077_v45  ;;  %v19124_v45 = vcombine.low %v2472_v23, %v2480_v31  ;;  %v19141_v54 = vcombine.high %v2488_v42, %v2496_v9  ;;  %v2535_v23 = vld [vmem:[#allocation10 + $0x3520] sm:$0xff] }
 0x6b2   :  { %v2543_v31 = vld [vmem:[#allocation10 + $0x3560] sm:$0xff] }
 0x6b3   :  { %14828 = vmatpush1.bf16.msra.mxu0 %v19074_v47  ;;  %v2504_v47 = vld [vmem:[#allocation10 + $0x3428] sm:$0xff] }
 0x6b4   :  { %15156 = vmatpush1.bf16.msra.mxu1 %v19076_v60  ;;  %14829 = vmatprep.subr.bf16.mxu0 %v19091_v34  ;;  %v2512_v60 = vld [vmem:[#allocation10 + $0x3468] sm:$0xff]  ;;  %v19138_v34 = vcombine.low %v2487_v36, %v2495_v48  ;;  %v19187_v36 = vcombine.high %v2535_v23, %v2543_v31 }
 0x6b5   :  { %15157 = vmatprep.subr.bf16.mxu1 %v19093_v61  ;;  %v19140_v61 = vcombine.low %v2488_v42, %v2496_v9  ;;  %v19157_v5 = vcombine.high %v2504_v47, %v2512_v60  ;;  %v2551_v42 = vld [vmem:[#allocation10 + $0x35a0] sm:$0xff] }
 0x6b6   :  { %v2559_v9 = vld [vmem:[#allocation10 + $0x35e0] sm:$0xff] }
 0x6b7   :  { %14830 = vmatpush1.bf16.msra.mxu0 %v19090_v18  ;;  %v2520_v18 = vld [vmem:[#allocation10 + $0x34a8] sm:$0xff] }
 0x6b8   :  { %15158 = vmatpush1.bf16.msra.mxu1 %v19092_v19  ;;  %14831 = vmatprep.subr.bf16.mxu0 %v19107_v20  ;;  %v2528_v19 = vld [vmem:[#allocation10 + $0x34e8] sm:$0xff]  ;;  %v19154_v20 = vcombine.low %v2503_v58, %v2511_v7  ;;  %v19203_v58 = vcombine.high %v2551_v42, %v2559_v9 }
 0x6b9   :  { %15159 = vmatprep.subr.bf16.mxu1 %v19109_v21  ;;  %v19156_v21 = vcombine.low %v2504_v47, %v2512_v60  ;;  %v19173_v22 = vcombine.high %v2520_v18, %v2528_v19  ;;  %v2567_v47 = vld [vmem:[#allocation10 + $0x3620] sm:$0xff] }
 0x6ba   :  { %v2575_v60 = vld [vmem:[#allocation10 + $0x3660] sm:$0xff] }
 0x6bb   :  { %14832 = vmatpush1.bf16.msra.mxu0 %v19106_v26  ;;  %v2536_v26 = vld [vmem:[#allocation10 + $0x3528] sm:$0xff] }
 0x6bc   :  { %15160 = vmatpush1.bf16.msra.mxu1 %v19108_v35  ;;  %14833 = vmatprep.subr.bf16.mxu0 %v19123_v15  ;;  %v2544_v35 = vld [vmem:[#allocation10 + $0x3568] sm:$0xff]  ;;  %v19170_v15 = vcombine.low %v2519_v8, %v2527_v11  ;;  %v19219_v8 = vcombine.high %v2567_v47, %v2575_v60 }
 0x6bd   :  { %15161 = vmatprep.subr.bf16.mxu1 %v19125_v40  ;;  %v19172_v40 = vcombine.low %v2520_v18, %v2528_v19  ;;  %v19189_v48 = vcombine.high %v2536_v26, %v2544_v35  ;;  %v2583_v18 = vld [vmem:[#allocation10 + $0x36a0] sm:$0xff] }
 0x6be   :  { %v2591_v19 = vld [vmem:[#allocation10 + $0x36e0] sm:$0xff] }
 0x6bf   :  { %14834 = vmatpush1.bf16.msra.mxu0 %v19122_v28  ;;  %v2552_v28 = vld [vmem:[#allocation10 + $0x35a8] sm:$0xff] }
 0x6c0   :  { %15162 = vmatpush1.bf16.msra.mxu1 %v19124_v45  ;;  %14835 = vmatprep.subr.bf16.mxu0 %v19139_v50  ;;  %v2560_v45 = vld [vmem:[#allocation10 + $0x35e8] sm:$0xff]  ;;  %v19186_v50 = vcombine.low %v2535_v23, %v2543_v31  ;;  %v19235_v23 = vcombine.high %v2583_v18, %v2591_v19 }
 0x6c1   :  { %15163 = vmatprep.subr.bf16.mxu1 %v19141_v54  ;;  %v19188_v54 = vcombine.low %v2536_v26, %v2544_v35  ;;  %v19205_v7 = vcombine.high %v2552_v28, %v2560_v45  ;;  %v2599_v26 = vld [vmem:[#allocation10 + $0x3720] sm:$0xff] }
 0x6c2   :  { %v2607_v35 = vld [vmem:[#allocation10 + $0x3760] sm:$0xff] }
 0x6c3   :  { %14836 = vmatpush1.bf16.msra.mxu0 %v19138_v34  ;;  %v2568_v34 = vld [vmem:[#allocation10 + $0x3628] sm:$0xff] }
 0x6c4   :  { %15164 = vmatpush1.bf16.msra.mxu1 %v19140_v61  ;;  %14837 = vmatprep.subr.bf16.mxu0 %v19155_v1  ;;  %v2576_v61 = vld [vmem:[#allocation10 + $0x3668] sm:$0xff]  ;;  %v19202_v1 = vcombine.low %v2551_v42, %v2559_v9  ;;  %v19251_v42 = vcombine.high %v2599_v26, %v2607_v35 }
 0x6c5   :  { %15165 = vmatprep.subr.bf16.mxu1 %v19157_v5  ;;  %v19204_v5 = vcombine.low %v2552_v28, %v2560_v45  ;;  %v19221_v11 = vcombine.high %v2568_v34, %v2576_v61  ;;  %v2615_v28 = vld [vmem:[#allocation10 + $0x37a0] sm:$0xff] }
 0x6c6   :  { %v2623_v45 = vld [vmem:[#allocation10 + $0x37e0] sm:$0xff] }
 0x6c7   :  { %14838 = vmatpush1.bf16.msra.mxu0 %v19154_v20  ;;  %v2584_v20 = vld [vmem:[#allocation10 + $0x36a8] sm:$0xff] }
 0x6c8   :  { %15166 = vmatpush1.bf16.msra.mxu1 %v19156_v21  ;;  %14839 = vmatprep.subr.bf16.mxu0 %v19171_v4  ;;  %v2592_v21 = vld [vmem:[#allocation10 + $0x36e8] sm:$0xff]  ;;  %v19218_v4 = vcombine.low %v2567_v47, %v2575_v60  ;;  %v19267_v47 = vcombine.high %v2615_v28, %v2623_v45 }
 0x6c9   :  { %15167 = vmatprep.subr.bf16.mxu1 %v19173_v22  ;;  %v19220_v22 = vcombine.low %v2568_v34, %v2576_v61  ;;  %v19237_v31 = vcombine.high %v2584_v20, %v2592_v21  ;;  %v2631_v34 = vld [vmem:[#allocation10 + $0x3820] sm:$0xff] }
 0x6ca   :  { %v2639_v61 = vld [vmem:[#allocation10 + $0x3860] sm:$0xff] }
 0x6cb   :  { %14840 = vmatpush1.bf16.msra.mxu0 %v19170_v15  ;;  %v2600_v15 = vld [vmem:[#allocation10 + $0x3728] sm:$0xff] }
 0x6cc   :  { %15168 = vmatpush1.bf16.msra.mxu1 %v19172_v40  ;;  %14841 = vmatprep.subr.bf16.mxu0 %v19187_v36  ;;  %v2608_v40 = vld [vmem:[#allocation10 + $0x3768] sm:$0xff]  ;;  %v19234_v36 = vcombine.low %v2583_v18, %v2591_v19  ;;  %v19283_v18 = vcombine.high %v2631_v34, %v2639_v61 }
 0x6cd   :  { %15169 = vmatprep.subr.bf16.mxu1 %v19189_v48  ;;  %v19236_v48 = vcombine.low %v2584_v20, %v2592_v21  ;;  %v19253_v9 = vcombine.high %v2600_v15, %v2608_v40  ;;  %v2647_v20 = vld [vmem:[#allocation10 + $0x38a0] sm:$0xff] }
 0x6ce   :  { %v2655_v21 = vld [vmem:[#allocation10 + $0x38e0] sm:$0xff] }
 0x6cf   :  { %14842 = vmatpush1.bf16.msra.mxu0 %v19186_v50  ;;  %v2616_v50 = vld [vmem:[#allocation10 + $0x37a8] sm:$0xff] }
 0x6d0   :  { %15170 = vmatpush1.bf16.msra.mxu1 %v19188_v54  ;;  %14843 = vmatprep.subr.bf16.mxu0 %v19203_v58  ;;  %v2624_v54 = vld [vmem:[#allocation10 + $0x37e8] sm:$0xff]  ;;  %v19250_v58 = vcombine.low %v2599_v26, %v2607_v35  ;;  %v19299_v26 = vcombine.high %v2647_v20, %v2655_v21  ;;  %v2663_v35 = vld [vmem:[#allocation10 + $0x3920] sm:$0xff] }
 0x6d1   :  { %15171 = vmatprep.subr.bf16.mxu1 %v19205_v7  ;;  %v19252_v7 = vcombine.low %v2600_v15, %v2608_v40  ;;  %v19269_v60 = vcombine.high %v2616_v50, %v2624_v54  ;;  %v2671_v15 = vld [vmem:[#allocation10 + $0x3960] sm:$0xff] }
 0x6d3   :  { %14844 = vmatpush1.bf16.msra.mxu0 %v19202_v1  ;;  %v2632_v1 = vld [vmem:[#allocation10 + $0x3828] sm:$0xff] }
 0x6d4   :  { %15172 = vmatpush1.bf16.msra.mxu1 %v19204_v5  ;;  %14845 = vmatprep.subr.bf16.mxu0 %v19219_v8  ;;  %v2640_v5 = vld [vmem:[#allocation10 + $0x3868] sm:$0xff]  ;;  %v19266_v8 = vcombine.low %v2615_v28, %v2623_v45  ;;  %v19315_v28 = vcombine.high %v2663_v35, %v2671_v15 }
 0x6d5   :  { %15173 = vmatprep.subr.bf16.mxu1 %v19221_v11  ;;  %v19268_v11 = vcombine.low %v2616_v50, %v2624_v54  ;;  %v19285_v19 = vcombine.high %v2632_v1, %v2640_v5  ;;  %v2679_v50 = vld [vmem:[#allocation10 + $0x39a0] sm:$0xff] }
 0x6d6   :  { %v2687_v54 = vld [vmem:[#allocation10 + $0x39e0] sm:$0xff] }
 0x6d7   :  { %14846 = vmatpush1.bf16.msra.mxu0 %v19218_v4  ;;  %v19282_v4 = vcombine.low %v2631_v34, %v2639_v61  ;;  %v19331_v34 = vcombine.high %v2679_v50, %v2687_v54 }
 0x6d8   :  { %15174 = vmatpush1.bf16.msra.mxu1 %v19220_v22  ;;  %14847 = vmatprep.subr.bf16.mxu0 %v19235_v23  ;;  %v2648_v22 = vld [vmem:[#allocation10 + $0x38a8] sm:$0xff] }
 0x6d9   :  { %15175 = vmatprep.subr.bf16.mxu1 %v19237_v31  ;;  %v2656_v23 = vld [vmem:[#allocation10 + $0x38e8] sm:$0xff]  ;;  %v19284_v31 = vcombine.low %v2632_v1, %v2640_v5  ;;  %v2695_v1 = vld [vmem:[#allocation10 + $0x3a20] sm:$0xff] }
 0x6da   :  { %v19301_v40 = vcombine.high %v2648_v22, %v2656_v23  ;;  %v2703_v5 = vld [vmem:[#allocation10 + $0x3a60] sm:$0xff] }
 0x6db   :  { %14848 = vmatpush1.bf16.msra.mxu0 %v19234_v36  ;;  %v2664_v36 = vld [vmem:[#allocation10 + $0x3928] sm:$0xff] }
 0x6dc   :  { %15176 = vmatpush1.bf16.msra.mxu1 %v19236_v48  ;;  %14849 = vmatprep.subr.bf16.mxu0 %v19251_v42  ;;  %v2672_v48 = vld [vmem:[#allocation10 + $0x3968] sm:$0xff]  ;;  %v19298_v42 = vcombine.low %v2647_v20, %v2655_v21  ;;  %v19347_v20 = vcombine.high %v2695_v1, %v2703_v5 }
 0x6dd   :  { %15177 = vmatprep.subr.bf16.mxu1 %v19253_v9  ;;  %v19300_v9 = vcombine.low %v2648_v22, %v2656_v23  ;;  %v19317_v45 = vcombine.high %v2664_v36, %v2672_v48  ;;  %v2719_v22 = vld [vmem:[#allocation10 + $0x3ae0] sm:$0xff]  ;;  %v2712_v23 = vld [vmem:[#allocation10 + $0x3aa8] sm:$0xff] }
 0x6df   :  { %14850 = vmatpush1.bf16.msra.mxu0 %v19250_v58  ;;  %v2680_v58 = vld [vmem:[#allocation10 + $0x39a8] sm:$0xff] }
 0x6e0   :  { %15178 = vmatpush1.bf16.msra.mxu1 %v19252_v7  ;;  %14851 = vmatprep.subr.bf16.mxu0 %v19267_v47  ;;  %v2688_v7 = vld [vmem:[#allocation10 + $0x39e8] sm:$0xff]  ;;  %v19314_v47 = vcombine.low %v2663_v35, %v2671_v15 }
 0x6e1   :  { %15179 = vmatprep.subr.bf16.mxu1 %v19269_v60  ;;  %v19316_v60 = vcombine.low %v2664_v36, %v2672_v48  ;;  %v19333_v61 = vcombine.high %v2680_v58, %v2688_v7  ;;  %v2727_v36 = vld [vmem:[#allocation10 + $0x3b20] sm:$0xff] }
 0x6e2   :  { %v2735_v48 = vld [vmem:[#allocation10 + $0x3b60] sm:$0xff] }
 0x6e3   :  { %14852 = vmatpush1.bf16.msra.mxu0 %v19266_v8  ;;  %v2696_v8 = vld [vmem:[#allocation10 + $0x3a28] sm:$0xff] }
 0x6e4   :  { %15180 = vmatpush1.bf16.msra.mxu1 %v19268_v11  ;;  %14862 = vmatprep.subr.bf16.mxu0 %v19283_v18  ;;  %v2704_v11 = vld [vmem:[#allocation10 + $0x3a68] sm:$0xff]  ;;  %v19330_v18 = vcombine.low %v2679_v50, %v2687_v54  ;;  %v19379_v50 = vcombine.high %v2727_v36, %v2735_v48 }
 0x6e5   :  { %15190 = vmatprep.subr.bf16.mxu1 %v19285_v19  ;;  %v19332_v19 = vcombine.low %v2680_v58, %v2688_v7  ;;  %v19349_v21 = vcombine.high %v2696_v8, %v2704_v11  ;;  %v19348_v35 = vcombine.low %v2696_v8, %v2704_v11  ;;  %v2743_v58 = vld [vmem:[#allocation10 + $0x3ba0] sm:$0xff] }
 0x6e6   :  { %14854 = vmatmul.mubr.bf16.vlgmr.msra.gmra.mrb[24].mxu0 %v20792_v32  ;;  %v2751_v7 = vld [vmem:[#allocation10 + $0x3be0] sm:$0xff] }
 0x6e7   :  { %15182 = vmatmul.mubr.bf16.vlgmr.msra.gmra.mrb[24].mxu1 %v20792_v32  ;;  %14863 = vmatpush1.bf16.msra.mxu0 %v19282_v4  ;;  %v2711_v4 = vld [vmem:[#allocation10 + $0x3aa0] sm:$0xff] }
 0x6e8   :  { %14894 = vmatprep.mubr.bf16.mxu0 %v20794_v10  ;;  %15191 = vmatpush1.bf16.msra.mxu1 %v19284_v31  ;;  %v2720_v31 = vld [vmem:[#allocation10 + $0x3ae8] sm:$0xff]  ;;  %v19363_v15 = vcombine.high %v2711_v4, %v2719_v22  ;;  %v2759_v8 = vld [vmem:[#allocation10 + $0x3c20] sm:$0xff] }
 0x6e9   :  { %15222 = vmatprep.mubr.bf16.mxu1 %v20794_v10  ;;  %14864 = vmatprep.subr.bf16.mxu0 %v19299_v26  ;;  %v19346_v26 = vcombine.low %v2695_v1, %v2703_v5  ;;  %v19395_v1 = vcombine.high %v2743_v58, %v2751_v7  ;;  %v2767_v11 = vld [vmem:[#allocation10 + $0x3c60] sm:$0xff] }
 0x6ea   :  { %15192 = vmatprep.subr.bf16.mxu1 %v19301_v40  ;;  %v19365_v40 = vcombine.high %v2712_v23, %v2720_v31 }
 0x6eb   :  { %14865 = vmatpush1.bf16.msra.mxu0 %v19298_v42  ;;  %v2728_v42 = vld [vmem:[#allocation10 + $0x3b28] sm:$0xff] }
 0x6ec   :  { %15193 = vmatpush1.bf16.msra.mxu1 %v19300_v9  ;;  %14866 = vmatprep.subr.bf16.mxu0 %v19315_v28  ;;  %v2736_v9 = vld [vmem:[#allocation10 + $0x3b68] sm:$0xff]  ;;  %v19362_v28 = vcombine.low %v2711_v4, %v2719_v22  ;;  %v19411_v4 = vcombine.high %v2759_v8, %v2767_v11 }
 0x6ed   :  { %15194 = vmatprep.subr.bf16.mxu1 %v19317_v45  ;;  %v19364_v45 = vcombine.low %v2712_v23, %v2720_v31  ;;  %v19381_v54 = vcombine.high %v2728_v42, %v2736_v9  ;;  %v2775_v23 = vld [vmem:[#allocation10 + $0x3ca0] sm:$0xff] }
 0x6ee   :  { %v2783_v31 = vld [vmem:[#allocation10 + $0x3ce0] sm:$0xff] }
 0x6ef   :  { %14867 = vmatpush1.bf16.msra.mxu0 %v19314_v47  ;;  %v2744_v47 = vld [vmem:[#allocation10 + $0x3ba8] sm:$0xff] }
 0x6f0   :  { %15195 = vmatpush1.bf16.msra.mxu1 %v19316_v60  ;;  %14868 = vmatprep.subr.bf16.mxu0 %v19331_v34  ;;  %v2752_v60 = vld [vmem:[#allocation10 + $0x3be8] sm:$0xff]  ;;  %v19378_v34 = vcombine.low %v2727_v36, %v2735_v48  ;;  %v19427_v36 = vcombine.high %v2775_v23, %v2783_v31 }
 0x6f1   :  { %15196 = vmatprep.subr.bf16.mxu1 %v19333_v61  ;;  %v19380_v61 = vcombine.low %v2728_v42, %v2736_v9  ;;  %v19397_v5 = vcombine.high %v2744_v47, %v2752_v60  ;;  %v2791_v42 = vld [vmem:[#allocation10 + $0x3d20] sm:$0xff] }
 0x6f2   :  { %v2799_v9 = vld [vmem:[#allocation10 + $0x3d60] sm:$0xff] }
 0x6f3   :  { %14869 = vmatpush1.bf16.msra.mxu0 %v19330_v18  ;;  %v2760_v18 = vld [vmem:[#allocation10 + $0x3c28] sm:$0xff] }
 0x6f4   :  { %15197 = vmatpush1.bf16.msra.mxu1 %v19332_v19  ;;  %14870 = vmatprep.subr.bf16.mxu0 %v19347_v20  ;;  %v2768_v19 = vld [vmem:[#allocation10 + $0x3c68] sm:$0xff]  ;;  %v19394_v20 = vcombine.low %v2743_v58, %v2751_v7  ;;  %v19443_v58 = vcombine.high %v2791_v42, %v2799_v9 }
 0x6f5   :  { %15198 = vmatprep.subr.bf16.mxu1 %v19349_v21  ;;  %v19396_v21 = vcombine.low %v2744_v47, %v2752_v60  ;;  %v19413_v22 = vcombine.high %v2760_v18, %v2768_v19  ;;  %v2807_v47 = vld [vmem:[#allocation10 + $0x3da0] sm:$0xff] }
 0x6f6   :  { %v2815_v60 = vld [vmem:[#allocation10 + $0x3de0] sm:$0xff] }
 0x6f7   :  { %14871 = vmatpush1.bf16.msra.mxu0 %v19346_v26  ;;  %v2776_v26 = vld [vmem:[#allocation10 + $0x3ca8] sm:$0xff] }
 0x6f8   :  { %15199 = vmatpush1.bf16.msra.mxu1 %v19348_v35  ;;  %14872 = vmatprep.subr.bf16.mxu0 %v19363_v15  ;;  %v2784_v35 = vld [vmem:[#allocation10 + $0x3ce8] sm:$0xff]  ;;  %v19410_v15 = vcombine.low %v2759_v8, %v2767_v11  ;;  %v19459_v8 = vcombine.high %v2807_v47, %v2815_v60 }
 0x6f9   :  { %15200 = vmatprep.subr.bf16.mxu1 %v19365_v40  ;;  %v19412_v40 = vcombine.low %v2760_v18, %v2768_v19  ;;  %v19429_v48 = vcombine.high %v2776_v26, %v2784_v35  ;;  %v2823_v18 = vld [vmem:[#allocation10 + $0x3e20] sm:$0xff] }
 0x6fa   :  { %v2831_v19 = vld [vmem:[#allocation10 + $0x3e60] sm:$0xff] }
 0x6fb   :  { %14873 = vmatpush1.bf16.msra.mxu0 %v19362_v28  ;;  %v2792_v28 = vld [vmem:[#allocation10 + $0x3d28] sm:$0xff] }
 0x6fc   :  { %15201 = vmatpush1.bf16.msra.mxu1 %v19364_v45  ;;  %14874 = vmatprep.subr.bf16.mxu0 %v19379_v50  ;;  %v2800_v45 = vld [vmem:[#allocation10 + $0x3d68] sm:$0xff]  ;;  %v19426_v50 = vcombine.low %v2775_v23, %v2783_v31  ;;  %v19475_v23 = vcombine.high %v2823_v18, %v2831_v19 }
 0x6fd   :  { %15202 = vmatprep.subr.bf16.mxu1 %v19381_v54  ;;  %v19428_v54 = vcombine.low %v2776_v26, %v2784_v35  ;;  %v19445_v7 = vcombine.high %v2792_v28, %v2800_v45  ;;  %v2839_v26 = vld [vmem:[#allocation10 + $0x3ea0] sm:$0xff] }
 0x6fe   :  { %v2847_v35 = vld [vmem:[#allocation10 + $0x3ee0] sm:$0xff] }
 0x6ff   :  { %14875 = vmatpush1.bf16.msra.mxu0 %v19378_v34  ;;  %v2808_v34 = vld [vmem:[#allocation10 + $0x3da8] sm:$0xff] }
 0x700   :  { %15203 = vmatpush1.bf16.msra.mxu1 %v19380_v61  ;;  %14876 = vmatprep.subr.bf16.mxu0 %v19395_v1  ;;  %v2816_v61 = vld [vmem:[#allocation10 + $0x3de8] sm:$0xff]  ;;  %v19442_v1 = vcombine.low %v2791_v42, %v2799_v9  ;;  %v19491_v42 = vcombine.high %v2839_v26, %v2847_v35 }
 0x701   :  { %15204 = vmatprep.subr.bf16.mxu1 %v19397_v5  ;;  %v19444_v5 = vcombine.low %v2792_v28, %v2800_v45  ;;  %v19461_v11 = vcombine.high %v2808_v34, %v2816_v61  ;;  %v2855_v28 = vld [vmem:[#allocation10 + $0x3f20] sm:$0xff] }
 0x702   :  { %v2863_v45 = vld [vmem:[#allocation10 + $0x3f60] sm:$0xff] }
 0x703   :  { %14877 = vmatpush1.bf16.msra.mxu0 %v19394_v20  ;;  %v2824_v20 = vld [vmem:[#allocation10 + $0x3e28] sm:$0xff] }
 0x704   :  { %15205 = vmatpush1.bf16.msra.mxu1 %v19396_v21  ;;  %14878 = vmatprep.subr.bf16.mxu0 %v19411_v4  ;;  %v2832_v21 = vld [vmem:[#allocation10 + $0x3e68] sm:$0xff]  ;;  %v19458_v4 = vcombine.low %v2807_v47, %v2815_v60  ;;  %v19507_v47 = vcombine.high %v2855_v28, %v2863_v45 }
 0x705   :  { %15206 = vmatprep.subr.bf16.mxu1 %v19413_v22  ;;  %v19460_v22 = vcombine.low %v2808_v34, %v2816_v61  ;;  %v19477_v31 = vcombine.high %v2824_v20, %v2832_v21  ;;  %v2871_v34 = vld [vmem:[#allocation10 + $0x3fa0] sm:$0xff] }
 0x706   :  { %v2879_v61 = vld [vmem:[#allocation10 + $0x3fe0] sm:$0xff] }
 0x707   :  { %14879 = vmatpush1.bf16.msra.mxu0 %v19410_v15  ;;  %v2840_v15 = vld [vmem:[#allocation10 + $0x3ea8] sm:$0xff] }
 0x708   :  { %15207 = vmatpush1.bf16.msra.mxu1 %v19412_v40  ;;  %14880 = vmatprep.subr.bf16.mxu0 %v19427_v36  ;;  %v2848_v40 = vld [vmem:[#allocation10 + $0x3ee8] sm:$0xff]  ;;  %v19474_v36 = vcombine.low %v2823_v18, %v2831_v19  ;;  %v19523_v18 = vcombine.high %v2871_v34, %v2879_v61 }
 0x709   :  { %15208 = vmatprep.subr.bf16.mxu1 %v19429_v48  ;;  %v19476_v48 = vcombine.low %v2824_v20, %v2832_v21  ;;  %v19493_v9 = vcombine.high %v2840_v15, %v2848_v40  ;;  %v841_v20 = vld [vmem:[#allocation10 + $0x30] sm:$0xff] }
 0x70a   :  { %v849_v21 = vld [vmem:[#allocation10 + $0x70] sm:$0xff] }
 0x70b   :  { %14881 = vmatpush1.bf16.msra.mxu0 %v19426_v50  ;;  %v2856_v50 = vld [vmem:[#allocation10 + $0x3f28] sm:$0xff] }
 0x70c   :  { %15209 = vmatpush1.bf16.msra.mxu1 %v19428_v54  ;;  %14882 = vmatprep.subr.bf16.mxu0 %v19443_v58  ;;  %v2864_v54 = vld [vmem:[#allocation10 + $0x3f68] sm:$0xff]  ;;  %v19490_v58 = vcombine.low %v2839_v26, %v2847_v35  ;;  %v17495_v26 = vcombine.high %v841_v20, %v849_v21 }
 0x70d   :  { %15210 = vmatprep.subr.bf16.mxu1 %v19445_v7  ;;  %v19492_v7 = vcombine.low %v2840_v15, %v2848_v40  ;;  %v19509_v60 = vcombine.high %v2856_v50, %v2864_v54  ;;  %v857_v15 = vld [vmem:[#allocation10 + $0xb0] sm:$0xff] }
 0x70e   :  { %v865_v40 = vld [vmem:[#allocation10 + $0xf0] sm:$0xff] }
 0x70f   :  { %14883 = vmatpush1.bf16.msra.mxu0 %v19442_v1  ;;  %v2872_v1 = vld [vmem:[#allocation10 + $0x3fa8] sm:$0xff] }
 0x710   :  { %15211 = vmatpush1.bf16.msra.mxu1 %v19444_v5  ;;  %14884 = vmatprep.subr.bf16.mxu0 %v19459_v8  ;;  %v2880_v5 = vld [vmem:[#allocation10 + $0x3fe8] sm:$0xff]  ;;  %v19506_v8 = vcombine.low %v2855_v28, %v2863_v45  ;;  %v17511_v28 = vcombine.high %v857_v15, %v865_v40  ;;  %v873_v45 = vld [vmem:[#allocation10 + $0x130] sm:$0xff] }
 0x711   :  { %15212 = vmatprep.subr.bf16.mxu1 %v19461_v11  ;;  %v19508_v11 = vcombine.low %v2856_v50, %v2864_v54  ;;  %v19525_v19 = vcombine.high %v2872_v1, %v2880_v5  ;;  %v881_v50 = vld [vmem:[#allocation10 + $0x170] sm:$0xff] }
 0x713   :  { %14885 = vmatpush1.bf16.msra.mxu0 %v19458_v4  ;;  %v842_v4 = vld [vmem:[#allocation10 + $0x38] sm:$0xff] }
 0x714   :  { %15213 = vmatpush1.bf16.msra.mxu1 %v19460_v22  ;;  %14886 = vmatprep.subr.bf16.mxu0 %v19475_v23  ;;  %v850_v22 = vld [vmem:[#allocation10 + $0x78] sm:$0xff]  ;;  %v19522_v23 = vcombine.low %v2871_v34, %v2879_v61  ;;  %v17527_v34 = vcombine.high %v873_v45, %v881_v50 }
 0x715   :  { %15214 = vmatprep.subr.bf16.mxu1 %v19477_v31  ;;  %v19524_v31 = vcombine.low %v2872_v1, %v2880_v5  ;;  %v17497_v35 = vcombine.high %v842_v4, %v850_v22  ;;  %v889_v1 = vld [vmem:[#allocation10 + $0x1b0] sm:$0xff] }
 0x716   :  { %v897_v5 = vld [vmem:[#allocation10 + $0x1f0] sm:$0xff] }
 0x717   :  { %14887 = vmatpush1.bf16.msra.mxu0 %v19474_v36  ;;  %v17494_v36 = vcombine.low %v841_v20, %v849_v21  ;;  %v17543_v20 = vcombine.high %v889_v1, %v897_v5 }
 0x718   :  { %15215 = vmatpush1.bf16.msra.mxu1 %v19476_v48  ;;  %14888 = vmatprep.subr.bf16.mxu0 %v19491_v42  ;;  %v858_v48 = vld [vmem:[#allocation10 + $0xb8] sm:$0xff] }
 0x719   :  { %15216 = vmatprep.subr.bf16.mxu1 %v19493_v9  ;;  %v866_v42 = vld [vmem:[#allocation10 + $0xf8] sm:$0xff]  ;;  %v17496_v9 = vcombine.low %v842_v4, %v850_v22  ;;  %v905_v4 = vld [vmem:[#allocation10 + $0x230] sm:$0xff] }
 0x71a   :  { %v17513_v54 = vcombine.high %v858_v48, %v866_v42  ;;  %v913_v22 = vld [vmem:[#allocation10 + $0x270] sm:$0xff] }
 0x71b   :  { %14889 = vmatpush1.bf16.msra.mxu0 %v19490_v58  ;;  %v874_v58 = vld [vmem:[#allocation10 + $0x138] sm:$0xff] }
 0x71c   :  { %15217 = vmatpush1.bf16.msra.mxu1 %v19492_v7  ;;  %14890 = vmatprep.subr.bf16.mxu0 %v19507_v47  ;;  %v882_v7 = vld [vmem:[#allocation10 + $0x178] sm:$0xff]  ;;  %v17510_v47 = vcombine.low %v857_v15, %v865_v40  ;;  %v921_v40 = vld [vmem:[#allocation10 + $0x2b0] sm:$0xff] }
 0x71d   :  { %15218 = vmatprep.subr.bf16.mxu1 %v19509_v60  ;;  %v17512_v60 = vcombine.low %v858_v48, %v866_v42  ;;  %v17529_v61 = vcombine.high %v874_v58, %v882_v7  ;;  %v922_v48 = vld [vmem:[#allocation10 + $0x2b8] sm:$0xff] }
 0x71e   :  { %v930_v42 = vld [vmem:[#allocation10 + $0x2f8] sm:$0xff] }
 0x71f   :  { %14891 = vmatpush1.bf16.msra.mxu0 %v19506_v8  ;;  %v890_v8 = vld [vmem:[#allocation10 + $0x1b8] sm:$0xff] }
 0x720   :  { %15219 = vmatpush1.bf16.msra.mxu1 %v19508_v11  ;;  %14892 = vmatprep.subr.bf16.mxu0 %v19523_v18  ;;  %v898_v11 = vld [vmem:[#allocation10 + $0x1f8] sm:$0xff]  ;;  %v17526_v18 = vcombine.low %v873_v45, %v881_v50  ;;  %v17577_v50 = vcombine.high %v922_v48, %v930_v42 }
 0x721   :  { %15220 = vmatprep.subr.bf16.mxu1 %v19525_v19  ;;  %v17528_v19 = vcombine.low %v874_v58, %v882_v7  ;;  %v17545_v21 = vcombine.high %v890_v8, %v898_v11  ;;  %v945_v58 = vld [vmem:[#allocation10 + $0x370] sm:$0xff]  ;;  %v938_v7 = vld [vmem:[#allocation10 + $0x338] sm:$0xff] }
 0x723   :  { %14893 = vmatpush1.bf16.msra.mxu0 %v19522_v23  ;;  %v906_v23 = vld [vmem:[#allocation10 + $0x238] sm:$0xff] }
 0x724   :  { %15221 = vmatpush1.bf16.msra.mxu1 %v19524_v31  ;;  %15231 = vmatprep.subr.bf16.mxu0 %v17495_v26  ;;  %v914_v31 = vld [vmem:[#allocation10 + $0x278] sm:$0xff]  ;;  %v17544_v26 = vcombine.low %v890_v8, %v898_v11  ;;  %v961_v8 = vld [vmem:[#allocation10 + $0x3f0] sm:$0xff] }
 0x725   :  { %15559 = vmatprep.subr.bf16.mxu1 %v17497_v35  ;;  %v17559_v35 = vcombine.high %v905_v4, %v913_v22  ;;  %v17561_v15 = vcombine.high %v906_v23, %v914_v31  ;;  %v954_v11 = vld [vmem:[#allocation10 + $0x3b8] sm:$0xff] }
 0x726   :  { %14895 = vmatmul.mubr.bf16.vlgmr.msra.gmra.mrb[24].mxu0 %v20803_v3 }
 0x727   :  { %15223 = vmatmul.mubr.bf16.vlgmr.msra.gmra.mrb[24].mxu1 %v20803_v3  ;;  %15232 = vmatpush1.bf16.msra.mxu0 %v17494_v36  ;;  %v929_v36 = vld [vmem:[#allocation10 + $0x2f0] sm:$0xff] }
 0x728   :  { %15263 = vmatprep.mubr.bf16.mxu0 %v20662_v37  ;;  %15560 = vmatpush1.bf16.msra.mxu1 %v17496_v9  ;;  %v17558_v9 = vcombine.low %v905_v4, %v913_v22  ;;  %v17575_v45 = vcombine.high %v921_v40, %v929_v36  ;;  %v969_v22 = vld [vmem:[#allocation10 + $0x430] sm:$0xff] }
 0x729   :  { %15591 = vmatprep.mubr.bf16.mxu1 %v20662_v37  ;;  %15233 = vmatprep.subr.bf16.mxu0 %v17511_v28  ;;  %v17542_v37 = vcombine.low %v889_v1, %v897_v5  ;;  %v17560_v28 = vcombine.low %v906_v23, %v914_v31  ;;  %v953_v5 = vld [vmem:[#allocation10 + $0x3b0] sm:$0xff]  ;;  %v970_v31 = vld [vmem:[#allocation10 + $0x438] sm:$0xff] }
 0x72a   :  { %15561 = vmatprep.subr.bf16.mxu1 %v17513_v54  ;;  %v937_v54 = vld [vmem:[#allocation10 + $0x330] sm:$0xff] }
 0x72b   :  { %15234 = vmatpush1.bf16.msra.mxu0 %v17510_v47  ;;  %v946_v47 = vld [vmem:[#allocation10 + $0x378] sm:$0xff]  ;;  %v977_v23 = vld [vmem:[#allocation10 + $0x470] sm:$0xff] }
 0x72c   :  { %15562 = vmatpush1.bf16.msra.mxu1 %v17512_v60  ;;  %15235 = vmatprep.subr.bf16.mxu0 %v17527_v34  ;;  %v17574_v60 = vcombine.low %v921_v40, %v929_v36  ;;  %v17576_v34 = vcombine.low %v922_v48, %v930_v42  ;;  %v17593_v1 = vcombine.high %v938_v7, %v946_v47  ;;  %v985_v36 = vld [vmem:[#allocation10 + $0x4b0] sm:$0xff]  ;;  %v986_v42 = vld [vmem:[#allocation10 + $0x4b8] sm:$0xff] }
 0x72d   :  { %15563 = vmatprep.subr.bf16.mxu1 %v17529_v61  ;;  %v17591_v61 = vcombine.high %v937_v54, %v945_v58  ;;  %v993_v48 = vld [vmem:[#allocation10 + $0x4f0] sm:$0xff] }
 0x72f   :  { %15236 = vmatpush1.bf16.msra.mxu0 %v17526_v18  ;;  %v962_v18 = vld [vmem:[#allocation10 + $0x3f8] sm:$0xff] }
 0x730   :  { %15564 = vmatpush1.bf16.msra.mxu1 %v17528_v19  ;;  %15237 = vmatprep.subr.bf16.mxu0 %v17543_v20  ;;  %v17590_v19 = vcombine.low %v937_v54, %v945_v58  ;;  %v17592_v20 = vcombine.low %v938_v7, %v946_v47  ;;  %v17609_v4 = vcombine.high %v954_v11, %v962_v18  ;;  %v1001_v58 = vld [vmem:[#allocation10 + $0x530] sm:$0xff]  ;;  %v1002_v47 = vld [vmem:[#allocation10 + $0x538] sm:$0xff] }
 0x731   :  { %15565 = vmatprep.subr.bf16.mxu1 %v17545_v21  ;;  %v17607_v21 = vcombine.high %v953_v5, %v961_v8  ;;  %v1009_v7 = vld [vmem:[#allocation10 + $0x570] sm:$0xff] }
 0x733   :  { %15238 = vmatpush1.bf16.msra.mxu0 %v17542_v37  ;;  %v978_v37 = vld [vmem:[#allocation10 + $0x478] sm:$0xff] }
 0x734   :  { %15566 = vmatpush1.bf16.msra.mxu1 %v17544_v26  ;;  %15239 = vmatprep.subr.bf16.mxu0 %v17559_v35  ;;  %v17606_v26 = vcombine.low %v953_v5, %v961_v8  ;;  %v17608_v35 = vcombine.low %v954_v11, %v962_v18  ;;  %v17625_v40 = vcombine.high %v970_v31, %v978_v37  ;;  %v1017_v8 = vld [vmem:[#allocation10 + $0x5b0] sm:$0xff]  ;;  %v1018_v18 = vld [vmem:[#allocation10 + $0x5b8] sm:$0xff] }
 0x735   :  { %15567 = vmatprep.subr.bf16.mxu1 %v17561_v15  ;;  %v17623_v15 = vcombine.high %v969_v22, %v977_v23  ;;  %v1025_v11 = vld [vmem:[#allocation10 + $0x5f0] sm:$0xff] }
 0x737   :  { %15240 = vmatpush1.bf16.msra.mxu0 %v17558_v9  ;;  %v994_v9 = vld [vmem:[#allocation10 + $0x4f8] sm:$0xff] }
 0x738   :  { %15568 = vmatpush1.bf16.msra.mxu1 %v17560_v28  ;;  %15241 = vmatprep.subr.bf16.mxu0 %v17575_v45  ;;  %v17622_v28 = vcombine.low %v969_v22, %v977_v23  ;;  %v17624_v45 = vcombine.low %v970_v31, %v978_v37  ;;  %v17641_v54 = vcombine.high %v986_v42, %v994_v9  ;;  %v1033_v23 = vld [vmem:[#allocation10 + $0x630] sm:$0xff]  ;;  %v1034_v37 = vld [vmem:[#allocation10 + $0x638] sm:$0xff] }
 0x739   :  { %15569 = vmatprep.subr.bf16.mxu1 %v17577_v50  ;;  %v17639_v50 = vcombine.high %v985_v36, %v993_v48  ;;  %v1041_v31 = vld [vmem:[#allocation10 + $0x670] sm:$0xff] }
 0x73b   :  { %15242 = vmatpush1.bf16.msra.mxu0 %v17574_v60  ;;  %v1010_v60 = vld [vmem:[#allocation10 + $0x578] sm:$0xff] }
 0x73c   :  { %15570 = vmatpush1.bf16.msra.mxu1 %v17576_v34  ;;  %15243 = vmatprep.subr.bf16.mxu0 %v17591_v61  ;;  %v17638_v34 = vcombine.low %v985_v36, %v993_v48  ;;  %v17640_v61 = vcombine.low %v986_v42, %v994_v9  ;;  %v17657_v5 = vcombine.high %v1002_v47, %v1010_v60  ;;  %v1049_v48 = vld [vmem:[#allocation10 + $0x6b0] sm:$0xff]  ;;  %v1050_v9 = vld [vmem:[#allocation10 + $0x6b8] sm:$0xff] }
 0x73d   :  { %15571 = vmatprep.subr.bf16.mxu1 %v17593_v1  ;;  %v17655_v1 = vcombine.high %v1001_v58, %v1009_v7  ;;  %v1057_v42 = vld [vmem:[#allocation10 + $0x6f0] sm:$0xff] }
 0x73f   :  { %15244 = vmatpush1.bf16.msra.mxu0 %v17590_v19  ;;  %v1026_v19 = vld [vmem:[#allocation10 + $0x5f8] sm:$0xff] }
 0x740   :  { %15572 = vmatpush1.bf16.msra.mxu1 %v17592_v20  ;;  %15245 = vmatprep.subr.bf16.mxu0 %v17607_v21  ;;  %v17654_v20 = vcombine.low %v1001_v58, %v1009_v7  ;;  %v17656_v21 = vcombine.low %v1002_v47, %v1010_v60  ;;  %v17673_v22 = vcombine.high %v1018_v18, %v1026_v19  ;;  %v1065_v7 = vld [vmem:[#allocation10 + $0x730] sm:$0xff]  ;;  %v1066_v60 = vld [vmem:[#allocation10 + $0x738] sm:$0xff] }
 0x741   :  { %15573 = vmatprep.subr.bf16.mxu1 %v17609_v4  ;;  %v17671_v4 = vcombine.high %v1017_v8, %v1025_v11  ;;  %v1073_v47 = vld [vmem:[#allocation10 + $0x770] sm:$0xff] }
 0x743   :  { %15246 = vmatpush1.bf16.msra.mxu0 %v17606_v26  ;;  %v1042_v26 = vld [vmem:[#allocation10 + $0x678] sm:$0xff] }
 0x744   :  { %15574 = vmatpush1.bf16.msra.mxu1 %v17608_v35  ;;  %15247 = vmatprep.subr.bf16.mxu0 %v17623_v15  ;;  %v17670_v35 = vcombine.low %v1017_v8, %v1025_v11  ;;  %v17672_v15 = vcombine.low %v1018_v18, %v1026_v19  ;;  %v17689_v36 = vcombine.high %v1034_v37, %v1042_v26  ;;  %v1081_v11 = vld [vmem:[#allocation10 + $0x7b0] sm:$0xff]  ;;  %v1082_v19 = vld [vmem:[#allocation10 + $0x7b8] sm:$0xff] }
 0x745   :  { %15575 = vmatprep.subr.bf16.mxu1 %v17625_v40  ;;  %v17687_v40 = vcombine.high %v1033_v23, %v1041_v31  ;;  %v1089_v18 = vld [vmem:[#allocation10 + $0x7f0] sm:$0xff] }
 0x747   :  { %15248 = vmatpush1.bf16.msra.mxu0 %v17622_v28  ;;  %v1058_v28 = vld [vmem:[#allocation10 + $0x6f8] sm:$0xff] }
 0x748   :  { %15576 = vmatpush1.bf16.msra.mxu1 %v17624_v45  ;;  %15249 = vmatprep.subr.bf16.mxu0 %v17639_v50  ;;  %v17686_v45 = vcombine.low %v1033_v23, %v1041_v31  ;;  %v17688_v50 = vcombine.low %v1034_v37, %v1042_v26  ;;  %v17705_v58 = vcombine.high %v1050_v9, %v1058_v28  ;;  %v1097_v31 = vld [vmem:[#allocation10 + $0x830] sm:$0xff]  ;;  %v1098_v26 = vld [vmem:[#allocation10 + $0x838] sm:$0xff] }
 0x749   :  { %15577 = vmatprep.subr.bf16.mxu1 %v17641_v54  ;;  %v17703_v54 = vcombine.high %v1049_v48, %v1057_v42  ;;  %v1105_v37 = vld [vmem:[#allocation10 + $0x870] sm:$0xff] }
 0x74b   :  { %15250 = vmatpush1.bf16.msra.mxu0 %v17638_v34  ;;  %v1074_v34 = vld [vmem:[#allocation10 + $0x778] sm:$0xff] }
 0x74c   :  { %15578 = vmatpush1.bf16.msra.mxu1 %v17640_v61  ;;  %15251 = vmatprep.subr.bf16.mxu0 %v17655_v1  ;;  %v17702_v61 = vcombine.low %v1049_v48, %v1057_v42  ;;  %v17704_v1 = vcombine.low %v1050_v9, %v1058_v28  ;;  %v17721_v8 = vcombine.high %v1066_v60, %v1074_v34  ;;  %v1113_v42 = vld [vmem:[#allocation10 + $0x8b0] sm:$0xff] }
 0x74d   :  { %15579 = vmatprep.subr.bf16.mxu1 %v17657_v5  ;;  %v17719_v5 = vcombine.high %v1065_v7, %v1073_v47  ;;  %v1121_v9 = vld [vmem:[#allocation10 + $0x8f0] sm:$0xff]  ;;  %v17750_v28 = vcombine.low %v1097_v31, %v1105_v37 }
 0x74f   :  { %15252 = vmatpush1.bf16.msra.mxu0 %v17654_v20  ;;  %v1090_v20 = vld [vmem:[#allocation10 + $0x7f8] sm:$0xff] }
 0x750   :  { %15580 = vmatpush1.bf16.msra.mxu1 %v17656_v21  ;;  %15253 = vmatprep.subr.bf16.mxu0 %v17671_v4  ;;  %v17718_v21 = vcombine.low %v1065_v7, %v1073_v47  ;;  %v17720_v4 = vcombine.low %v1066_v60, %v1074_v34  ;;  %v17737_v23 = vcombine.high %v1082_v19, %v1090_v20  ;;  %v1129_v7 = vld [vmem:[#allocation10 + $0x930] sm:$0xff]  ;;  %v1130_v34 = vld [vmem:[#allocation10 + $0x938] sm:$0xff] }
 0x751   :  { %15581 = vmatprep.subr.bf16.mxu1 %v17673_v22  ;;  %v17735_v22 = vcombine.high %v1081_v11, %v1089_v18  ;;  %v1137_v47 = vld [vmem:[#allocation10 + $0x970] sm:$0xff] }
 0x753   :  { %15254 = vmatpush1.bf16.msra.mxu0 %v17670_v35  ;;  %v1106_v35 = vld [vmem:[#allocation10 + $0x878] sm:$0xff] }
 0x754   :  { %15582 = vmatpush1.bf16.msra.mxu1 %v17672_v15  ;;  %15255 = vmatprep.subr.bf16.mxu0 %v17687_v40  ;;  %v17734_v15 = vcombine.low %v1081_v11, %v1089_v18  ;;  %v17736_v40 = vcombine.low %v1082_v19, %v1090_v20  ;;  %v17753_v48 = vcombine.high %v1098_v26, %v1106_v35  ;;  %v1145_v18 = vld [vmem:[#allocation10 + $0x9b0] sm:$0xff]  ;;  %v1146_v20 = vld [vmem:[#allocation10 + $0x9b8] sm:$0xff] }
 0x755   :  { %15583 = vmatprep.subr.bf16.mxu1 %v17689_v36  ;;  %v17751_v36 = vcombine.high %v1097_v31, %v1105_v37  ;;  %v1153_v19 = vld [vmem:[#allocation10 + $0x9f0] sm:$0xff] }
 0x756   :  { %v1161_v31 = vld [vmem:[#allocation10 + $0xa30] sm:$0xff] }
 0x757   :  { %15256 = vmatpush1.bf16.msra.mxu0 %v17686_v45  ;;  %v1114_v45 = vld [vmem:[#allocation10 + $0x8b8] sm:$0xff]  ;;  %v1169_v37 = vld [vmem:[#allocation10 + $0xa70] sm:$0xff] }
 0x758   :  { %15584 = vmatpush1.bf16.msra.mxu1 %v17688_v50  ;;  %15257 = vmatprep.subr.bf16.mxu0 %v17703_v54  ;;  %v1122_v50 = vld [vmem:[#allocation10 + $0x8f8] sm:$0xff]  ;;  %v17752_v54 = vcombine.low %v1098_v26, %v1106_v35 }
 0x759   :  { %15585 = vmatprep.subr.bf16.mxu1 %v17705_v58  ;;  %v17767_v58 = vcombine.high %v1113_v42, %v1121_v9  ;;  %v17769_v60 = vcombine.high %v1114_v45, %v1122_v50  ;;  %v1162_v26 = vld [vmem:[#allocation10 + $0xa38] sm:$0xff] }
 0x75a   :  { %v1170_v35 = vld [vmem:[#allocation10 + $0xa78] sm:$0xff] }
 0x75b   :  { %15258 = vmatpush1.bf16.msra.mxu0 %v17702_v61  ;;  %v1138_v61 = vld [vmem:[#allocation10 + $0x978] sm:$0xff] }
 0x75c   :  { %15586 = vmatpush1.bf16.msra.mxu1 %v17704_v1  ;;  %15259 = vmatprep.subr.bf16.mxu0 %v17719_v5  ;;  %v17766_v1 = vcombine.low %v1113_v42, %v1121_v9  ;;  %v17768_v5 = vcombine.low %v1114_v45, %v1122_v50  ;;  %v17785_v11 = vcombine.high %v1130_v34, %v1138_v61  ;;  %v1185_v42 = vld [vmem:[#allocation10 + $0xaf0] sm:$0xff]  ;;  %v1178_v9 = vld [vmem:[#allocation10 + $0xab8] sm:$0xff] }
 0x75d   :  { %15587 = vmatprep.subr.bf16.mxu1 %v17721_v8  ;;  %v17783_v8 = vcombine.high %v1129_v7, %v1137_v47  ;;  %v17814_v45 = vcombine.low %v1161_v31, %v1169_v37  ;;  %v17816_v50 = vcombine.low %v1162_v26, %v1170_v35 }
 0x75f   :  { %15260 = vmatpush1.bf16.msra.mxu0 %v17718_v21  ;;  %v1154_v21 = vld [vmem:[#allocation10 + $0x9f8] sm:$0xff] }
 0x760   :  { %15588 = vmatpush1.bf16.msra.mxu1 %v17720_v4  ;;  %15261 = vmatprep.subr.bf16.mxu0 %v17735_v22  ;;  %v17782_v4 = vcombine.low %v1129_v7, %v1137_v47  ;;  %v17799_v22 = vcombine.high %v1145_v18, %v1153_v19  ;;  %v1193_v7 = vld [vmem:[#allocation10 + $0xb30] sm:$0xff] }
 0x761   :  { %15589 = vmatprep.subr.bf16.mxu1 %v17737_v23  ;;  %v17801_v23 = vcombine.high %v1146_v20, %v1154_v21  ;;  %v1201_v47 = vld [vmem:[#allocation10 + $0xb70] sm:$0xff] }
 0x763   :  { %15262 = vmatpush1.bf16.msra.mxu0 %v17734_v15  ;;  %v17800_v15 = vcombine.low %v1146_v20, %v1154_v21  ;;  %v1218_v20 = vld [vmem:[#allocation10 + $0xbf8] sm:$0xff]  ;;  %v17846_v21 = vcombine.low %v1193_v7, %v1201_v47 }
 0x764   :  { %15590 = vmatpush1.bf16.msra.mxu1 %v17736_v40  ;;  %15272 = vmatprep.subr.bf16.mxu0 %v17751_v36  ;;  %v17815_v40 = vcombine.high %v1161_v31, %v1169_v37  ;;  %v17817_v36 = vcombine.high %v1162_v26, %v1170_v35  ;;  %v1233_v31 = vld [vmem:[#allocation10 + $0xc70] sm:$0xff]  ;;  %v1226_v37 = vld [vmem:[#allocation10 + $0xc38] sm:$0xff] }
 0x765   :  { %15600 = vmatprep.subr.bf16.mxu1 %v17753_v48  ;;  %v1177_v48 = vld [vmem:[#allocation10 + $0xab0] sm:$0xff]  ;;  %v1234_v26 = vld [vmem:[#allocation10 + $0xc78] sm:$0xff] }
 0x766   :  { %15264 = vmatmul.mubr.bf16.vlgmr.msra.gmra.mrb[28].mxu0 %v20664_v39 }
 0x767   :  { %15592 = vmatmul.mubr.bf16.vlgmr.msra.gmra.mrb[28].mxu1 %v20664_v39  ;;  %15273 = vmatpush1.bf16.msra.mxu0 %v17750_v28  ;;  %v17784_v39 = vcombine.low %v1130_v34, %v1138_v61  ;;  %v1186_v28 = vld [vmem:[#allocation10 + $0xaf8] sm:$0xff]  ;;  %v17830_v61 = vcombine.low %v1177_v48, %v1185_v42 }
 0x768   :  { %15304 = vmatprep.mubr.bf16.mxu0 %v20668_v46  ;;  %15601 = vmatpush1.bf16.msra.mxu1 %v17752_v54  ;;  %v17831_v54 = vcombine.high %v1177_v48, %v1185_v42  ;;  %v1202_v34 = vld [vmem:[#allocation10 + $0xb78] sm:$0xff]  ;;  %v1249_v48 = vld [vmem:[#allocation10 + $0xcf0] sm:$0xff] }
 0x769   :  { %15632 = vmatprep.mubr.bf16.mxu1 %v20668_v46  ;;  %15274 = vmatprep.subr.bf16.mxu0 %v17767_v58  ;;  %v17798_v46 = vcombine.low %v1145_v18, %v1153_v19  ;;  %v17833_v58 = vcombine.high %v1178_v9, %v1186_v28  ;;  %v1217_v18 = vld [vmem:[#allocation10 + $0xbf0] sm:$0xff]  ;;  %v1210_v19 = vld [vmem:[#allocation10 + $0xbb8] sm:$0xff] }
 0x76a   :  { %15602 = vmatprep.subr.bf16.mxu1 %v17769_v60  ;;  %v1194_v60 = vld [vmem:[#allocation10 + $0xb38] sm:$0xff] }
 0x76b   :  { %15275 = vmatpush1.bf16.msra.mxu0 %v17766_v1  ;;  %v17832_v1 = vcombine.low %v1178_v9, %v1186_v28  ;;  %v1242_v42 = vld [vmem:[#allocation10 + $0xcb8] sm:$0xff] }
 0x76c   :  { %15603 = vmatpush1.bf16.msra.mxu1 %v17768_v5  ;;  %15276 = vmatprep.subr.bf16.mxu0 %v17783_v8  ;;  %v17847_v5 = vcombine.high %v1193_v7, %v1201_v47  ;;  %v17849_v8 = vcombine.high %v1194_v60, %v1202_v34  ;;  %v1250_v9 = vld [vmem:[#allocation10 + $0xcf8] sm:$0xff]  ;;  %v1265_v7 = vld [vmem:[#allocation10 + $0xd70] sm:$0xff] }
 0x76d   :  { %15604 = vmatprep.subr.bf16.mxu1 %v17785_v11  ;;  %v1209_v11 = vld [vmem:[#allocation10 + $0xbb0] sm:$0xff]  ;;  %v1258_v47 = vld [vmem:[#allocation10 + $0xd38] sm:$0xff] }
 0x76e   :  { %v17862_v35 = vcombine.low %v1209_v11, %v1217_v18 }
 0x76f   :  { %15277 = vmatpush1.bf16.msra.mxu0 %v17782_v4  ;;  %v17848_v4 = vcombine.low %v1194_v60, %v1202_v34  ;;  %v1266_v60 = vld [vmem:[#allocation10 + $0xd78] sm:$0xff] }
 0x770   :  { %15605 = vmatpush1.bf16.msra.mxu1 %v17784_v39  ;;  %15278 = vmatprep.subr.bf16.mxu0 %v17799_v22  ;;  %v17863_v39 = vcombine.high %v1209_v11, %v1217_v18  ;;  %v17865_v22 = vcombine.high %v1210_v19, %v1218_v20  ;;  %v1281_v11 = vld [vmem:[#allocation10 + $0xdf0] sm:$0xff]  ;;  %v1274_v18 = vld [vmem:[#allocation10 + $0xdb8] sm:$0xff] }
 0x771   :  { %15606 = vmatprep.subr.bf16.mxu1 %v17801_v23  ;;  %v1225_v23 = vld [vmem:[#allocation10 + $0xc30] sm:$0xff] }
 0x772   :  { %v17878_v28 = vcombine.low %v1225_v23, %v1233_v31 }
 0x773   :  { %15279 = vmatpush1.bf16.msra.mxu0 %v17798_v46  ;;  %v17864_v46 = vcombine.low %v1210_v19, %v1218_v20  ;;  %v1282_v19 = vld [vmem:[#allocation10 + $0xdf8] sm:$0xff] }
 0x774   :  { %15607 = vmatpush1.bf16.msra.mxu1 %v17800_v15  ;;  %15280 = vmatprep.subr.bf16.mxu0 %v17815_v40  ;;  %v17879_v15 = vcombine.high %v1225_v23, %v1233_v31  ;;  %v17881_v40 = vcombine.high %v1226_v37, %v1234_v26  ;;  %v1297_v23 = vld [vmem:[#allocation10 + $0xe70] sm:$0xff]  ;;  %v1290_v31 = vld [vmem:[#allocation10 + $0xe38] sm:$0xff] }
 0x775   :  { %15608 = vmatprep.subr.bf16.mxu1 %v17817_v36  ;;  %v1241_v36 = vld [vmem:[#allocation10 + $0xcb0] sm:$0xff] }
 0x776   :  { %v17894_v34 = vcombine.low %v1241_v36, %v1249_v48 }
 0x777   :  { %15281 = vmatpush1.bf16.msra.mxu0 %v17814_v45  ;;  %v17880_v45 = vcombine.low %v1226_v37, %v1234_v26  ;;  %v1298_v37 = vld [vmem:[#allocation10 + $0xe78] sm:$0xff] }
 0x778   :  { %15609 = vmatpush1.bf16.msra.mxu1 %v17816_v50  ;;  %15282 = vmatprep.subr.bf16.mxu0 %v17831_v54  ;;  %v17895_v50 = vcombine.high %v1241_v36, %v1249_v48  ;;  %v17897_v54 = vcombine.high %v1242_v42, %v1250_v9  ;;  %v1313_v36 = vld [vmem:[#allocation10 + $0xef0] sm:$0xff]  ;;  %v1306_v48 = vld [vmem:[#allocation10 + $0xeb8] sm:$0xff] }
 0x779   :  { %15610 = vmatprep.subr.bf16.mxu1 %v17833_v58  ;;  %v1257_v58 = vld [vmem:[#allocation10 + $0xd30] sm:$0xff] }
 0x77a   :  { %v17910_v20 = vcombine.low %v1257_v58, %v1265_v7 }
 0x77b   :  { %15283 = vmatpush1.bf16.msra.mxu0 %v17830_v61  ;;  %v17896_v61 = vcombine.low %v1242_v42, %v1250_v9  ;;  %v1314_v42 = vld [vmem:[#allocation10 + $0xef8] sm:$0xff] }
 0x77c   :  { %15611 = vmatpush1.bf16.msra.mxu1 %v17832_v1  ;;  %15284 = vmatprep.subr.bf16.mxu0 %v17847_v5  ;;  %v17911_v1 = vcombine.high %v1257_v58, %v1265_v7  ;;  %v17913_v5 = vcombine.high %v1258_v47, %v1266_v60  ;;  %v1329_v58 = vld [vmem:[#allocation10 + $0xf70] sm:$0xff]  ;;  %v1322_v7 = vld [vmem:[#allocation10 + $0xf38] sm:$0xff] }
 0x77d   :  { %15612 = vmatprep.subr.bf16.mxu1 %v17849_v8  ;;  %v1273_v8 = vld [vmem:[#allocation10 + $0xdb0] sm:$0xff] }
 0x77e   :  { %v17926_v26 = vcombine.low %v1273_v8, %v1281_v11 }
 0x77f   :  { %15285 = vmatpush1.bf16.msra.mxu0 %v17846_v21  ;;  %v17912_v21 = vcombine.low %v1258_v47, %v1266_v60  ;;  %v1330_v47 = vld [vmem:[#allocation10 + $0xf78] sm:$0xff] }
 0x780   :  { %15613 = vmatpush1.bf16.msra.mxu1 %v17848_v4  ;;  %15286 = vmatprep.subr.bf16.mxu0 %v17863_v39  ;;  %v17927_v4 = vcombine.high %v1273_v8, %v1281_v11  ;;  %v17929_v39 = vcombine.high %v1274_v18, %v1282_v19  ;;  %v1345_v8 = vld [vmem:[#allocation10 + $0xff0] sm:$0xff]  ;;  %v1338_v11 = vld [vmem:[#allocation10 + $0xfb8] sm:$0xff] }
 0x781   :  { %15614 = vmatprep.subr.bf16.mxu1 %v17865_v22  ;;  %v1289_v22 = vld [vmem:[#allocation10 + $0xe30] sm:$0xff] }
 0x782   :  { %v17942_v9 = vcombine.low %v1289_v22, %v1297_v23 }
 0x783   :  { %15287 = vmatpush1.bf16.msra.mxu0 %v17862_v35  ;;  %v17928_v35 = vcombine.low %v1274_v18, %v1282_v19  ;;  %v1346_v18 = vld [vmem:[#allocation10 + $0xff8] sm:$0xff] }
 0x784   :  { %15615 = vmatpush1.bf16.msra.mxu1 %v17864_v46  ;;  %15288 = vmatprep.subr.bf16.mxu0 %v17879_v15  ;;  %v17943_v46 = vcombine.high %v1289_v22, %v1297_v23  ;;  %v17945_v15 = vcombine.high %v1290_v31, %v1298_v37  ;;  %v1361_v22 = vld [vmem:[#allocation10 + $0x1070] sm:$0xff]  ;;  %v1354_v23 = vld [vmem:[#allocation10 + $0x1038] sm:$0xff] }
 0x785   :  { %15616 = vmatprep.subr.bf16.mxu1 %v17881_v40  ;;  %v1305_v40 = vld [vmem:[#allocation10 + $0xeb0] sm:$0xff] }
 0x786   :  { %v17958_v60 = vcombine.low %v1305_v40, %v1313_v36 }
 0x787   :  { %15289 = vmatpush1.bf16.msra.mxu0 %v17878_v28  ;;  %v17944_v28 = vcombine.low %v1290_v31, %v1298_v37  ;;  %v1362_v31 = vld [vmem:[#allocation10 + $0x1078] sm:$0xff] }
 0x788   :  { %15617 = vmatpush1.bf16.msra.mxu1 %v17880_v45  ;;  %15290 = vmatprep.subr.bf16.mxu0 %v17895_v50  ;;  %v17959_v45 = vcombine.high %v1305_v40, %v1313_v36  ;;  %v17961_v50 = vcombine.high %v1306_v48, %v1314_v42  ;;  %v1377_v40 = vld [vmem:[#allocation10 + $0x10f0] sm:$0xff] }
 0x789   :  { %15618 = vmatprep.subr.bf16.mxu1 %v17897_v54  ;;  %v1321_v54 = vld [vmem:[#allocation10 + $0xf30] sm:$0xff] }
 0x78a   :  { %v17974_v19 = vcombine.low %v1321_v54, %v1329_v58 }
 0x78b   :  { %15291 = vmatpush1.bf16.msra.mxu0 %v17894_v34  ;;  %v17960_v34 = vcombine.low %v1306_v48, %v1314_v42  ;;  %v1370_v48 = vld [vmem:[#allocation10 + $0x10b8] sm:$0xff] }
 0x78c   :  { %15619 = vmatpush1.bf16.msra.mxu1 %v17896_v61  ;;  %15292 = vmatprep.subr.bf16.mxu0 %v17911_v1  ;;  %v17975_v61 = vcombine.high %v1321_v54, %v1329_v58  ;;  %v17977_v1 = vcombine.high %v1322_v7, %v1330_v47  ;;  %v1378_v42 = vld [vmem:[#allocation10 + $0x10f8] sm:$0xff] }
 0x78d   :  { %15620 = vmatprep.subr.bf16.mxu1 %v17913_v5  ;;  %v1337_v5 = vld [vmem:[#allocation10 + $0xfb0] sm:$0xff]  ;;  %v18025_v54 = vcombine.high %v1370_v48, %v1378_v42  ;;  %v1386_v58 = vld [vmem:[#allocation10 + $0x1138] sm:$0xff] }
 0x78e   :  { %v17990_v37 = vcombine.low %v1337_v5, %v1345_v8 }
 0x78f   :  { %15293 = vmatpush1.bf16.msra.mxu0 %v17910_v20  ;;  %v17976_v20 = vcombine.low %v1322_v7, %v1330_v47  ;;  %v1394_v7 = vld [vmem:[#allocation10 + $0x1178] sm:$0xff] }
 0x790   :  { %15621 = vmatpush1.bf16.msra.mxu1 %v17912_v21  ;;  %15294 = vmatprep.subr.bf16.mxu0 %v17927_v4  ;;  %v17991_v21 = vcombine.high %v1337_v5, %v1345_v8  ;;  %v17993_v4 = vcombine.high %v1338_v11, %v1346_v18  ;;  %v1409_v5 = vld [vmem:[#allocation10 + $0x11f0] sm:$0xff]  ;;  %v1402_v8 = vld [vmem:[#allocation10 + $0x11b8] sm:$0xff] }
 0x791   :  { %15622 = vmatprep.subr.bf16.mxu1 %v17929_v39  ;;  %v1353_v39 = vld [vmem:[#allocation10 + $0x1030] sm:$0xff] }
 0x792   :  { %v18006_v36 = vcombine.low %v1353_v39, %v1361_v22 }
 0x793   :  { %15295 = vmatpush1.bf16.msra.mxu0 %v17926_v26  ;;  %v17992_v26 = vcombine.low %v1338_v11, %v1346_v18  ;;  %v1410_v11 = vld [vmem:[#allocation10 + $0x11f8] sm:$0xff] }
 0x794   :  { %15623 = vmatpush1.bf16.msra.mxu1 %v17928_v35  ;;  %15296 = vmatprep.subr.bf16.mxu0 %v17943_v46  ;;  %v18007_v35 = vcombine.high %v1353_v39, %v1361_v22  ;;  %v18009_v46 = vcombine.high %v1354_v23, %v1362_v31  ;;  %v1418_v39 = vld [vmem:[#allocation10 + $0x1238] sm:$0xff] }
 0x795   :  { %15624 = vmatprep.subr.bf16.mxu1 %v17945_v15  ;;  %v1369_v15 = vld [vmem:[#allocation10 + $0x10b0] sm:$0xff]  ;;  %v1426_v22 = vld [vmem:[#allocation10 + $0x1278] sm:$0xff] }
 0x796   :  { %v18022_v47 = vcombine.low %v1369_v15, %v1377_v40 }
 0x797   :  { %15297 = vmatpush1.bf16.msra.mxu0 %v17942_v9  ;;  %v18008_v9 = vcombine.low %v1354_v23, %v1362_v31  ;;  %v18056_v23 = vcombine.low %v1402_v8, %v1410_v11 }
 0x798   :  { %15625 = vmatpush1.bf16.msra.mxu1 %v17944_v28  ;;  %15298 = vmatprep.subr.bf16.mxu0 %v17959_v45  ;;  %v18023_v28 = vcombine.high %v1369_v15, %v1377_v40  ;;  %v1385_v45 = vld [vmem:[#allocation10 + $0x1130] sm:$0xff]  ;;  %v1442_v15 = vld [vmem:[#allocation10 + $0x12f8] sm:$0xff] }
 0x799   :  { %15626 = vmatprep.subr.bf16.mxu1 %v17961_v50  ;;  %v1393_v50 = vld [vmem:[#allocation10 + $0x1170] sm:$0xff] }
 0x79a   :  { %v18038_v18 = vcombine.low %v1385_v45, %v1393_v50 }
 0x79b   :  { %15299 = vmatpush1.bf16.msra.mxu0 %v17958_v60  ;;  %v18024_v60 = vcombine.low %v1370_v48, %v1378_v42 }
 0x79c   :  { %15627 = vmatpush1.bf16.msra.mxu1 %v17960_v34  ;;  %15300 = vmatprep.subr.bf16.mxu0 %v17975_v61  ;;  %v18039_v34 = vcombine.high %v1385_v45, %v1393_v50  ;;  %v18041_v61 = vcombine.high %v1386_v58, %v1394_v7  ;;  %v1450_v45 = vld [vmem:[#allocation10 + $0x1338] sm:$0xff] }
 0x79d   :  { %15628 = vmatprep.subr.bf16.mxu1 %v17977_v1  ;;  %v1401_v1 = vld [vmem:[#allocation10 + $0x11b0] sm:$0xff]  ;;  %v1458_v50 = vld [vmem:[#allocation10 + $0x1378] sm:$0xff] }
 0x79f   :  { %15301 = vmatpush1.bf16.msra.mxu0 %v17974_v19  ;;  %v18055_v19 = vcombine.high %v1401_v1, %v1409_v5 }
 0x7a0   :  { %15629 = vmatpush1.bf16.msra.mxu1 %v17976_v20  ;;  %15302 = vmatprep.subr.bf16.mxu0 %v17991_v21  ;;  %v18057_v20 = vcombine.high %v1402_v8, %v1410_v11  ;;  %v1417_v21 = vld [vmem:[#allocation10 + $0x1230] sm:$0xff]  ;;  %v18104_v8 = vcombine.low %v1450_v45, %v1458_v50 }
 0x7a1   :  { %15630 = vmatprep.subr.bf16.mxu1 %v17993_v4  ;;  %v1425_v4 = vld [vmem:[#allocation10 + $0x1270] sm:$0xff] }
 0x7a2   :  { %v18071_v31 = vcombine.high %v1417_v21, %v1425_v4  ;;  %v18070_v40 = vcombine.low %v1417_v21, %v1425_v4  ;;  %v1490_v21 = vld [vmem:[#allocation10 + $0x1478] sm:$0xff] }
 0x7a3   :  { %15303 = vmatpush1.bf16.msra.mxu0 %v17990_v37  ;;  %v18073_v37 = vcombine.high %v1418_v39, %v1426_v22 }
 0x7a4   :  { %15631 = vmatpush1.bf16.msra.mxu1 %v17992_v26  ;;  %15313 = vmatprep.subr.bf16.mxu0 %v18007_v35  ;;  %v1433_v26 = vld [vmem:[#allocation10 + $0x12b0] sm:$0xff] }
 0x7a5   :  { %15641 = vmatprep.subr.bf16.mxu1 %v18009_v46  ;;  %v1441_v35 = vld [vmem:[#allocation10 + $0x12f0] sm:$0xff]  ;;  %v1434_v46 = vld [vmem:[#allocation10 + $0x12b8] sm:$0xff] }
 0x7a6   :  { %15305 = vmatmul.mubr.bf16.vlgmr.msra.gmra.mrb[28].mxu0 %v20702_v38  ;;  %v18087_v48 = vcombine.high %v1433_v26, %v1441_v35  ;;  %v18089_v42 = vcombine.high %v1434_v46, %v1442_v15 }
 0x7a7   :  { %15633 = vmatmul.mubr.bf16.vlgmr.msra.gmra.mrb[28].mxu1 %v20702_v38  ;;  %15314 = vmatpush1.bf16.msra.mxu0 %v18006_v36  ;;  %v18040_v38 = vcombine.low %v1386_v58, %v1394_v7  ;;  %v18072_v36 = vcombine.low %v1418_v39, %v1426_v22  ;;  %v18088_v58 = vcombine.low %v1434_v46, %v1442_v15 }
 0x7a8   :  { %15345 = vmatprep.mubr.bf16.mxu0 %v20704_v51  ;;  %15642 = vmatpush1.bf16.msra.mxu1 %v18008_v9  ;;  %v1449_v9 = vld [vmem:[#allocation10 + $0x1330] sm:$0xff] }
 0x7a9   :  { %15673 = vmatprep.mubr.bf16.mxu1 %v20704_v51  ;;  %15315 = vmatprep.subr.bf16.mxu0 %v18023_v28  ;;  %v18054_v51 = vcombine.low %v1401_v1, %v1409_v5  ;;  %v1457_v28 = vld [vmem:[#allocation10 + $0x1370] sm:$0xff]  ;;  %v1474_v1 = vld [vmem:[#allocation10 + $0x13f8] sm:$0xff] }
 0x7aa   :  { %15643 = vmatprep.subr.bf16.mxu1 %v18025_v54  ;;  %v18086_v54 = vcombine.low %v1433_v26, %v1441_v35  ;;  %v18103_v7 = vcombine.high %v1449_v9, %v1457_v28  ;;  %v18102_v5 = vcombine.low %v1449_v9, %v1457_v28  ;;  %v1506_v26 = vld [vmem:[#allocation10 + $0x14f8] sm:$0xff] }
 0x7ab   :  { %15316 = vmatpush1.bf16.msra.mxu0 %v18022_v47  ;;  %v18105_v47 = vcombine.high %v1450_v45, %v1458_v50  ;;  %v1522_v9 = vld [vmem:[#allocation10 + $0x1578] sm:$0xff] }
 0x7ac   :  { %15644 = vmatpush1.bf16.msra.mxu1 %v18024_v60  ;;  %15317 = vmatprep.subr.bf16.mxu0 %v18039_v34  ;;  %v1465_v60 = vld [vmem:[#allocation10 + $0x13b0] sm:$0xff] }
 0x7ad   :  { %15645 = vmatprep.subr.bf16.mxu1 %v18041_v61  ;;  %v1473_v34 = vld [vmem:[#allocation10 + $0x13f0] sm:$0xff]  ;;  %v1466_v61 = vld [vmem:[#allocation10 + $0x13b8] sm:$0xff] }
 0x7ae   :  { %v18119_v11 = vcombine.high %v1465_v60, %v1473_v34  ;;  %v18118_v4 = vcombine.low %v1465_v60, %v1473_v34  ;;  %v18120_v39 = vcombine.low %v1466_v61, %v1474_v1  ;;  %v1538_v60 = vld [vmem:[#allocation10 + $0x15f8] sm:$0xff] }
 0x7af   :  { %15318 = vmatpush1.bf16.msra.mxu0 %v18038_v18  ;;  %v18121_v18 = vcombine.high %v1466_v61, %v1474_v1 }
 0x7b0   :  { %15646 = vmatpush1.bf16.msra.mxu1 %v18040_v38  ;;  %15319 = vmatprep.subr.bf16.mxu0 %v18055_v19  ;;  %v1481_v38 = vld [vmem:[#allocation10 + $0x1430] sm:$0xff] }
 0x7b1   :  { %15647 = vmatprep.subr.bf16.mxu1 %v18057_v20  ;;  %v1489_v19 = vld [vmem:[#allocation10 + $0x1470] sm:$0xff]  ;;  %v1482_v20 = vld [vmem:[#allocation10 + $0x1438] sm:$0xff] }
 0x7b2   :  { %v18135_v22 = vcombine.high %v1481_v38, %v1489_v19  ;;  %v18134_v35 = vcombine.low %v1481_v38, %v1489_v19  ;;  %v18136_v46 = vcombine.low %v1482_v20, %v1490_v21  ;;  %v1554_v38 = vld [vmem:[#allocation10 + $0x1678] sm:$0xff] }
 0x7b3   :  { %15320 = vmatpush1.bf16.msra.mxu0 %v18054_v51  ;;  %v18137_v51 = vcombine.high %v1482_v20, %v1490_v21 }
 0x7b4   :  { %15648 = vmatpush1.bf16.msra.mxu1 %v18056_v23  ;;  %15321 = vmatprep.subr.bf16.mxu0 %v18071_v31  ;;  %v1497_v23 = vld [vmem:[#allocation10 + $0x14b0] sm:$0xff] }
 0x7b5   :  { %15649 = vmatprep.subr.bf16.mxu1 %v18073_v37  ;;  %v1505_v31 = vld [vmem:[#allocation10 + $0x14f0] sm:$0xff]  ;;  %v1498_v37 = vld [vmem:[#allocation10 + $0x14b8] sm:$0xff] }
 0x7b6   :  { %v18151_v15 = vcombine.high %v1497_v23, %v1505_v31  ;;  %v18150_v28 = vcombine.low %v1497_v23, %v1505_v31  ;;  %v18152_v45 = vcombine.low %v1498_v37, %v1506_v26  ;;  %v1570_v23 = vld [vmem:[#allocation10 + $0x16f8] sm:$0xff] }
 0x7b7   :  { %15322 = vmatpush1.bf16.msra.mxu0 %v18070_v40  ;;  %v18153_v40 = vcombine.high %v1498_v37, %v1506_v26 }
 0x7b8   :  { %15650 = vmatpush1.bf16.msra.mxu1 %v18072_v36  ;;  %15323 = vmatprep.subr.bf16.mxu0 %v18087_v48  ;;  %v1513_v36 = vld [vmem:[#allocation10 + $0x1530] sm:$0xff] }
 0x7b9   :  { %15651 = vmatprep.subr.bf16.mxu1 %v18089_v42  ;;  %v1521_v48 = vld [vmem:[#allocation10 + $0x1570] sm:$0xff]  ;;  %v1514_v42 = vld [vmem:[#allocation10 + $0x1538] sm:$0xff] }
 0x7ba   :  { %v18167_v50 = vcombine.high %v1513_v36, %v1521_v48  ;;  %v18166_v34 = vcombine.low %v1513_v36, %v1521_v48  ;;  %v18168_v61 = vcombine.low %v1514_v42, %v1522_v9  ;;  %v1586_v36 = vld [vmem:[#allocation10 + $0x1778] sm:$0xff] }
 0x7bb   :  { %15324 = vmatpush1.bf16.msra.mxu0 %v18086_v54  ;;  %v18169_v54 = vcombine.high %v1514_v42, %v1522_v9 }
 0x7bc   :  { %15652 = vmatpush1.bf16.msra.mxu1 %v18088_v58  ;;  %15325 = vmatprep.subr.bf16.mxu0 %v18103_v7  ;;  %v1529_v58 = vld [vmem:[#allocation10 + $0x15b0] sm:$0xff] }
 0x7bd   :  { %15653 = vmatprep.subr.bf16.mxu1 %v18105_v47  ;;  %v1537_v7 = vld [vmem:[#allocation10 + $0x15f0] sm:$0xff]  ;;  %v1530_v47 = vld [vmem:[#allocation10 + $0x15b8] sm:$0xff] }
 0x7be   :  { %v18183_v1 = vcombine.high %v1529_v58, %v1537_v7  ;;  %v18182_v19 = vcombine.low %v1529_v58, %v1537_v7  ;;  %v18184_v20 = vcombine.low %v1530_v47, %v1538_v60  ;;  %v1602_v58 = vld [vmem:[#allocation10 + $0x17f8] sm:$0xff] }
 0x7bf   :  { %15326 = vmatpush1.bf16.msra.mxu0 %v18102_v5  ;;  %v18185_v5 = vcombine.high %v1530_v47, %v1538_v60 }
 0x7c0   :  { %15654 = vmatpush1.bf16.msra.mxu1 %v18104_v8  ;;  %15327 = vmatprep.subr.bf16.mxu0 %v18119_v11  ;;  %v1545_v8 = vld [vmem:[#allocation10 + $0x1630] sm:$0xff] }
 0x7c1   :  { %15655 = vmatprep.subr.bf16.mxu1 %v18121_v18  ;;  %v1553_v11 = vld [vmem:[#allocation10 + $0x1670] sm:$0xff]  ;;  %v1546_v18 = vld [vmem:[#allocation10 + $0x1638] sm:$0xff] }
 0x7c2   :  { %v18199_v21 = vcombine.high %v1545_v8, %v1553_v11  ;;  %v18198_v31 = vcombine.low %v1545_v8, %v1553_v11  ;;  %v18200_v37 = vcombine.low %v1546_v18, %v1554_v38  ;;  %v1618_v8 = vld [vmem:[#allocation10 + $0x1878] sm:$0xff] }
 0x7c3   :  { %15328 = vmatpush1.bf16.msra.mxu0 %v18118_v4  ;;  %v18201_v4 = vcombine.high %v1546_v18, %v1554_v38 }
 0x7c4   :  { %15656 = vmatpush1.bf16.msra.mxu1 %v18120_v39  ;;  %15329 = vmatprep.subr.bf16.mxu0 %v18135_v22  ;;  %v1561_v39 = vld [vmem:[#allocation10 + $0x16b0] sm:$0xff] }
 0x7c5   :  { %15657 = vmatprep.subr.bf16.mxu1 %v18137_v51  ;;  %v1569_v22 = vld [vmem:[#allocation10 + $0x16f0] sm:$0xff]  ;;  %v1562_v51 = vld [vmem:[#allocation10 + $0x16b8] sm:$0xff] }
 0x7c6   :  { %v18215_v26 = vcombine.high %v1561_v39, %v1569_v22  ;;  %v18214_v48 = vcombine.low %v1561_v39, %v1569_v22  ;;  %v18216_v42 = vcombine.low %v1562_v51, %v1570_v23  ;;  %v1626_v39 = vld [vmem:[#allocation10 + $0x18b8] sm:$0xff] }
 0x7c7   :  { %15330 = vmatpush1.bf16.msra.mxu0 %v18134_v35  ;;  %v18217_v35 = vcombine.high %v1562_v51, %v1570_v23  ;;  %v1634_v22 = vld [vmem:[#allocation10 + $0x18f8] sm:$0xff] }
 0x7c8   :  { %15658 = vmatpush1.bf16.msra.mxu1 %v18136_v46  ;;  %15331 = vmatprep.subr.bf16.mxu0 %v18151_v15  ;;  %v1577_v46 = vld [vmem:[#allocation10 + $0x1730] sm:$0xff] }
 0x7c9   :  { %15659 = vmatprep.subr.bf16.mxu1 %v18153_v40  ;;  %v1585_v15 = vld [vmem:[#allocation10 + $0x1770] sm:$0xff]  ;;  %v1578_v40 = vld [vmem:[#allocation10 + $0x1738] sm:$0xff] }
 0x7ca   :  { %v18231_v9 = vcombine.high %v1577_v46, %v1585_v15  ;;  %v18230_v7 = vcombine.low %v1577_v46, %v1585_v15  ;;  %v18232_v47 = vcombine.low %v1578_v40, %v1586_v36  ;;  %v1650_v46 = vld [vmem:[#allocation10 + $0x1978] sm:$0xff] }
 0x7cb   :  { %15332 = vmatpush1.bf16.msra.mxu0 %v18150_v28  ;;  %v18233_v28 = vcombine.high %v1578_v40, %v1586_v36  ;;  %v18280_v40 = vcombine.low %v1626_v39, %v1634_v22 }
 0x7cc   :  { %15660 = vmatpush1.bf16.msra.mxu1 %v18152_v45  ;;  %15333 = vmatprep.subr.bf16.mxu0 %v18167_v50  ;;  %v1593_v45 = vld [vmem:[#allocation10 + $0x17b0] sm:$0xff] }
 0x7cd   :  { %15661 = vmatprep.subr.bf16.mxu1 %v18169_v54  ;;  %v1601_v50 = vld [vmem:[#allocation10 + $0x17f0] sm:$0xff]  ;;  %v1594_v54 = vld [vmem:[#allocation10 + $0x17b8] sm:$0xff] }
 0x7ce   :  { %v18247_v60 = vcombine.high %v1593_v45, %v1601_v50  ;;  %v18246_v11 = vcombine.low %v1593_v45, %v1601_v50  ;;  %v18248_v18 = vcombine.low %v1594_v54, %v1602_v58  ;;  %v1666_v45 = vld [vmem:[#allocation10 + $0x19f8] sm:$0xff] }
 0x7cf   :  { %15334 = vmatpush1.bf16.msra.mxu0 %v18166_v34  ;;  %v18249_v34 = vcombine.high %v1594_v54, %v1602_v58 }
 0x7d0   :  { %15662 = vmatpush1.bf16.msra.mxu1 %v18168_v61  ;;  %15335 = vmatprep.subr.bf16.mxu0 %v18183_v1  ;;  %v1609_v61 = vld [vmem:[#allocation10 + $0x1830] sm:$0xff] }
 0x7d1   :  { %15663 = vmatprep.subr.bf16.mxu1 %v18185_v5  ;;  %v1617_v1 = vld [vmem:[#allocation10 + $0x1870] sm:$0xff]  ;;  %v1610_v5 = vld [vmem:[#allocation10 + $0x1838] sm:$0xff] }
 0x7d2   :  { %v18263_v38 = vcombine.high %v1609_v61, %v1617_v1  ;;  %v18264_v51 = vcombine.low %v1610_v5, %v1618_v8 }
 0x7d3   :  { %15336 = vmatpush1.bf16.msra.mxu0 %v18182_v19  ;;  %v18265_v19 = vcombine.high %v1610_v5, %v1618_v8  ;;  %v1689_v8 = vld [vmem:[#allocation10 + $0x1ab0] sm:$0xff] }
 0x7d4   :  { %15664 = vmatpush1.bf16.msra.mxu1 %v18184_v20  ;;  %15337 = vmatprep.subr.bf16.mxu0 %v18199_v21  ;;  %v1625_v20 = vld [vmem:[#allocation10 + $0x18b0] sm:$0xff] }
 0x7d5   :  { %15665 = vmatprep.subr.bf16.mxu1 %v18201_v4  ;;  %v1633_v21 = vld [vmem:[#allocation10 + $0x18f0] sm:$0xff]  ;;  %v18262_v4 = vcombine.low %v1609_v61, %v1617_v1 }
 0x7d6   :  { %v18279_v23 = vcombine.high %v1625_v20, %v1633_v21  ;;  %v18278_v15 = vcombine.low %v1625_v20, %v1633_v21 }
 0x7d7   :  { %15338 = vmatpush1.bf16.msra.mxu0 %v18198_v31  ;;  %v1641_v31 = vld [vmem:[#allocation10 + $0x1930] sm:$0xff] }
 0x7d8   :  { %15666 = vmatpush1.bf16.msra.mxu1 %v18200_v37  ;;  %15339 = vmatprep.subr.bf16.mxu0 %v18215_v26  ;;  %v1649_v37 = vld [vmem:[#allocation10 + $0x1970] sm:$0xff]  ;;  %v18281_v26 = vcombine.high %v1626_v39, %v1634_v22 }
 0x7d9   :  { %15667 = vmatprep.subr.bf16.mxu1 %v18217_v35  ;;  %v1642_v35 = vld [vmem:[#allocation10 + $0x1938] sm:$0xff]  ;;  %v18295_v36 = vcombine.high %v1641_v31, %v1649_v37  ;;  %v18294_v50 = vcombine.low %v1641_v31, %v1649_v37  ;;  %v1705_v39 = vld [vmem:[#allocation10 + $0x1b30] sm:$0xff] }
 0x7da   :  { %v1713_v22 = vld [vmem:[#allocation10 + $0x1b70] sm:$0xff] }
 0x7db   :  { %15340 = vmatpush1.bf16.msra.mxu0 %v18214_v48  ;;  %v18297_v48 = vcombine.high %v1642_v35, %v1650_v46 }
 0x7dc   :  { %15668 = vmatpush1.bf16.msra.mxu1 %v18216_v42  ;;  %15341 = vmatprep.subr.bf16.mxu0 %v18231_v9  ;;  %v1657_v42 = vld [vmem:[#allocation10 + $0x19b0] sm:$0xff] }
 0x7dd   :  { %15669 = vmatprep.subr.bf16.mxu1 %v18233_v28  ;;  %v1665_v9 = vld [vmem:[#allocation10 + $0x19f0] sm:$0xff]  ;;  %v1658_v28 = vld [vmem:[#allocation10 + $0x19b8] sm:$0xff] }
 0x7de   :  { %v18311_v54 = vcombine.high %v1657_v42, %v1665_v9  ;;  %v18313_v58 = vcombine.high %v1658_v28, %v1666_v45  ;;  %v18312_v61 = vcombine.low %v1658_v28, %v1666_v45 }
 0x7df   :  { %15342 = vmatpush1.bf16.msra.mxu0 %v18230_v7  ;;  %v1673_v7 = vld [vmem:[#allocation10 + $0x1a30] sm:$0xff] }
 0x7e0   :  { %15670 = vmatpush1.bf16.msra.mxu1 %v18232_v47  ;;  %15343 = vmatprep.subr.bf16.mxu0 %v18247_v60  ;;  %v1681_v47 = vld [vmem:[#allocation10 + $0x1a70] sm:$0xff]  ;;  %v1674_v60 = vld [vmem:[#allocation10 + $0x1a38] sm:$0xff] }
 0x7e1   :  { %15671 = vmatprep.subr.bf16.mxu1 %v18249_v34  ;;  %v1682_v34 = vld [vmem:[#allocation10 + $0x1a78] sm:$0xff]  ;;  %v18327_v1 = vcombine.high %v1673_v7, %v1681_v47 }
 0x7e2   :  { %v18329_v5 = vcombine.high %v1674_v60, %v1682_v34  ;;  %v18328_v20 = vcombine.low %v1674_v60, %v1682_v34  ;;  %v1737_v34 = vld [vmem:[#allocation10 + $0x1c30] sm:$0xff] }
 0x7e3   :  { %15344 = vmatpush1.bf16.msra.mxu0 %v18246_v11  ;;  %v1697_v11 = vld [vmem:[#allocation10 + $0x1af0] sm:$0xff] }
 0x7e4   :  { %15672 = vmatpush1.bf16.msra.mxu1 %v18248_v18  ;;  %15354 = vmatprep.subr.bf16.mxu0 %v18263_v38  ;;  %v1690_v18 = vld [vmem:[#allocation10 + $0x1ab8] sm:$0xff]  ;;  %v18343_v21 = vcombine.high %v1689_v8, %v1697_v11  ;;  %v18342_v31 = vcombine.low %v1689_v8, %v1697_v11 }
 0x7e5   :  { %15682 = vmatprep.subr.bf16.mxu1 %v18265_v19  ;;  %v1698_v38 = vld [vmem:[#allocation10 + $0x1af8] sm:$0xff]  ;;  %v18326_v19 = vcombine.low %v1673_v7, %v1681_v47 }
 0x7e6   :  { %15346 = vmatmul.mubr.bf16.vlgmr.msra.gmra.mrb[28].mxu0 %v20722_v41  ;;  %v18344_v37 = vcombine.low %v1690_v18, %v1698_v38 }
 0x7e7   :  { %15674 = vmatmul.mubr.bf16.vlgmr.msra.gmra.mrb[28].mxu1 %v20722_v41  ;;  %15355 = vmatpush1.bf16.msra.mxu0 %v18262_v4  ;;  %v18296_v41 = vcombine.low %v1642_v35, %v1650_v46  ;;  %v18345_v4 = vcombine.high %v1690_v18, %v1698_v38  ;;  %v1753_v38 = vld [vmem:[#allocation10 + $0x1cb0] sm:$0xff] }
 0x7e8   :  { %15386 = vmatprep.mubr.bf16.mxu0 %v20724_v55  ;;  %15683 = vmatpush1.bf16.msra.mxu1 %v18264_v51  ;;  %v1706_v51 = vld [vmem:[#allocation10 + $0x1b38] sm:$0xff] }
 0x7e9   :  { %15714 = vmatprep.mubr.bf16.mxu1 %v20724_v55  ;;  %15356 = vmatprep.subr.bf16.mxu0 %v18279_v23  ;;  %v18310_v55 = vcombine.low %v1657_v42, %v1665_v9  ;;  %v1714_v23 = vld [vmem:[#allocation10 + $0x1b78] sm:$0xff] }
 0x7ea   :  { %15684 = vmatprep.subr.bf16.mxu1 %v18281_v26  ;;  %v18359_v26 = vcombine.high %v1705_v39, %v1713_v22  ;;  %v18361_v46 = vcombine.high %v1706_v51, %v1714_v23  ;;  %v1722_v42 = vld [vmem:[#allocation10 + $0x1bb8] sm:$0xff] }
 0x7eb   :  { %15357 = vmatpush1.bf16.msra.mxu0 %v18278_v15  ;;  %v1721_v15 = vld [vmem:[#allocation10 + $0x1bb0] sm:$0xff]  ;;  %v1730_v9 = vld [vmem:[#allocation10 + $0x1bf8] sm:$0xff] }
 0x7ec   :  { %15685 = vmatpush1.bf16.msra.mxu1 %v18280_v40  ;;  %15358 = vmatprep.subr.bf16.mxu0 %v18295_v36  ;;  %v1729_v40 = vld [vmem:[#allocation10 + $0x1bf0] sm:$0xff]  ;;  %v18377_v60 = vcombine.high %v1722_v42, %v1730_v9  ;;  %v18376_v8 = vcombine.low %v1722_v42, %v1730_v9 }
 0x7ed   :  { %15686 = vmatprep.subr.bf16.mxu1 %v18297_v48  ;;  %v18375_v7 = vcombine.high %v1721_v15, %v1729_v40  ;;  %v1785_v9 = vld [vmem:[#allocation10 + $0x1db0] sm:$0xff] }
 0x7ef   :  { %15359 = vmatpush1.bf16.msra.mxu0 %v18294_v50  ;;  %v18358_v50 = vcombine.low %v1705_v39, %v1713_v22 }
 0x7f0   :  { %15687 = vmatpush1.bf16.msra.mxu1 %v18296_v41  ;;  %15360 = vmatprep.subr.bf16.mxu0 %v18311_v54 }
 0x7f1   :  { %15688 = vmatprep.subr.bf16.mxu1 %v18313_v58  ;;  %v18360_v58 = vcombine.low %v1706_v51, %v1714_v23  ;;  %v1769_v23 = vld [vmem:[#allocation10 + $0x1d30] sm:$0xff] }
 0x7f3   :  { %15361 = vmatpush1.bf16.msra.mxu0 %v18310_v55  ;;  %v1745_v55 = vld [vmem:[#allocation10 + $0x1c70] sm:$0xff] }
 0x7f4   :  { %15689 = vmatpush1.bf16.msra.mxu1 %v18312_v61  ;;  %15362 = vmatprep.subr.bf16.mxu0 %v18327_v1  ;;  %v1738_v61 = vld [vmem:[#allocation10 + $0x1c38] sm:$0xff]  ;;  %v18391_v11 = vcombine.high %v1737_v34, %v1745_v55 }
 0x7f5   :  { %15690 = vmatprep.subr.bf16.mxu1 %v18329_v5  ;;  %v1746_v1 = vld [vmem:[#allocation10 + $0x1c78] sm:$0xff]  ;;  %v18374_v5 = vcombine.low %v1721_v15, %v1729_v40 }
 0x7f6   :  { %v18393_v18 = vcombine.high %v1738_v61, %v1746_v1  ;;  %v18392_v39 = vcombine.low %v1738_v61, %v1746_v1  ;;  %v1810_v61 = vld [vmem:[#allocation10 + $0x1e78] sm:$0xff] }
 0x7f7   :  { %15363 = vmatpush1.bf16.msra.mxu0 %v18326_v19  ;;  %v1761_v19 = vld [vmem:[#allocation10 + $0x1cf0] sm:$0xff] }
 0x7f8   :  { %15691 = vmatpush1.bf16.msra.mxu1 %v18328_v20  ;;  %15364 = vmatprep.subr.bf16.mxu0 %v18343_v21  ;;  %v1754_v20 = vld [vmem:[#allocation10 + $0x1cb8] sm:$0xff]  ;;  %v18407_v22 = vcombine.high %v1753_v38, %v1761_v19 }
 0x7f9   :  { %v20901_v35 = vpop.f32.mrb[24].mxu0  ;;  %15692 = vmatprep.subr.bf16.mxu1 %v18345_v4  ;;  %v1762_v21 = vld [vmem:[#allocation10 + $0x1cf8] sm:$0xff]  ;;  %v18390_v4 = vcombine.low %v1737_v34, %v1745_v55  ;;  %v1809_v34 = vld [vmem:[#allocation10 + $0x1e70] sm:$0xff] }
 0x7fa   :  { %v20903_v36 = vpop.f32.mrb[24].mxu1  ;;  %v20905_v48 = vpop.f32.mrb[25].mxu0  ;;  %v18409_v51 = vcombine.high %v1754_v20, %v1762_v21  ;;  %v18408_v15 = vcombine.low %v1754_v20, %v1762_v21  ;;  %v1802_v55 = vld [vmem:[#allocation10 + $0x1e38] sm:$0xff] }
 0x7fb   :  { %v20907_v28 = vpop.f32.mrb[25].mxu1  ;;  %v14900_v45 = vpop.f32.mrb[26].mxu0  ;;  %15365 = vmatpush1.bf16.msra.mxu0 %v18342_v31  ;;  %v1777_v31 = vld [vmem:[#allocation10 + $0x1d70] sm:$0xff]  ;;  %v1826_v20 = vld [vmem:[#allocation10 + $0x1ef8] sm:$0xff] }
 0x7fc   :  { %v15228_v41 = vpop.f32.mrb[26].mxu1  ;;  %15693 = vmatpush1.bf16.msra.mxu1 %v18344_v37  ;;  %v14901_v54 = vpop.f32.mrb[27].mxu0  ;;  %15366 = vmatprep.subr.bf16.mxu0 %v18359_v26  ;;  %v1770_v37 = vld [vmem:[#allocation10 + $0x1d38] sm:$0xff]  ;;  %v18423_v40 = vcombine.high %v1769_v23, %v1777_v31  ;;  %v1793_v45 = vld [vmem:[#allocation10 + $0x1df0] sm:$0xff] }
 0x7fd   :  { %v15229_v47 = vpop.f32.mrb[27].mxu1  ;;  %15694 = vmatprep.subr.bf16.mxu1 %v18361_v46  ;;  %v1778_v26 = vld [vmem:[#allocation10 + $0x1d78] sm:$0xff]  ;;  %v18406_v46 = vcombine.low %v1753_v38, %v1761_v19  ;;  %v18422_v54 = vcombine.low %v1769_v23, %v1777_v31  ;;  %v18438_v1 = vcombine.low %v1785_v9, %v1793_v45  ;;  %v1825_v38 = vld [vmem:[#allocation10 + $0x1ef0] sm:$0xff] }
 0x7fe   :  { %v18425_v42 = vcombine.high %v1770_v37, %v1778_v26  ;;  %v1794_v41 = vld [vmem:[#allocation10 + $0x1df8] sm:$0xff]  ;;  %v1841_v23 = vld [vmem:[#allocation10 + $0x1f70] sm:$0xff] }
 0x7ff   :  { %15367 = vmatpush1.bf16.msra.mxu0 %v18358_v50  ;;  %v1786_v50 = vld [vmem:[#allocation10 + $0x1db8] sm:$0xff] }
 0x800   :  { %15695 = vmatpush1.bf16.msra.mxu1 %v18360_v58  ;;  %15368 = vmatprep.subr.bf16.mxu0 %v18375_v7  ;;  %v18424_v58 = vcombine.low %v1770_v37, %v1778_v26  ;;  %v18439_v7 = vcombine.high %v1785_v9, %v1793_v45  ;;  %v18441_v47 = vcombine.high %v1786_v50, %v1794_v41  ;;  %v1818_v19 = vld [vmem:[#allocation10 + $0x1eb8] sm:$0xff]  ;;  %v1857_v9 = vld [vmem:[#allocation10 + $0x1ff0] sm:$0xff] }
 0x801   :  { %15696 = vmatprep.subr.bf16.mxu1 %v18377_v60  ;;  %v1801_v60 = vld [vmem:[#allocation10 + $0x1e30] sm:$0xff]  ;;  %v1834_v31 = vld [vmem:[#allocation10 + $0x1f38] sm:$0xff] }
 0x802   :  { %v18454_v21 = vcombine.low %v1801_v60, %v1809_v34  ;;  %v1842_v37 = vld [vmem:[#allocation10 + $0x1f78] sm:$0xff] }
 0x803   :  { %15369 = vmatpush1.bf16.msra.mxu0 %v18374_v5  ;;  %v18440_v5 = vcombine.low %v1786_v50, %v1794_v41  ;;  %v1850_v45 = vld [vmem:[#allocation10 + $0x1fb8] sm:$0xff] }
 0x804   :  { %15697 = vmatpush1.bf16.msra.mxu1 %v18376_v8  ;;  %15370 = vmatprep.subr.bf16.mxu0 %v18391_v11  ;;  %v18455_v8 = vcombine.high %v1801_v60, %v1809_v34  ;;  %v18457_v11 = vcombine.high %v1802_v55, %v1810_v61  ;;  %v1858_v50 = vld [vmem:[#allocation10 + $0x1ff8] sm:$0xff]  ;;  %v1873_v60 = vld [vmem:[#allocation10 + $0x2070] sm:$0xff] }
 0x805   :  { %15698 = vmatprep.subr.bf16.mxu1 %v18393_v18  ;;  %v1817_v18 = vld [vmem:[#allocation10 + $0x1eb0] sm:$0xff]  ;;  %v1866_v34 = vld [vmem:[#allocation10 + $0x2038] sm:$0xff] }
 0x806   :  { %v18470_v26 = vcombine.low %v1817_v18, %v1825_v38 }
 0x807   :  { %15371 = vmatpush1.bf16.msra.mxu0 %v18390_v4  ;;  %v18456_v4 = vcombine.low %v1802_v55, %v1810_v61  ;;  %v1874_v55 = vld [vmem:[#allocation10 + $0x2078] sm:$0xff] }
 0x808   :  { %15699 = vmatpush1.bf16.msra.mxu1 %v18392_v39  ;;  %15372 = vmatprep.subr.bf16.mxu0 %v18407_v22  ;;  %v18471_v39 = vcombine.high %v1817_v18, %v1825_v38  ;;  %v18473_v22 = vcombine.high %v1818_v19, %v1826_v20  ;;  %v1889_v18 = vld [vmem:[#allocation10 + $0x20f0] sm:$0xff] }
 0x809   :  { %15700 = vmatprep.subr.bf16.mxu1 %v18409_v51  ;;  %v1833_v51 = vld [vmem:[#allocation10 + $0x1f30] sm:$0xff] }
 0x80a   :  { %v18486_v41 = vcombine.low %v1833_v51, %v1841_v23 }
 0x80b   :  { %15373 = vmatpush1.bf16.msra.mxu0 %v18406_v46  ;;  %v18472_v46 = vcombine.low %v1818_v19, %v1826_v20  ;;  %v1882_v19 = vld [vmem:[#allocation10 + $0x20b8] sm:$0xff] }
 0x80c   :  { %15701 = vmatpush1.bf16.msra.mxu1 %v18408_v15  ;;  %15374 = vmatprep.subr.bf16.mxu0 %v18423_v40  ;;  %v18487_v15 = vcombine.high %v1833_v51, %v1841_v23  ;;  %v18489_v40 = vcombine.high %v1834_v31, %v1842_v37  ;;  %v1890_v20 = vld [vmem:[#allocation10 + $0x20f8] sm:$0xff] }
 0x80d   :  { %15702 = vmatprep.subr.bf16.mxu1 %v18425_v42  ;;  %v1849_v42 = vld [vmem:[#allocation10 + $0x1fb0] sm:$0xff]  ;;  %v18537_v51 = vcombine.high %v1882_v19, %v1890_v20  ;;  %v1898_v23 = vld [vmem:[#allocation10 + $0x2138] sm:$0xff] }
 0x80e   :  { %v18502_v61 = vcombine.low %v1849_v42, %v1857_v9 }
 0x80f   :  { %15375 = vmatpush1.bf16.msra.mxu0 %v18422_v54  ;;  %v18488_v54 = vcombine.low %v1834_v31, %v1842_v37  ;;  %v1906_v31 = vld [vmem:[#allocation10 + $0x2178] sm:$0xff] }
 0x810   :  { %15703 = vmatpush1.bf16.msra.mxu1 %v18424_v58  ;;  %15376 = vmatprep.subr.bf16.mxu0 %v18439_v7  ;;  %v18503_v58 = vcombine.high %v1849_v42, %v1857_v9  ;;  %v18505_v7 = vcombine.high %v1850_v45, %v1858_v50  ;;  %v1921_v42 = vld [vmem:[#allocation10 + $0x21f0] sm:$0xff]  ;;  %v1914_v9 = vld [vmem:[#allocation10 + $0x21b8] sm:$0xff] }
 0x811   :  { %15704 = vmatprep.subr.bf16.mxu1 %v18441_v47  ;;  %v1865_v47 = vld [vmem:[#allocation10 + $0x2030] sm:$0xff] }
 0x812   :  { %v18518_v38 = vcombine.low %v1865_v47, %v1873_v60 }
 0x813   :  { %15377 = vmatpush1.bf16.msra.mxu0 %v18438_v1  ;;  %v18504_v1 = vcombine.low %v1850_v45, %v1858_v50  ;;  %v1922_v45 = vld [vmem:[#allocation10 + $0x21f8] sm:$0xff] }
 0x814   :  { %15705 = vmatpush1.bf16.msra.mxu1 %v18440_v5  ;;  %15378 = vmatprep.subr.bf16.mxu0 %v18455_v8  ;;  %v18519_v5 = vcombine.high %v1865_v47, %v1873_v60  ;;  %v18521_v8 = vcombine.high %v1866_v34, %v1874_v55  ;;  %v1930_v47 = vld [vmem:[#allocation10 + $0x2238] sm:$0xff] }
 0x815   :  { %15706 = vmatprep.subr.bf16.mxu1 %v18457_v11  ;;  %v1881_v11 = vld [vmem:[#allocation10 + $0x20b0] sm:$0xff]  ;;  %v1938_v60 = vld [vmem:[#allocation10 + $0x2278] sm:$0xff] }
 0x816   :  { %v18534_v37 = vcombine.low %v1881_v11, %v1889_v18 }
 0x817   :  { %15379 = vmatpush1.bf16.msra.mxu0 %v18454_v21  ;;  %v18520_v21 = vcombine.low %v1866_v34, %v1874_v55  ;;  %v18568_v34 = vcombine.low %v1914_v9, %v1922_v45 }
 0x818   :  { %15707 = vmatpush1.bf16.msra.mxu1 %v18456_v4  ;;  %15380 = vmatprep.subr.bf16.mxu0 %v18471_v39  ;;  %v18535_v4 = vcombine.high %v1881_v11, %v1889_v18  ;;  %v1897_v39 = vld [vmem:[#allocation10 + $0x2130] sm:$0xff]  ;;  %v1954_v11 = vld [vmem:[#allocation10 + $0x22f8] sm:$0xff] }
 0x819   :  { %15708 = vmatprep.subr.bf16.mxu1 %v18473_v22  ;;  %v1905_v22 = vld [vmem:[#allocation10 + $0x2170] sm:$0xff] }
 0x81a   :  { %v18550_v50 = vcombine.low %v1897_v39, %v1905_v22 }
 0x81b   :  { %15381 = vmatpush1.bf16.msra.mxu0 %v18470_v26  ;;  %v18536_v26 = vcombine.low %v1882_v19, %v1890_v20 }
 0x81c   :  { %15709 = vmatpush1.bf16.msra.mxu1 %v18472_v46  ;;  %15382 = vmatprep.subr.bf16.mxu0 %v18487_v15  ;;  %v18551_v46 = vcombine.high %v1897_v39, %v1905_v22  ;;  %v18553_v15 = vcombine.high %v1898_v23, %v1906_v31  ;;  %v1962_v39 = vld [vmem:[#allocation10 + $0x2338] sm:$0xff] }
 0x81d   :  { %15710 = vmatprep.subr.bf16.mxu1 %v18489_v40  ;;  %v1913_v40 = vld [vmem:[#allocation10 + $0x21b0] sm:$0xff]  ;;  %v1970_v22 = vld [vmem:[#allocation10 + $0x2378] sm:$0xff] }
 0x81f   :  { %15383 = vmatpush1.bf16.msra.mxu0 %v18486_v41  ;;  %v18567_v41 = vcombine.high %v1913_v40, %v1921_v42 }
 0x820   :  { %15711 = vmatpush1.bf16.msra.mxu1 %v18488_v54  ;;  %15384 = vmatprep.subr.bf16.mxu0 %v18503_v58  ;;  %v18569_v54 = vcombine.high %v1914_v9, %v1922_v45  ;;  %v1929_v58 = vld [vmem:[#allocation10 + $0x2230] sm:$0xff]  ;;  %v18616_v9 = vcombine.low %v1962_v39, %v1970_v22 }
 0x821   :  { %15712 = vmatprep.subr.bf16.mxu1 %v18505_v7  ;;  %v1937_v7 = vld [vmem:[#allocation10 + $0x2270] sm:$0xff] }
 0x822   :  { %v18583_v55 = vcombine.high %v1929_v58, %v1937_v7  ;;  %v18582_v18 = vcombine.low %v1929_v58, %v1937_v7  ;;  %v2002_v58 = vld [vmem:[#allocation10 + $0x2478] sm:$0xff] }
 0x823   :  { %15385 = vmatpush1.bf16.msra.mxu0 %v18502_v61  ;;  %v18585_v61 = vcombine.high %v1930_v47, %v1938_v60 }
 0x824   :  { %15713 = vmatpush1.bf16.msra.mxu1 %v18504_v1  ;;  %15395 = vmatprep.subr.bf16.mxu0 %v18519_v5  ;;  %v1945_v1 = vld [vmem:[#allocation10 + $0x22b0] sm:$0xff] }
 0x825   :  { %15723 = vmatprep.subr.bf16.mxu1 %v18521_v8  ;;  %v1953_v5 = vld [vmem:[#allocation10 + $0x22f0] sm:$0xff]  ;;  %v1946_v8 = vld [vmem:[#allocation10 + $0x22b8] sm:$0xff] }
 0x826   :  { %15387 = vmatmul.mubr.bf16.vlgmr.msra.gmra.mrb[28].mxu0 %v20744_v57  ;;  %v18599_v19 = vcombine.high %v1945_v1, %v1953_v5  ;;  %v18601_v20 = vcombine.high %v1946_v8, %v1954_v11 }
 0x827   :  { %15715 = vmatmul.mubr.bf16.vlgmr.msra.gmra.mrb[28].mxu1 %v20744_v57  ;;  %15396 = vmatpush1.bf16.msra.mxu0 %v18518_v38  ;;  %v18552_v57 = vcombine.low %v1898_v23, %v1906_v31  ;;  %v18584_v38 = vcombine.low %v1930_v47, %v1938_v60  ;;  %v18600_v23 = vcombine.low %v1946_v8, %v1954_v11 }
 0x828   :  { %15427 = vmatprep.mubr.bf16.mxu0 %v20746_v2  ;;  %15724 = vmatpush1.bf16.msra.mxu1 %v18520_v21  ;;  %v1961_v21 = vld [vmem:[#allocation10 + $0x2330] sm:$0xff] }
 0x829   :  { %15755 = vmatprep.mubr.bf16.mxu1 %v20746_v2  ;;  %15397 = vmatprep.subr.bf16.mxu0 %v18535_v4  ;;  %v18566_v2 = vcombine.low %v1913_v40, %v1921_v42  ;;  %v1969_v4 = vld [vmem:[#allocation10 + $0x2370] sm:$0xff]  ;;  %v1986_v40 = vld [vmem:[#allocation10 + $0x23f8] sm:$0xff] }
 0x82a   :  { %15725 = vmatprep.subr.bf16.mxu1 %v18537_v51  ;;  %v18598_v51 = vcombine.low %v1945_v1, %v1953_v5  ;;  %v18615_v31 = vcombine.high %v1961_v21, %v1969_v4  ;;  %v18614_v42 = vcombine.low %v1961_v21, %v1969_v4  ;;  %v2018_v1 = vld [vmem:[#allocation10 + $0x24f8] sm:$0xff] }
 0x82b   :  { %15398 = vmatpush1.bf16.msra.mxu0 %v18534_v37  ;;  %v18617_v37 = vcombine.high %v1962_v39, %v1970_v22  ;;  %v2034_v21 = vld [vmem:[#allocation10 + $0x2578] sm:$0xff] }
 0x82c   :  { %15726 = vmatpush1.bf16.msra.mxu1 %v18536_v26  ;;  %15399 = vmatprep.subr.bf16.mxu0 %v18551_v46  ;;  %v1977_v26 = vld [vmem:[#allocation10 + $0x23b0] sm:$0xff] }
 0x82d   :  { %15727 = vmatprep.subr.bf16.mxu1 %v18553_v15  ;;  %v1985_v46 = vld [vmem:[#allocation10 + $0x23f0] sm:$0xff]  ;;  %v1978_v15 = vld [vmem:[#allocation10 + $0x23b8] sm:$0xff] }
 0x82e   :  { %v18631_v45 = vcombine.high %v1977_v26, %v1985_v46  ;;  %v18630_v7 = vcombine.low %v1977_v26, %v1985_v46  ;;  %v18632_v47 = vcombine.low %v1978_v15, %v1986_v40  ;;  %v2050_v26 = vld [vmem:[#allocation10 + $0x25f8] sm:$0xff] }
 0x82f   :  { %15400 = vmatpush1.bf16.msra.mxu0 %v18550_v50  ;;  %v18633_v50 = vcombine.high %v1978_v15, %v1986_v40 }
 0x830   :  { %15728 = vmatpush1.bf16.msra.mxu1 %v18552_v57  ;;  %15401 = vmatprep.subr.bf16.mxu0 %v18567_v41  ;;  %v1993_v57 = vld [vmem:[#allocation10 + $0x2430] sm:$0xff] }
 0x831   :  { %15729 = vmatprep.subr.bf16.mxu1 %v18569_v54  ;;  %v2001_v41 = vld [vmem:[#allocation10 + $0x2470] sm:$0xff]  ;;  %v1994_v54 = vld [vmem:[#allocation10 + $0x2438] sm:$0xff] }
 0x832   :  { %v18647_v60 = vcombine.high %v1993_v57, %v2001_v41  ;;  %v18646_v5 = vcombine.low %v1993_v57, %v2001_v41  ;;  %v18648_v8 = vcombine.low %v1994_v54, %v2002_v58  ;;  %v2066_v57 = vld [vmem:[#allocation10 + $0x2678] sm:$0xff] }
 0x833   :  { %15402 = vmatpush1.bf16.msra.mxu0 %v18566_v2  ;;  %v18649_v2 = vcombine.high %v1994_v54, %v2002_v58 }
 0x834   :  { %15730 = vmatpush1.bf16.msra.mxu1 %v18568_v34  ;;  %15403 = vmatprep.subr.bf16.mxu0 %v18583_v55  ;;  %v2009_v34 = vld [vmem:[#allocation10 + $0x24b0] sm:$0xff] }
 0x835   :  { %15731 = vmatprep.subr.bf16.mxu1 %v18585_v61  ;;  %v2017_v55 = vld [vmem:[#allocation10 + $0x24f0] sm:$0xff]  ;;  %v2010_v61 = vld [vmem:[#allocation10 + $0x24b8] sm:$0xff] }
 0x836   :  { %v18663_v11 = vcombine.high %v2009_v34, %v2017_v55  ;;  %v18662_v4 = vcombine.low %v2009_v34, %v2017_v55  ;;  %v18664_v39 = vcombine.low %v2010_v61, %v2018_v1  ;;  %v2082_v34 = vld [vmem:[#allocation10 + $0x26f8] sm:$0xff] }
 0x837   :  { %15404 = vmatpush1.bf16.msra.mxu0 %v18582_v18  ;;  %v18665_v18 = vcombine.high %v2010_v61, %v2018_v1 }
 0x838   :  { %15732 = vmatpush1.bf16.msra.mxu1 %v18584_v38  ;;  %15405 = vmatprep.subr.bf16.mxu0 %v18599_v19  ;;  %v2025_v38 = vld [vmem:[#allocation10 + $0x2530] sm:$0xff] }
 0x839   :  { %15733 = vmatprep.subr.bf16.mxu1 %v18601_v20  ;;  %v2033_v19 = vld [vmem:[#allocation10 + $0x2570] sm:$0xff]  ;;  %v2026_v20 = vld [vmem:[#allocation10 + $0x2538] sm:$0xff] }
 0x83a   :  { %v18679_v22 = vcombine.high %v2025_v38, %v2033_v19  ;;  %v18678_v46 = vcombine.low %v2025_v38, %v2033_v19  ;;  %v18680_v15 = vcombine.low %v2026_v20, %v2034_v21  ;;  %v2098_v38 = vld [vmem:[#allocation10 + $0x2778] sm:$0xff] }
 0x83b   :  { %15406 = vmatpush1.bf16.msra.mxu0 %v18598_v51  ;;  %v18681_v51 = vcombine.high %v2026_v20, %v2034_v21 }
 0x83c   :  { %15734 = vmatpush1.bf16.msra.mxu1 %v18600_v23  ;;  %15407 = vmatprep.subr.bf16.mxu0 %v18615_v31  ;;  %v2041_v23 = vld [vmem:[#allocation10 + $0x25b0] sm:$0xff] }
 0x83d   :  { %15735 = vmatprep.subr.bf16.mxu1 %v18617_v37  ;;  %v2049_v31 = vld [vmem:[#allocation10 + $0x25f0] sm:$0xff]  ;;  %v2042_v37 = vld [vmem:[#allocation10 + $0x25b8] sm:$0xff] }
 0x83e   :  { %v18695_v40 = vcombine.high %v2041_v23, %v2049_v31  ;;  %v18694_v41 = vcombine.low %v2041_v23, %v2049_v31  ;;  %v18696_v54 = vcombine.low %v2042_v37, %v2050_v26  ;;  %v2114_v23 = vld [vmem:[#allocation10 + $0x27f8] sm:$0xff] }
 0x83f   :  { %15408 = vmatpush1.bf16.msra.mxu0 %v18614_v42  ;;  %v18697_v42 = vcombine.high %v2042_v37, %v2050_v26 }
 0x840   :  { %15736 = vmatpush1.bf16.msra.mxu1 %v18616_v9  ;;  %15409 = vmatprep.subr.bf16.mxu0 %v18631_v45  ;;  %v2057_v9 = vld [vmem:[#allocation10 + $0x2630] sm:$0xff] }
 0x841   :  { %15737 = vmatprep.subr.bf16.mxu1 %v18633_v50  ;;  %v2065_v45 = vld [vmem:[#allocation10 + $0x2670] sm:$0xff]  ;;  %v2058_v50 = vld [vmem:[#allocation10 + $0x2638] sm:$0xff] }
 0x842   :  { %v18711_v58 = vcombine.high %v2057_v9, %v2065_v45  ;;  %v18710_v55 = vcombine.low %v2057_v9, %v2065_v45  ;;  %v18712_v61 = vcombine.low %v2058_v50, %v2066_v57  ;;  %v2130_v9 = vld [vmem:[#allocation10 + $0x2878] sm:$0xff] }
 0x843   :  { %15410 = vmatpush1.bf16.msra.mxu0 %v18630_v7  ;;  %v18713_v7 = vcombine.high %v2058_v50, %v2066_v57 }
 0x844   :  { %15738 = vmatpush1.bf16.msra.mxu1 %v18632_v47  ;;  %15411 = vmatprep.subr.bf16.mxu0 %v18647_v60  ;;  %v2073_v47 = vld [vmem:[#allocation10 + $0x26b0] sm:$0xff] }
 0x845   :  { %15739 = vmatprep.subr.bf16.mxu1 %v18649_v2  ;;  %v2081_v60 = vld [vmem:[#allocation10 + $0x26f0] sm:$0xff]  ;;  %v2074_v2 = vld [vmem:[#allocation10 + $0x26b8] sm:$0xff] }
 0x846   :  { %v18727_v1 = vcombine.high %v2073_v47, %v2081_v60  ;;  %v18726_v19 = vcombine.low %v2073_v47, %v2081_v60  ;;  %v18728_v20 = vcombine.low %v2074_v2, %v2082_v34  ;;  %v2138_v47 = vld [vmem:[#allocation10 + $0x28b8] sm:$0xff] }
 0x847   :  { %15412 = vmatpush1.bf16.msra.mxu0 %v18646_v5  ;;  %v18729_v5 = vcombine.high %v2074_v2, %v2082_v34  ;;  %v2146_v60 = vld [vmem:[#allocation10 + $0x28f8] sm:$0xff] }
 0x848   :  { %15740 = vmatpush1.bf16.msra.mxu1 %v18648_v8  ;;  %15413 = vmatprep.subr.bf16.mxu0 %v18663_v11  ;;  %v2089_v8 = vld [vmem:[#allocation10 + $0x2730] sm:$0xff] }
 0x849   :  { %15741 = vmatprep.subr.bf16.mxu1 %v18665_v18  ;;  %v2097_v11 = vld [vmem:[#allocation10 + $0x2770] sm:$0xff]  ;;  %v2090_v18 = vld [vmem:[#allocation10 + $0x2738] sm:$0xff] }
 0x84a   :  { %v18743_v21 = vcombine.high %v2089_v8, %v2097_v11  ;;  %v18742_v31 = vcombine.low %v2089_v8, %v2097_v11  ;;  %v18744_v37 = vcombine.low %v2090_v18, %v2098_v38  ;;  %v2162_v8 = vld [vmem:[#allocation10 + $0x2978] sm:$0xff] }
 0x84b   :  { %15414 = vmatpush1.bf16.msra.mxu0 %v18662_v4  ;;  %v18745_v4 = vcombine.high %v2090_v18, %v2098_v38  ;;  %v18792_v18 = vcombine.low %v2138_v47, %v2146_v60 }
 0x84c   :  { %15742 = vmatpush1.bf16.msra.mxu1 %v18664_v39  ;;  %15415 = vmatprep.subr.bf16.mxu0 %v18679_v22  ;;  %v2105_v39 = vld [vmem:[#allocation10 + $0x27b0] sm:$0xff] }
 0x84d   :  { %15743 = vmatprep.subr.bf16.mxu1 %v18681_v51  ;;  %v2113_v22 = vld [vmem:[#allocation10 + $0x27f0] sm:$0xff]  ;;  %v2106_v51 = vld [vmem:[#allocation10 + $0x27b8] sm:$0xff] }
 0x84e   :  { %v18759_v26 = vcombine.high %v2105_v39, %v2113_v22  ;;  %v18758_v45 = vcombine.low %v2105_v39, %v2113_v22  ;;  %v18760_v50 = vcombine.low %v2106_v51, %v2114_v23  ;;  %v2178_v39 = vld [vmem:[#allocation10 + $0x29f8] sm:$0xff] }
 0x84f   :  { %15416 = vmatpush1.bf16.msra.mxu0 %v18678_v46  ;;  %v18761_v46 = vcombine.high %v2106_v51, %v2114_v23 }
 0x850   :  { %15744 = vmatpush1.bf16.msra.mxu1 %v18680_v15  ;;  %15417 = vmatprep.subr.bf16.mxu0 %v18695_v40  ;;  %v2121_v15 = vld [vmem:[#allocation10 + $0x2830] sm:$0xff] }
 0x851   :  { %15745 = vmatprep.subr.bf16.mxu1 %v18697_v42  ;;  %v2129_v40 = vld [vmem:[#allocation10 + $0x2870] sm:$0xff]  ;;  %v2122_v42 = vld [vmem:[#allocation10 + $0x2838] sm:$0xff] }
 0x852   :  { %v18775_v57 = vcombine.high %v2121_v15, %v2129_v40  ;;  %v18776_v2 = vcombine.low %v2122_v42, %v2130_v9 }
 0x853   :  { %15418 = vmatpush1.bf16.msra.mxu0 %v18694_v41  ;;  %v18777_v41 = vcombine.high %v2122_v42, %v2130_v9  ;;  %v2201_v9 = vld [vmem:[#allocation10 + $0x2ab0] sm:$0xff] }
 0x854   :  { %15746 = vmatpush1.bf16.msra.mxu1 %v18696_v54  ;;  %15419 = vmatprep.subr.bf16.mxu0 %v18711_v58  ;;  %v2137_v54 = vld [vmem:[#allocation10 + $0x28b0] sm:$0xff] }
 0x855   :  { %15747 = vmatprep.subr.bf16.mxu1 %v18713_v7  ;;  %v2145_v58 = vld [vmem:[#allocation10 + $0x28f0] sm:$0xff]  ;;  %v18774_v7 = vcombine.low %v2121_v15, %v2129_v40 }
 0x856   :  { %v18791_v34 = vcombine.high %v2137_v54, %v2145_v58  ;;  %v18790_v11 = vcombine.low %v2137_v54, %v2145_v58 }
 0x857   :  { %15420 = vmatpush1.bf16.msra.mxu0 %v18710_v55  ;;  %v2153_v55 = vld [vmem:[#allocation10 + $0x2930] sm:$0xff] }
 0x858   :  { %15748 = vmatpush1.bf16.msra.mxu1 %v18712_v61  ;;  %15421 = vmatprep.subr.bf16.mxu0 %v18727_v1  ;;  %v2161_v61 = vld [vmem:[#allocation10 + $0x2970] sm:$0xff]  ;;  %v18793_v1 = vcombine.high %v2138_v47, %v2146_v60 }
 0x859   :  { %15749 = vmatprep.subr.bf16.mxu1 %v18729_v5  ;;  %v2154_v5 = vld [vmem:[#allocation10 + $0x2938] sm:$0xff]  ;;  %v18807_v38 = vcombine.high %v2153_v55, %v2161_v61  ;;  %v18806_v22 = vcombine.low %v2153_v55, %v2161_v61  ;;  %v2217_v47 = vld [vmem:[#allocation10 + $0x2b30] sm:$0xff] }
 0x85a   :  { %v2225_v60 = vld [vmem:[#allocation10 + $0x2b70] sm:$0xff] }
 0x85b   :  { %15422 = vmatpush1.bf16.msra.mxu0 %v18726_v19  ;;  %v18809_v19 = vcombine.high %v2154_v5, %v2162_v8 }
 0x85c   :  { %15750 = vmatpush1.bf16.msra.mxu1 %v18728_v20  ;;  %15423 = vmatprep.subr.bf16.mxu0 %v18743_v21  ;;  %v2169_v20 = vld [vmem:[#allocation10 + $0x29b0] sm:$0xff] }
 0x85d   :  { %15751 = vmatprep.subr.bf16.mxu1 %v18745_v4  ;;  %v2177_v21 = vld [vmem:[#allocation10 + $0x29f0] sm:$0xff]  ;;  %v2170_v4 = vld [vmem:[#allocation10 + $0x29b8] sm:$0xff] }
 0x85e   :  { %v18823_v51 = vcombine.high %v2169_v20, %v2177_v21  ;;  %v18825_v23 = vcombine.high %v2170_v4, %v2178_v39  ;;  %v18824_v15 = vcombine.low %v2170_v4, %v2178_v39  ;;  %v2249_v39 = vld [vmem:[#allocation10 + $0x2c30] sm:$0xff] }
 0x85f   :  { %15424 = vmatpush1.bf16.msra.mxu0 %v18742_v31  ;;  %v2185_v31 = vld [vmem:[#allocation10 + $0x2a30] sm:$0xff] }
 0x860   :  { %15752 = vmatpush1.bf16.msra.mxu1 %v18744_v37  ;;  %15425 = vmatprep.subr.bf16.mxu0 %v18759_v26  ;;  %v2193_v37 = vld [vmem:[#allocation10 + $0x2a70] sm:$0xff]  ;;  %v2186_v26 = vld [vmem:[#allocation10 + $0x2a38] sm:$0xff] }
 0x861   :  { %15753 = vmatprep.subr.bf16.mxu1 %v18761_v46  ;;  %v2194_v46 = vld [vmem:[#allocation10 + $0x2a78] sm:$0xff]  ;;  %v18839_v40 = vcombine.high %v2185_v31, %v2193_v37 }
 0x862   :  { %v18841_v42 = vcombine.high %v2186_v26, %v2194_v46  ;;  %v18840_v54 = vcombine.low %v2186_v26, %v2194_v46  ;;  %v2265_v46 = vld [vmem:[#allocation10 + $0x2cb0] sm:$0xff] }
 0x863   :  { %15426 = vmatpush1.bf16.msra.mxu0 %v18758_v45  ;;  %v2209_v45 = vld [vmem:[#allocation10 + $0x2af0] sm:$0xff] }
 0x864   :  { %15754 = vmatpush1.bf16.msra.mxu1 %v18760_v50  ;;  %15436 = vmatprep.subr.bf16.mxu0 %v18775_v57  ;;  %v2202_v50 = vld [vmem:[#allocation10 + $0x2ab8] sm:$0xff]  ;;  %v18855_v58 = vcombine.high %v2201_v9, %v2209_v45  ;;  %v18854_v55 = vcombine.low %v2201_v9, %v2209_v45 }
 0x865   :  { %15764 = vmatprep.subr.bf16.mxu1 %v18777_v41  ;;  %v2210_v57 = vld [vmem:[#allocation10 + $0x2af8] sm:$0xff]  ;;  %v18838_v41 = vcombine.low %v2185_v31, %v2193_v37 }
 0x866   :  { %15428 = vmatmul.mubr.bf16.vlgmr.msra.gmra.mrb[28].mxu0 %v20758_v29  ;;  %v18856_v61 = vcombine.low %v2202_v50, %v2210_v57 }
 0x867   :  { %15756 = vmatmul.mubr.bf16.vlgmr.msra.gmra.mrb[28].mxu1 %v20758_v29  ;;  %15437 = vmatpush1.bf16.msra.mxu0 %v18774_v7  ;;  %v18808_v29 = vcombine.low %v2154_v5, %v2162_v8  ;;  %v18857_v7 = vcombine.high %v2202_v50, %v2210_v57  ;;  %v2233_v8 = vld [vmem:[#allocation10 + $0x2bb0] sm:$0xff] }
 0x868   :  { %15468 = vmatprep.mubr.bf16.mxu0 %v20760_v33  ;;  %15765 = vmatpush1.bf16.msra.mxu1 %v18776_v2  ;;  %v2218_v2 = vld [vmem:[#allocation10 + $0x2b38] sm:$0xff]  ;;  %v2281_v57 = vld [vmem:[#allocation10 + $0x2d30] sm:$0xff] }
 0x869   :  { %15796 = vmatprep.mubr.bf16.mxu1 %v20760_v33  ;;  %15438 = vmatprep.subr.bf16.mxu0 %v18791_v34  ;;  %v18822_v33 = vcombine.low %v2169_v20, %v2177_v21  ;;  %v2226_v34 = vld [vmem:[#allocation10 + $0x2b78] sm:$0xff] }
 0x86a   :  { %15766 = vmatprep.subr.bf16.mxu1 %v18793_v1  ;;  %v18871_v1 = vcombine.high %v2217_v47, %v2225_v60  ;;  %v18873_v5 = vcombine.high %v2218_v2, %v2226_v34  ;;  %v18872_v20 = vcombine.low %v2218_v2, %v2226_v34  ;;  %v2297_v34 = vld [vmem:[#allocation10 + $0x2db0] sm:$0xff] }
 0x86b   :  { %15439 = vmatpush1.bf16.msra.mxu0 %v18790_v11  ;;  %v2241_v11 = vld [vmem:[#allocation10 + $0x2bf0] sm:$0xff] }
 0x86c   :  { %15767 = vmatpush1.bf16.msra.mxu1 %v18792_v18  ;;  %15440 = vmatprep.subr.bf16.mxu0 %v18807_v38  ;;  %v2234_v18 = vld [vmem:[#allocation10 + $0x2bb8] sm:$0xff]  ;;  %v18887_v21 = vcombine.high %v2233_v8, %v2241_v11 }
 0x86d   :  { %15768 = vmatprep.subr.bf16.mxu1 %v18809_v19  ;;  %v2242_v38 = vld [vmem:[#allocation10 + $0x2bf8] sm:$0xff]  ;;  %v18870_v19 = vcombine.low %v2217_v47, %v2225_v60 }
 0x86e   :  { %v18889_v4 = vcombine.high %v2234_v18, %v2242_v38  ;;  %v18888_v31 = vcombine.low %v2234_v18, %v2242_v38  ;;  %v2313_v38 = vld [vmem:[#allocation10 + $0x2e30] sm:$0xff] }
 0x86f   :  { %15441 = vmatpush1.bf16.msra.mxu0 %v18806_v22  ;;  %v2257_v22 = vld [vmem:[#allocation10 + $0x2c70] sm:$0xff] }
 0x870   :  { %15769 = vmatpush1.bf16.msra.mxu1 %v18808_v29  ;;  %15442 = vmatprep.subr.bf16.mxu0 %v18823_v51  ;;  %v2250_v29 = vld [vmem:[#allocation10 + $0x2c38] sm:$0xff]  ;;  %v18903_v37 = vcombine.high %v2249_v39, %v2257_v22 }
 0x871   :  { %15770 = vmatprep.subr.bf16.mxu1 %v18825_v23  ;;  %v2258_v51 = vld [vmem:[#allocation10 + $0x2c78] sm:$0xff]  ;;  %v18886_v23 = vcombine.low %v2233_v8, %v2241_v11 }
 0x872   :  { %v18905_v26 = vcombine.high %v2250_v29, %v2258_v51  ;;  %v18904_v9 = vcombine.low %v2250_v29, %v2258_v51  ;;  %v2329_v51 = vld [vmem:[#allocation10 + $0x2eb0] sm:$0xff] }
 0x873   :  { %15443 = vmatpush1.bf16.msra.mxu0 %v18822_v33  ;;  %v2273_v33 = vld [vmem:[#allocation10 + $0x2cf0] sm:$0xff] }
 0x874   :  { %15771 = vmatpush1.bf16.msra.mxu1 %v18824_v15  ;;  %15444 = vmatprep.subr.bf16.mxu0 %v18839_v40  ;;  %v2266_v15 = vld [vmem:[#allocation10 + $0x2cb8] sm:$0xff]  ;;  %v18919_v45 = vcombine.high %v2265_v46, %v2273_v33 }
 0x875   :  { %15772 = vmatprep.subr.bf16.mxu1 %v18841_v42  ;;  %v2274_v40 = vld [vmem:[#allocation10 + $0x2cf8] sm:$0xff]  ;;  %v18902_v42 = vcombine.low %v2249_v39, %v2257_v22 }
 0x876   :  { %v18921_v50 = vcombine.high %v2266_v15, %v2274_v40  ;;  %v18920_v47 = vcombine.low %v2266_v15, %v2274_v40  ;;  %v2345_v40 = vld [vmem:[#allocation10 + $0x2f30] sm:$0xff] }
 0x877   :  { %15445 = vmatpush1.bf16.msra.mxu0 %v18838_v41  ;;  %v2289_v41 = vld [vmem:[#allocation10 + $0x2d70] sm:$0xff] }
 0x878   :  { %15773 = vmatpush1.bf16.msra.mxu1 %v18840_v54  ;;  %15446 = vmatprep.subr.bf16.mxu0 %v18855_v58  ;;  %v2282_v54 = vld [vmem:[#allocation10 + $0x2d38] sm:$0xff]  ;;  %v18935_v60 = vcombine.high %v2281_v57, %v2289_v41 }
 0x879   :  { %15774 = vmatprep.subr.bf16.mxu1 %v18857_v7  ;;  %v2290_v58 = vld [vmem:[#allocation10 + $0x2d78] sm:$0xff]  ;;  %v18918_v7 = vcombine.low %v2265_v46, %v2273_v33 }
 0x87a   :  { %v18937_v2 = vcombine.high %v2282_v54, %v2290_v58  ;;  %v18936_v8 = vcombine.low %v2282_v54, %v2290_v58  ;;  %v2361_v58 = vld [vmem:[#allocation10 + $0x2fb0] sm:$0xff] }
 0x87b   :  { %15447 = vmatpush1.bf16.msra.mxu0 %v18854_v55  ;;  %v2305_v55 = vld [vmem:[#allocation10 + $0x2df0] sm:$0xff] }
 0x87c   :  { %15775 = vmatpush1.bf16.msra.mxu1 %v18856_v61  ;;  %15448 = vmatprep.subr.bf16.mxu0 %v18871_v1  ;;  %v2298_v61 = vld [vmem:[#allocation10 + $0x2db8] sm:$0xff]  ;;  %v18951_v11 = vcombine.high %v2297_v34, %v2305_v55 }
 0x87d   :  { %15776 = vmatprep.subr.bf16.mxu1 %v18873_v5  ;;  %v2306_v1 = vld [vmem:[#allocation10 + $0x2df8] sm:$0xff]  ;;  %v18934_v5 = vcombine.low %v2281_v57, %v2289_v41 }
 0x87e   :  { %v18953_v18 = vcombine.high %v2298_v61, %v2306_v1  ;;  %v18952_v39 = vcombine.low %v2298_v61, %v2306_v1  ;;  %v2377_v1 = vld [vmem:[#allocation10 + $0x3030] sm:$0xff] }
 0x87f   :  { %15449 = vmatpush1.bf16.msra.mxu0 %v18870_v19  ;;  %v2321_v19 = vld [vmem:[#allocation10 + $0x2e70] sm:$0xff] }
 0x880   :  { %15777 = vmatpush1.bf16.msra.mxu1 %v18872_v20  ;;  %15450 = vmatprep.subr.bf16.mxu0 %v18887_v21  ;;  %v2314_v20 = vld [vmem:[#allocation10 + $0x2e38] sm:$0xff]  ;;  %v18967_v22 = vcombine.high %v2313_v38, %v2321_v19 }
 0x881   :  { %15778 = vmatprep.subr.bf16.mxu1 %v18889_v4  ;;  %v2322_v21 = vld [vmem:[#allocation10 + $0x2e78] sm:$0xff]  ;;  %v18950_v4 = vcombine.low %v2297_v34, %v2305_v55 }
 0x882   :  { %v18969_v29 = vcombine.high %v2314_v20, %v2322_v21  ;;  %v18968_v46 = vcombine.low %v2314_v20, %v2322_v21  ;;  %v2393_v21 = vld [vmem:[#allocation10 + $0x30b0] sm:$0xff] }
 0x883   :  { %15451 = vmatpush1.bf16.msra.mxu0 %v18886_v23  ;;  %v2337_v23 = vld [vmem:[#allocation10 + $0x2ef0] sm:$0xff] }
 0x884   :  { %15779 = vmatpush1.bf16.msra.mxu1 %v18888_v31  ;;  %15452 = vmatprep.subr.bf16.mxu0 %v18903_v37  ;;  %v2330_v31 = vld [vmem:[#allocation10 + $0x2eb8] sm:$0xff]  ;;  %v18983_v33 = vcombine.high %v2329_v51, %v2337_v23 }
 0x885   :  { %15780 = vmatprep.subr.bf16.mxu1 %v18905_v26  ;;  %v2338_v37 = vld [vmem:[#allocation10 + $0x2ef8] sm:$0xff]  ;;  %v18966_v26 = vcombine.low %v2313_v38, %v2321_v19 }
 0x886   :  { %v18985_v15 = vcombine.high %v2330_v31, %v2338_v37  ;;  %v18984_v57 = vcombine.low %v2330_v31, %v2338_v37  ;;  %v2409_v31 = vld [vmem:[#allocation10 + $0x3130] sm:$0xff] }
 0x887   :  { %15453 = vmatpush1.bf16.msra.mxu0 %v18902_v42  ;;  %v2353_v42 = vld [vmem:[#allocation10 + $0x2f70] sm:$0xff] }
 0x888   :  { %15781 = vmatpush1.bf16.msra.mxu1 %v18904_v9  ;;  %15454 = vmatprep.subr.bf16.mxu0 %v18919_v45  ;;  %v2346_v9 = vld [vmem:[#allocation10 + $0x2f38] sm:$0xff]  ;;  %v18999_v41 = vcombine.high %v2345_v40, %v2353_v42  ;;  %v2417_v37 = vld [vmem:[#allocation10 + $0x3170] sm:$0xff] }
 0x889   :  { %15782 = vmatprep.subr.bf16.mxu1 %v18921_v50  ;;  %v2354_v45 = vld [vmem:[#allocation10 + $0x2f78] sm:$0xff]  ;;  %v18982_v50 = vcombine.low %v2329_v51, %v2337_v23 }
 0x88a   :  { %v19001_v54 = vcombine.high %v2346_v9, %v2354_v45  ;;  %v19000_v34 = vcombine.low %v2346_v9, %v2354_v45  ;;  %v2425_v45 = vld [vmem:[#allocation10 + $0x31b0] sm:$0xff] }
 0x88b   :  { %15455 = vmatpush1.bf16.msra.mxu0 %v18918_v7  ;;  %v2369_v7 = vld [vmem:[#allocation10 + $0x2ff0] sm:$0xff] }
 0x88c   :  { %15783 = vmatpush1.bf16.msra.mxu1 %v18920_v47  ;;  %15456 = vmatprep.subr.bf16.mxu0 %v18935_v60  ;;  %v2362_v47 = vld [vmem:[#allocation10 + $0x2fb8] sm:$0xff]  ;;  %v19015_v55 = vcombine.high %v2361_v58, %v2369_v7 }
 0x88d   :  { %15784 = vmatprep.subr.bf16.mxu1 %v18937_v2  ;;  %v2370_v60 = vld [vmem:[#allocation10 + $0x2ff8] sm:$0xff]  ;;  %v18998_v2 = vcombine.low %v2345_v40, %v2353_v42  ;;  %v19063_v42 = vcombine.high %v2409_v31, %v2417_v37 }
 0x88e   :  { %v19017_v61 = vcombine.high %v2362_v47, %v2370_v60  ;;  %v19016_v38 = vcombine.low %v2362_v47, %v2370_v60  ;;  %v2441_v47 = vld [vmem:[#allocation10 + $0x3230] sm:$0xff] }
 0x88f   :  { %15457 = vmatpush1.bf16.msra.mxu0 %v18934_v5  ;;  %v2385_v5 = vld [vmem:[#allocation10 + $0x3070] sm:$0xff] }
 0x890   :  { %15785 = vmatpush1.bf16.msra.mxu1 %v18936_v8  ;;  %15458 = vmatprep.subr.bf16.mxu0 %v18951_v11  ;;  %v2378_v8 = vld [vmem:[#allocation10 + $0x3038] sm:$0xff]  ;;  %v19031_v19 = vcombine.high %v2377_v1, %v2385_v5  ;;  %v2449_v60 = vld [vmem:[#allocation10 + $0x3270] sm:$0xff] }
 0x891   :  { %15786 = vmatprep.subr.bf16.mxu1 %v18953_v18  ;;  %v2386_v11 = vld [vmem:[#allocation10 + $0x3078] sm:$0xff]  ;;  %v19014_v18 = vcombine.low %v2361_v58, %v2369_v7 }
 0x892   :  { %v19033_v20 = vcombine.high %v2378_v8, %v2386_v11  ;;  %v19032_v51 = vcombine.low %v2378_v8, %v2386_v11  ;;  %v2465_v8 = vld [vmem:[#allocation10 + $0x32f0] sm:$0xff]  ;;  %v2458_v11 = vld [vmem:[#allocation10 + $0x32b8] sm:$0xff] }
 0x893   :  { %15459 = vmatpush1.bf16.msra.mxu0 %v18950_v4  ;;  %v2401_v4 = vld [vmem:[#allocation10 + $0x30f0] sm:$0xff] }
 0x894   :  { %15787 = vmatpush1.bf16.msra.mxu1 %v18952_v39  ;;  %15460 = vmatprep.subr.bf16.mxu0 %v18967_v22  ;;  %v19030_v39 = vcombine.low %v2377_v1, %v2385_v5  ;;  %v2394_v22 = vld [vmem:[#allocation10 + $0x30b8] sm:$0xff]  ;;  %v19047_v23 = vcombine.high %v2393_v21, %v2401_v4  ;;  %v2457_v5 = vld [vmem:[#allocation10 + $0x32b0] sm:$0xff] }
 0x895   :  { %15788 = vmatprep.subr.bf16.mxu1 %v18969_v29  ;;  %v2402_v29 = vld [vmem:[#allocation10 + $0x30f8] sm:$0xff] }
 0x896   :  { %v19048_v40 = vcombine.low %v2394_v22, %v2402_v29 }
 0x897   :  { %15461 = vmatpush1.bf16.msra.mxu0 %v18966_v26  ;;  %v19049_v26 = vcombine.high %v2394_v22, %v2402_v29  ;;  %v2474_v22 = vld [vmem:[#allocation10 + $0x3338] sm:$0xff] }
 0x898   :  { %15789 = vmatpush1.bf16.msra.mxu1 %v18968_v46  ;;  %15462 = vmatprep.subr.bf16.mxu0 %v18983_v33  ;;  %v2410_v46 = vld [vmem:[#allocation10 + $0x3138] sm:$0xff] }
 0x899   :  { %15790 = vmatprep.subr.bf16.mxu1 %v18985_v15  ;;  %v2418_v33 = vld [vmem:[#allocation10 + $0x3178] sm:$0xff]  ;;  %v19046_v15 = vcombine.low %v2393_v21, %v2401_v4  ;;  %v2473_v4 = vld [vmem:[#allocation10 + $0x3330] sm:$0xff] }
 0x89a   :  { %v19065_v9 = vcombine.high %v2410_v46, %v2418_v33  ;;  %v2482_v29 = vld [vmem:[#allocation10 + $0x3378] sm:$0xff] }
 0x89b   :  { %15463 = vmatpush1.bf16.msra.mxu0 %v18982_v50  ;;  %v2433_v50 = vld [vmem:[#allocation10 + $0x31f0] sm:$0xff] }
 0x89c   :  { %15791 = vmatpush1.bf16.msra.mxu1 %v18984_v57  ;;  %15464 = vmatprep.subr.bf16.mxu0 %v18999_v41  ;;  %v2426_v57 = vld [vmem:[#allocation10 + $0x31b8] sm:$0xff]  ;;  %v19079_v58 = vcombine.high %v2425_v45, %v2433_v50 }
 0x89d   :  { %15792 = vmatprep.subr.bf16.mxu1 %v19001_v54  ;;  %v2434_v41 = vld [vmem:[#allocation10 + $0x31f8] sm:$0xff]  ;;  %v19062_v54 = vcombine.low %v2409_v31, %v2417_v37  ;;  %v19129_v37 = vcombine.high %v2474_v22, %v2482_v29 }
 0x89e   :  { %v19081_v7 = vcombine.high %v2426_v57, %v2434_v41 }
 0x89f   :  { %15465 = vmatpush1.bf16.msra.mxu0 %v18998_v2  ;;  %v2442_v2 = vld [vmem:[#allocation10 + $0x3238] sm:$0xff] }
 0x8a0   :  { %15793 = vmatpush1.bf16.msra.mxu1 %v19000_v34  ;;  %15466 = vmatprep.subr.bf16.mxu0 %v19015_v55  ;;  %v2450_v34 = vld [vmem:[#allocation10 + $0x3278] sm:$0xff]  ;;  %v19080_v55 = vcombine.low %v2426_v57, %v2434_v41  ;;  %v2513_v57 = vld [vmem:[#allocation10 + $0x3470] sm:$0xff] }
 0x8a1   :  { %15794 = vmatprep.subr.bf16.mxu1 %v19017_v61  ;;  %v19095_v61 = vcombine.high %v2441_v47, %v2449_v60  ;;  %v19097_v1 = vcombine.high %v2442_v2, %v2450_v34  ;;  %v2506_v41 = vld [vmem:[#allocation10 + $0x3438] sm:$0xff] }
 0x8a3   :  { %15467 = vmatpush1.bf16.msra.mxu0 %v19014_v18  ;;  %v2466_v18 = vld [vmem:[#allocation10 + $0x32f8] sm:$0xff] }
 0x8a4   :  { %15795 = vmatpush1.bf16.msra.mxu1 %v19016_v38  ;;  %15477 = vmatprep.subr.bf16.mxu0 %v19031_v19  ;;  %v19094_v38 = vcombine.low %v2441_v47, %v2449_v60  ;;  %v19096_v19 = vcombine.low %v2442_v2, %v2450_v34  ;;  %v19113_v21 = vcombine.high %v2458_v11, %v2466_v18  ;;  %v2521_v60 = vld [vmem:[#allocation10 + $0x34b0] sm:$0xff]  ;;  %v2522_v34 = vld [vmem:[#allocation10 + $0x34b8] sm:$0xff] }
 0x8a5   :  { %15805 = vmatprep.subr.bf16.mxu1 %v19033_v20  ;;  %v19111_v20 = vcombine.high %v2457_v5, %v2465_v8  ;;  %v2529_v2 = vld [vmem:[#allocation10 + $0x34f0] sm:$0xff] }
 0x8a6   :  { %15469 = vmatmul.mubr.bf16.vlgmr.msra.gmra.mrb[28].mxu0 %v20776_v53 }
 0x8a7   :  { %15797 = vmatmul.mubr.bf16.vlgmr.msra.gmra.mrb[28].mxu1 %v20776_v53  ;;  %15478 = vmatpush1.bf16.msra.mxu0 %v19030_v39  ;;  %v19064_v53 = vcombine.low %v2410_v46, %v2418_v33  ;;  %v2481_v39 = vld [vmem:[#allocation10 + $0x3370] sm:$0xff]  ;;  %v2490_v33 = vld [vmem:[#allocation10 + $0x33b8] sm:$0xff] }
 0x8a8   :  { %15509 = vmatprep.mubr.bf16.mxu0 %v20778_v6  ;;  %15806 = vmatpush1.bf16.msra.mxu1 %v19032_v51  ;;  %v19110_v51 = vcombine.low %v2457_v5, %v2465_v8  ;;  %v19127_v31 = vcombine.high %v2473_v4, %v2481_v39  ;;  %v2497_v46 = vld [vmem:[#allocation10 + $0x33f0] sm:$0xff] }
 0x8a9   :  { %15837 = vmatprep.mubr.bf16.mxu1 %v20778_v6  ;;  %15479 = vmatprep.subr.bf16.mxu0 %v19047_v23  ;;  %v19078_v6 = vcombine.low %v2425_v45, %v2433_v50  ;;  %v19112_v23 = vcombine.low %v2458_v11, %v2466_v18  ;;  %v2505_v50 = vld [vmem:[#allocation10 + $0x3430] sm:$0xff]  ;;  %v2538_v18 = vld [vmem:[#allocation10 + $0x3538] sm:$0xff] }
 0x8aa   :  { %15807 = vmatprep.subr.bf16.mxu1 %v19049_v26  ;;  %v2489_v26 = vld [vmem:[#allocation10 + $0x33b0] sm:$0xff] }
 0x8ab   :  { %15480 = vmatpush1.bf16.msra.mxu0 %v19046_v15  ;;  %v2498_v15 = vld [vmem:[#allocation10 + $0x33f8] sm:$0xff]  ;;  %v2537_v8 = vld [vmem:[#allocation10 + $0x3530] sm:$0xff] }
 0x8ac   :  { %15808 = vmatpush1.bf16.msra.mxu1 %v19048_v40  ;;  %15481 = vmatprep.subr.bf16.mxu0 %v19063_v42  ;;  %v19126_v40 = vcombine.low %v2473_v4, %v2481_v39  ;;  %v19128_v42 = vcombine.low %v2474_v22, %v2482_v29  ;;  %v19145_v45 = vcombine.high %v2490_v33, %v2498_v15  ;;  %v2545_v11 = vld [vmem:[#allocation10 + $0x3570] sm:$0xff]  ;;  %v2554_v29 = vld [vmem:[#allocation10 + $0x35b8] sm:$0xff] }
 0x8ad   :  { %15809 = vmatprep.subr.bf16.mxu1 %v19065_v9  ;;  %v19143_v9 = vcombine.high %v2489_v26, %v2497_v46  ;;  %v2553_v39 = vld [vmem:[#allocation10 + $0x35b0] sm:$0xff] }
 0x8ae   :  { %v2561_v22 = vld [vmem:[#allocation10 + $0x35f0] sm:$0xff] }
 0x8af   :  { %15482 = vmatpush1.bf16.msra.mxu0 %v19062_v54  ;;  %v2514_v54 = vld [vmem:[#allocation10 + $0x3478] sm:$0xff] }
 0x8b0   :  { %15810 = vmatpush1.bf16.msra.mxu1 %v19064_v53  ;;  %15483 = vmatprep.subr.bf16.mxu0 %v19079_v58  ;;  %v19142_v53 = vcombine.low %v2489_v26, %v2497_v46  ;;  %v19144_v58 = vcombine.low %v2490_v33, %v2498_v15  ;;  %v19161_v47 = vcombine.high %v2506_v41, %v2514_v54  ;;  %v2569_v46 = vld [vmem:[#allocation10 + $0x3630] sm:$0xff]  ;;  %v2570_v15 = vld [vmem:[#allocation10 + $0x3638] sm:$0xff] }
 0x8b1   :  { %15811 = vmatprep.subr.bf16.mxu1 %v19081_v7  ;;  %v19159_v7 = vcombine.high %v2505_v50, %v2513_v57  ;;  %v2577_v33 = vld [vmem:[#allocation10 + $0x3670] sm:$0xff] }
 0x8b3   :  { %15484 = vmatpush1.bf16.msra.mxu0 %v19078_v6  ;;  %v2530_v6 = vld [vmem:[#allocation10 + $0x34f8] sm:$0xff] }
 0x8b4   :  { %15812 = vmatpush1.bf16.msra.mxu1 %v19080_v55  ;;  %15485 = vmatprep.subr.bf16.mxu0 %v19095_v61  ;;  %v19158_v55 = vcombine.low %v2505_v50, %v2513_v57  ;;  %v19160_v61 = vcombine.low %v2506_v41, %v2514_v54  ;;  %v19177_v5 = vcombine.high %v2522_v34, %v2530_v6  ;;  %v2585_v57 = vld [vmem:[#allocation10 + $0x36b0] sm:$0xff]  ;;  %v2586_v54 = vld [vmem:[#allocation10 + $0x36b8] sm:$0xff] }
 0x8b5   :  { %15813 = vmatprep.subr.bf16.mxu1 %v19097_v1  ;;  %v19175_v1 = vcombine.high %v2521_v60, %v2529_v2  ;;  %v2593_v41 = vld [vmem:[#allocation10 + $0x36f0] sm:$0xff] }
 0x8b7   :  { %15486 = vmatpush1.bf16.msra.mxu0 %v19094_v38  ;;  %v2546_v38 = vld [vmem:[#allocation10 + $0x3578] sm:$0xff] }
 0x8b8   :  { %15814 = vmatpush1.bf16.msra.mxu1 %v19096_v19  ;;  %15487 = vmatprep.subr.bf16.mxu0 %v19111_v20  ;;  %v19174_v19 = vcombine.low %v2521_v60, %v2529_v2  ;;  %v19176_v20 = vcombine.low %v2522_v34, %v2530_v6  ;;  %v19193_v4 = vcombine.high %v2538_v18, %v2546_v38  ;;  %v2601_v2 = vld [vmem:[#allocation10 + $0x3730] sm:$0xff]  ;;  %v2602_v6 = vld [vmem:[#allocation10 + $0x3738] sm:$0xff] }
 0x8b9   :  { %15815 = vmatprep.subr.bf16.mxu1 %v19113_v21  ;;  %v19191_v21 = vcombine.high %v2537_v8, %v2545_v11  ;;  %v2609_v34 = vld [vmem:[#allocation10 + $0x3770] sm:$0xff] }
 0x8bb   :  { %15488 = vmatpush1.bf16.msra.mxu0 %v19110_v51  ;;  %v2562_v51 = vld [vmem:[#allocation10 + $0x35f8] sm:$0xff] }
 0x8bc   :  { %15816 = vmatpush1.bf16.msra.mxu1 %v19112_v23  ;;  %15489 = vmatprep.subr.bf16.mxu0 %v19127_v31  ;;  %v19190_v23 = vcombine.low %v2537_v8, %v2545_v11  ;;  %v19192_v31 = vcombine.low %v2538_v18, %v2546_v38  ;;  %v19209_v26 = vcombine.high %v2554_v29, %v2562_v51  ;;  %v2617_v11 = vld [vmem:[#allocation10 + $0x37b0] sm:$0xff]  ;;  %v2618_v38 = vld [vmem:[#allocation10 + $0x37b8] sm:$0xff] }
 0x8bd   :  { %15817 = vmatprep.subr.bf16.mxu1 %v19129_v37  ;;  %v19207_v37 = vcombine.high %v2553_v39, %v2561_v22  ;;  %v2625_v18 = vld [vmem:[#allocation10 + $0x37f0] sm:$0xff] }
 0x8bf   :  { %15490 = vmatpush1.bf16.msra.mxu0 %v19126_v40  ;;  %v2578_v40 = vld [vmem:[#allocation10 + $0x3678] sm:$0xff] }
 0x8c0   :  { %15818 = vmatpush1.bf16.msra.mxu1 %v19128_v42  ;;  %15491 = vmatprep.subr.bf16.mxu0 %v19143_v9  ;;  %v19206_v42 = vcombine.low %v2553_v39, %v2561_v22  ;;  %v19208_v9 = vcombine.low %v2554_v29, %v2562_v51  ;;  %v19225_v50 = vcombine.high %v2570_v15, %v2578_v40  ;;  %v2633_v22 = vld [vmem:[#allocation10 + $0x3830] sm:$0xff]  ;;  %v2634_v51 = vld [vmem:[#allocation10 + $0x3838] sm:$0xff] }
 0x8c1   :  { %15819 = vmatprep.subr.bf16.mxu1 %v19145_v45  ;;  %v19223_v45 = vcombine.high %v2569_v46, %v2577_v33  ;;  %v2641_v29 = vld [vmem:[#allocation10 + $0x3870] sm:$0xff] }
 0x8c3   :  { %15492 = vmatpush1.bf16.msra.mxu0 %v19142_v53  ;;  %v2594_v53 = vld [vmem:[#allocation10 + $0x36f8] sm:$0xff] }
 0x8c4   :  { %15820 = vmatpush1.bf16.msra.mxu1 %v19144_v58  ;;  %15493 = vmatprep.subr.bf16.mxu0 %v19159_v7  ;;  %v19222_v58 = vcombine.low %v2569_v46, %v2577_v33  ;;  %v19224_v7 = vcombine.low %v2570_v15, %v2578_v40  ;;  %v19241_v60 = vcombine.high %v2586_v54, %v2594_v53  ;;  %v2649_v33 = vld [vmem:[#allocation10 + $0x38b0] sm:$0xff] }
 0x8c5   :  { %15821 = vmatprep.subr.bf16.mxu1 %v19161_v47  ;;  %v19239_v47 = vcombine.high %v2585_v57, %v2593_v41  ;;  %v2657_v15 = vld [vmem:[#allocation10 + $0x38f0] sm:$0xff]  ;;  %v19286_v40 = vcombine.low %v2633_v22, %v2641_v29 }
 0x8c7   :  { %15494 = vmatpush1.bf16.msra.mxu0 %v19158_v55  ;;  %v2610_v55 = vld [vmem:[#allocation10 + $0x3778] sm:$0xff] }
 0x8c8   :  { %15822 = vmatpush1.bf16.msra.mxu1 %v19160_v61  ;;  %15495 = vmatprep.subr.bf16.mxu0 %v19175_v1  ;;  %v19238_v61 = vcombine.low %v2585_v57, %v2593_v41  ;;  %v19240_v1 = vcombine.low %v2586_v54, %v2594_v53  ;;  %v19257_v8 = vcombine.high %v2602_v6, %v2610_v55  ;;  %v2665_v57 = vld [vmem:[#allocation10 + $0x3930] sm:$0xff]  ;;  %v2666_v53 = vld [vmem:[#allocation10 + $0x3938] sm:$0xff] }
 0x8c9   :  { %15823 = vmatprep.subr.bf16.mxu1 %v19177_v5  ;;  %v19255_v5 = vcombine.high %v2601_v2, %v2609_v34  ;;  %v2673_v41 = vld [vmem:[#allocation10 + $0x3970] sm:$0xff] }
 0x8cb   :  { %15496 = vmatpush1.bf16.msra.mxu0 %v19174_v19  ;;  %v2626_v19 = vld [vmem:[#allocation10 + $0x37f8] sm:$0xff] }
 0x8cc   :  { %15824 = vmatpush1.bf16.msra.mxu1 %v19176_v20  ;;  %15497 = vmatprep.subr.bf16.mxu0 %v19191_v21  ;;  %v19254_v20 = vcombine.low %v2601_v2, %v2609_v34  ;;  %v19256_v21 = vcombine.low %v2602_v6, %v2610_v55  ;;  %v19273_v39 = vcombine.high %v2618_v38, %v2626_v19  ;;  %v2681_v34 = vld [vmem:[#allocation10 + $0x39b0] sm:$0xff]  ;;  %v2682_v55 = vld [vmem:[#allocation10 + $0x39b8] sm:$0xff] }
 0x8cd   :  { %15825 = vmatprep.subr.bf16.mxu1 %v19193_v4  ;;  %v19271_v4 = vcombine.high %v2617_v11, %v2625_v18  ;;  %v2689_v6 = vld [vmem:[#allocation10 + $0x39f0] sm:$0xff] }
 0x8cf   :  { %15498 = vmatpush1.bf16.msra.mxu0 %v19190_v23  ;;  %v2642_v23 = vld [vmem:[#allocation10 + $0x3878] sm:$0xff] }
 0x8d0   :  { %15826 = vmatpush1.bf16.msra.mxu1 %v19192_v31  ;;  %15499 = vmatprep.subr.bf16.mxu0 %v19207_v37  ;;  %v19270_v31 = vcombine.low %v2617_v11, %v2625_v18  ;;  %v19272_v37 = vcombine.low %v2618_v38, %v2626_v19  ;;  %v19289_v46 = vcombine.high %v2634_v51, %v2642_v23  ;;  %v2697_v11 = vld [vmem:[#allocation10 + $0x3a30] sm:$0xff]  ;;  %v2698_v38 = vld [vmem:[#allocation10 + $0x3a38] sm:$0xff] }
 0x8d1   :  { %15827 = vmatprep.subr.bf16.mxu1 %v19209_v26  ;;  %v19287_v26 = vcombine.high %v2633_v22, %v2641_v29  ;;  %v2705_v18 = vld [vmem:[#allocation10 + $0x3a70] sm:$0xff]  ;;  %v2706_v19 = vld [vmem:[#allocation10 + $0x3a78] sm:$0xff] }
 0x8d2   :  { %v2721_v22 = vld [vmem:[#allocation10 + $0x3af0] sm:$0xff]  ;;  %v2714_v29 = vld [vmem:[#allocation10 + $0x3ab8] sm:$0xff] }
 0x8d3   :  { %15500 = vmatpush1.bf16.msra.mxu0 %v19206_v42  ;;  %v2650_v42 = vld [vmem:[#allocation10 + $0x38b8] sm:$0xff] }
 0x8d4   :  { %15828 = vmatpush1.bf16.msra.mxu1 %v19208_v9  ;;  %15501 = vmatprep.subr.bf16.mxu0 %v19223_v45  ;;  %v2658_v9 = vld [vmem:[#allocation10 + $0x38f8] sm:$0xff]  ;;  %v19288_v45 = vcombine.low %v2634_v51, %v2642_v23  ;;  %v19350_v23 = vcombine.low %v2697_v11, %v2705_v18 }
 0x8d5   :  { %15829 = vmatprep.subr.bf16.mxu1 %v19225_v50  ;;  %v19303_v50 = vcombine.high %v2649_v33, %v2657_v15  ;;  %v19305_v54 = vcombine.high %v2650_v42, %v2658_v9  ;;  %v2722_v51 = vld [vmem:[#allocation10 + $0x3af8] sm:$0xff] }
 0x8d7   :  { %15502 = vmatpush1.bf16.msra.mxu0 %v19222_v58  ;;  %v2674_v58 = vld [vmem:[#allocation10 + $0x3978] sm:$0xff] }
 0x8d8   :  { %15830 = vmatpush1.bf16.msra.mxu1 %v19224_v7  ;;  %15503 = vmatprep.subr.bf16.mxu0 %v19239_v47  ;;  %v19302_v7 = vcombine.low %v2649_v33, %v2657_v15  ;;  %v19304_v47 = vcombine.low %v2650_v42, %v2658_v9  ;;  %v19321_v2 = vcombine.high %v2666_v53, %v2674_v58  ;;  %v2737_v33 = vld [vmem:[#allocation10 + $0x3b70] sm:$0xff]  ;;  %v2730_v15 = vld [vmem:[#allocation10 + $0x3b38] sm:$0xff] }
 0x8d9   :  { %15831 = vmatprep.subr.bf16.mxu1 %v19241_v60  ;;  %v19319_v60 = vcombine.high %v2665_v57, %v2673_v41  ;;  %v19368_v9 = vcombine.low %v2714_v29, %v2722_v51 }
 0x8db   :  { %15504 = vmatpush1.bf16.msra.mxu0 %v19238_v61  ;;  %v2690_v61 = vld [vmem:[#allocation10 + $0x39f8] sm:$0xff] }
 0x8dc   :  { %15832 = vmatpush1.bf16.msra.mxu1 %v19240_v1  ;;  %15505 = vmatprep.subr.bf16.mxu0 %v19255_v5  ;;  %v19318_v1 = vcombine.low %v2665_v57, %v2673_v41  ;;  %v19335_v5 = vcombine.high %v2681_v34, %v2689_v6  ;;  %v2745_v57 = vld [vmem:[#allocation10 + $0x3bb0] sm:$0xff] }
 0x8dd   :  { %15833 = vmatprep.subr.bf16.mxu1 %v19257_v8  ;;  %v19337_v8 = vcombine.high %v2682_v55, %v2690_v61  ;;  %v2753_v41 = vld [vmem:[#allocation10 + $0x3bf0] sm:$0xff] }
 0x8df   :  { %15506 = vmatpush1.bf16.msra.mxu0 %v19254_v20  ;;  %v19336_v20 = vcombine.low %v2682_v55, %v2690_v61  ;;  %v2770_v55 = vld [vmem:[#allocation10 + $0x3c78] sm:$0xff]  ;;  %v19398_v61 = vcombine.low %v2745_v57, %v2753_v41 }
 0x8e0   :  { %15834 = vmatpush1.bf16.msra.mxu1 %v19256_v21  ;;  %15507 = vmatprep.subr.bf16.mxu0 %v19271_v4  ;;  %v19351_v21 = vcombine.high %v2697_v11, %v2705_v18  ;;  %v19353_v4 = vcombine.high %v2698_v38, %v2706_v19  ;;  %v2785_v11 = vld [vmem:[#allocation10 + $0x3cf0] sm:$0xff]  ;;  %v2778_v18 = vld [vmem:[#allocation10 + $0x3cb8] sm:$0xff] }
 0x8e1   :  { %15835 = vmatprep.subr.bf16.mxu1 %v19273_v39  ;;  %v2713_v39 = vld [vmem:[#allocation10 + $0x3ab0] sm:$0xff] }
 0x8e2   :  { %v19366_v42 = vcombine.low %v2713_v39, %v2721_v22 }
 0x8e3   :  { %15508 = vmatpush1.bf16.msra.mxu0 %v19270_v31  ;;  %v19352_v31 = vcombine.low %v2698_v38, %v2706_v19  ;;  %v2786_v38 = vld [vmem:[#allocation10 + $0x3cf8] sm:$0xff] }
 0x8e4   :  { %15836 = vmatpush1.bf16.msra.mxu1 %v19272_v37  ;;  %15518 = vmatprep.subr.bf16.mxu0 %v19287_v26  ;;  %v19367_v37 = vcombine.high %v2713_v39, %v2721_v22  ;;  %v19369_v26 = vcombine.high %v2714_v29, %v2722_v51  ;;  %v2801_v39 = vld [vmem:[#allocation10 + $0x3d70] sm:$0xff]  ;;  %v2794_v22 = vld [vmem:[#allocation10 + $0x3d38] sm:$0xff] }
 0x8e5   :  { %15846 = vmatprep.subr.bf16.mxu1 %v19289_v46  ;;  %v2729_v46 = vld [vmem:[#allocation10 + $0x3b30] sm:$0xff]  ;;  %v2802_v29 = vld [vmem:[#allocation10 + $0x3d78] sm:$0xff] }
 0x8e6   :  { %15510 = vmatmul.mubr.bf16.vlgmr.msra.gmra.mrb[28].mxu0 %v20792_v32 }
 0x8e7   :  { %15838 = vmatmul.mubr.bf16.vlgmr.msra.gmra.mrb[28].mxu1 %v20792_v32  ;;  %15519 = vmatpush1.bf16.msra.mxu0 %v19286_v40  ;;  %v19320_v32 = vcombine.low %v2666_v53, %v2674_v58  ;;  %v2738_v40 = vld [vmem:[#allocation10 + $0x3b78] sm:$0xff]  ;;  %v19382_v58 = vcombine.low %v2729_v46, %v2737_v33 }
 0x8e8   :  { %15550 = vmatprep.mubr.bf16.mxu0 %v20794_v10  ;;  %15847 = vmatpush1.bf16.msra.mxu1 %v19288_v45  ;;  %v19383_v45 = vcombine.high %v2729_v46, %v2737_v33  ;;  %v2754_v53 = vld [vmem:[#allocation10 + $0x3bf8] sm:$0xff]  ;;  %v2817_v46 = vld [vmem:[#allocation10 + $0x3df0] sm:$0xff] }
 0x8e9   :  { %15878 = vmatprep.mubr.bf16.mxu1 %v20794_v10  ;;  %15520 = vmatprep.subr.bf16.mxu0 %v19303_v50  ;;  %v19334_v10 = vcombine.low %v2681_v34, %v2689_v6  ;;  %v19385_v50 = vcombine.high %v2730_v15, %v2738_v40  ;;  %v2769_v34 = vld [vmem:[#allocation10 + $0x3c70] sm:$0xff]  ;;  %v2762_v6 = vld [vmem:[#allocation10 + $0x3c38] sm:$0xff] }
 0x8ea   :  { %15848 = vmatprep.subr.bf16.mxu1 %v19305_v54  ;;  %v2746_v54 = vld [vmem:[#allocation10 + $0x3bb8] sm:$0xff] }
 0x8eb   :  { %15521 = vmatpush1.bf16.msra.mxu0 %v19302_v7  ;;  %v19384_v7 = vcombine.low %v2730_v15, %v2738_v40  ;;  %v2810_v33 = vld [vmem:[#allocation10 + $0x3db8] sm:$0xff] }
 0x8ec   :  { %15849 = vmatpush1.bf16.msra.mxu1 %v19304_v47  ;;  %15522 = vmatprep.subr.bf16.mxu0 %v19319_v60  ;;  %v19399_v47 = vcombine.high %v2745_v57, %v2753_v41  ;;  %v19401_v60 = vcombine.high %v2746_v54, %v2754_v53  ;;  %v2818_v15 = vld [vmem:[#allocation10 + $0x3df8] sm:$0xff]  ;;  %v2833_v57 = vld [vmem:[#allocation10 + $0x3e70] sm:$0xff] }
 0x8ed   :  { %15850 = vmatprep.subr.bf16.mxu1 %v19321_v2  ;;  %v2761_v2 = vld [vmem:[#allocation10 + $0x3c30] sm:$0xff]  ;;  %v2826_v41 = vld [vmem:[#allocation10 + $0x3e38] sm:$0xff] }
 0x8ee   :  { %v19414_v19 = vcombine.low %v2761_v2, %v2769_v34 }
 0x8ef   :  { %15523 = vmatpush1.bf16.msra.mxu0 %v19318_v1  ;;  %v19400_v1 = vcombine.low %v2746_v54, %v2754_v53  ;;  %v2834_v54 = vld [vmem:[#allocation10 + $0x3e78] sm:$0xff] }
 0x8f0   :  { %15851 = vmatpush1.bf16.msra.mxu1 %v19320_v32  ;;  %15524 = vmatprep.subr.bf16.mxu0 %v19335_v5  ;;  %v19415_v32 = vcombine.high %v2761_v2, %v2769_v34  ;;  %v19417_v5 = vcombine.high %v2762_v6, %v2770_v55  ;;  %v2849_v2 = vld [vmem:[#allocation10 + $0x3ef0] sm:$0xff]  ;;  %v2842_v34 = vld [vmem:[#allocation10 + $0x3eb8] sm:$0xff] }
 0x8f1   :  { %15852 = vmatprep.subr.bf16.mxu1 %v19337_v8  ;;  %v2777_v8 = vld [vmem:[#allocation10 + $0x3cb0] sm:$0xff] }
 0x8f2   :  { %v19430_v51 = vcombine.low %v2777_v8, %v2785_v11 }
 0x8f3   :  { %15525 = vmatpush1.bf16.msra.mxu0 %v19334_v10  ;;  %v19416_v10 = vcombine.low %v2762_v6, %v2770_v55  ;;  %v2850_v6 = vld [vmem:[#allocation10 + $0x3ef8] sm:$0xff] }
 0x8f4   :  { %15853 = vmatpush1.bf16.msra.mxu1 %v19336_v20  ;;  %15526 = vmatprep.subr.bf16.mxu0 %v19351_v21  ;;  %v19431_v20 = vcombine.high %v2777_v8, %v2785_v11  ;;  %v19433_v21 = vcombine.high %v2778_v18, %v2786_v38  ;;  %v2865_v8 = vld [vmem:[#allocation10 + $0x3f70] sm:$0xff]  ;;  %v2858_v11 = vld [vmem:[#allocation10 + $0x3f38] sm:$0xff] }
 0x8f5   :  { %15854 = vmatprep.subr.bf16.mxu1 %v19353_v4  ;;  %v2793_v4 = vld [vmem:[#allocation10 + $0x3d30] sm:$0xff] }
 0x8f6   :  { %v19446_v40 = vcombine.low %v2793_v4, %v2801_v39 }
 0x8f7   :  { %15527 = vmatpush1.bf16.msra.mxu0 %v19350_v23  ;;  %v19432_v23 = vcombine.low %v2778_v18, %v2786_v38  ;;  %v2866_v18 = vld [vmem:[#allocation10 + $0x3f78] sm:$0xff]  ;;  %v20925_v38 = vld [vmem:[#allocation12] sm:$0xff] }
 0x8f8   :  { %15855 = vmatpush1.bf16.msra.mxu1 %v19352_v31  ;;  %15528 = vmatprep.subr.bf16.mxu0 %v19367_v37  ;;  %v19447_v31 = vcombine.high %v2793_v4, %v2801_v39  ;;  %v19449_v37 = vcombine.high %v2794_v22, %v2802_v29  ;;  %v2873_v4 = vld [vmem:[#allocation10 + $0x3fb0] sm:$0xff] }
 0x8f9   :  { %15856 = vmatprep.subr.bf16.mxu1 %v19369_v26  ;;  %v2809_v26 = vld [vmem:[#allocation10 + $0x3db0] sm:$0xff] }
 0x8fa   :  { %v19462_v53 = vcombine.low %v2809_v26, %v2817_v46  ;;  %v2881_v39 = vld [vmem:[#allocation10 + $0x3ff0] sm:$0xff] }
 0x8fb   :  { %15529 = vmatpush1.bf16.msra.mxu0 %v19366_v42  ;;  %v19448_v42 = vcombine.low %v2794_v22, %v2802_v29  ;;  %v2894_v22 = vrot.slane %v20925_v38, %v20649_v16  ;;  %v2874_v29 = vld [vmem:[#allocation10 + $0x3fb8] sm:$0xff] }
 0x8fc   :  { %15857 = vmatpush1.bf16.msra.mxu1 %v19368_v9  ;;  %15530 = vmatprep.subr.bf16.mxu0 %v19383_v45  ;;  %v19463_v9 = vcombine.high %v2809_v26, %v2817_v46  ;;  %v19465_v45 = vcombine.high %v2810_v33, %v2818_v15  ;;  %v19527_v26 = vcombine.high %v2873_v4, %v2881_v39 }
 0x8fd   :  { %15858 = vmatprep.subr.bf16.mxu1 %v19385_v50  ;;  %v2825_v50 = vld [vmem:[#allocation10 + $0x3e30] sm:$0xff] }
 0x8fe   :  { %v19478_v55 = vcombine.low %v2825_v50, %v2833_v57 }
 0x8ff   :  { %15531 = vmatpush1.bf16.msra.mxu0 %v19382_v58  ;;  %v19464_v58 = vcombine.low %v2810_v33, %v2818_v15  ;;  %v19884_v33 = vadd.f32 %v20825_v27, %v2894_v22  ;;  %v20141_v27 = vld [vmem:[%s21398_s5] sm:$0xff]   ;;  %v20164_v22 = vld [vmem:[%s21398_s5 + $0xf0] sm:$0xff]  }
 0x900   :  { %15859 = vmatpush1.bf16.msra.mxu1 %v19384_v7  ;;  %15532 = vmatprep.subr.bf16.mxu0 %v19399_v47  ;;  %v19479_v7 = vcombine.high %v2825_v50, %v2833_v57  ;;  %v19481_v47 = vcombine.high %v2826_v41, %v2834_v54 }
 0x901   :  { %15860 = vmatprep.subr.bf16.mxu1 %v19401_v60  ;;  %v2841_v60 = vld [vmem:[#allocation10 + $0x3eb0] sm:$0xff]  ;;  %v15888_v50 = vmax.f32 %v19884_v33, 0.0  ;;  %v20168_v33 = vld [vmem:[%s21398_s5 + $0xf8] sm:$0xff]  }
 0x903   :  { %15533 = vmatpush1.bf16.msra.mxu0 %v19398_v61  ;;  %v19480_v61 = vcombine.low %v2826_v41, %v2834_v54  ;;  %v20143_v41 = vld [vmem:[%s21398_s5 + $0x48] sm:$0xff]   ;;  %v15905_v54 = vpack.c.bf16 %v15888_v50, %v15888_v50 }
 0x904   :  { %15861 = vmatpush1.bf16.msra.mxu1 %v19400_v1  ;;  %15534 = vmatprep.subr.bf16.mxu0 %v19415_v32  ;;  %v19495_v1 = vcombine.high %v2841_v60, %v2849_v2  ;;  %v19497_v32 = vcombine.high %v2842_v34, %v2850_v6 }
 0x905   :  { %15862 = vmatprep.subr.bf16.mxu1 %v19417_v5  ;;  %v2857_v5 = vld [vmem:[#allocation10 + $0x3f30] sm:$0xff] }
 0x907   :  { %15535 = vmatpush1.bf16.msra.mxu0 %v19414_v19  ;;  %v19494_v19 = vcombine.low %v2841_v60, %v2849_v2  ;;  %v20147_v60 = vld [vmem:[%s21398_s5 + $0x50] sm:$0xff]  }
 0x908   :  { %15863 = vmatpush1.bf16.msra.mxu1 %v19416_v10  ;;  %15536 = vmatprep.subr.bf16.mxu0 %v19431_v20  ;;  %v19496_v10 = vcombine.low %v2842_v34, %v2850_v6  ;;  %v19511_v20 = vcombine.high %v2857_v5, %v2865_v8  ;;  %v20149_v2 = vld [vmem:[%s21398_s5 + $0x10] sm:$0xff]   ;;  %v20151_v6 = vld [vmem:[%s21398_s5 + $0x58] sm:$0xff]  }
 0x909   :  { %15864 = vmatprep.subr.bf16.mxu1 %v19433_v21  ;;  %v19513_v21 = vcombine.high %v2858_v11, %v2866_v18  ;;  %v20150_v34 = vld [vmem:[%s21398_s5 + $0x90] sm:$0xff]  }
 0x90b   :  { %15537 = vmatpush1.bf16.msra.mxu0 %v19430_v51  ;;  %v2882_v51 = vld [vmem:[#allocation10 + $0x3ff8] sm:$0xff] }
 0x90c   :  { %15865 = vmatpush1.bf16.msra.mxu1 %v19432_v23  ;;  %15538 = vmatprep.subr.bf16.mxu0 %v19447_v31  ;;  %v2902_v23 = vrot.slane %v20925_v38, %v20652_v17  ;;  %v19510_v31 = vcombine.low %v2857_v5, %v2865_v8  ;;  %v19529_v46 = vcombine.high %v2874_v29, %v2882_v51  ;;  %v20156_v5 = vld [vmem:[%s21398_s5 + $0xe0] sm:$0xff]  }
 0x90d   :  { %15866 = vmatprep.subr.bf16.mxu1 %v19449_v37  ;;  %v19512_v37 = vcombine.low %v2858_v11, %v2866_v18  ;;  %v20157_v8 = vld [vmem:[%s21398_s5 + $0x20] sm:$0xff]   ;;  %v20159_v18 = vld [vmem:[%s21398_s5 + $0x68] sm:$0xff]  }
 0x90e   :  { %v19886_v15 = vadd.f32 %v20827_v30, %v2902_v23  ;;  %v20142_v30 = vld [vmem:[%s21398_s5 + $0x80] sm:$0xff]   ;;  %v20165_v23 = vld [vmem:[%s21398_s5 + $0x30] sm:$0xff]  }
 0x90f   :  { %15539 = vmatpush1.bf16.msra.mxu0 %v19446_v40  ;;  %v19526_v40 = vcombine.low %v2873_v4, %v2881_v39  ;;  %v20158_v11 = vld [vmem:[%s21398_s5 + $0xa0] sm:$0xff]   ;;  %v20163_v4 = vld [vmem:[%s21398_s5 + $0x70] sm:$0xff]   ;;  %v2898_v39 = vrot.slane %v20925_v38, %v20687_v44 }
 0x910   :  { %15867 = vmatpush1.bf16.msra.mxu1 %v19448_v42  ;;  %15540 = vmatprep.subr.bf16.mxu0 %v19463_v9  ;;  %v19528_v42 = vcombine.low %v2874_v29, %v2882_v51  ;;  %v20139_v9 = vld [vmem:[%s21398_s5 + $0x40] sm:$0xff]   ;;  %v15890_v57 = vmax.f32 %v19886_v15, 0.0  ;;  %v2910_v29 = vrot.slane %v20925_v38, %v20690_v56  ;;  %v2918_v51 = vrot.slane %v20925_v38, %v20714_v62 }
 0x911   :  { %15868 = vmatprep.subr.bf16.mxu1 %v19465_v45  ;;  %v20140_v45 = vld [vmem:[%s21398_s5 + $0xc0] sm:$0xff]  }
 0x912   :  { %v19888_v15 = vadd.f32 %v20865_v63, %v2910_v29  ;;  %v20172_v63 = vld [vmem:[%s21398_s5 + $0x1c0] sm:$0xff]   ;;  %v2914_v29 = vrot.slane %v20925_v38, %v20731_v59 }
 0x913   :  { %15541 = vmatpush1.bf16.msra.mxu0 %v19462_v53  ;;  %v20144_v53 = vld [vmem:[%s21398_s5 + $0xc8] sm:$0xff]  }
 0x914   :  { %15869 = vmatpush1.bf16.msra.mxu1 %v19464_v58  ;;  %15542 = vmatprep.subr.bf16.mxu0 %v19479_v7  ;;  %v15907_v58 = vpack.c.bf16 %v15890_v57, %v15890_v57  ;;  %v20145_v7 = vld [vmem:[%s21398_s5 + $0x8] sm:$0xff]   ;;  %v20173_v57 = vld [vmem:[%s21398_s5 + $0x100] sm:$0xff]  }
 0x915   :  { %15870 = vmatprep.subr.bf16.mxu1 %v19481_v47  ;;  %v20146_v47 = vld [vmem:[%s21398_s5 + $0x88] sm:$0xff]  }
 0x917   :  { %15543 = vmatpush1.bf16.msra.mxu0 %v19478_v55  ;;  %v20152_v55 = vld [vmem:[%s21398_s5 + $0xd8] sm:$0xff]  }
 0x918   :  { %15871 = vmatpush1.bf16.msra.mxu1 %v19480_v61  ;;  %15544 = vmatprep.subr.bf16.mxu0 %v19495_v1  ;;  %v20153_v61 = vld [vmem:[%s21398_s5 + $0x18] sm:$0xff]  }
 0x919   :  { %15872 = vmatprep.subr.bf16.mxu1 %v19497_v32  ;;  %v20154_v1 = vld [vmem:[%s21398_s5 + $0x98] sm:$0xff]   ;;  %v20155_v32 = vld [vmem:[%s21398_s5 + $0x60] sm:$0xff]  }
 0x91b   :  { %15545 = vmatpush1.bf16.msra.mxu0 %v19494_v19  ;;  %v20160_v19 = vld [vmem:[%s21398_s5 + $0xe8] sm:$0xff]  }
 0x91c   :  { %15873 = vmatpush1.bf16.msra.mxu1 %v19496_v10  ;;  %15546 = vmatprep.subr.bf16.mxu0 %v19511_v20  ;;  %v20161_v10 = vld [vmem:[%s21398_s5 + $0x28] sm:$0xff]   ;;  %v2890_v20 = vrot.slane %v20925_v38, %v20644_v14 }
 0x91d   :  { %15874 = vmatprep.subr.bf16.mxu1 %v19513_v21  ;;  %v20162_v21 = vld [vmem:[%s21398_s5 + $0xa8] sm:$0xff]  }
 0x91f   :  { %15547 = vmatpush1.bf16.msra.mxu0 %v19510_v31  ;;  %v19883_v31 = vadd.f32 %v20821_v0, %v2890_v20  ;;  %v19890_v0 = vadd.f32 %v20867_v49, %v2918_v51  ;;  %v15892_v49 = vmax.f32 %v19888_v15, 0.0  ;;  %v21109_v20 = vld [vmem:[#allocation12 + $0x8] sm:$0xff]  ;;  %v20196_v51 = vld [vmem:[%s21398_s5 + $0x1f0] sm:$0xff]   ;;  %v20201_v15 = vld [vmem:[%s21398_s5 + $0x138] sm:$0xff]  }
 0x920   :  { %15875 = vmatpush1.bf16.msra.mxu1 %v19512_v37  ;;  %15548 = vmatprep.subr.bf16.mxu0 %v19527_v26  ;;  %v20166_v37 = vld [vmem:[%s21398_s5 + $0xb0] sm:$0xff]   ;;  %v20167_v26 = vld [vmem:[%s21398_s5 + $0x78] sm:$0xff]  }
 0x921   :  { %15876 = vmatprep.subr.bf16.mxu1 %v19529_v46  ;;  %v19885_v46 = vadd.f32 %v20823_v24, %v2898_v39  ;;  %v20170_v24 = vld [vmem:[%s21398_s5 + $0xb8] sm:$0xff]   ;;  %v15894_v50 = vmax.f32 %v19890_v0, 0.0  ;;  %v20194_v39 = vld [vmem:[%s21398_s5 + $0x1a8] sm:$0xff]  }
 0x923   :  { %15549 = vmatpush1.bf16.msra.mxu0 %v19526_v40  ;;  %v20169_v40 = vld [vmem:[%s21398_s5 + $0x38] sm:$0xff]  }
 0x924   :  { %15877 = vmatpush1.bf16.msra.mxu1 %v19528_v42  ;;  %19685 = vmatprep.subr.bf16.mxu0 %v20139_v9  ;;  %v15887_v42 = vmax.f32 %v19883_v31, 0.0  ;;  %v20171_v9 = vld [vmem:[%s21398_s5 + $0x140] sm:$0xff]   ;;  %v2934_v31 = vrot.slane %v21109_v20, %v20652_v17  ;;  %v20200_v17 = vld [vmem:[%s21398_s5 + $0x1f8] sm:$0xff]  }
 0x925   :  { %19707 = vmatprep.subr.bf16.mxu1 %v20140_v45  ;;  %v15889_v45 = vmax.f32 %v19885_v46, 0.0  ;;  %v19889_v46 = vadd.f32 %v20863_v43, %v2914_v29  ;;  %v20202_v43 = vld [vmem:[%s21398_s5 + $0x1b8] sm:$0xff]  }
 0x926   :  { %15551 = vmatmul.mubr.bf16.vlgmr.msra.gmra.mrb[28].mxu0 %v20803_v3  ;;  %v20232_v29 = vld [vmem:[%s21398_s5 + $0x2f8] sm:$0xff]  }
 0x927   :  { %15879 = vmatmul.mubr.bf16.vlgmr.msra.gmra.mrb[28].mxu1 %v20803_v3  ;;  %19686 = vmatpush3.bf16.msra.mxu0 %v20141_v27  ;;  %v20148_v3 = vld [vmem:[%s21398_s5 + $0xd0] sm:$0xff]   ;;  %v15904_v27 = vpack.c.bf16 %v15887_v42, %v15887_v42  ;;  %v15893_v42 = vmax.f32 %v19889_v46, 0.0  ;;  %v20239_v46 = vld [vmem:[%s21398_s5 + $0x348] sm:$0xff]  }
 0x928   :  { %16976 = vmatprep.mubr.bf16.mxu0 %v15905_v54  ;;  %19708 = vmatpush3.bf16.msra.mxu1 %v20142_v30  ;;  %v20174_v30 = vld [vmem:[%s21398_s5 + $0x180] sm:$0xff]   ;;  %v20175_v54 = vld [vmem:[%s21398_s5 + $0x148] sm:$0xff]  }
 0x929   :  { %17016 = vmatprep.mubr.bf16.mxu1 %v15907_v58  ;;  %19687 = vmatprep.subr.bf16.mxu0 %v20143_v41  ;;  %v15906_v41 = vpack.c.bf16 %v15889_v45, %v15889_v45  ;;  %v20176_v58 = vld [vmem:[%s21398_s5 + $0x1c8] sm:$0xff]  }
 0x92a   :  { %19709 = vmatprep.subr.bf16.mxu1 %v20144_v53  ;;  %v15909_v53 = vpack.c.bf16 %v15892_v49, %v15892_v49  ;;  %v15910_v49 = vpack.c.bf16 %v15893_v42, %v15893_v42  ;;  %v20246_v42 = vld [vmem:[%s21398_s5 + $0x390] sm:$0xff]  }
 0x92b   :  { %19688 = vmatpush3.bf16.msra.mxu0 %v20145_v7  ;;  %v15911_v7 = vpack.c.bf16 %v15894_v50, %v15894_v50  ;;  %v20207_v50 = vld [vmem:[%s21398_s5 + $0x248] sm:$0xff]  }
 0x92c   :  { %19710 = vmatpush3.bf16.msra.mxu1 %v20146_v47  ;;  %19689 = vmatprep.subr.bf16.mxu0 %v20147_v60  ;;  %v20177_v47 = vld [vmem:[%s21398_s5 + $0x108] sm:$0xff]  }
 0x92d   :  { %19711 = vmatprep.subr.bf16.mxu1 %v20148_v3  ;;  %v20178_v60 = vld [vmem:[%s21398_s5 + $0x188] sm:$0xff]   ;;  %v20179_v3 = vld [vmem:[%s21398_s5 + $0x150] sm:$0xff]  }
 0x92f   :  { %19690 = vmatpush3.bf16.msra.mxu0 %v20149_v2  ;;  %v20180_v2 = vld [vmem:[%s21398_s5 + $0x1d0] sm:$0xff]  }
 0x930   :  { %19712 = vmatpush3.bf16.msra.mxu1 %v20150_v34  ;;  %19691 = vmatprep.subr.bf16.mxu0 %v20151_v6  ;;  %v20181_v34 = vld [vmem:[%s21398_s5 + $0x110] sm:$0xff]  }
 0x931   :  { %19713 = vmatprep.subr.bf16.mxu1 %v20152_v55  ;;  %v20182_v6 = vld [vmem:[%s21398_s5 + $0x190] sm:$0xff]   ;;  %v20183_v55 = vld [vmem:[%s21398_s5 + $0x158] sm:$0xff]  }
 0x933   :  { %19692 = vmatpush3.bf16.msra.mxu0 %v20153_v61  ;;  %v20184_v61 = vld [vmem:[%s21398_s5 + $0x1d8] sm:$0xff]  }
 0x934   :  { %19714 = vmatpush3.bf16.msra.mxu1 %v20154_v1  ;;  %19693 = vmatprep.subr.bf16.mxu0 %v20155_v32  ;;  %v20185_v1 = vld [vmem:[%s21398_s5 + $0x118] sm:$0xff]  }
 0x935   :  { %19715 = vmatprep.subr.bf16.mxu1 %v20156_v5  ;;  %v20186_v32 = vld [vmem:[%s21398_s5 + $0x198] sm:$0xff]   ;;  %v20187_v5 = vld [vmem:[%s21398_s5 + $0x160] sm:$0xff]  }
 0x937   :  { %19694 = vmatpush3.bf16.msra.mxu0 %v20157_v8  ;;  %v20188_v8 = vld [vmem:[%s21398_s5 + $0x1e0] sm:$0xff]  }
 0x938   :  { %19716 = vmatpush3.bf16.msra.mxu1 %v20158_v11  ;;  %19695 = vmatprep.subr.bf16.mxu0 %v20159_v18  ;;  %v20189_v11 = vld [vmem:[%s21398_s5 + $0x120] sm:$0xff]  }
 0x939   :  { %19717 = vmatprep.subr.bf16.mxu1 %v20160_v19  ;;  %v20190_v18 = vld [vmem:[%s21398_s5 + $0x1a0] sm:$0xff]   ;;  %v20191_v19 = vld [vmem:[%s21398_s5 + $0x168] sm:$0xff]  }
 0x93b   :  { %19696 = vmatpush3.bf16.msra.mxu0 %v20161_v10  ;;  %v20192_v10 = vld [vmem:[%s21398_s5 + $0x1e8] sm:$0xff]  }
 0x93c   :  { %19718 = vmatpush3.bf16.msra.mxu1 %v20162_v21  ;;  %19697 = vmatprep.subr.bf16.mxu0 %v20163_v4  ;;  %v20193_v21 = vld [vmem:[%s21398_s5 + $0x128] sm:$0xff]   ;;  %v2906_v4 = vrot.slane %v20925_v38, %v20711_v52  ;;  %v20198_v38 = vld [vmem:[%s21398_s5 + $0x1b0] sm:$0xff]  }
 0x93d   :  { %19719 = vmatprep.subr.bf16.mxu1 %v20164_v22  ;;  %v20195_v22 = vld [vmem:[%s21398_s5 + $0x170] sm:$0xff]  }
 0x93f   :  { %19698 = vmatpush3.bf16.msra.mxu0 %v20165_v23  ;;  %v2926_v23 = vrot.slane %v21109_v20, %v20649_v16  ;;  %v20199_v16 = vld [vmem:[%s21398_s5 + $0x178] sm:$0xff]  }
 0x940   :  { %19720 = vmatpush3.bf16.msra.mxu1 %v20166_v37  ;;  %19699 = vmatprep.subr.bf16.mxu0 %v20167_v26  ;;  %v20197_v37 = vld [vmem:[%s21398_s5 + $0x130] sm:$0xff]   ;;  %v19887_v26 = vadd.f32 %v20861_v25, %v2906_v4  ;;  %v19894_v25 = vadd.f32 %v20907_v28, %v2934_v31 }
 0x941   :  { %19721 = vmatprep.subr.bf16.mxu1 %v20168_v33  ;;  %v19892_v33 = vadd.f32 %v20905_v48, %v2926_v23  ;;  %v20204_v48 = vld [vmem:[%s21398_s5 + $0x2c0] sm:$0xff]   ;;  %v20234_v23 = vld [vmem:[%s21398_s5 + $0x2b8] sm:$0xff]  }
 0x942   :  { %v15891_v0 = vmax.f32 %v19887_v26, 0.0  ;;  %v20236_v26 = vld [vmem:[%s21398_s5 + $0x300] sm:$0xff]  }
 0x943   :  { %19700 = vmatpush3.bf16.msra.mxu0 %v20169_v40  ;;  %v20203_v40 = vld [vmem:[%s21398_s5 + $0x240] sm:$0xff]   ;;  %v15896_v28 = vmax.f32 %v19892_v33, 0.0  ;;  %v20241_v33 = vld [vmem:[%s21398_s5 + $0x3c8] sm:$0xff]  }
 0x944   :  { %19722 = vmatpush3.bf16.msra.mxu1 %v20170_v24  ;;  %19729 = vmatprep.subr.bf16.mxu0 %v20171_v9  ;;  %v15898_v24 = vmax.f32 %v19894_v25, 0.0  ;;  %v20205_v9 = vld [vmem:[%s21398_s5 + $0x200] sm:$0xff]   ;;  %v15908_v45 = vpack.c.bf16 %v15891_v0, %v15891_v0  ;;  %v20240_v25 = vld [vmem:[%s21398_s5 + $0x308] sm:$0xff]   ;;  %v20243_v0 = vld [vmem:[%s21398_s5 + $0x350] sm:$0xff]  }
 0x945   :  { %19751 = vmatprep.subr.bf16.mxu1 %v20172_v63  ;;  %v20206_v63 = vld [vmem:[%s21398_s5 + $0x280] sm:$0xff]  }
 0x946   :  { %16977 = vmatmul.mubr.bf16.vlgmr.msra.gmra.mrb[32].mxu0 %v15904_v27  ;;  %v20208_v27 = vld [vmem:[%s21398_s5 + $0x2c8] sm:$0xff]  }
 0x947   :  { %17017 = vmatmul.mubr.bf16.vlgmr.msra.gmra.mrb[32].mxu1 %v15906_v41  ;;  %19730 = vmatpush3.bf16.msra.mxu0 %v20173_v57  ;;  %v15913_v57 = vpack.c.bf16 %v15896_v28, %v15896_v28  ;;  %v20209_v41 = vld [vmem:[%s21398_s5 + $0x208] sm:$0xff]   ;;  %v20249_v28 = vld [vmem:[%s21398_s5 + $0x3d8] sm:$0xff]  }
 0x948   :  { %17056 = vmatprep.mubr.bf16.mxu0 %v15909_v53  ;;  %19752 = vmatpush3.bf16.msra.mxu1 %v20174_v30  ;;  %v15915_v30 = vpack.c.bf16 %v15898_v24, %v15898_v24  ;;  %v20211_v53 = vld [vmem:[%s21398_s5 + $0x250] sm:$0xff]   ;;  %v20248_v24 = vld [vmem:[%s21398_s5 + $0x318] sm:$0xff]  }
 0x949   :  { %17096 = vmatprep.mubr.bf16.mxu1 %v15911_v7  ;;  %19731 = vmatprep.subr.bf16.mxu0 %v20175_v54  ;;  %v20210_v54 = vld [vmem:[%s21398_s5 + $0x288] sm:$0xff]   ;;  %v20213_v7 = vld [vmem:[%s21398_s5 + $0x210] sm:$0xff]  }
 0x94a   :  { %19753 = vmatprep.subr.bf16.mxu1 %v20176_v58  ;;  %v20212_v58 = vld [vmem:[%s21398_s5 + $0x2d0] sm:$0xff]  }
 0x94b   :  { %19732 = vmatpush3.bf16.msra.mxu0 %v20177_v47  ;;  %v20214_v47 = vld [vmem:[%s21398_s5 + $0x290] sm:$0xff]  }
 0x94c   :  { %19754 = vmatpush3.bf16.msra.mxu1 %v20178_v60  ;;  %19733 = vmatprep.subr.bf16.mxu0 %v20179_v3  ;;  %v20215_v60 = vld [vmem:[%s21398_s5 + $0x258] sm:$0xff]  }
 0x94d   :  { %19755 = vmatprep.subr.bf16.mxu1 %v20180_v2  ;;  %v20216_v3 = vld [vmem:[%s21398_s5 + $0x2d8] sm:$0xff]  }
 0x94e   :  { %v20217_v2 = vld [vmem:[%s21398_s5 + $0x218] sm:$0xff]  }
 0x94f   :  { %19734 = vmatpush3.bf16.msra.mxu0 %v20181_v34  ;;  %v20218_v34 = vld [vmem:[%s21398_s5 + $0x298] sm:$0xff]  }
 0x950   :  { %19756 = vmatpush3.bf16.msra.mxu1 %v20182_v6  ;;  %19735 = vmatprep.subr.bf16.mxu0 %v20183_v55  ;;  %v20219_v6 = vld [vmem:[%s21398_s5 + $0x260] sm:$0xff]  }
 0x951   :  { %19757 = vmatprep.subr.bf16.mxu1 %v20184_v61  ;;  %v20220_v55 = vld [vmem:[%s21398_s5 + $0x2e0] sm:$0xff]  }
 0x952   :  { %v20221_v61 = vld [vmem:[%s21398_s5 + $0x220] sm:$0xff]  }
 0x953   :  { %19736 = vmatpush3.bf16.msra.mxu0 %v20185_v1  ;;  %v20222_v1 = vld [vmem:[%s21398_s5 + $0x2a0] sm:$0xff]  }
 0x954   :  { %19758 = vmatpush3.bf16.msra.mxu1 %v20186_v32  ;;  %19737 = vmatprep.subr.bf16.mxu0 %v20187_v5  ;;  %v20223_v32 = vld [vmem:[%s21398_s5 + $0x268] sm:$0xff]  }
 0x955   :  { %19759 = vmatprep.subr.bf16.mxu1 %v20188_v8  ;;  %v20224_v5 = vld [vmem:[%s21398_s5 + $0x2e8] sm:$0xff]  }
 0x956   :  { %v20225_v8 = vld [vmem:[%s21398_s5 + $0x228] sm:$0xff]  }
 0x957   :  { %19738 = vmatpush3.bf16.msra.mxu0 %v20189_v11  ;;  %v2922_v11 = vrot.slane %v21109_v20, %v20644_v14  ;;  %v20229_v14 = vld [vmem:[%s21398_s5 + $0x230] sm:$0xff]  }
 0x958   :  { %19760 = vmatpush3.bf16.msra.mxu1 %v20190_v18  ;;  %19739 = vmatprep.subr.bf16.mxu0 %v20191_v19  ;;  %v20226_v18 = vld [vmem:[%s21398_s5 + $0x2a8] sm:$0xff]   ;;  %v20227_v19 = vld [vmem:[%s21398_s5 + $0x270] sm:$0xff]  }
 0x959   :  { %19761 = vmatprep.subr.bf16.mxu1 %v20192_v10  ;;  %v2930_v10 = vrot.slane %v21109_v20, %v20687_v44  ;;  %v19891_v4 = vadd.f32 %v20901_v35, %v2922_v11  ;;  %v20231_v44 = vld [vmem:[%s21398_s5 + $0x278] sm:$0xff]  }
 0x95a   :  { %v20233_v35 = vld [vmem:[%s21398_s5 + $0x238] sm:$0xff]  }
 0x95b   :  { %19740 = vmatpush3.bf16.msra.mxu0 %v20193_v21  ;;  %v20228_v21 = vld [vmem:[%s21398_s5 + $0x2f0] sm:$0xff]  }
 0x95c   :  { %19762 = vmatpush3.bf16.msra.mxu1 %v20194_v39  ;;  %19741 = vmatprep.subr.bf16.mxu0 %v20195_v22  ;;  %v20230_v39 = vld [vmem:[%s21398_s5 + $0x2b0] sm:$0xff]   ;;  %v19893_v22 = vadd.f32 %v20903_v36, %v2930_v10  ;;  %v20235_v36 = vld [vmem:[%s21398_s5 + $0x340] sm:$0xff]  }
 0x95d   :  { %19763 = vmatprep.subr.bf16.mxu1 %v20196_v51  ;;  %v15895_v51 = vmax.f32 %v19891_v4, 0.0 }
 0x95e   :  { %v15897_v31 = vmax.f32 %v19893_v22, 0.0 }
 0x95f   :  { %19742 = vmatpush3.bf16.msra.mxu0 %v20197_v37  ;;  %v20237_v37 = vld [vmem:[%s21398_s5 + $0x3c0] sm:$0xff]  }
 0x960   :  { %19764 = vmatpush3.bf16.msra.mxu1 %v20198_v38  ;;  %19743 = vmatprep.subr.bf16.mxu0 %v20199_v16  ;;  %v15912_v38 = vpack.c.bf16 %v15895_v51, %v15895_v51  ;;  %v20238_v16 = vld [vmem:[%s21398_s5 + $0x380] sm:$0xff]  }
 0x961   :  { %19765 = vmatprep.subr.bf16.mxu1 %v20200_v17  ;;  %v15914_v17 = vpack.c.bf16 %v15897_v31, %v15897_v31  ;;  %v17283_v31 = vld [vmem:[%s21400_s7 + $0x18] sm:$0xff] }
 0x963   :  { %19744 = vmatpush3.bf16.msra.mxu0 %v20201_v15  ;;  %v20242_v15 = vld [vmem:[%s21398_s5 + $0x388] sm:$0xff]  }
 0x964   :  { %19766 = vmatpush3.bf16.msra.mxu1 %v20202_v43  ;;  %19773 = vmatprep.subr.bf16.mxu0 %v20203_v40  ;;  %v20245_v43 = vld [vmem:[%s21398_s5 + $0x3d0] sm:$0xff]  }
 0x965   :  { %19795 = vmatprep.subr.bf16.mxu1 %v20204_v48  ;;  %v20244_v40 = vld [vmem:[%s21398_s5 + $0x310] sm:$0xff]   ;;  %v20247_v48 = vld [vmem:[%s21398_s5 + $0x358] sm:$0xff]  }
 0x966   :  { %17057 = vmatmul.mubr.bf16.vlgmr.msra.gmra.mrb[36].mxu0 %v15908_v45  ;;  %v20251_v45 = vld [vmem:[%s21398_s5 + $0x360] sm:$0xff]  }
 0x967   :  { %17097 = vmatmul.mubr.bf16.vlgmr.msra.gmra.mrb[36].mxu1 %v15910_v49  ;;  %19774 = vmatpush3.bf16.msra.mxu0 %v20205_v9  ;;  %v20250_v9 = vld [vmem:[%s21398_s5 + $0x398] sm:$0xff]   ;;  %v20252_v49 = vld [vmem:[%s21398_s5 + $0x320] sm:$0xff]  }
 0x968   :  { %17136 = vmatprep.mubr.bf16.mxu0 %v15913_v57  ;;  %19796 = vmatpush3.bf16.msra.mxu1 %v20206_v63  ;;  %v20253_v63 = vld [vmem:[%s21398_s5 + $0x3e0] sm:$0xff]   ;;  %v20255_v57 = vld [vmem:[%s21398_s5 + $0x368] sm:$0xff]  }
 0x969   :  { %17176 = vmatprep.mubr.bf16.mxu1 %v15915_v30  ;;  %19775 = vmatprep.subr.bf16.mxu0 %v20207_v50  ;;  %v20254_v50 = vld [vmem:[%s21398_s5 + $0x3a0] sm:$0xff]   ;;  %v20256_v30 = vld [vmem:[%s21398_s5 + $0x328] sm:$0xff]  }
 0x96a   :  { %19797 = vmatprep.subr.bf16.mxu1 %v20208_v27  ;;  %v20257_v27 = vld [vmem:[%s21398_s5 + $0x3e8] sm:$0xff]  }
 0x96b   :  { %19776 = vmatpush3.bf16.msra.mxu0 %v20209_v41  ;;  %v20258_v41 = vld [vmem:[%s21398_s5 + $0x3a8] sm:$0xff]  }
 0x96c   :  { %19798 = vmatpush3.bf16.msra.mxu1 %v20210_v54  ;;  %19777 = vmatprep.subr.bf16.mxu0 %v20211_v53  ;;  %v20259_v54 = vld [vmem:[%s21398_s5 + $0x370] sm:$0xff]  }
 0x96d   :  { %19799 = vmatprep.subr.bf16.mxu1 %v20212_v58  ;;  %v20261_v53 = vld [vmem:[%s21398_s5 + $0x3f0] sm:$0xff]  }
 0x96e   :  { %v20260_v58 = vld [vmem:[%s21398_s5 + $0x330] sm:$0xff]  }
 0x96f   :  { %19778 = vmatpush3.bf16.msra.mxu0 %v20213_v7  ;;  %v20262_v7 = vld [vmem:[%s21398_s5 + $0x3b0] sm:$0xff]  }
 0x970   :  { %19800 = vmatpush3.bf16.msra.mxu1 %v20214_v47  ;;  %19779 = vmatprep.subr.bf16.mxu0 %v20215_v60  ;;  %v20263_v47 = vld [vmem:[%s21398_s5 + $0x378] sm:$0xff]  }
 0x971   :  { %19801 = vmatprep.subr.bf16.mxu1 %v20216_v3  ;;  %v20265_v60 = vld [vmem:[%s21398_s5 + $0x3f8] sm:$0xff]  }
 0x972   :  { %v20264_v3 = vld [vmem:[%s21398_s5 + $0x338] sm:$0xff]  }
 0x973   :  { %19780 = vmatpush3.bf16.msra.mxu0 %v20217_v2  ;;  %v20266_v2 = vld [vmem:[%s21398_s5 + $0x3b8] sm:$0xff]  }
 0x974   :  { %19802 = vmatpush3.bf16.msra.mxu1 %v20218_v34  ;;  %19781 = vmatprep.subr.bf16.mxu0 %v20219_v6  ;;  %v20469_v34 = vmov 0.0|0.0   ;;  %v2938_v6 = vrot.slane %v21109_v20, %v20711_v52 }
 0x975   :  { %19803 = vmatprep.subr.bf16.mxu1 %v20220_v55  ;;  %v2946_v55 = vrot.slane %v21109_v20, %v20731_v59  ;;  %v17280_v59 = vld [vmem:[%s21400_s7] sm:$0xff] }
 0x977   :  { %19782 = vmatpush3.bf16.msra.mxu0 %v20221_v61  ;;  %v2942_v61 = vrot.slane %v21109_v20, %v20690_v56  ;;  %v17281_v56 = vld [vmem:[%s21400_s7 + $0x8] sm:$0xff] }
 0x978   :  { %19804 = vmatpush3.bf16.msra.mxu1 %v20222_v1  ;;  %19783 = vmatprep.subr.bf16.mxu0 %v20223_v32  ;;  %v2950_v1 = vrot.slane %v21109_v20, %v20714_v62 }
 0x979   :  { %19805 = vmatprep.subr.bf16.mxu1 %v20224_v5 }
 0x97b   :  { %19784 = vmatpush3.bf16.msra.mxu0 %v20225_v8 }
 0x97c   :  { %19806 = vmatpush3.bf16.msra.mxu1 %v20226_v18  ;;  %19785 = vmatprep.subr.bf16.mxu0 %v20227_v19 }
 0x97d   :  { %19807 = vmatprep.subr.bf16.mxu1 %v20228_v21 }
 0x97f   :  { %19786 = vmatpush3.bf16.msra.mxu0 %v20229_v14 }
 0x980   :  { %19808 = vmatpush3.bf16.msra.mxu1 %v20230_v39  ;;  %19787 = vmatprep.subr.bf16.mxu0 %v20231_v44 }
 0x981   :  { %19809 = vmatprep.subr.bf16.mxu1 %v20232_v29 }
 0x983   :  { %19788 = vmatpush3.bf16.msra.mxu0 %v20233_v35  ;;  %v19878_v35 = vpack.c.bf16 %v17281_v56, %v17280_v59 }
 0x984   :  { %19810 = vmatpush3.bf16.msra.mxu1 %v20234_v23  ;;  %19817 = vmatprep.subr.bf16.mxu0 %v20235_v36  ;;  %v17282_v36 = vld [vmem:[%s21400_s7 + $0x10] sm:$0xff]  ;;  %s20472_s7 = smov 127  }
 0x985   :  { %19839 = vmatprep.subr.bf16.mxu1 %v20237_v37 }
 0x986   :  { %17137 = vmatmul.mubr.bf16.vlgmr.msra.gmra.mrb[40].mxu0 %v15912_v38  ;;  %v20471_v38 = vmov 0.0  }
 0x987   :  { %17177 = vmatmul.mubr.bf16.vlgmr.msra.gmra.mrb[40].mxu1 %v15914_v17  ;;  %19818 = vmatpush3.bf16.msra.mxu0 %v20236_v26  ;;  %v19881_v26 = vpack.c.bf16 %v17283_v31, %v17282_v36  ;;  %826 = vst.msk [vmem:[#allocation16] sm:$0xff] %vm825_vm2, %v20471_v38 }
 0x988   :  { %19840 = vmatpush3.bf16.msra.mxu1 %v20238_v16  ;;  %19819 = vmatprep.subr.bf16.mxu0 %v20239_v46  ;;  %v17279_v16 = vld [vmem:[#allocation4] sm:$0xff] }
 0x989   :  { %19841 = vmatprep.subr.bf16.mxu1 %v20241_v33 }
 0x98b   :  { %19820 = vmatpush3.bf16.msra.mxu0 %v20240_v25 }
 0x98c   :  { %19842 = vmatpush3.bf16.msra.mxu1 %v20242_v15  ;;  %19821 = vmatprep.subr.bf16.mxu0 %v20243_v0 }
 0x98d   :  { %19843 = vmatprep.subr.bf16.mxu1 %v20245_v43 }
 0x98e   :  { %v15903_v59 = vld [vmem:[#allocation16] sm:$0xff] }
 0x98f   :  { %19822 = vmatpush3.bf16.msra.mxu0 %v20244_v40 }
 0x990   :  { %19844 = vmatpush3.bf16.msra.mxu1 %v20246_v42  ;;  %19823 = vmatprep.subr.bf16.mxu0 %v20247_v48 }
 0x991   :  { %19845 = vmatprep.subr.bf16.mxu1 %v20249_v28 }
 0x993   :  { %19824 = vmatpush3.bf16.msra.mxu0 %v20248_v24 }
 0x994   :  { %19846 = vmatpush3.bf16.msra.mxu1 %v20250_v9  ;;  %19825 = vmatprep.subr.bf16.mxu0 %v20251_v45 }
 0x995   :  { %19847 = vmatprep.subr.bf16.mxu1 %v20253_v63 }
 0x997   :  { %19826 = vmatpush3.bf16.msra.mxu0 %v20252_v49 }
 0x998   :  { %19848 = vmatpush3.bf16.msra.mxu1 %v20254_v50  ;;  %19827 = vmatprep.subr.bf16.mxu0 %v20255_v57 }
 0x999   :  { %19849 = vmatprep.subr.bf16.mxu1 %v20257_v27 }
 0x99b   :  { %19828 = vmatpush3.bf16.msra.mxu0 %v20256_v30 }
 0x99c   :  { %19850 = vmatpush3.bf16.msra.mxu1 %v20258_v41  ;;  %19829 = vmatprep.subr.bf16.mxu0 %v20259_v54 }
 0x99d   :  { %19851 = vmatprep.subr.bf16.mxu1 %v20261_v53 }
 0x99f   :  { %19830 = vmatpush3.bf16.msra.mxu0 %v20260_v58 }
 0x9a0   :  { %19852 = vmatpush3.bf16.msra.mxu1 %v20262_v7  ;;  %19831 = vmatprep.subr.bf16.mxu0 %v20263_v47 }
 0x9a1   :  { %19853 = vmatprep.subr.bf16.mxu1 %v20265_v60 }
 0x9a3   :  { %19832 = vmatpush3.bf16.msra.mxu0 %v20264_v3 }
 0x9a4   :  { %19854 = vmatpush3.bf16.msra.mxu1 %v20266_v2  ;;  %19877 = vmatprep.subr.bf16.mxu0 %v20469_v34 }
 0x9f9   :  { %v15552_v32 = vpop.f32.mrb[28].mxu0 }
 0x9fa   :  { %v19895_v5 = vadd.f32 %v15552_v32, %v2938_v6  ;;  %v15880_v8 = vpop.f32.mrb[28].mxu1  ;;  %v15554_v11 = vpop.f32.mrb[29].mxu0 }
 0x9fb   :  { %v19897_v18 = vadd.f32 %v15880_v8, %v2946_v55  ;;  %v19896_v19 = vadd.f32 %v15554_v11, %v2942_v61  ;;  %v15882_v10 = vpop.f32.mrb[29].mxu1  ;;  %v15556_v21 = vpop.f32.mrb[30].mxu0 }
 0x9fc   :  { %v15899_v14 = vmax.f32 %v19895_v5, 0.0  ;;  %v19898_v4 = vadd.f32 %v15882_v10, %v2950_v1  ;;  %v15884_v52 = vpop.f32.mrb[30].mxu1  ;;  %v15557_v39 = vpop.f32.mrb[31].mxu0 }
 0x9fd   :  { %v15901_v62 = vmax.f32 %v19897_v18, 0.0  ;;  %v15900_v20 = vmax.f32 %v19896_v19, 0.0  ;;  %v15885_v44 = vpop.f32.mrb[31].mxu1 }
 0x9fe   :  { %v15902_v22 = vmax.f32 %v19898_v4, 0.0  ;;  %v15916_v51 = vpack.c.bf16 %v15899_v14, %v15899_v14 }
 0x9ff   :  { %v15917_v29 = vpack.c.bf16 %v15900_v20, %v15900_v20  ;;  %v15918_v37 = vpack.c.bf16 %v15901_v62, %v15901_v62  ;;  %v19659_v62 = vld [vmem:[#allocation15] ss:$0 sm:$0xff] }
 0xa00   :  { %v15919_v23 = vpack.c.bf16 %v15902_v22, %v15902_v22 }
 0xa01   :  { %17216 = vmatprep.mubr.bf16.mxu0 %v15917_v29 }
 0xa02   :  { %17256 = vmatprep.mubr.bf16.mxu1 %v15919_v23  ;;  %17217 = vmatmul.mubr.bf16.vlgmr.msra.gmra.mrb[44].mxu0 %v15916_v51 }
 0xa03   :  { %17257 = vmatmul.mubr.bf16.vlgmr.msra.gmra.mrb[44].mxu1 %v15918_v37  ;;  %19879 = vmatpush3.bf16.msra.mxu0 %v19878_v35 }
 0xa04   :  { %19880 = vmatprep.subr.bf16.mxu0 %v20469_v34  ;;  %19874 = vmatprep.mubr.msk.f32.mxu0 %vm20470_vm1, %v20471_v38  ;;  %v17379_v38 = vand.u32 127, %v165_v12 }
 0xa06   :  { %vm17380_vm3 = vcmp.eq.s32.totalorder %v20641_v13, %v17379_v38 }
 0xa07   :  { %19882 = vmatpush3.bf16.msra.mxu0 %v19881_v26 }
 0xa0a   :  { %19875 = vmatmul.mubr.msk.f32.vlgmr.msra.gmra.mrb[48].mxu0 %vm405_vm0, %v17279_v16 }
 0xa19   :  { %v19701_v46 = vpop.f32.mrb[32].mxu0 }
 0xa1a   :  { %v19723_v17 = vpop.f32.mrb[32].mxu1  ;;  %v19702_v33 = vpop.f32.mrb[33].mxu0 }
 0xa1b   :  { %v19703_v25 = vadd.f32 %v19702_v33, %v19701_v46  ;;  %v19724_v15 = vpop.f32.mrb[33].mxu1  ;;  %v19704_v0 = vpop.f32.mrb[34].mxu0 }
 0xa1c   :  { %v19725_v43 = vadd.f32 %v19724_v15, %v19723_v17  ;;  %v19726_v40 = vpop.f32.mrb[34].mxu1  ;;  %v19705_v42 = vpop.f32.mrb[35].mxu0  ;;  %v19658_v0 = vld [vmem:[#allocation13] ss:$0 sm:$0xff] }
 0xa1d   :  { %v19727_v48 = vpop.f32.mrb[35].mxu1 }
 0xa1e   :  { %v17019_v28 = vadd.f32 %v19725_v43, %v19703_v25  ;;  %v17395_v48 = vstv %s21402_s9 }
 0xa39   :  { %v19745_v24 = vpop.f32.mrb[36].mxu0 }
 0xa3a   :  { %v19767_v9 = vpop.f32.mrb[36].mxu1  ;;  %v19746_v45 = vpop.f32.mrb[37].mxu0 }
 0xa3b   :  { %v19747_v63 = vadd.f32 %v19746_v45, %v19745_v24  ;;  %v19768_v49 = vpop.f32.mrb[37].mxu1  ;;  %v19748_v50 = vpop.f32.mrb[38].mxu0 }
 0xa3c   :  { %v19769_v57 = vadd.f32 %v19768_v49, %v19767_v9  ;;  %v19770_v27 = vpop.f32.mrb[38].mxu1  ;;  %v19749_v30 = vpop.f32.mrb[39].mxu0 }
 0xa3d   :  { %v17059_v41 = vadd.f32 %v19747_v63, %v17019_v28  ;;  %v19771_v54 = vpop.f32.mrb[39].mxu1 }
 0xa3f   :  { %v17099_v53 = vadd.f32 %v19769_v57, %v17059_v41 }
 0xa59   :  { %v19789_v58 = vpop.f32.mrb[40].mxu0 }
 0xa5a   :  { %v19811_v7 = vpop.f32.mrb[40].mxu1  ;;  %v19790_v47 = vpop.f32.mrb[41].mxu0 }
 0xa5b   :  { %v19791_v60 = vadd.f32 %v19790_v47, %v19789_v58  ;;  %v19812_v3 = vpop.f32.mrb[41].mxu1  ;;  %v19792_v2 = vpop.f32.mrb[42].mxu0 }
 0xa5c   :  { %v19813_v34 = vadd.f32 %v19812_v3, %v19811_v7  ;;  %v19814_v6 = vpop.f32.mrb[42].mxu1  ;;  %v19793_v55 = vpop.f32.mrb[43].mxu0 }
 0xa5d   :  { %v17139_v61 = vadd.f32 %v19791_v60, %v17099_v53  ;;  %v19815_v1 = vpop.f32.mrb[43].mxu1 }
 0xa5f   :  { %v17179_v32 = vadd.f32 %v19813_v34, %v17139_v61 }
 0xad5   :  { %v19833_v5 = vpop.f32.mrb[44].mxu0 }
 0xad6   :  { %v19855_v8 = vpop.f32.mrb[44].mxu1  ;;  %v19834_v11 = vpop.f32.mrb[45].mxu0 }
 0xad7   :  { %v19835_v18 = vadd.f32 %v19834_v11, %v19833_v5  ;;  %v19856_v19 = vpop.f32.mrb[45].mxu1  ;;  %v19836_v10 = vpop.f32.mrb[46].mxu0 }
 0xad8   :  { %v19857_v21 = vadd.f32 %v19856_v19, %v19855_v8  ;;  %v19858_v14 = vpop.f32.mrb[46].mxu1  ;;  %v19837_v4 = vpop.f32.mrb[47].mxu0 }
 0xad9   :  { %v17219_v52 = vadd.f32 %v19835_v18, %v17179_v32  ;;  %v19859_v39 = vpop.f32.mrb[47].mxu1 }
 0xadb   :  { %v17259_v56 = vadd.f32 %v19857_v21, %v17219_v52 }
 0xadd   :  { %v17264_v20 = vadd.f32 %v17259_v56, %v15903_v59  ;;  %v17361_v44 = vpop.f32.mrb[48].mxu0 }
 0xade   :  { %v17362_v22 = vadd.f32 %v19659_v62, %v17361_v44  ;;  %v19876_v29 = vpop.f32.mrb[49].mxu0 }
 0xadf   :  { %17266 = vst.msk [vmem:[#allocation16] sm:$0xff] %vm825_vm2, %v17264_v20 }
 0xae0   :  { %17366 = vrot.lane.b32.xlu0 %v17362_v22, %s20472_s7 }
 0xae6   :  { %v17270_v15 = vld [vmem:[#allocation16] sm:$0xff] }
 0xae7   :  { %v17278_v42 = vadd.f32 %v19658_v0, %v17270_v15 }
 0xae9   :  { %v17396_v12 = vsub.f32 %v17278_v42, %v17395_v48 }
 0xb52   :  { %v17367_v35 = vpop.permute.xlu0 %17366 }
 0xb53   :  { %v17369_v51 = vsub.f32 %v17362_v22, %v17367_v35 }
 0xb55   :  { %v17370_v23 = vsub.f32 0.0, %v17369_v51 }
 0xb57   :  { %v17371_v36 = vmul.f32 1.442695, %v17370_v23 }
 0xb59   :  { %20267 = vpow2.f32 %v17371_v36 }
 0xb63   :  { %v20268_v31 = vpop.eup %20267 }
 0xb64   :  { %v17373_v37 = vadd.f32 1.0, %v20268_v31 }
 0xb66   :  { %20269 = vrcp.f32 %v17373_v37 }
 0xb70   :  { %v20270_v26 = vpop.eup %20269 }
 0xb71   :  { %17383 = vperm.xlu0 %20138, %v20270_v26  }
 0xbf0   :  { %v17384_v16 = vpop.permute.xlu0 %17383 }
 0xbf1   :  { %v17386_v46 = vsel %vm17380_vm3, %v17384_v16, 0.0 }
 0xbf2   :  { %v17387_v17 = vsel %vm825_vm2, %v17386_v46, 0.0 }
 0xbf3   :  { %v17388_v33 = vrot.slane %v17387_v17, 4 }
 0xbf5   :  { %v17389_v25 = vadd.f32 %v17388_v33, %v17387_v17 }
 0xbf7   :  { %v17390_v43 = vrot.slane %v17389_v25, 2 }
 0xbf9   :  { %v17391_v40 = vadd.f32 %v17390_v43, %v17389_v25 }
 0xbfb   :  { %v17392_v28 = vrot.slane %v17391_v40, 1 }
 0xbfd   :  { %v17393_v24 = vadd.f32 %v17392_v28, %v17391_v40 }
 0xbff   :  { %v17397_v13 = vmul.f32 %v17396_v12, %v17393_v24 }
 0xc01   :  { %v17398_v9 = vadd.f32 %v17397_v13, %v17395_v48 }
 0xc03   :  { %17399 = vst.msk [vmem:[#allocation16] sm:$0xff] %vm825_vm2, %v17398_v9 }
 0xc04   :  { %20438 = shalt.err (!%p20435_p4)
}
 0xc05   :  { %s20439_s9 = scalar_lea.hbm %s21403_s10, 128 }
 0xc06   :  { %p20440_p5 = scmp.ne.s32.totalorder %s21403_s10, %s20439_s9  ;;  %p20443_p6 = scmp.lt.u32.totalorder %s20439_s9, %s21403_s10 }
 0xc08   :  { %p20445_p7 = pnand %p20443_p6, %p20440_p5 }
 0xc0a   :  { %20448 = shalt.err (!%p20445_p7)
}
 0xc0b   :  { %17409 = dma.vmem_to_hbm [thread:$0]  %s17407_s12, 128, %s21403_s10, [#allocation6]  }
 0xc0c   :  { %20457 = dma.done.wait [#allocation6], 128  }
 0xc0d   :  { %20458 = vsyncadd [#allocation6], 4294967168 }
 0xc0e   :  { %17413 = vsyncpa [#allocation5], 1 }
 0xc0f   :  { %17414 = vsyncpa [#allocation8], 1 }
 0xc10   :  { %17415 = vsyncpa [#allocation11], 1 }
 0xc11   :  { %17416 = vsyncpa [#allocation14], 1 }
 0xc12   :  { %17417 = vsyncpa [#allocation6], 1 }

</bundles_post_ra>
